<compile_context>
chip_gen: v7x
topology: tpu7x:2x2x1
jax: 0.10.0
libtpu: 0.0.40
codegen_flags: <defaults>
</compile_context>

<pallas_src>
import jax
import jax.numpy as jnp
from jax.experimental import pallas as pl
from jax.experimental.pallas import tpu as pltpu

NEGATIVE_SLOPE = 0.9503408

IN_C, OUT_C = 128, 16
KH, KW = 30, 10
LANE = 128


def _round_up(a, b):
    return ((a + b - 1) // b) * b


def _tree_sum(parts):
    """Balanced (log-depth) sum of a list of arrays."""
    parts = list(parts)
    while len(parts) > 1:
        nxt = [parts[i] + parts[i + 1] for i in range(0, len(parts) - 1, 2)]
        if len(parts) % 2:
            nxt.append(parts[-1])
        parts = nxt
    return parts[0]


def conv2d_leaky(x, weight, bias):
    """x: (N, C, H, W) f32; weight: (OC, C, KH, KW) f32; bias: (OC,) f32."""
    N, C, H, W = x.shape
    OC, _, KHD, KWD = weight.shape
    OH, OW = H - KHD + 1, W - KWD + 1

    MP = OH * W                       # useful "padded width" output columns
    MPP = _round_up(MP, LANE)         # lane-dense accumulator / output width
    WIN = LANE + MPP                  # per-group matmul window (lane aligned)

    # Group kh taps that share the same 128-aligned window start s0 (static).
    groups = []                       # [(s0, [kh, ...]), ...]
    for kh in range(KHD):
        s0 = (kh * W // LANE) * LANE
        if groups and groups[-1][0] == s0:
            groups[-1][1].append(kh)
        else:
            groups.append((s0, [kh]))
    NG = len(groups)
    GMAX = max(len(khs) for _, khs in groups)
    s0_last = groups[-1][0]

    HWPAD = _round_up(max(H * W, s0_last + WIN), LANE)   # shifted-image width
    HWPAD_IN = HWPAD + LANE                              # margin for kw shifts

    # ---- wrapper glue: cheap zero-pads / reshapes only, no patch blow-up ----
    x_flat = jnp.pad(x.reshape(N, C, H * W),
                     ((0, 0), (0, 0), (0, HWPAD_IN - H * W)))   # (N,C,HWPAD_IN)

    # Per-group weight matrix: row = kh_local*OC + oc, col = kw*C + c.
    w_t = weight.transpose(2, 0, 3, 1).reshape(KHD, OC, KWD * C)   # (KH,OC,KW*C)
    w_t = jnp.pad(w_t, ((0, NG * GMAX - KHD), (0, 0), (0, 0)))
    wg = w_t.reshape(NG, GMAX * OC, KWD * C)                       # (NG,GMAX*OC,KW*C)

    b2 = jnp.broadcast_to(bias.reshape(OC, 1), (OC, MPP)).astype(jnp.float32)

    def kernel(x_ref, w_ref, b_ref, o_ref, xs_ref):
        # x_ref : (C, HWPAD_IN)    w_ref: (NG, GMAX*OC, KW*C)   b_ref: (OC, MPP)
        # o_ref : (OC, MPP)        xs_ref: (KW*C, HWPAD) VMEM scratch
        xw = x_ref[...]
        # Pre-shift once: xs[kw*C + c, j] = x[c, j + kw]  (folds kw into K).
        for kw in range(KWD):
            xs_ref[kw * C:(kw + 1) * C, :] = xw[:, kw:kw + HWPAD]

        group_sums = []
        for gi, (s0, khs) in enumerate(groups):
            g = jnp.dot(w_ref[gi], xs_ref[:, s0:s0 + WIN],
                        preferred_element_type=jnp.float32)   # (GMAX*OC, WIN)
            parts = []
            for j, kh in enumerate(khs):
                r = kh * W - s0                                # static, < 128
                parts.append(g[j * OC:(j + 1) * OC, r:r + MPP])
            group_sums.append(_tree_sum(parts))
        acc = _tree_sum(group_sums)                            # (OC, MPP)

        v = acc + b_ref[...]
        o_ref[...] = jnp.where(v > 0, v, v * NEGATIVE_SLOPE)

    out_pad = pl.pallas_call(
        kernel,
        out_shape=jax.ShapeDtypeStruct((N, OC, MPP), jnp.float32),
        grid=(N,),
        in_specs=[
            pl.BlockSpec((None, C, HWPAD_IN), lambda n: (n, 0, 0)),
            pl.BlockSpec((NG, GMAX * OC, KWD * C), lambda n: (0, 0, 0)),
            pl.BlockSpec((OC, MPP), lambda n: (0, 0)),
        ],
        out_specs=pl.BlockSpec((None, OC, MPP), lambda n: (n, 0, 0)),
        scratch_shapes=[pltpu.VMEM((KWD * C, HWPAD), jnp.float32)],
        compiler_params=pltpu.CompilerParams(
            dimension_semantics=("parallel",),
            vmem_limit_bytes=32 * 1024 * 1024),
    )(x_flat, wg, b2)

    # Crop the lane padding (m >= OH*W) and the padded-width columns (ow >= OW).
    return out_pad[:, :, :MP].reshape(N, OC, OH, W)[:, :, :, :OW]


def reference(x, weight, bias):
    """Pure-JAX reference (lax conv) for validation."""
    v1 = jax.lax.conv_general_dilated(
        x, weight, window_strides=(1, 1), padding="VALID",
        dimension_numbers=("NCHW", "OIHW", "NCHW"),
        precision=jax.lax.Precision.HIGHEST)
    v1 = v1 + bias.reshape(1, -1, 1, 1)
    return jnp.where(v1 > 0, v1, v1 * NEGATIVE_SLOPE)


if __name__ == "__main__":
    key = jax.random.PRNGKey(0)
    k_x, k_w, k_b = jax.random.split(key, 3)

    # Smallest reasonable shapes: spatial must be >= kernel (30, 10).
    N, H, W = 2, 34, 16
    x = jax.random.normal(k_x, (N, IN_C, H, W), dtype=jnp.float32)

    fan_in = IN_C * KH * KW
    bound = 1.0 / (fan_in ** 0.5)
    weight = jax.random.uniform(k_w, (OUT_C, IN_C, KH, KW),
                                dtype=jnp.float32, minval=-bound, maxval=bound)
    bias = jax.random.uniform(k_b, (OUT_C,), dtype=jnp.float32,
                              minval=-bound, maxval=bound)

    out = jax.block_until_ready(jax.jit(conv2d_leaky)(x, weight, bias))
    ref = jax.block_until_ready(reference(x, weight, bias))

    assert out.shape == ref.shape == (N, OUT_C, H - KH + 1, W - KW + 1)
    max_err = float(jnp.max(jnp.abs(out - ref)))
    assert jnp.allclose(out, ref, atol=2e-3, rtol=2e-3), max_err

    print("KERNEL_OK")
</pallas_src>

<mosaic_0001>
module attributes {stable_mosaic.version = 11 : i64} {
  func.func @kernel(%arg0: i32, %arg1: memref<1x128x768xf32, #tpu.memory_space<vmem>>, %arg2: memref<4x128x1280xf32, #tpu.memory_space<vmem>>, %arg3: memref<16x128xf32, #tpu.memory_space<vmem>>, %arg4: memref<1x16x128xf32, #tpu.memory_space<vmem>>, %arg5: memref<1280x640xf32, #tpu.memory_space<vmem>>) attributes {dimension_semantics = [#tpu.dimension_semantics<parallel>], iteration_bounds = array<i64: 2>, scalar_prefetch = 0 : i64, scratch_operands = 1 : i64, tpu.core_type = #tpu.core_type<tc>, window_params = [{transform_indices = @transform_0, window_bounds = array<i64: 1, 128, 768>}, {pipeline_mode = #tpu.pipeline_mode<synchronous>, transform_indices = @transform_1, window_bounds = array<i64: 4, 128, 1280>}, {pipeline_mode = #tpu.pipeline_mode<synchronous>, transform_indices = @transform_2, window_bounds = array<i64: 16, 128>}, {transform_indices = @transform_3, window_bounds = array<i64: 1, 16, 128>}]} {
    %c0 = arith.constant 0 : index
    %c0_0 = arith.constant 0 : index
    %c0_1 = arith.constant 0 : index
    %0 = vector.load %arg1[%c0, %c0_0, %c0_1] : memref<1x128x768xf32, #tpu.memory_space<vmem>>, vector<1x128x768xf32>
    %1 = vector.shape_cast %0 : vector<1x128x768xf32> to vector<128x768xf32>
    %2 = vector.extract_strided_slice %1 {offsets = [0, 0], sizes = [128, 640], strides = [1, 1]} : vector<128x768xf32> to vector<128x640xf32>
    %c0_2 = arith.constant 0 : index
    %c0_3 = arith.constant 0 : index
    %3 = vector.load %arg5[%c0_2, %c0_3] : memref<1280x640xf32, #tpu.memory_space<vmem>>, vector<128x640xf32>
    tpu.vector_store %arg5[%c0_2, %c0_3], %2 {strides = array<i32>} : memref<1280x640xf32, #tpu.memory_space<vmem>>, vector<128x640xf32>,
    %4 = vector.extract_strided_slice %1 {offsets = [0, 1], sizes = [128, 640], strides = [1, 1]} : vector<128x768xf32> to vector<128x640xf32>
    %c128 = arith.constant 128 : index
    %c0_4 = arith.constant 0 : index
    %5 = vector.load %arg5[%c128, %c0_4] : memref<1280x640xf32, #tpu.memory_space<vmem>>, vector<128x640xf32>
    tpu.vector_store %arg5[%c128, %c0_4], %4 {strides = array<i32>} : memref<1280x640xf32, #tpu.memory_space<vmem>>, vector<128x640xf32>,
    %6 = vector.extract_strided_slice %1 {offsets = [0, 2], sizes = [128, 640], strides = [1, 1]} : vector<128x768xf32> to vector<128x640xf32>
    %c256 = arith.constant 256 : index
    %c0_5 = arith.constant 0 : index
    %7 = vector.load %arg5[%c256, %c0_5] : memref<1280x640xf32, #tpu.memory_space<vmem>>, vector<128x640xf32>
    tpu.vector_store %arg5[%c256, %c0_5], %6 {strides = array<i32>} : memref<1280x640xf32, #tpu.memory_space<vmem>>, vector<128x640xf32>,
    %8 = vector.extract_strided_slice %1 {offsets = [0, 3], sizes = [128, 640], strides = [1, 1]} : vector<128x768xf32> to vector<128x640xf32>
    %c384 = arith.constant 384 : index
    %c0_6 = arith.constant 0 : index
    %9 = vector.load %arg5[%c384, %c0_6] : memref<1280x640xf32, #tpu.memory_space<vmem>>, vector<128x640xf32>
    tpu.vector_store %arg5[%c384, %c0_6], %8 {strides = array<i32>} : memref<1280x640xf32, #tpu.memory_space<vmem>>, vector<128x640xf32>,
    %10 = vector.extract_strided_slice %1 {offsets = [0, 4], sizes = [128, 640], strides = [1, 1]} : vector<128x768xf32> to vector<128x640xf32>
    %c512 = arith.constant 512 : index
    %c0_7 = arith.constant 0 : index
    %11 = vector.load %arg5[%c512, %c0_7] : memref<1280x640xf32, #tpu.memory_space<vmem>>, vector<128x640xf32>
    tpu.vector_store %arg5[%c512, %c0_7], %10 {strides = array<i32>} : memref<1280x640xf32, #tpu.memory_space<vmem>>, vector<128x640xf32>,
    %12 = vector.extract_strided_slice %1 {offsets = [0, 5], sizes = [128, 640], strides = [1, 1]} : vector<128x768xf32> to vector<128x640xf32>
    %c640 = arith.constant 640 : index
    %c0_8 = arith.constant 0 : index
    %13 = vector.load %arg5[%c640, %c0_8] : memref<1280x640xf32, #tpu.memory_space<vmem>>, vector<128x640xf32>
    tpu.vector_store %arg5[%c640, %c0_8], %12 {strides = array<i32>} : memref<1280x640xf32, #tpu.memory_space<vmem>>, vector<128x640xf32>,
    %14 = vector.extract_strided_slice %1 {offsets = [0, 6], sizes = [128, 640], strides = [1, 1]} : vector<128x768xf32> to vector<128x640xf32>
    %c768 = arith.constant 768 : index
    %c0_9 = arith.constant 0 : index
    %15 = vector.load %arg5[%c768, %c0_9] : memref<1280x640xf32, #tpu.memory_space<vmem>>, vector<128x640xf32>
    tpu.vector_store %arg5[%c768, %c0_9], %14 {strides = array<i32>} : memref<1280x640xf32, #tpu.memory_space<vmem>>, vector<128x640xf32>,
    %16 = vector.extract_strided_slice %1 {offsets = [0, 7], sizes = [128, 640], strides = [1, 1]} : vector<128x768xf32> to vector<128x640xf32>
    %c896 = arith.constant 896 : index
    %c0_10 = arith.constant 0 : index
    %17 = vector.load %arg5[%c896, %c0_10] : memref<1280x640xf32, #tpu.memory_space<vmem>>, vector<128x640xf32>
    tpu.vector_store %arg5[%c896, %c0_10], %16 {strides = array<i32>} : memref<1280x640xf32, #tpu.memory_space<vmem>>, vector<128x640xf32>,
    %18 = vector.extract_strided_slice %1 {offsets = [0, 8], sizes = [128, 640], strides = [1, 1]} : vector<128x768xf32> to vector<128x640xf32>
    %c1024 = arith.constant 1024 : index
    %c0_11 = arith.constant 0 : index
    %19 = vector.load %arg5[%c1024, %c0_11] : memref<1280x640xf32, #tpu.memory_space<vmem>>, vector<128x640xf32>
    tpu.vector_store %arg5[%c1024, %c0_11], %18 {strides = array<i32>} : memref<1280x640xf32, #tpu.memory_space<vmem>>, vector<128x640xf32>,
    %20 = vector.extract_strided_slice %1 {offsets = [0, 9], sizes = [128, 640], strides = [1, 1]} : vector<128x768xf32> to vector<128x640xf32>
    %c1152 = arith.constant 1152 : index
    %c0_12 = arith.constant 0 : index
    %21 = vector.load %arg5[%c1152, %c0_12] : memref<1280x640xf32, #tpu.memory_space<vmem>>, vector<128x640xf32>
    tpu.vector_store %arg5[%c1152, %c0_12], %20 {strides = array<i32>} : memref<1280x640xf32, #tpu.memory_space<vmem>>, vector<128x640xf32>,
    %c0_13 = arith.constant 0 : index
    %c0_14 = arith.constant 0 : index
    %c0_15 = arith.constant 0 : index
    %22 = vector.load %arg2[%c0_13, %c0_14, %c0_15] : memref<4x128x1280xf32, #tpu.memory_space<vmem>>, vector<1x128x1280xf32>
    %23 = vector.shape_cast %22 : vector<1x128x1280xf32> to vector<128x1280xf32>
    %c0_16 = arith.constant 0 : index
    %c0_17 = arith.constant 0 : index
    %24 = vector.load %arg5[%c0_16, %c0_17] : memref<1280x640xf32, #tpu.memory_space<vmem>>, vector<1280x256xf32>
    %cst = arith.constant dense<0.000000e+00> : vector<128x256xf32>
    %25 = tpu.matmul %23, %24, %cst {dimension_numbers = #tpu.dot_dimension_numbers<[1], [0], [0], [1], [0, 0, 1, 1], [], []>} : vector<128x1280xf32>, vector<1280x256xf32>, vector<128x256xf32> -> vector<128x256xf32>
    %26 = vector.extract_strided_slice %25 {offsets = [0, 0], sizes = [16, 128], strides = [1, 1]} : vector<128x256xf32> to vector<16x128xf32>
    %27 = vector.extract_strided_slice %25 {offsets = [16, 16], sizes = [16, 128], strides = [1, 1]} : vector<128x256xf32> to vector<16x128xf32>
    %28 = vector.extract_strided_slice %25 {offsets = [32, 32], sizes = [16, 128], strides = [1, 1]} : vector<128x256xf32> to vector<16x128xf32>
    %29 = vector.extract_strided_slice %25 {offsets = [48, 48], sizes = [16, 128], strides = [1, 1]} : vector<128x256xf32> to vector<16x128xf32>
    %30 = vector.extract_strided_slice %25 {offsets = [64, 64], sizes = [16, 128], strides = [1, 1]} : vector<128x256xf32> to vector<16x128xf32>
    %31 = vector.extract_strided_slice %25 {offsets = [80, 80], sizes = [16, 128], strides = [1, 1]} : vector<128x256xf32> to vector<16x128xf32>
    %32 = vector.extract_strided_slice %25 {offsets = [96, 96], sizes = [16, 128], strides = [1, 1]} : vector<128x256xf32> to vector<16x128xf32>
    %33 = vector.extract_strided_slice %25 {offsets = [112, 112], sizes = [16, 128], strides = [1, 1]} : vector<128x256xf32> to vector<16x128xf32>
    %34 = arith.addf %26, %27 : vector<16x128xf32>
    %35 = arith.addf %28, %29 : vector<16x128xf32>
    %36 = arith.addf %30, %31 : vector<16x128xf32>
    %37 = arith.addf %32, %33 : vector<16x128xf32>
    %38 = arith.addf %34, %35 : vector<16x128xf32>
    %39 = arith.addf %36, %37 : vector<16x128xf32>
    %40 = arith.addf %38, %39 : vector<16x128xf32>
    %c1 = arith.constant 1 : index
    %c0_18 = arith.constant 0 : index
    %c0_19 = arith.constant 0 : index
    %41 = vector.load %arg2[%c1, %c0_18, %c0_19] : memref<4x128x1280xf32, #tpu.memory_space<vmem>>, vector<1x128x1280xf32>
    %42 = vector.shape_cast %41 : vector<1x128x1280xf32> to vector<128x1280xf32>
    %c0_20 = arith.constant 0 : index
    %c128_21 = arith.constant 128 : index
    %43 = vector.load %arg5[%c0_20, %c128_21] : memref<1280x640xf32, #tpu.memory_space<vmem>>, vector<1280x256xf32>
    %cst_22 = arith.constant dense<0.000000e+00> : vector<128x256xf32>
    %44 = tpu.matmul %42, %43, %cst_22 {dimension_numbers = #tpu.dot_dimension_numbers<[1], [0], [0], [1], [0, 0, 1, 1], [], []>} : vector<128x1280xf32>, vector<1280x256xf32>, vector<128x256xf32> -> vector<128x256xf32>
    %45 = vector.extract_strided_slice %44 {offsets = [0, 0], sizes = [16, 128], strides = [1, 1]} : vector<128x256xf32> to vector<16x128xf32>
    %46 = vector.extract_strided_slice %44 {offsets = [16, 16], sizes = [16, 128], strides = [1, 1]} : vector<128x256xf32> to vector<16x128xf32>
    %47 = vector.extract_strided_slice %44 {offsets = [32, 32], sizes = [16, 128], strides = [1, 1]} : vector<128x256xf32> to vector<16x128xf32>
    %48 = vector.extract_strided_slice %44 {offsets = [48, 48], sizes = [16, 128], strides = [1, 1]} : vector<128x256xf32> to vector<16x128xf32>
    %49 = vector.extract_strided_slice %44 {offsets = [64, 64], sizes = [16, 128], strides = [1, 1]} : vector<128x256xf32> to vector<16x128xf32>
    %50 = vector.extract_strided_slice %44 {offsets = [80, 80], sizes = [16, 128], strides = [1, 1]} : vector<128x256xf32> to vector<16x128xf32>
    %51 = vector.extract_strided_slice %44 {offsets = [96, 96], sizes = [16, 128], strides = [1, 1]} : vector<128x256xf32> to vector<16x128xf32>
    %52 = vector.extract_strided_slice %44 {offsets = [112, 112], sizes = [16, 128], strides = [1, 1]} : vector<128x256xf32> to vector<16x128xf32>
    %53 = arith.addf %45, %46 : vector<16x128xf32>
    %54 = arith.addf %47, %48 : vector<16x128xf32>
    %55 = arith.addf %49, %50 : vector<16x128xf32>
    %56 = arith.addf %51, %52 : vector<16x128xf32>
    %57 = arith.addf %53, %54 : vector<16x128xf32>
    %58 = arith.addf %55, %56 : vector<16x128xf32>
    %59 = arith.addf %57, %58 : vector<16x128xf32>
    %c2 = arith.constant 2 : index
    %c0_23 = arith.constant 0 : index
    %c0_24 = arith.constant 0 : index
    %60 = vector.load %arg2[%c2, %c0_23, %c0_24] : memref<4x128x1280xf32, #tpu.memory_space<vmem>>, vector<1x128x1280xf32>
    %61 = vector.shape_cast %60 : vector<1x128x1280xf32> to vector<128x1280xf32>
    %c0_25 = arith.constant 0 : index
    %c256_26 = arith.constant 256 : index
    %62 = vector.load %arg5[%c0_25, %c256_26] : memref<1280x640xf32, #tpu.memory_space<vmem>>, vector<1280x256xf32>
    %cst_27 = arith.constant dense<0.000000e+00> : vector<128x256xf32>
    %63 = tpu.matmul %61, %62, %cst_27 {dimension_numbers = #tpu.dot_dimension_numbers<[1], [0], [0], [1], [0, 0, 1, 1], [], []>} : vector<128x1280xf32>, vector<1280x256xf32>, vector<128x256xf32> -> vector<128x256xf32>
    %64 = vector.extract_strided_slice %63 {offsets = [0, 0], sizes = [16, 128], strides = [1, 1]} : vector<128x256xf32> to vector<16x128xf32>
    %65 = vector.extract_strided_slice %63 {offsets = [16, 16], sizes = [16, 128], strides = [1, 1]} : vector<128x256xf32> to vector<16x128xf32>
    %66 = vector.extract_strided_slice %63 {offsets = [32, 32], sizes = [16, 128], strides = [1, 1]} : vector<128x256xf32> to vector<16x128xf32>
    %67 = vector.extract_strided_slice %63 {offsets = [48, 48], sizes = [16, 128], strides = [1, 1]} : vector<128x256xf32> to vector<16x128xf32>
    %68 = vector.extract_strided_slice %63 {offsets = [64, 64], sizes = [16, 128], strides = [1, 1]} : vector<128x256xf32> to vector<16x128xf32>
    %69 = vector.extract_strided_slice %63 {offsets = [80, 80], sizes = [16, 128], strides = [1, 1]} : vector<128x256xf32> to vector<16x128xf32>
    %70 = vector.extract_strided_slice %63 {offsets = [96, 96], sizes = [16, 128], strides = [1, 1]} : vector<128x256xf32> to vector<16x128xf32>
    %71 = vector.extract_strided_slice %63 {offsets = [112, 112], sizes = [16, 128], strides = [1, 1]} : vector<128x256xf32> to vector<16x128xf32>
    %72 = arith.addf %64, %65 : vector<16x128xf32>
    %73 = arith.addf %66, %67 : vector<16x128xf32>
    %74 = arith.addf %68, %69 : vector<16x128xf32>
    %75 = arith.addf %70, %71 : vector<16x128xf32>
    %76 = arith.addf %72, %73 : vector<16x128xf32>
    %77 = arith.addf %74, %75 : vector<16x128xf32>
    %78 = arith.addf %76, %77 : vector<16x128xf32>
    %c3 = arith.constant 3 : index
    %c0_28 = arith.constant 0 : index
    %c0_29 = arith.constant 0 : index
    %79 = vector.load %arg2[%c3, %c0_28, %c0_29] : memref<4x128x1280xf32, #tpu.memory_space<vmem>>, vector<1x128x1280xf32>
    %80 = vector.shape_cast %79 : vector<1x128x1280xf32> to vector<128x1280xf32>
    %c0_30 = arith.constant 0 : index
    %c384_31 = arith.constant 384 : index
    %81 = vector.load %arg5[%c0_30, %c384_31] : memref<1280x640xf32, #tpu.memory_space<vmem>>, vector<1280x256xf32>
    %cst_32 = arith.constant dense<0.000000e+00> : vector<128x256xf32>
    %82 = tpu.matmul %80, %81, %cst_32 {dimension_numbers = #tpu.dot_dimension_numbers<[1], [0], [0], [1], [0, 0, 1, 1], [], []>} : vector<128x1280xf32>, vector<1280x256xf32>, vector<128x256xf32> -> vector<128x256xf32>
    %83 = vector.extract_strided_slice %82 {offsets = [0, 0], sizes = [16, 128], strides = [1, 1]} : vector<128x256xf32> to vector<16x128xf32>
    %84 = vector.extract_strided_slice %82 {offsets = [16, 16], sizes = [16, 128], strides = [1, 1]} : vector<128x256xf32> to vector<16x128xf32>
    %85 = vector.extract_strided_slice %82 {offsets = [32, 32], sizes = [16, 128], strides = [1, 1]} : vector<128x256xf32> to vector<16x128xf32>
    %86 = vector.extract_strided_slice %82 {offsets = [48, 48], sizes = [16, 128], strides = [1, 1]} : vector<128x256xf32> to vector<16x128xf32>
    %87 = vector.extract_strided_slice %82 {offsets = [64, 64], sizes = [16, 128], strides = [1, 1]} : vector<128x256xf32> to vector<16x128xf32>
    %88 = vector.extract_strided_slice %82 {offsets = [80, 80], sizes = [16, 128], strides = [1, 1]} : vector<128x256xf32> to vector<16x128xf32>
    %89 = arith.addf %83, %84 : vector<16x128xf32>
    %90 = arith.addf %85, %86 : vector<16x128xf32>
    %91 = arith.addf %87, %88 : vector<16x128xf32>
    %92 = arith.addf %89, %90 : vector<16x128xf32>
    %93 = arith.addf %92, %91 : vector<16x128xf32>
    %94 = arith.addf %40, %59 : vector<16x128xf32>
    %95 = arith.addf %78, %93 : vector<16x128xf32>
    %96 = arith.addf %94, %95 : vector<16x128xf32>
    %c0_33 = arith.constant 0 : index
    %c0_34 = arith.constant 0 : index
    %97 = vector.load %arg3[%c0_33, %c0_34] : memref<16x128xf32, #tpu.memory_space<vmem>>, vector<16x128xf32>
    %98 = arith.addf %96, %97 : vector<16x128xf32>
    %cst_35 = arith.constant 0.000000e+00 : f32
    %99 = vector.broadcast %cst_35 : f32 to vector<16x128xf32>
    %100 = arith.cmpf ogt, %98, %99 : vector<16x128xf32>
    %cst_36 = arith.constant 0.950340807 : f32
    %101 = vector.broadcast %cst_36 : f32 to vector<16x128xf32>
    %102 = arith.mulf %98, %101 : vector<16x128xf32>
    %103 = arith.select %100, %98, %102 : vector<16x128xi1>, vector<16x128xf32>
    %c0_37 = arith.constant 0 : index
    %c0_38 = arith.constant 0 : index
    %c0_39 = arith.constant 0 : index
    %104 = vector.load %arg4[%c0_37, %c0_38, %c0_39] : memref<1x16x128xf32, #tpu.memory_space<vmem>>, vector<1x16x128xf32>
    %105 = vector.shape_cast %104 : vector<1x16x128xf32> to vector<16x128xf32>
    %106 = vector.shape_cast %103 : vector<16x128xf32> to vector<1x16x128xf32>
    tpu.vector_store %arg4[%c0_37, %c0_38, %c0_39], %106 {strides = array<i32>} : memref<1x16x128xf32, #tpu.memory_space<vmem>>, vector<1x16x128xf32>,
    return
  }
  func.func @transform_0(%arg0: i32) -> (i32, i32, i32) {
    %c0_i32 = arith.constant 0 : i32
    %c0_i32_0 = arith.constant 0 : i32
    %c0_i32_1 = arith.constant 0 : i32
    return %arg0, %c0_i32, %c0_i32_0 : i32, i32, i32
  }
  func.func @transform_1(%arg0: i32) -> (i32, i32, i32) {
    %c0_i32 = arith.constant 0 : i32
    %c0_i32_0 = arith.constant 0 : i32
    %c0_i32_1 = arith.constant 0 : i32
    %c0_i32_2 = arith.constant 0 : i32
    return %c0_i32, %c0_i32_0, %c0_i32_1 : i32, i32, i32
  }
  func.func @transform_2(%arg0: i32) -> (i32, i32) {
    %c0_i32 = arith.constant 0 : i32
    %c0_i32_0 = arith.constant 0 : i32
    %c0_i32_1 = arith.constant 0 : i32
    return %c0_i32, %c0_i32_0 : i32, i32
  }
  func.func @transform_3(%arg0: i32) -> (i32, i32, i32) {
    %c0_i32 = arith.constant 0 : i32
    %c0_i32_0 = arith.constant 0 : i32
    %c0_i32_1 = arith.constant 0 : i32
    return %arg0, %c0_i32, %c0_i32_0 : i32, i32, i32
  }
}

</mosaic_0001>

<bundles_post_ra>
// kernel: conv2d_leaky.1
= control target key start
LH: loop header
LB: loop body
LE: loop exit
PB: predicated region body
PF: predicated region fallthrough
CT: control target
= control target key end

     0   :  { %s14793_s12 = smov 0   ;;  %s22627_s0 = inlined_call_operand.vmem [shape: f32[2,128,768], index: 0, kind: input, shape index: {}]   ;;  %s22628_s1 = inlined_call_operand.vmem [shape: f32[4,128,1280], index: 1, kind: input, shape index: {}]   ;;  %s22629_s2 = inlined_call_operand.vmem [shape: f32[16,128], index: 2, kind: input, shape index: {}]   ;;  %s22630_s3 = inlined_call_operand.vmem [shape: f32[2,16,128], index: 3, kind: output, shape index: {}]  }
   0x1 LB: > { %s10003_s13 = sadd.s32 4294967295, %s14759_s12   ;;  %p10007_p0 = scmp.ge.s32.totalorder %s14759_s12, 1  ;;  %s14759_s12 = sphi %s14793_s12, %s13_s12  }
   0x2   : > { %p137_p1 = scmp.lt.s32.totalorder %s14759_s12, 3 }
   0x4   : > { %p138_p2 = pnand %p10007_p0, %p137_p1 }
   0x6   : > { %141 = sbr.rel (%p138_p2) target bundleno = 1831 (0x727), region = 32 }
   0xd   : > { %p161_p3 = scmp.lt.s32.totalorder %s10003_s13, 1  ;;  %s14761_s18 = smov 127   ;;  %vm635_vm0 = vcmask 1039360   ;;  %vm1068_vm1 = vcmask 1031168   ;;  %vm1501_vm2 = vcmask 1022976   ;;  %vm1934_vm3 = vcmask 1014784  }
   0xe   : > { %s14762_s19 = smov 126   ;;  %s14763_s24 = smov 125   ;;  %vm2367_vm4 = vcmask 1006592   ;;  %vm2800_vm5 = vcmask 998400   ;;  %vm3233_vm6 = vcmask 990208   ;;  %vm3666_vm7 = vcmask 982016  }
   0xf   : > { %s24032_s13 = smov (!%p161_p3, %s10003_s13), 1  ;;  %s14765_s11 = smov 123   ;;  %vm4099_vm8 = vcmask 973824   ;;  %vm5627_vm9 = vcmask 916480   ;;  %vm5712_vm10 = vcmask 785408   ;;  %vm5753_vm11 = vcmask 523264  }
  0x10   : > { %s12190_s14 = smul.u32 768, %s24032_s13  ;;  %s14766_s8 = smov 122  }
  0x11   : > { %s14768_s30 = smov 120   ;;  %s14769_s26 = smov 119  }
  0x12   : > { %s14807_s17 = scalar_lea.vmem %s22627_s0, %s12190_s14  ;;  %s14770_s10 = smov 112  }
  0x13   : > { %v175_v0 = vld [vmem:[%s14807_s17 + $0x20] sm:$0xff]  ;;  %v176_v1 = vld [vmem:[%s14807_s17 + $0x28] sm:$0xff]  ;;  %v177_v5 = vld [vmem:[%s14807_s17 + $0x30] sm:$0xff]  ;;  %s14772_s7 = smov 64  }
  0x14   : > { %v171_v2 = vld [vmem:[%s14807_s17] sm:$0xff]  ;;  %v14812_v3 = vpack.i.bf16 %v176_v1, %v175_v0  ;;  %v172_v4 = vld [vmem:[%s14807_s17 + $0x8] sm:$0xff]  ;;  %v178_v6 = vld [vmem:[%s14807_s17 + $0x38] sm:$0xff] }
  0x15   : > { %v14817_v7 = vpack.i.bf16 %v172_v4, %v171_v2  ;;  %v173_v8 = vld [vmem:[%s14807_s17 + $0x10] sm:$0xff]  ;;  %v174_v9 = vld [vmem:[%s14807_s17 + $0x18] sm:$0xff]  ;;  %v10494_v10 = vpack.c.bf16 %v178_v6, %v172_v4  ;;  %v14823_v11 = vpack.i.bf16 %v178_v6, %v177_v5  ;;  %v179_v13 = vld [vmem:[%s14807_s17 + $0x40] sm:$0xff]  ;;  %v10496_v14 = vpack.c.bf16 %v177_v5, %v171_v2 }
  0x16   : > { %12222 = vrot.lane.b32.xlu1 %v14812_v3, %s14761_s18  ;;  %v181_v12 = vld [vmem:[%s14807_s17 + $0x50] sm:$0xff]  ;;  %v14829_v15 = vpack.i.bf16 %v174_v9, %v173_v8  ;;  %v182_v16 = vld [vmem:[%s14807_s17 + $0x58] sm:$0xff]  ;;  %v180_v17 = vld [vmem:[%s14807_s17 + $0x48] sm:$0xff]  ;;  %v14834_v19 = vpack.c.bf16 %v179_v13, %v173_v8 }
  0x17   : > { %12212 = vrot.lane.b32.xlu0 %v14817_v7, %s14761_s18  ;;  %v183_v18 = vld [vmem:[%s14807_s17 + $0x60] sm:$0xff]  ;;  %10495 = vmatprep.subr.bf16.mxu0 %v10494_v10  ;;  %v184_v20 = vld [vmem:[%s14807_s17 + $0x68] sm:$0xff]  ;;  %v189_v21 = vld [vmem:[%s14807_s17 + $0x90] sm:$0xff]  ;;  %v14842_v25 = vpack.i.bf16 %v182_v16, %v181_v12  ;;  %v14848_v28 = vpack.i.bf16 %v180_v17, %v179_v13 }
  0x18   : > { %23056 = vst [vmem:[#allocation3_spill] sm:$0xff] %v14834_v19  ;;  %v190_v22 = vld [vmem:[%s14807_s17 + $0x98] sm:$0xff]  ;;  %10497 = vmatpush1.bf16.msra.mxu0 %v10496_v14  ;;  %10815 = vmatprep.subr.bf16.mxu1 %v14834_v19  ;;  %v10500_v24 = vpack.c.bf16 %v189_v21, %v183_v18  ;;  %v185_v26 = vld [vmem:[%s14807_s17 + $0x70] sm:$0xff]  ;;  %v191_v27 = vld [vmem:[%s14807_s17 + $0xa0] sm:$0xff]  ;;  %v14880_v40 = vpack.i.bf16 %v184_v20, %v183_v18 }
  0x19   : > { %v10498_v23 = vpack.c.bf16 %v190_v22, %v184_v20  ;;  %10817 = vmatpush1.bf16.msra.mxu1 %v10494_v10  ;;  %v186_v29 = vld [vmem:[%s14807_s17 + $0x78] sm:$0xff]  ;;  %v14852_v30 = vld [vmem:[%s14807_s17 + $0xc0] sm:$0xff]  ;;  %v14854_v31 = vpack.c.bf16 %v191_v27, %v185_v26  ;;  %v14857_v32 = vld [vmem:[%s14807_s17 + $0xc8] sm:$0xff]  ;;  %v14906_v50 = vpack.i.bf16 %v190_v22, %v189_v21 }
  0x1a   : > { %12227 = vrot.lane.b32.xlu1 %v14823_v11, %s14761_s18  ;;  %v14860_v33 = vld [vmem:[%s14807_s17 + $0xf0] sm:$0xff]  ;;  %v14863_v34 = vld [vmem:[%s14807_s17 + $0xf8] sm:$0xff]  ;;  %v14872_v37 = vpack.i.bf16 %v186_v29, %v185_v26  ;;  %v14876_v39 = vld [vmem:[%s14807_s17 + $0x100] sm:$0xff]  ;;  %v14992_v20 = vpack.i.bf16 %v14857_v32, %v14852_v30 }
  0x1b   : > { %12217 = vrot.lane.b32.xlu0 %v14829_v15, %s14761_s18  ;;  %23057 = vst [vmem:[#allocation4_spill] sm:$0xff] %v14854_v31  ;;  %10499 = vmatprep.subr.bf16.mxu0 %v10498_v23  ;;  %v10502_v35 = vpack.c.bf16 %v14863_v34, %v14857_v32  ;;  %v10504_v36 = vpack.c.bf16 %v14860_v33, %v14852_v30  ;;  %v197_v38 = vld [vmem:[%s14807_s17 + $0xd0] sm:$0xff]  ;;  %v187_v41 = vld [vmem:[%s14807_s17 + $0x80] sm:$0xff]  ;;  %v188_v42 = vld [vmem:[%s14807_s17 + $0x88] sm:$0xff] }
  0x1c   : > { %10501 = vmatpush1.bf16.msra.mxu0 %v10500_v24  ;;  %10819 = vmatprep.subr.bf16.mxu1 %v14854_v31  ;;  %v14885_v43 = vld [vmem:[%s14807_s17 + $0x120] sm:$0xff]  ;;  %v14888_v44 = vpack.c.bf16 %v14876_v39, %v197_v38  ;;  %v14891_v45 = vld [vmem:[%s14807_s17 + $0x128] sm:$0xff]  ;;  %v14894_v46 = vld [vmem:[%s14807_s17 + $0x150] sm:$0xff]  ;;  %v14917_v54 = vpack.i.bf16 %v188_v42, %v187_v41 }
  0x1d   : > { %10821 = vmatpush1.bf16.msra.mxu1 %v10498_v23  ;;  %10503 = vmatprep.subr.bf16.mxu0 %v10502_v35  ;;  %v14897_v47 = vld [vmem:[%s14807_s17 + $0x158] sm:$0xff]  ;;  %v10508_v49 = vpack.c.bf16 %v14894_v46, %v14885_v43  ;;  %v193_v51 = vld [vmem:[%s14807_s17 + $0xb0] sm:$0xff]  ;;  %v14913_v53 = vld [vmem:[%s14807_s17 + $0x160] sm:$0xff] }
  0x1e   : > { %12237 = vrot.lane.b32.xlu1 %v14842_v25, %s14761_s18  ;;  %23058 = vst [vmem:[#allocation5_spill] sm:$0xff] %v14888_v44  ;;  %10823 = vmatprep.subr.bf16.mxu1 %v14888_v44  ;;  %v10506_v48 = vpack.c.bf16 %v14897_v47, %v14891_v45  ;;  %v14910_v52 = vld [vmem:[%s14807_s17 + $0x130] sm:$0xff]  ;;  %v194_v55 = vld [vmem:[%s14807_s17 + $0xb8] sm:$0xff]  ;;  %v192_v56 = vld [vmem:[%s14807_s17 + $0xa8] sm:$0xff] }
  0x1f   : > { %12232 = vrot.lane.b32.xlu0 %v14848_v28, %s14761_s18  ;;  %v14922_v57 = vld [vmem:[%s14807_s17 + $0x180] sm:$0xff]  ;;  %v14926_v58 = vpack.c.bf16 %v14913_v53, %v14910_v52  ;;  %v14929_v59 = vld [vmem:[%s14807_s17 + $0x188] sm:$0xff]  ;;  %v14932_v60 = vld [vmem:[%s14807_s17 + $0x1b0] sm:$0xff]  ;;  %v14944_v0 = vpack.i.bf16 %v194_v55, %v193_v51  ;;  %v14954_v4 = vpack.i.bf16 %v192_v56, %v191_v27 }
  0x20   : > { %10505 = vmatpush1.bf16.msra.mxu0 %v10504_v36  ;;  %v14935_v61 = vld [vmem:[%s14807_s17 + $0x1b8] sm:$0xff]  ;;  %v10512_v63 = vpack.c.bf16 %v14932_v60, %v14922_v57  ;;  %v14947_v1 = vld [vmem:[%s14807_s17 + $0x190] sm:$0xff]  ;;  %v14950_v2 = vld [vmem:[%s14807_s17 + $0x1c0] sm:$0xff] }
  0x21   : > { %10825 = vmatpush1.bf16.msra.mxu1 %v10502_v35  ;;  %23059 = vst [vmem:[#allocation6_spill] sm:$0xff] %v14926_v58  ;;  %10507 = vmatprep.subr.bf16.mxu0 %v10506_v48  ;;  %v10510_v62 = vpack.c.bf16 %v14935_v61, %v14929_v59  ;;  %v198_v5 = vld [vmem:[%s14807_s17 + $0xd8] sm:$0xff]  ;;  %v14958_v6 = vld [vmem:[%s14807_s17 + $0x1e0] sm:$0xff]  ;;  %v14962_v8 = vpack.c.bf16 %v14950_v2, %v14947_v1  ;;  %v14965_v9 = vld [vmem:[%s14807_s17 + $0x1e8] sm:$0xff] }
  0x22   : > { %12247 = vrot.lane.b32.xlu1 %v14872_v37, %s14761_s18  ;;  %10827 = vmatprep.subr.bf16.mxu1 %v14926_v58  ;;  %v14968_v10 = vld [vmem:[%s14807_s17 + $0x210] sm:$0xff]  ;;  %v14971_v12 = vld [vmem:[%s14807_s17 + $0x218] sm:$0xff]  ;;  %v14980_v16 = vpack.i.bf16 %v198_v5, %v197_v38  ;;  %v14986_v18 = vld [vmem:[%s14807_s17 + $0x220] sm:$0xff]  ;;  %v15021_v35 = vpack.i.bf16 %v14863_v34, %v14860_v33 }
  0x23   : > { %12242 = vrot.lane.b32.xlu0 %v14880_v40, %s14761_s18  ;;  %23060 = vst [vmem:[#allocation7_spill] sm:$0xff] %v14962_v8  ;;  %v10514_v13 = vpack.c.bf16 %v14971_v12, %v14965_v9  ;;  %v10516_v14 = vpack.c.bf16 %v14968_v10, %v14958_v6  ;;  %v14983_v17 = vld [vmem:[%s14807_s17 + $0x1f0] sm:$0xff]  ;;  %v199_v21 = vld [vmem:[%s14807_s17 + $0xe0] sm:$0xff]  ;;  %v200_v22 = vld [vmem:[%s14807_s17 + $0xe8] sm:$0xff] }
  0x24   : > { %10509 = vmatpush1.bf16.msra.mxu0 %v10508_v49  ;;  %v14997_v23 = vld [vmem:[%s14807_s17 + $0x240] sm:$0xff]  ;;  %v15001_v24 = vpack.c.bf16 %v14986_v18, %v14983_v17  ;;  %v15004_v26 = vld [vmem:[%s14807_s17 + $0x248] sm:$0xff]  ;;  %v15007_v27 = vld [vmem:[%s14807_s17 + $0x270] sm:$0xff]  ;;  %v15032_v42 = vpack.i.bf16 %v200_v22, %v199_v21 }
  0x25   : > { %10829 = vmatpush1.bf16.msra.mxu1 %v10506_v48  ;;  %10511 = vmatprep.subr.bf16.mxu0 %v10510_v62  ;;  %v15010_v29 = vld [vmem:[%s14807_s17 + $0x278] sm:$0xff]  ;;  %v10520_v32 = vpack.c.bf16 %v15007_v27, %v14997_v23  ;;  %v205_v36 = vld [vmem:[%s14807_s17 + $0x110] sm:$0xff]  ;;  %v15028_v41 = vld [vmem:[%s14807_s17 + $0x280] sm:$0xff] }
  0x26   : > { %12257 = vrot.lane.b32.xlu1 %v14906_v50, %s14761_s18  ;;  %10831 = vmatprep.subr.bf16.mxu1 %v14962_v8  ;;  %23061 = vst [vmem:[#allocation8_spill] sm:$0xff] %v15001_v24  ;;  %v10518_v30 = vpack.c.bf16 %v15010_v29, %v15004_v26  ;;  %v15025_v38 = vld [vmem:[%s14807_s17 + $0x250] sm:$0xff]  ;;  %v206_v48 = vld [vmem:[%s14807_s17 + $0x118] sm:$0xff]  ;;  %v204_v49 = vld [vmem:[%s14807_s17 + $0x108] sm:$0xff] }
  0x27   : > { %12252 = vrot.lane.b32.xlu0 %v14917_v54, %s14761_s18  ;;  %v15037_v51 = vld [vmem:[%s14807_s17 + $0x2a0] sm:$0xff]  ;;  %v15041_v33 = vpack.c.bf16 %v15028_v41, %v15025_v38  ;;  %v15044_v34 = vld [vmem:[%s14807_s17 + $0x2a8] sm:$0xff]  ;;  %v15047_v55 = vld [vmem:[%s14807_s17 + $0x2d0] sm:$0xff]  ;;  %v15059_v5 = vpack.i.bf16 %v206_v48, %v205_v36  ;;  %v15070_v21 = vpack.i.bf16 %v204_v49, %v14876_v39  ;;  %v15087_v39 = vpack.i.bf16 %v14891_v45, %v14885_v43 }
  0x28   : > { %10513 = vmatpush1.bf16.msra.mxu0 %v10512_v63  ;;  %v15050_v56 = vld [vmem:[%s14807_s17 + $0x2d8] sm:$0xff]  ;;  %v10524_v63 = vpack.c.bf16 %v15047_v55, %v15037_v51  ;;  %v211_v36 = vld [vmem:[%s14807_s17 + $0x140] sm:$0xff]  ;;  %v212_v48 = vld [vmem:[%s14807_s17 + $0x148] sm:$0xff]  ;;  %v15095_v49 = vpack.i.bf16 %v14897_v47, %v14894_v46 }
  0x29   : > { %10833 = vmatpush1.bf16.msra.mxu1 %v10510_v62  ;;  %10515 = vmatprep.subr.bf16.mxu0 %v10514_v13  ;;  %23062 = vst [vmem:[#allocation9_spill] sm:$0xff] %v15041_v33  ;;  %v10522_v62 = vpack.c.bf16 %v15050_v56, %v15044_v34  ;;  %v210_v22 = vld [vmem:[%s14807_s17 + $0x138] sm:$0xff]  ;;  %v216_v43 = vld [vmem:[%s14807_s17 + $0x168] sm:$0xff] }
  0x2a   : > { %12267 = vrot.lane.b32.xlu1 %v14944_v0, %s14761_s18  ;;  %10835 = vmatprep.subr.bf16.mxu1 %v15001_v24  ;;  %v15111_v46 = vpack.i.bf16 %v216_v43, %v14913_v53  ;;  %v222_v47 = vld [vmem:[%s14807_s17 + $0x198] sm:$0xff]  ;;  %v15131_v53 = vpack.i.bf16 %v14935_v61, %v14932_v60 }
  0x2b   : > { %12262 = vrot.lane.b32.xlu0 %v14954_v4, %s14761_s18  ;;  %v230_v43 = vld [vmem:[%s14807_s17 + $0x1d8] sm:$0xff] }
  0x2c   : > { %10517 = vmatpush1.bf16.msra.mxu0 %v10516_v14  ;;  %v15065_v14 = vld [vmem:[%s14807_s17 + $0x2e0] sm:$0xff]  ;;  %v234_v61 = vld [vmem:[%s14807_s17 + $0x1f8] sm:$0xff] }
  0x2d   : > { %10837 = vmatpush1.bf16.msra.mxu1 %v10514_v13  ;;  %10519 = vmatprep.subr.bf16.mxu0 %v10518_v30  ;;  %v15062_v13 = vld [vmem:[%s14807_s17 + $0x2b0] sm:$0xff]  ;;  %v14492_v58 = vld [vmem:[%s14807_s17 + $0x138] sm:$0xff] }
  0x2e   : > { %12277 = vrot.lane.b32.xlu1 %v14980_v16, %s14761_s18  ;;  %10839 = vmatprep.subr.bf16.mxu1 %v15041_v33 }
  0x2f   : > { %12272 = vrot.lane.b32.xlu0 %v14992_v20, %s14761_s18 }
  0x30   : > { %10521 = vmatpush1.bf16.msra.mxu0 %v10520_v32  ;;  %v15075_v32 = vpack.c.bf16 %v15065_v14, %v15062_v13 }
  0x31   : > { %10841 = vmatpush1.bf16.msra.mxu1 %v10518_v30  ;;  %10523 = vmatprep.subr.bf16.mxu0 %v10522_v62  ;;  %v15081_v30 = vpack.i.bf16 %v210_v22, %v14910_v52  ;;  %v15099_v52 = vpack.i.bf16 %v212_v48, %v211_v36  ;;  %v15117_v22 = vpack.i.bf16 %v222_v47, %v14947_v1  ;;  %v223_v48 = vld [vmem:[%s14807_s17 + $0x1a0] sm:$0xff] }
  0x32   : > { %12287 = vrot.lane.b32.xlu1 %v15021_v35, %s14761_s18  ;;  %23063 = vst [vmem:[#allocation10_spill] sm:$0xff] %v15075_v32  ;;  %10843 = vmatprep.subr.bf16.mxu1 %v15075_v32  ;;  %v15123_v36 = vpack.i.bf16 %v14929_v59, %v14922_v57  ;;  %v228_v57 = vld [vmem:[%s14807_s17 + $0x1c8] sm:$0xff]  ;;  %v15153_v47 = vpack.i.bf16 %v234_v61, %v14983_v17 }
  0x33   : > { %12282 = vrot.lane.b32.xlu0 %v15032_v42, %s14761_s18  ;;  %v15147_v60 = vpack.i.bf16 %v228_v57, %v14950_v2  ;;  %v15167_v2 = vpack.i.bf16 %v14971_v12, %v14968_v10  ;;  %v242_v57 = vld [vmem:[%s14807_s17 + $0x238] sm:$0xff] }
  0x34   : > { %10525 = vmatpush1.bf16.msra.mxu0 %v10524_v63  ;;  %v218_v63 = vld [vmem:[%s14807_s17 + $0x178] sm:$0xff] }
  0x35   : > { %10845 = vmatpush1.bf16.msra.mxu1 %v10522_v62  ;;  %v217_v62 = vld [vmem:[%s14807_s17 + $0x170] sm:$0xff]  ;;  %v246_v12 = vld [vmem:[%s14807_s17 + $0x258] sm:$0xff] }
  0x36   : > { %12297 = vrot.lane.b32.xlu1 %v15059_v5, %s14761_s18  ;;  %v15106_v45 = vpack.i.bf16 %v218_v63, %v217_v62  ;;  %v224_v62 = vld [vmem:[%s14807_s17 + $0x1a8] sm:$0xff]  ;;  %v229_v63 = vld [vmem:[%s14807_s17 + $0x1d0] sm:$0xff]  ;;  %v15189_v61 = vpack.i.bf16 %v246_v12, %v15025_v38 }
  0x37   : > { %12292 = vrot.lane.b32.xlu0 %v15070_v21, %s14761_s18  ;;  %v15135_v1 = vpack.i.bf16 %v224_v62, %v223_v48  ;;  %v15142_v59 = vpack.i.bf16 %v230_v43, %v229_v63  ;;  %v15159_v48 = vpack.i.bf16 %v14965_v9, %v14958_v6  ;;  %v235_v62 = vld [vmem:[%s14807_s17 + $0x200] sm:$0xff]  ;;  %v236_v63 = vld [vmem:[%s14807_s17 + $0x208] sm:$0xff]  ;;  %v241_v43 = vld [vmem:[%s14807_s17 + $0x230] sm:$0xff] }
  0x38   : > { %v15171_v17 = vpack.i.bf16 %v236_v63, %v235_v62  ;;  %v240_v6 = vld [vmem:[%s14807_s17 + $0x228] sm:$0xff]  ;;  %v15178_v9 = vpack.i.bf16 %v242_v57, %v241_v43  ;;  %v15195_v62 = vpack.i.bf16 %v15004_v26, %v14997_v23  ;;  %v247_v63 = vld [vmem:[%s14807_s17 + $0x260] sm:$0xff]  ;;  %v253_v57 = vld [vmem:[%s14807_s17 + $0x290] sm:$0xff] }
  0x39   : > { %v15183_v10 = vpack.i.bf16 %v240_v6, %v14986_v18  ;;  %v248_v43 = vld [vmem:[%s14807_s17 + $0x268] sm:$0xff]  ;;  %v15203_v18 = vpack.i.bf16 %v15010_v29, %v15007_v27  ;;  %v254_v6 = vld [vmem:[%s14807_s17 + $0x298] sm:$0xff] }
  0x3a   : > { %12307 = vrot.lane.b32.xlu1 %v15081_v30, %s14761_s18  ;;  %v15207_v38 = vpack.i.bf16 %v248_v43, %v247_v63  ;;  %v252_v23 = vld [vmem:[%s14807_s17 + $0x288] sm:$0xff]  ;;  %v15214_v26 = vpack.i.bf16 %v254_v6, %v253_v57  ;;  %v258_v29 = vld [vmem:[%s14807_s17 + $0x2b8] sm:$0xff]  ;;  %v15231_v63 = vpack.i.bf16 %v15044_v34, %v15037_v51  ;;  %v259_v43 = vld [vmem:[%s14807_s17 + $0x2c0] sm:$0xff] }
  0x3b   : > { %12302 = vrot.lane.b32.xlu0 %v15087_v39, %s14761_s18  ;;  %v15219_v27 = vpack.i.bf16 %v252_v23, %v15028_v41  ;;  %v15225_v12 = vpack.i.bf16 %v258_v29, %v15062_v13  ;;  %v260_v57 = vld [vmem:[%s14807_s17 + $0x2c8] sm:$0xff]  ;;  %v15239_v41 = vpack.i.bf16 %v15050_v56, %v15047_v55  ;;  %v265_v6 = vld [vmem:[%s14807_s17 + $0x2f0] sm:$0xff]  ;;  %v266_v23 = vld [vmem:[%s14807_s17 + $0x2f8] sm:$0xff] }
  0x3c   : > { %v15243_v13 = vpack.i.bf16 %v260_v57, %v259_v43  ;;  %v264_v29 = vld [vmem:[%s14807_s17 + $0x2e8] sm:$0xff]  ;;  %v15250_v51 = vpack.i.bf16 %v266_v23, %v265_v6 }
  0x3d   : > { %v15255_v34 = vpack.i.bf16 %v264_v29, %v15065_v14  ;;  %v4341_v55 = vld [vmem:[%s22628_s1 + $0x8] sm:$0xff] }
  0x3e   : > { %12317 = vrot.lane.b32.xlu1 %v15095_v49, %s14761_s18  ;;  %v10012_v56 = vld [vmem:[%s22628_s1 + $0x508] sm:$0xff]  ;;  %4884 = vmatprep.mubr.f32.mxu0 %v4341_v55 }
  0x3f   : > { %12312 = vrot.lane.b32.xlu0 %v15099_v52, %s14761_s18  ;;  %6305 = vmatprep.mubr.f32.mxu1 %v10012_v56 }
  0x42   : > { %12327 = vrot.lane.b32.xlu1 %v15106_v45, %s14761_s18 }
  0x43   : > { %12322 = vrot.lane.b32.xlu0 %v15111_v46, %s14761_s18 }
  0x46   : > { %12337 = vrot.lane.b32.xlu1 %v15117_v22, %s14761_s18 }
  0x47   : > { %12332 = vrot.lane.b32.xlu0 %v15123_v36, %s14761_s18 }
  0x4a   : > { %12347 = vrot.lane.b32.xlu1 %v15131_v53, %s14761_s18 }
  0x4b   : > { %12342 = vrot.lane.b32.xlu0 %v15135_v1, %s14761_s18 }
  0x4e   : > { %12357 = vrot.lane.b32.xlu1 %v15142_v59, %s14761_s18 }
  0x4f   : > { %12352 = vrot.lane.b32.xlu0 %v15147_v60, %s14761_s18 }
  0x52   : > { %12367 = vrot.lane.b32.xlu1 %v15153_v47, %s14761_s18 }
  0x53   : > { %12362 = vrot.lane.b32.xlu0 %v15159_v48, %s14761_s18 }
  0x56   : > { %12377 = vrot.lane.b32.xlu1 %v15167_v2, %s14761_s18 }
  0x57   : > { %12372 = vrot.lane.b32.xlu0 %v15171_v17, %s14761_s18 }
  0x5a   : > { %12387 = vrot.lane.b32.xlu1 %v15178_v9, %s14761_s18 }
  0x5b   : > { %12382 = vrot.lane.b32.xlu0 %v15183_v10, %s14761_s18 }
  0x5e   : > { %12397 = vrot.lane.b32.xlu1 %v15189_v61, %s14761_s18 }
  0x5f   : > { %12392 = vrot.lane.b32.xlu0 %v15195_v62, %s14761_s18 }
  0x62   : > { %12407 = vrot.lane.b32.xlu1 %v15203_v18, %s14761_s18 }
  0x63   : > { %12402 = vrot.lane.b32.xlu0 %v15207_v38, %s14761_s18 }
  0x66   : > { %12417 = vrot.lane.b32.xlu1 %v15214_v26, %s14761_s18 }
  0x67   : > { %12412 = vrot.lane.b32.xlu0 %v15219_v27, %s14761_s18 }
  0x6a   : > { %12427 = vrot.lane.b32.xlu1 %v15225_v12, %s14761_s18 }
  0x6b   : > { %12422 = vrot.lane.b32.xlu0 %v15231_v63, %s14761_s18 }
  0x6e   : > { %12437 = vrot.lane.b32.xlu1 %v15239_v41, %s14761_s18 }
  0x6f   : > { %12432 = vrot.lane.b32.xlu0 %v15243_v13, %s14761_s18 }
  0x72   : > { %12447 = vrot.lane.b32.xlu1 %v15250_v51, %s14761_s18 }
  0x73   : > { %12442 = vrot.lane.b32.xlu0 %v15255_v34, %s14761_s18  ;;  %s14764_s18 = smov 124  }
  0x76   : > { %12457 = vrot.lane.b32.xlu1 %v14829_v15, %s14762_s19 }
  0x77   : > { %12452 = vrot.lane.b32.xlu0 %v14817_v7, %s14762_s19 }
  0x7a   : > { %12467 = vrot.lane.b32.xlu1 %v14823_v11, %s14762_s19 }
  0x7b   : > { %12462 = vrot.lane.b32.xlu0 %v14812_v3, %s14762_s19 }
  0x7e   : > { %12477 = vrot.lane.b32.xlu1 %v14842_v25, %s14762_s19 }
  0x7f   : > { %12472 = vrot.lane.b32.xlu0 %v14848_v28, %s14762_s19 }
  0x82   : > { %12487 = vrot.lane.b32.xlu1 %v14872_v37, %s14762_s19 }
  0x83   : > { %12482 = vrot.lane.b32.xlu0 %v14880_v40, %s14762_s19 }
  0x86   : > { %12497 = vrot.lane.b32.xlu1 %v14906_v50, %s14762_s19 }
  0x87   : > { %12492 = vrot.lane.b32.xlu0 %v14917_v54, %s14762_s19 }
  0x88   : > { %v12223_v7 = vpop.permute.xlu1 %12222 }
  0x89   : > { %v12213_v3 = vpop.permute.xlu0 %12212  ;;  %v12225_v15 = vunpack.i.h.bf16 %v12223_v7  ;;  %v12224_v28 = vunpack.i.l.bf16 %v12223_v7 }
  0x8a   : > { %12507 = vrot.lane.b32.xlu1 %v14944_v0, %s14762_s19  ;;  %v12215_v54 = vunpack.i.h.bf16 %v12213_v3  ;;  %v12214_v0 = vunpack.i.l.bf16 %v12213_v3 }
  0x8b   : > { %12502 = vrot.lane.b32.xlu0 %v14954_v4, %s14762_s19  ;;  %v15296_v23 = vsel %vm635_vm0, %v12224_v28, %v12225_v15 }
  0x8c   : > { %v12228_v11 = vpop.permute.xlu1 %12227  ;;  %23064 = vst [vmem:[#allocation11_spill] sm:$0xff] %v15296_v23 }
  0x8d   : > { %v12218_v25 = vpop.permute.xlu0 %12217  ;;  %v12230_v37 = vunpack.i.h.bf16 %v12228_v11  ;;  %v12229_v40 = vunpack.i.l.bf16 %v12228_v11 }
  0x8e   : > { %12517 = vrot.lane.b32.xlu1 %v14980_v16, %s14762_s19  ;;  %v12220_v50 = vunpack.i.h.bf16 %v12218_v25  ;;  %v12219_v14 = vunpack.i.l.bf16 %v12218_v25 }
  0x8f   : > { %12512 = vrot.lane.b32.xlu0 %v14992_v20, %s14762_s19  ;;  %v641_v56 = vsel %vm635_vm0, %v12229_v40, %v12230_v37 }
  0x90   : > { %v12238_v43 = vpop.permute.xlu1 %12237  ;;  %v637_v16 = vsel %vm635_vm0, %v12215_v54, %v12219_v14  ;;  %v638_v20 = vsel %vm635_vm0, %v12219_v14, %v12220_v50  ;;  %v636_v14 = vsel %vm635_vm0, %v12214_v0, %v12215_v54 }
  0x91   : > { %v12240_v57 = vunpack.i.h.bf16 %v12238_v43  ;;  %v12239_v4 = vunpack.i.l.bf16 %v12238_v43  ;;  %v12233_v6 = vpop.permute.xlu0 %12232  ;;  %v10528_v40 = vpack.c.bf16 %v641_v56, %v636_v14 }
  0x92   : > { %v12235_v29 = vunpack.i.h.bf16 %v12233_v6  ;;  %v12234_v55 = vunpack.i.l.bf16 %v12233_v6  ;;  %12527 = vrot.lane.b32.xlu1 %v15021_v35, %s14762_s19 }
  0x93   : > { %12522 = vrot.lane.b32.xlu0 %v15032_v42, %s14762_s19  ;;  %v15306_v7 = vsel %vm635_vm0, %v12239_v4, %v12240_v57  ;;  %v639_v57 = vsel %vm635_vm0, %v12220_v50, %v12224_v28 }
  0x94   : > { %23065 = vst [vmem:[#allocation12_spill] sm:$0xff] %v15306_v7  ;;  %v12248_v3 = vpop.permute.xlu1 %12247  ;;  %v642_v11 = vsel %vm635_vm0, %v12230_v37, %v12234_v55  ;;  %v643_v15 = vsel %vm635_vm0, %v12234_v55, %v12235_v29  ;;  %v644_v25 = vsel %vm635_vm0, %v12235_v29, %v12239_v4 }
  0x95   : > { %v12243_v42 = vpop.permute.xlu0 %12242  ;;  %v10526_v43 = vpack.c.bf16 %v642_v11, %v637_v16  ;;  %v15313_v6 = vpack.c.bf16 %v643_v15, %v638_v20  ;;  %v15321_v37 = vpack.c.bf16 %v644_v25, %v639_v57  ;;  %v12249_v55 = vunpack.i.l.bf16 %v12248_v3 }
  0x96   : > { %12537 = vrot.lane.b32.xlu1 %v15059_v5, %s14762_s19  ;;  %v12245_v54 = vunpack.i.h.bf16 %v12243_v42  ;;  %v12244_v20 = vunpack.i.l.bf16 %v12243_v42 }
  0x97   : > { %23066 = vst [vmem:[#allocation13_spill] sm:$0xff] %v15313_v6  ;;  %12532 = vrot.lane.b32.xlu0 %v15070_v21, %s14762_s19  ;;  %10527 = vmatprep.subr.bf16.mxu0 %v10526_v43  ;;  %23067 = vst [vmem:[#allocation14_spill] sm:$0xff] %v15321_v37  ;;  %v12250_v21 = vunpack.i.h.bf16 %v12248_v3 }
  0x98   : > { %10847 = vmatprep.subr.bf16.mxu1 %v15313_v6  ;;  %10529 = vmatpush1.bf16.msra.mxu0 %v10528_v40  ;;  %v12258_v4 = vpop.permute.xlu1 %12257  ;;  %v647_v14 = vsel %vm635_vm0, %v12245_v54, %v12249_v55 }
  0x99   : > { %10849 = vmatpush1.bf16.msra.mxu1 %v10526_v43  ;;  %v12253_v29 = vpop.permute.xlu0 %12252  ;;  %v12260_v5 = vunpack.i.h.bf16 %v12258_v4  ;;  %v12259_v0 = vunpack.i.l.bf16 %v12258_v4 }
  0x9a   : > { %12547 = vrot.lane.b32.xlu1 %v15081_v30, %s14762_s19  ;;  %v12255_v28 = vunpack.i.h.bf16 %v12253_v29  ;;  %v12254_v50 = vunpack.i.l.bf16 %v12253_v29  ;;  %v648_v30 = vsel %vm635_vm0, %v12249_v55, %v12250_v21 }
  0x9b   : > { %12542 = vrot.lane.b32.xlu0 %v15087_v39, %s14762_s19  ;;  %v651_v39 = vsel %vm635_vm0, %v12259_v0, %v12260_v5  ;;  %v646_v0 = vsel %vm635_vm0, %v12244_v20, %v12245_v54 }
  0x9c   : > { %v12268_v16 = vpop.permute.xlu1 %12267  ;;  %v15336_v3 = vsel %vm635_vm0, %v12254_v50, %v12255_v28  ;;  %v10532_v28 = vpack.c.bf16 %v651_v39, %v646_v0 }
  0x9d   : > { %v12270_v56 = vunpack.i.h.bf16 %v12268_v16  ;;  %v12269_v11 = vunpack.i.l.bf16 %v12268_v16  ;;  %v12263_v15 = vpop.permute.xlu0 %12262  ;;  %23068 = vst [vmem:[#allocation15_spill] sm:$0xff] %v15336_v3 }
  0x9e   : > { %v12265_v25 = vunpack.i.h.bf16 %v12263_v15  ;;  %v12264_v43 = vunpack.i.l.bf16 %v12263_v15  ;;  %12557 = vrot.lane.b32.xlu1 %v15095_v49, %s14762_s19 }
  0x9f   : > { %12552 = vrot.lane.b32.xlu0 %v15099_v52, %s14762_s19  ;;  %v15339_v42 = vsel %vm635_vm0, %v12269_v11, %v12270_v56  ;;  %v649_v56 = vsel %vm635_vm0, %v12250_v21, %v12254_v50 }
  0xa0   : > { %23069 = vst [vmem:[#allocation16_spill] sm:$0xff] %v15339_v42  ;;  %v12278_v40 = vpop.permute.xlu1 %12277  ;;  %v652_v57 = vsel %vm635_vm0, %v12260_v5, %v12264_v43  ;;  %v653_v49 = vsel %vm635_vm0, %v12264_v43, %v12265_v25  ;;  %v654_v4 = vsel %vm635_vm0, %v12265_v25, %v12269_v11 }
  0xa1   : > { %v12273_v29 = vpop.permute.xlu0 %12272  ;;  %v10530_v55 = vpack.c.bf16 %v652_v57, %v647_v14  ;;  %v15346_v16 = vpack.c.bf16 %v653_v49, %v648_v30  ;;  %v15354_v5 = vpack.c.bf16 %v654_v4, %v649_v56  ;;  %v12279_v25 = vunpack.i.l.bf16 %v12278_v40 }
  0xa2   : > { %12567 = vrot.lane.b32.xlu1 %v15106_v45, %s14762_s19  ;;  %v12275_v54 = vunpack.i.h.bf16 %v12273_v29  ;;  %v12274_v30 = vunpack.i.l.bf16 %v12273_v29 }
  0xa3   : > { %23070 = vst [vmem:[#allocation17_spill] sm:$0xff] %v15346_v16  ;;  %12562 = vrot.lane.b32.xlu0 %v15111_v46, %s14762_s19  ;;  %10531 = vmatprep.subr.bf16.mxu0 %v10530_v55  ;;  %23071 = vst [vmem:[#allocation18_spill] sm:$0xff] %v15354_v5  ;;  %v12280_v46 = vunpack.i.h.bf16 %v12278_v40 }
  0xa4   : > { %10851 = vmatprep.subr.bf16.mxu1 %v15346_v16  ;;  %10533 = vmatpush1.bf16.msra.mxu0 %v10532_v28  ;;  %v12288_v11 = vpop.permute.xlu1 %12287 }
  0xa5   : > { %10853 = vmatpush1.bf16.msra.mxu1 %v10530_v55  ;;  %v12283_v15 = vpop.permute.xlu0 %12282  ;;  %v12290_v45 = vunpack.i.h.bf16 %v12288_v11  ;;  %v12289_v20 = vunpack.i.l.bf16 %v12288_v11  ;;  %v657_v55 = vsel %vm635_vm0, %v12275_v54, %v12279_v25 }
  0xa6   : > { %12577 = vrot.lane.b32.xlu1 %v15117_v22, %s14762_s19  ;;  %v12285_v50 = vunpack.i.h.bf16 %v12283_v15  ;;  %v12284_v21 = vunpack.i.l.bf16 %v12283_v15  ;;  %v658_v22 = vsel %vm635_vm0, %v12279_v25, %v12280_v46 }
  0xa7   : > { %12572 = vrot.lane.b32.xlu0 %v15123_v36, %s14762_s19  ;;  %v661_v36 = vsel %vm635_vm0, %v12289_v20, %v12290_v45  ;;  %v656_v20 = vsel %vm635_vm0, %v12274_v30, %v12275_v54 }
  0xa8   : > { %v12298_v43 = vpop.permute.xlu1 %12297  ;;  %v15369_v40 = vsel %vm635_vm0, %v12284_v21, %v12285_v50  ;;  %v10536_v50 = vpack.c.bf16 %v661_v36, %v656_v20 }
  0xa9   : > { %v12300_v14 = vunpack.i.h.bf16 %v12298_v43  ;;  %v12299_v39 = vunpack.i.l.bf16 %v12298_v43  ;;  %v12293_v57 = vpop.permute.xlu0 %12292  ;;  %23072 = vst [vmem:[#allocation19_spill] sm:$0xff] %v15369_v40  ;;  %v659_v43 = vsel %vm635_vm0, %v12280_v46, %v12284_v21 }
  0xaa   : > { %v12295_v49 = vunpack.i.h.bf16 %v12293_v57  ;;  %v12294_v4 = vunpack.i.l.bf16 %v12293_v57  ;;  %12587 = vrot.lane.b32.xlu1 %v15131_v53, %s14762_s19 }
  0xab   : > { %12582 = vrot.lane.b32.xlu0 %v15135_v1, %s14762_s19  ;;  %v15372_v29 = vsel %vm635_vm0, %v12299_v39, %v12300_v14  ;;  %v14384_v1 = vld [vmem:[%s14807_s17 + $0x78] sm:$0xff] }
  0xac   : > { %23073 = vst [vmem:[#allocation20_spill] sm:$0xff] %v15372_v29  ;;  %v12308_v0 = vpop.permute.xlu1 %12307  ;;  %v662_v28 = vsel %vm635_vm0, %v12290_v45, %v12294_v4  ;;  %v663_v53 = vsel %vm635_vm0, %v12294_v4, %v12295_v49  ;;  %v664_v56 = vsel %vm635_vm0, %v12295_v49, %v12299_v39 }
  0xad   : > { %v12303_v11 = vpop.permute.xlu0 %12302  ;;  %v10534_v15 = vpack.c.bf16 %v662_v28, %v657_v55  ;;  %v15379_v25 = vpack.c.bf16 %v663_v53, %v658_v22  ;;  %v15387_v45 = vpack.c.bf16 %v664_v56, %v659_v43  ;;  %v12309_v57 = vunpack.i.l.bf16 %v12308_v0 }
  0xae   : > { %12597 = vrot.lane.b32.xlu1 %v15142_v59, %s14762_s19  ;;  %v12305_v54 = vunpack.i.h.bf16 %v12303_v11  ;;  %v12304_v4 = vunpack.i.l.bf16 %v12303_v11 }
  0xaf   : > { %23074 = vst [vmem:[#allocation21_spill] sm:$0xff] %v15379_v25  ;;  %12592 = vrot.lane.b32.xlu0 %v15147_v60, %s14762_s19  ;;  %10535 = vmatprep.subr.bf16.mxu0 %v10534_v15  ;;  %23075 = vst [vmem:[#allocation22_spill] sm:$0xff] %v15387_v45  ;;  %v12310_v60 = vunpack.i.h.bf16 %v12308_v0  ;;  %v14466_v45 = vld [vmem:[%s14807_s17 + $0x2e8] sm:$0xff] }
  0xb0   : > { %10855 = vmatprep.subr.bf16.mxu1 %v15379_v25  ;;  %10537 = vmatpush1.bf16.msra.mxu0 %v10536_v50  ;;  %v12318_v14 = vpop.permute.xlu1 %12317  ;;  %v667_v56 = vsel %vm635_vm0, %v12305_v54, %v12309_v57  ;;  %v14465_v25 = vld [vmem:[%s14807_s17 + $0x2e0] sm:$0xff] }
  0xb1   : > { %10857 = vmatpush1.bf16.msra.mxu1 %v10534_v15  ;;  %v12313_v39 = vpop.permute.xlu0 %12312  ;;  %v12320_v59 = vunpack.i.h.bf16 %v12318_v14  ;;  %v12319_v30 = vunpack.i.l.bf16 %v12318_v14  ;;  %v16100_v16 = vpack.i.bf16 %v14466_v45, %v14465_v25  ;;  %v4460_v25 = vld [vmem:[%s22628_s1 + $0x3c0] sm:$0xff] }
  0xb2   : > { %12607 = vrot.lane.b32.xlu1 %v15153_v47, %s14762_s19  ;;  %v12315_v21 = vunpack.i.h.bf16 %v12313_v39  ;;  %v12314_v46 = vunpack.i.l.bf16 %v12313_v39  ;;  %v668_v47 = vsel %vm635_vm0, %v12309_v57, %v12310_v60  ;;  %v666_v57 = vsel %vm635_vm0, %v12304_v4, %v12305_v54 }
  0xb3   : > { %12602 = vrot.lane.b32.xlu0 %v15159_v48, %s14762_s19  ;;  %v671_v48 = vsel %vm635_vm0, %v12319_v30, %v12320_v59 }
  0xb4   : > { %v12328_v49 = vpop.permute.xlu1 %12327  ;;  %v15402_v0 = vsel %vm635_vm0, %v12314_v46, %v12315_v21  ;;  %v10540_v30 = vpack.c.bf16 %v671_v48, %v666_v57  ;;  %v669_v21 = vsel %vm635_vm0, %v12310_v60, %v12314_v46 }
  0xb5   : > { %v12330_v22 = vunpack.i.h.bf16 %v12328_v49  ;;  %v12329_v55 = vunpack.i.l.bf16 %v12328_v49  ;;  %v12323_v36 = vpop.permute.xlu0 %12322  ;;  %23076 = vst [vmem:[#allocation23_spill] sm:$0xff] %v15402_v0 }
  0xb6   : > { %v12325_v28 = vunpack.i.h.bf16 %v12323_v36  ;;  %v12324_v53 = vunpack.i.l.bf16 %v12323_v36  ;;  %12617 = vrot.lane.b32.xlu1 %v15167_v2, %s14762_s19 }
  0xb7   : > { %12612 = vrot.lane.b32.xlu0 %v15171_v17, %s14762_s19  ;;  %v15405_v11 = vsel %vm635_vm0, %v12329_v55, %v12330_v22  ;;  %v14383_v17 = vld [vmem:[%s14807_s17 + $0x70] sm:$0xff] }
  0xb8   : > { %23077 = vst [vmem:[#allocation24_spill] sm:$0xff] %v15405_v11  ;;  %v12338_v15 = vpop.permute.xlu1 %12337  ;;  %v672_v20 = vsel %vm635_vm0, %v12320_v59, %v12324_v53  ;;  %v673_v2 = vsel %vm635_vm0, %v12324_v53, %v12325_v28  ;;  %v674_v50 = vsel %vm635_vm0, %v12325_v28, %v12329_v55 }
  0xb9   : > { %v12333_v43 = vpop.permute.xlu0 %12332  ;;  %v10538_v14 = vpack.c.bf16 %v672_v20, %v667_v56  ;;  %v15412_v39 = vpack.c.bf16 %v673_v2, %v668_v47  ;;  %v15420_v59 = vpack.c.bf16 %v674_v50, %v669_v21  ;;  %v12339_v55 = vunpack.i.l.bf16 %v12338_v15 }
  0xba   : > { %12627 = vrot.lane.b32.xlu1 %v15178_v9, %s14762_s19  ;;  %v12335_v54 = vunpack.i.h.bf16 %v12333_v43  ;;  %v12334_v28 = vunpack.i.l.bf16 %v12333_v43 }
  0xbb   : > { %23078 = vst [vmem:[#allocation25_spill] sm:$0xff] %v15412_v39  ;;  %12622 = vrot.lane.b32.xlu0 %v15183_v10, %s14762_s19  ;;  %10539 = vmatprep.subr.bf16.mxu0 %v10538_v14  ;;  %23079 = vst [vmem:[#allocation26_spill] sm:$0xff] %v15420_v59  ;;  %v12340_v10 = vunpack.i.h.bf16 %v12338_v15 }
  0xbc   : > { %10859 = vmatprep.subr.bf16.mxu1 %v15412_v39  ;;  %10541 = vmatpush1.bf16.msra.mxu0 %v10540_v30  ;;  %v12348_v49 = vpop.permute.xlu1 %12347  ;;  %v677_v2 = vsel %vm635_vm0, %v12335_v54, %v12339_v55 }
  0xbd   : > { %10861 = vmatpush1.bf16.msra.mxu1 %v10538_v14  ;;  %v12343_v22 = vpop.permute.xlu0 %12342  ;;  %v12350_v9 = vunpack.i.h.bf16 %v12348_v49  ;;  %v12349_v4 = vunpack.i.l.bf16 %v12348_v49 }
  0xbe   : > { %12637 = vrot.lane.b32.xlu1 %v15189_v61, %s14762_s19  ;;  %v12345_v46 = vunpack.i.h.bf16 %v12343_v22  ;;  %v12344_v60 = vunpack.i.l.bf16 %v12343_v22  ;;  %v678_v61 = vsel %vm635_vm0, %v12339_v55, %v12340_v10  ;;  %v676_v22 = vsel %vm635_vm0, %v12334_v28, %v12335_v54 }
  0xbf   : > { %12632 = vrot.lane.b32.xlu0 %v15195_v62, %s14762_s19  ;;  %v681_v62 = vsel %vm635_vm0, %v12349_v4, %v12350_v9 }
  0xc0   : > { %v12358_v36 = vpop.permute.xlu1 %12357  ;;  %v15435_v15 = vsel %vm635_vm0, %v12344_v60, %v12345_v46  ;;  %v10544_v55 = vpack.c.bf16 %v681_v62, %v676_v22  ;;  %v679_v4 = vsel %vm635_vm0, %v12340_v10, %v12344_v60 }
  0xc1   : > { %v12360_v53 = vunpack.i.h.bf16 %v12358_v36  ;;  %v12359_v47 = vunpack.i.l.bf16 %v12358_v36  ;;  %v12353_v56 = vpop.permute.xlu0 %12352  ;;  %23080 = vst [vmem:[#allocation27_spill] sm:$0xff] %v15435_v15 }
  0xc2   : > { %v12355_v48 = vunpack.i.h.bf16 %v12353_v56  ;;  %v12354_v20 = vunpack.i.l.bf16 %v12353_v56  ;;  %12647 = vrot.lane.b32.xlu1 %v15203_v18, %s14762_s19 }
  0xc3   : > { %12642 = vrot.lane.b32.xlu0 %v15207_v38, %s14762_s19  ;;  %v15438_v50 = vsel %vm635_vm0, %v12359_v47, %v12360_v53 }
  0xc4   : > { %23081 = vst [vmem:[#allocation28_spill] sm:$0xff] %v15438_v50  ;;  %v12368_v43 = vpop.permute.xlu1 %12367  ;;  %v682_v14 = vsel %vm635_vm0, %v12350_v9, %v12354_v20  ;;  %v683_v18 = vsel %vm635_vm0, %v12354_v20, %v12355_v48  ;;  %v684_v57 = vsel %vm635_vm0, %v12355_v48, %v12359_v47 }
  0xc5   : > { %v12363_v30 = vpop.permute.xlu0 %12362  ;;  %v10542_v21 = vpack.c.bf16 %v682_v14, %v677_v2  ;;  %v15445_v49 = vpack.c.bf16 %v683_v18, %v678_v61  ;;  %v15453_v9 = vpack.c.bf16 %v684_v57, %v679_v4  ;;  %v12369_v53 = vunpack.i.l.bf16 %v12368_v43 }
  0xc6   : > { %12657 = vrot.lane.b32.xlu1 %v15214_v26, %s14762_s19  ;;  %v12365_v54 = vunpack.i.h.bf16 %v12363_v30  ;;  %v12364_v56 = vunpack.i.l.bf16 %v12363_v30 }
  0xc7   : > { %23082 = vst [vmem:[#allocation29_spill] sm:$0xff] %v15445_v49  ;;  %12652 = vrot.lane.b32.xlu0 %v15219_v27, %s14762_s19  ;;  %10543 = vmatprep.subr.bf16.mxu0 %v10542_v21  ;;  %23083 = vst [vmem:[#allocation30_spill] sm:$0xff] %v15453_v9  ;;  %v12370_v27 = vunpack.i.h.bf16 %v12368_v43 }
  0xc8   : > { %10863 = vmatprep.subr.bf16.mxu1 %v15445_v49  ;;  %10545 = vmatpush1.bf16.msra.mxu0 %v10544_v55  ;;  %v12378_v46 = vpop.permute.xlu1 %12377  ;;  %v687_v14 = vsel %vm635_vm0, %v12365_v54, %v12369_v53 }
  0xc9   : > { %10865 = vmatpush1.bf16.msra.mxu1 %v10542_v21  ;;  %v12373_v36 = vpop.permute.xlu0 %12372  ;;  %v12380_v26 = vunpack.i.h.bf16 %v12378_v46  ;;  %v12379_v28 = vunpack.i.l.bf16 %v12378_v46  ;;  %v686_v46 = vsel %vm635_vm0, %v12364_v56, %v12365_v54 }
  0xca   : > { %12667 = vrot.lane.b32.xlu1 %v15225_v12, %s14762_s19  ;;  %v12375_v60 = vunpack.i.h.bf16 %v12373_v36  ;;  %v12374_v10 = vunpack.i.l.bf16 %v12373_v36  ;;  %v688_v12 = vsel %vm635_vm0, %v12369_v53, %v12370_v27  ;;  %v14371_v53 = vld [vmem:[%s14807_s17 + $0x10] sm:$0xff] }
  0xcb   : > { %12662 = vrot.lane.b32.xlu0 %v15231_v63, %s14762_s19  ;;  %v691_v63 = vsel %vm635_vm0, %v12379_v28, %v12380_v26 }
  0xcc   : > { %v12388_v47 = vpop.permute.xlu1 %12387  ;;  %v15468_v43 = vsel %vm635_vm0, %v12374_v10, %v12375_v60  ;;  %v10548_v36 = vpack.c.bf16 %v691_v63, %v686_v46  ;;  %v689_v60 = vsel %vm635_vm0, %v12370_v27, %v12374_v10 }
  0xcd   : > { %v12390_v48 = vunpack.i.h.bf16 %v12388_v47  ;;  %v12389_v20 = vunpack.i.l.bf16 %v12388_v47  ;;  %v12383_v61 = vpop.permute.xlu0 %12382  ;;  %23084 = vst [vmem:[#allocation31_spill] sm:$0xff] %v15468_v43  ;;  %v14373_v47 = vld [vmem:[%s14807_s17] sm:$0xff]  ;;  %v14394_v43 = vld [vmem:[%s14807_s17 + $0xa8] sm:$0xff] }
  0xce   : > { %v12385_v2 = vunpack.i.h.bf16 %v12383_v61  ;;  %v12384_v62 = vunpack.i.l.bf16 %v12383_v61  ;;  %12677 = vrot.lane.b32.xlu1 %v15239_v41, %s14762_s19  ;;  %v14376_v61 = vld [vmem:[%s14807_s17 + $0x38] sm:$0xff] }
  0xcf   : > { %12672 = vrot.lane.b32.xlu0 %v15243_v13, %s14762_s19  ;;  %v15471_v18 = vsel %vm635_vm0, %v12389_v20, %v12390_v48  ;;  %v14374_v48 = vld [vmem:[%s14807_s17 + $0x8] sm:$0xff] }
  0xd0   : > { %23085 = vst [vmem:[#allocation32_spill] sm:$0xff] %v15471_v18  ;;  %v15473_v57 = vpop.permute.xlu1 %12397  ;;  %v692_v41 = vsel %vm635_vm0, %v12380_v26, %v12384_v62  ;;  %v693_v30 = vsel %vm635_vm0, %v12384_v62, %v12385_v2  ;;  %v694_v13 = vsel %vm635_vm0, %v12385_v2, %v12389_v20  ;;  %v14372_v26 = vld [vmem:[%s14807_s17 + $0x18] sm:$0xff]  ;;  %v15496_v54 = vpack.i.bf16 %v14374_v48, %v14373_v47  ;;  %v14375_v20 = vld [vmem:[%s14807_s17 + $0x30] sm:$0xff]  ;;  %v14377_v62 = vld [vmem:[%s14807_s17 + $0x20] sm:$0xff] }
  0xd1   : > { %v15480_v22 = vpop.permute.xlu0 %12392  ;;  %v10546_v55 = vpack.c.bf16 %v692_v41, %v687_v14  ;;  %v15482_v4 = vpack.c.bf16 %v693_v30, %v688_v12  ;;  %v15489_v28 = vpack.i.bf16 %v14372_v26, %v14371_v53  ;;  %v12399_v27 = vunpack.i.l.bf16 %v15473_v57  ;;  %v14378_v12 = vld [vmem:[%s14807_s17 + $0x28] sm:$0xff]  ;;  %v14379_v47 = vld [vmem:[%s14807_s17 + $0x50] sm:$0xff]  ;;  %v14380_v48 = vld [vmem:[%s14807_s17 + $0x58] sm:$0xff] }
  0xd2   : > { %12687 = vrot.lane.b32.xlu1 %v15250_v51, %s14762_s19  ;;  %v15498_v51 = vpack.c.bf16 %v694_v13, %v689_v60  ;;  %v15507_v2 = vpack.i.bf16 %v14376_v61, %v14375_v20  ;;  %v15511_v14 = vpack.i.bf16 %v14378_v12, %v14377_v62  ;;  %v15519_v20 = vpack.i.bf16 %v14380_v48, %v14379_v47  ;;  %v14382_v62 = vld [vmem:[%s14807_s17 + $0x48] sm:$0xff]  ;;  %v14396_v18 = vld [vmem:[%s14807_s17 + $0xd8] sm:$0xff] }
  0xd3   : > { %23086 = vst [vmem:[#allocation33_spill] sm:$0xff] %v15482_v4  ;;  %12682 = vrot.lane.b32.xlu0 %v15255_v34, %s14762_s19  ;;  %10547 = vmatprep.subr.bf16.mxu0 %v10546_v55  ;;  %v12395_v34 = vunpack.i.h.bf16 %v15480_v22 }
  0xd4   : > { %23087 = vst [vmem:[#allocation34_spill] sm:$0xff] %v15498_v51  ;;  %10867 = vmatprep.subr.bf16.mxu1 %v15482_v4  ;;  %10549 = vmatpush1.bf16.msra.mxu0 %v10548_v36  ;;  %v12408_v56 = vpop.permute.xlu1 %12407  ;;  %v12394_v36 = vunpack.i.l.bf16 %v15480_v22 }
  0xd5   : > { %10869 = vmatpush1.bf16.msra.mxu1 %v10546_v55  ;;  %v12403_v10 = vpop.permute.xlu0 %12402  ;;  %v12410_v63 = vunpack.i.h.bf16 %v12408_v56  ;;  %v12409_v41 = vunpack.i.l.bf16 %v12408_v56  ;;  %v12400_v55 = vunpack.i.h.bf16 %v15473_v57  ;;  %v697_v22 = vsel %vm635_vm0, %v12395_v34, %v12399_v27 }
  0xd6   : > { %12697 = vrot.lane.b32.xlu1 %v15489_v28, %s14763_s24  ;;  %v12405_v30 = vunpack.i.h.bf16 %v12403_v10  ;;  %v12404_v13 = vunpack.i.l.bf16 %v12403_v10  ;;  %v14381_v10 = vld [vmem:[%s14807_s17 + $0x40] sm:$0xff] }
  0xd7   : > { %12692 = vrot.lane.b32.xlu0 %v15496_v54, %s14763_s24  ;;  %v15525_v12 = vpack.i.bf16 %v14382_v62, %v14381_v10  ;;  %v698_v57 = vsel %vm635_vm0, %v12399_v27, %v12400_v55 }
  0xd8   : > { %v12418_v46 = vpop.permute.xlu1 %12417 }
  0xd9   : > { %v12420_v53 = vunpack.i.h.bf16 %v12418_v46  ;;  %v12419_v26 = vunpack.i.l.bf16 %v12418_v46  ;;  %v12413_v60 = vpop.permute.xlu0 %12412  ;;  %v701_v46 = vsel %vm635_vm0, %v12409_v41, %v12410_v63 }
  0xda   : > { %v12415_v56 = vunpack.i.h.bf16 %v12413_v60  ;;  %v12414_v61 = vunpack.i.l.bf16 %v12413_v60  ;;  %12707 = vrot.lane.b32.xlu1 %v15507_v2, %s14763_s24  ;;  %v15533_v60 = vsel %vm635_vm0, %v12404_v13, %v12405_v30 }
  0xdb   : > { %12702 = vrot.lane.b32.xlu0 %v15511_v14, %s14763_s24  ;;  %23088 = vst [vmem:[#allocation35_spill] sm:$0xff] %v15533_v60  ;;  %v15536_v47 = vsel %vm635_vm0, %v12419_v26, %v12420_v53  ;;  %v696_v53 = vsel %vm635_vm0, %v12394_v36, %v12395_v34  ;;  %v14392_v60 = vld [vmem:[%s14807_s17 + $0xb8] sm:$0xff] }
  0xdc   : > { %23089 = vst [vmem:[#allocation36_spill] sm:$0xff] %v15536_v47  ;;  %v15538_v48 = vpop.permute.xlu1 %12427  ;;  %v702_v10 = vsel %vm635_vm0, %v12410_v63, %v12414_v61  ;;  %v703_v62 = vsel %vm635_vm0, %v12414_v61, %v12415_v56  ;;  %v704_v21 = vsel %vm635_vm0, %v12415_v56, %v12419_v26  ;;  %v10552_v63 = vpack.c.bf16 %v701_v46, %v696_v53  ;;  %v14385_v56 = vld [vmem:[%s14807_s17 + $0x60] sm:$0xff]  ;;  %v14388_v46 = vld [vmem:[%s14807_s17 + $0x98] sm:$0xff] }
  0xdd   : > { %v15545_v41 = vpop.permute.xlu0 %12422  ;;  %v10550_v30 = vpack.c.bf16 %v702_v10, %v697_v22  ;;  %v15547_v38 = vpack.c.bf16 %v703_v62, %v698_v57  ;;  %v12726_v61 = vpack.i.bf16 %v14384_v1, %v14383_v17  ;;  %v699_v26 = vsel %vm635_vm0, %v12400_v55, %v12404_v13  ;;  %v14386_v57 = vld [vmem:[%s14807_s17 + $0x68] sm:$0xff]  ;;  %v14387_v55 = vld [vmem:[%s14807_s17 + $0x90] sm:$0xff]  ;;  %v14389_v62 = vld [vmem:[%s14807_s17 + $0x80] sm:$0xff] }
  0xde   : > { %12717 = vrot.lane.b32.xlu1 %v15519_v20, %s14763_s24  ;;  %v12721_v34 = vpack.i.bf16 %v14386_v57, %v14385_v56  ;;  %v15559_v36 = vpack.c.bf16 %v704_v21, %v699_v26  ;;  %v12429_v17 = vunpack.i.l.bf16 %v15538_v48  ;;  %v12425_v13 = vunpack.i.h.bf16 %v15545_v41  ;;  %v14390_v21 = vld [vmem:[%s14807_s17 + $0x88] sm:$0xff] }
  0xdf   : > { %23090 = vst [vmem:[#allocation37_spill] sm:$0xff] %v15547_v38  ;;  %12712 = vrot.lane.b32.xlu0 %v15525_v12, %s14763_s24  ;;  %10551 = vmatprep.subr.bf16.mxu0 %v10550_v30  ;;  %v12736_v10 = vpack.i.bf16 %v14388_v46, %v14387_v55  ;;  %v12731_v53 = vpack.i.bf16 %v14390_v21, %v14389_v62  ;;  %v12430_v57 = vunpack.i.h.bf16 %v15538_v48  ;;  %v14391_v46 = vld [vmem:[%s14807_s17 + $0xb0] sm:$0xff] }
  0xe0   : > { %23091 = vst [vmem:[#allocation38_spill] sm:$0xff] %v15559_v36  ;;  %10871 = vmatprep.subr.bf16.mxu1 %v15547_v38  ;;  %10553 = vmatpush1.bf16.msra.mxu0 %v10552_v63  ;;  %v12438_v22 = vpop.permute.xlu1 %12437  ;;  %v12746_v47 = vpack.i.bf16 %v14392_v60, %v14391_v46  ;;  %v707_v48 = vsel %vm635_vm0, %v12425_v13, %v12429_v17 }
  0xe1   : > { %10873 = vmatpush1.bf16.msra.mxu1 %v10550_v30  ;;  %v12433_v1 = vpop.permute.xlu0 %12432  ;;  %v12440_v26 = vunpack.i.h.bf16 %v12438_v22  ;;  %v12439_v56 = vunpack.i.l.bf16 %v12438_v22  ;;  %v14393_v22 = vld [vmem:[%s14807_s17 + $0xa0] sm:$0xff] }
  0xe2   : > { %12727 = vrot.lane.b32.xlu1 %v12726_v61, %s14763_s24  ;;  %v12435_v63 = vunpack.i.h.bf16 %v12433_v1  ;;  %v12434_v30 = vunpack.i.l.bf16 %v12433_v1  ;;  %v12424_v61 = vunpack.i.l.bf16 %v15545_v41  ;;  %v12741_v1 = vpack.i.bf16 %v14394_v43, %v14393_v22 }
  0xe3   : > { %12722 = vrot.lane.b32.xlu0 %v12721_v34, %s14763_s24  ;;  %v708_v34 = vsel %vm635_vm0, %v12429_v17, %v12430_v57  ;;  %v14404_v17 = vld [vmem:[%s14807_s17 + $0x118] sm:$0xff] }
  0xe4   : > { %v12448_v27 = vpop.permute.xlu1 %12447  ;;  %v15582_v41 = vsel %vm635_vm0, %v12434_v30, %v12435_v63 }
  0xe5   : > { %v12450_v52 = vunpack.i.h.bf16 %v12448_v27  ;;  %v12449_v35 = vunpack.i.l.bf16 %v12448_v27  ;;  %v12443_v55 = vpop.permute.xlu0 %12442  ;;  %v711_v27 = vsel %vm635_vm0, %v12439_v56, %v12440_v26  ;;  %23092 = vst [vmem:[#allocation39_spill] sm:$0xff] %v15582_v41 }
  0xe6   : > { %v12445_v62 = vunpack.i.h.bf16 %v12443_v55  ;;  %v12444_v21 = vunpack.i.l.bf16 %v12443_v55  ;;  %12737 = vrot.lane.b32.xlu1 %v12736_v10, %s14763_s24 }
  0xe7   : > { %12732 = vrot.lane.b32.xlu0 %v12731_v53, %s14763_s24  ;;  %v15585_v60 = vsel %vm635_vm0, %v12449_v35, %v12450_v52  ;;  %v706_v52 = vsel %vm635_vm0, %v12424_v61, %v12425_v13 }
  0xe8   : > { %23093 = vst [vmem:[#allocation40_spill] sm:$0xff] %v15585_v60  ;;  %v15587_v10 = vpop.permute.xlu1 %12457  ;;  %v712_v43 = vsel %vm635_vm0, %v12440_v26, %v12444_v21  ;;  %v713_v55 = vsel %vm635_vm0, %v12444_v21, %v12445_v62  ;;  %v714_v53 = vsel %vm635_vm0, %v12445_v62, %v12449_v35  ;;  %v10556_v22 = vpack.c.bf16 %v711_v27, %v706_v52  ;;  %v14395_v26 = vld [vmem:[%s14807_s17 + $0xd0] sm:$0xff]  ;;  %v14397_v35 = vld [vmem:[%s14807_s17 + $0xc0] sm:$0xff]  ;;  %v14398_v62 = vld [vmem:[%s14807_s17 + $0xc8] sm:$0xff] }
  0xe9   : > { %v15594_v56 = vpop.permute.xlu0 %12452  ;;  %v10554_v63 = vpack.c.bf16 %v712_v43, %v707_v48  ;;  %v15596_v46 = vpack.c.bf16 %v713_v55, %v708_v34  ;;  %v12756_v15 = vpack.i.bf16 %v14396_v18, %v14395_v26  ;;  %v709_v21 = vsel %vm635_vm0, %v12430_v57, %v12434_v30  ;;  %v4340_v18 = vld [vmem:[%s22628_s1] sm:$0xff]  ;;  %v14400_v27 = vld [vmem:[%s14807_s17 + $0xf8] sm:$0xff] }
  0xea   : > { %12747 = vrot.lane.b32.xlu1 %v12746_v47, %s14763_s24  ;;  %v12751_v34 = vpack.i.bf16 %v14398_v62, %v14397_v35  ;;  %v15606_v48 = vpack.c.bf16 %v714_v53, %v709_v21  ;;  %v10011_v30 = vld [vmem:[%s22628_s1 + $0x500] sm:$0xff]  ;;  %v12459_v57 = vunpack.i.l.bf16 %v15587_v10  ;;  %v12455_v61 = vunpack.i.h.bf16 %v15594_v56  ;;  %v14402_v53 = vld [vmem:[%s14807_s17 + $0xe8] sm:$0xff] }
  0xeb   : > { %23094 = vst [vmem:[#allocation41_spill] sm:$0xff] %v15596_v46  ;;  %12742 = vrot.lane.b32.xlu0 %v12741_v1, %s14763_s24  ;;  %10555 = vmatprep.subr.bf16.mxu0 %v10554_v63  ;;  %v14399_v1 = vld [vmem:[%s14807_s17 + $0xf0] sm:$0xff]  ;;  %v14401_v55 = vld [vmem:[%s14807_s17 + $0xe0] sm:$0xff]  ;;  %v12460_v35 = vunpack.i.h.bf16 %v15587_v10  ;;  %v12454_v62 = vunpack.i.l.bf16 %v15594_v56 }
  0xec   : > { %23095 = vst [vmem:[#allocation42_spill] sm:$0xff] %v15606_v48  ;;  %10875 = vmatprep.subr.bf16.mxu1 %v15596_v46  ;;  %10557 = vmatpush1.bf16.msra.mxu0 %v10556_v22  ;;  %v12468_v47 = vpop.permute.xlu1 %12467  ;;  %v12766_v43 = vpack.i.bf16 %v14400_v27, %v14399_v1  ;;  %v12761_v52 = vpack.i.bf16 %v14402_v53, %v14401_v55  ;;  %v14403_v53 = vld [vmem:[%s14807_s17 + $0x110] sm:$0xff] }
  0xed   : > { %10877 = vmatpush1.bf16.msra.mxu1 %v10554_v63  ;;  %v12463_v13 = vpop.permute.xlu0 %12462  ;;  %v12470_v63 = vunpack.i.h.bf16 %v12468_v47  ;;  %v12469_v22 = vunpack.i.l.bf16 %v12468_v47  ;;  %v12776_v47 = vpack.i.bf16 %v14404_v17, %v14403_v53  ;;  %v1071_v10 = vsel %vm1068_vm1, %v12459_v57, %v12460_v35 }
  0xee   : > { %12757 = vrot.lane.b32.xlu1 %v12756_v15, %s14763_s24  ;;  %v12465_v26 = vunpack.i.h.bf16 %v12463_v13  ;;  %v12464_v21 = vunpack.i.l.bf16 %v12463_v13  ;;  %v1070_v56 = vsel %vm1068_vm1, %v12455_v61, %v12459_v57  ;;  %v1069_v57 = vsel %vm1068_vm1, %v12454_v62, %v12455_v61  ;;  %v14409_v61 = vld [vmem:[%s14807_s17 + $0x120] sm:$0xff]  ;;  %v14410_v62 = vld [vmem:[%s14807_s17 + $0x128] sm:$0xff] }
  0xef   : > { %12752 = vrot.lane.b32.xlu0 %v12751_v34, %s14763_s24  ;;  %4885 = vmatmul.mubr.f32.vlgmr.msra.gmra.mrb[0].mxu0 %v4340_v18  ;;  %v14405_v34 = vld [vmem:[%s14807_s17 + $0x100] sm:$0xff]  ;;  %v14406_v18 = vld [vmem:[%s14807_s17 + $0x108] sm:$0xff]  ;;  %v1074_v50 = vsel %vm1068_vm1, %v12469_v22, %v12470_v63 }
  0xf0   : > { %v12478_v15 = vpop.permute.xlu1 %12477  ;;  %6306 = vmatmul.mubr.f32.vlgmr.msra.gmra.mrb[0].mxu1 %v10011_v30  ;;  %v12771_v60 = vpack.i.bf16 %v14406_v18, %v14405_v34  ;;  %v15635_v30 = vsel %vm1068_vm1, %v12464_v21, %v12465_v26  ;;  %v10560_v34 = vpack.c.bf16 %v1074_v50, %v1069_v57  ;;  %v14408_v18 = vld [vmem:[%s14807_s17 + $0x138] sm:$0xff] }
  0xf1   : > { %v12480_v1 = vunpack.i.h.bf16 %v12478_v15  ;;  %v12479_v27 = vunpack.i.l.bf16 %v12478_v15  ;;  %v12473_v55 = vpop.permute.xlu0 %12472  ;;  %23096 = vst [vmem:[#allocation43_spill] sm:$0xff] %v15635_v30 }
  0xf2   : > { %v12475_v41 = vunpack.i.h.bf16 %v12473_v55  ;;  %v12474_v13 = vunpack.i.l.bf16 %v12473_v55  ;;  %12767 = vrot.lane.b32.xlu1 %v12766_v43, %s14763_s24 }
  0xf3   : > { %12762 = vrot.lane.b32.xlu0 %v12761_v52, %s14763_s24  ;;  %v15638_v17 = vsel %vm1068_vm1, %v12479_v27, %v12480_v1 }
  0xf4   : > { %23097 = vst [vmem:[#allocation44_spill] sm:$0xff] %v15638_v17  ;;  %v15640_v43 = vpop.permute.xlu1 %12487  ;;  %v1075_v15 = vsel %vm1068_vm1, %v12470_v63, %v12474_v13  ;;  %v1076_v55 = vsel %vm1068_vm1, %v12474_v13, %v12475_v41  ;;  %v1077_v22 = vsel %vm1068_vm1, %v12475_v41, %v12479_v27  ;;  %v14407_v63 = vld [vmem:[%s14807_s17 + $0x130] sm:$0xff]  ;;  %v1072_v41 = vsel %vm1068_vm1, %v12460_v35, %v12464_v21  ;;  %v14412_v21 = vld [vmem:[%s14807_s17 + $0x158] sm:$0xff] }
  0xf5   : > { %v15648_v26 = vpop.permute.xlu0 %12482  ;;  %v10558_v53 = vpack.c.bf16 %v1075_v15, %v1070_v56  ;;  %v15650_v1 = vpack.c.bf16 %v1076_v55, %v1071_v10  ;;  %v12786_v13 = vpack.i.bf16 %v14408_v18, %v14407_v63  ;;  %v12781_v27 = vpack.i.bf16 %v14410_v62, %v14409_v61  ;;  %v14413_v15 = vld [vmem:[%s14807_s17 + $0x140] sm:$0xff]  ;;  %v14414_v55 = vld [vmem:[%s14807_s17 + $0x148] sm:$0xff]  ;;  %v4351_v18 = vld [vmem:[%s22628_s1 + $0x58] sm:$0xff] }
  0xf6   : > { %12777 = vrot.lane.b32.xlu1 %v12776_v47, %s14763_s24  ;;  %v15659_v10 = vpack.c.bf16 %v1077_v22, %v1072_v41  ;;  %v22642_v56 = vunpack.i.h.bf16 %v15640_v43  ;;  %v12791_v22 = vpack.i.bf16 %v14414_v55, %v14413_v15  ;;  %v12489_v57 = vunpack.i.l.bf16 %v15640_v43  ;;  %v14415_v61 = vld [vmem:[%s14807_s17 + $0x170] sm:$0xff]  ;;  %v14416_v62 = vld [vmem:[%s14807_s17 + $0x178] sm:$0xff]  ;;  %4889 = vmatprep.mubr.f32.mxu0 %v4351_v18 }
  0xf7   : > { %23098 = vst [vmem:[#allocation45_spill] sm:$0xff] %v15650_v1  ;;  %12772 = vrot.lane.b32.xlu0 %v12771_v60, %s14763_s24  ;;  %10559 = vmatprep.subr.bf16.mxu0 %v10558_v53  ;;  %v14411_v60 = vld [vmem:[%s14807_s17 + $0x150] sm:$0xff] }
  0xf8   : > { %23099 = vst [vmem:[#allocation46_spill] sm:$0xff] %v15659_v10  ;;  %10879 = vmatprep.subr.bf16.mxu1 %v15650_v1  ;;  %10561 = vmatpush1.bf16.msra.mxu0 %v10560_v34  ;;  %v12498_v50 = vpop.permute.xlu1 %12497  ;;  %v12796_v35 = vpack.i.bf16 %v14412_v21, %v14411_v60  ;;  %v12485_v34 = vunpack.i.h.bf16 %v15648_v26  ;;  %v12806_v60 = vpack.i.bf16 %v14416_v62, %v14415_v61  ;;  %v12484_v21 = vunpack.i.l.bf16 %v15648_v26  ;;  %v14417_v26 = vld [vmem:[%s14807_s17 + $0x160] sm:$0xff]  ;;  %v14442_v10 = vld [vmem:[%s14807_s17 + $0x228] sm:$0xff] }
  0xf9   : > { %10881 = vmatpush1.bf16.msra.mxu1 %v10558_v53  ;;  %v15662_v47 = vpop.permute.xlu0 %12492  ;;  %v12500_v63 = vunpack.i.h.bf16 %v12498_v50  ;;  %v12499_v53 = vunpack.i.l.bf16 %v12498_v50  ;;  %v4350_v50 = vld [vmem:[%s22628_s1 + $0x50] sm:$0xff]  ;;  %v1081_v18 = vsel %vm1068_vm1, %v12489_v57, %v22642_v56  ;;  %v14441_v1 = vld [vmem:[%s14807_s17 + $0x220] sm:$0xff] }
  0xfa   : > { %12787 = vrot.lane.b32.xlu1 %v12786_v13, %s14763_s24  ;;  %v10022_v13 = vld [vmem:[%s22628_s1 + $0x558] sm:$0xff]  ;;  %4890 = vmatmul.mubr.f32.gmra.mrb[2].mxu0 %v4350_v50  ;;  %v12494_v61 = vunpack.i.l.bf16 %v15662_v47  ;;  %v1080_v56 = vsel %vm1068_vm1, %v12485_v34, %v12489_v57  ;;  %v4361_v50 = vld [vmem:[%s22628_s1 + $0xa8] sm:$0xff]  ;;  %v15898_v46 = vpack.i.bf16 %v14442_v10, %v14441_v1  ;;  %v4410_v1 = vld [vmem:[%s22628_s1 + $0x230] sm:$0xff] }
  0xfb   : > { %12782 = vrot.lane.b32.xlu0 %v12781_v27, %s14763_s24  ;;  %6310 = vmatprep.mubr.f32.mxu1 %v10022_v13  ;;  %v10021_v27 = vld [vmem:[%s22628_s1 + $0x550] sm:$0xff]  ;;  %v12495_v13 = vunpack.i.h.bf16 %v15662_v47  ;;  %v1084_v17 = vsel %vm1068_vm1, %v12499_v53, %v12500_v63  ;;  %v4360_v47 = vld [vmem:[%s22628_s1 + $0xa0] sm:$0xff] }
  0xfc   : > { %v12508_v41 = vpop.permute.xlu1 %12507  ;;  %6311 = vmatmul.mubr.f32.gmra.mrb[2].mxu1 %v10021_v27  ;;  %4894 = vmatprep.mubr.f32.mxu0 %v4361_v50  ;;  %v10031_v27 = vld [vmem:[%s22628_s1 + $0x5a0] sm:$0xff]  ;;  %v14420_v50 = vld [vmem:[%s14807_s17 + $0x198] sm:$0xff] }
  0xfd   : > { %v12510_v15 = vunpack.i.h.bf16 %v12508_v41  ;;  %v12509_v55 = vunpack.i.l.bf16 %v12508_v41  ;;  %v12503_v52 = vpop.permute.xlu0 %12502  ;;  %v14418_v41 = vld [vmem:[%s14807_s17 + $0x168] sm:$0xff] }
  0xfe   : > { %v12505_v62 = vunpack.i.h.bf16 %v12503_v52  ;;  %v12504_v30 = vunpack.i.l.bf16 %v12503_v52  ;;  %12797 = vrot.lane.b32.xlu1 %v12796_v35, %s14763_s24  ;;  %v15698_v0 = vpack.i.bf16 %v14418_v41, %v14417_v26  ;;  %v10032_v52 = vld [vmem:[%s22628_s1 + $0x5a8] sm:$0xff]  ;;  %4895 = vmatmul.mubr.f32.gmra.mrb[4].mxu0 %v4360_v47  ;;  %v4370_v47 = vld [vmem:[%s22628_s1 + $0xf0] sm:$0xff] }
  0xff   : > { %12792 = vrot.lane.b32.xlu0 %v12791_v22, %s14763_s24  ;;  %v15711_v35 = vsel %vm1068_vm1, %v12509_v55, %v12510_v15  ;;  %6315 = vmatprep.mubr.f32.mxu1 %v10032_v52  ;;  %v1079_v15 = vsel %vm1068_vm1, %v12484_v21, %v12485_v34  ;;  %v15735_v34 = vsel %vm1068_vm1, %v12494_v61, %v12495_v13  ;;  %v14422_v21 = vld [vmem:[%s14807_s17 + $0x188] sm:$0xff]  ;;  %v14429_v13 = vld [vmem:[%s14807_s17 + $0x1c0] sm:$0xff] }
 0x100   : > { %23100 = vst [vmem:[#allocation47_spill] sm:$0xff] %v15711_v35  ;;  %v15713_v22 = vpop.permute.xlu1 %12517  ;;  %v1085_v57 = vsel %vm1068_vm1, %v12500_v63, %v12504_v30  ;;  %v1086_v53 = vsel %vm1068_vm1, %v12504_v30, %v12505_v62  ;;  %v1087_v26 = vsel %vm1068_vm1, %v12505_v62, %v12509_v55  ;;  %6316 = vmatmul.mubr.f32.gmra.mrb[4].mxu1 %v10031_v27  ;;  %v14419_v63 = vld [vmem:[%s14807_s17 + $0x190] sm:$0xff]  ;;  %v23102_v55 = vunpack.i.h.bf16 %v15640_v43  ;;  %v10042_v43 = vld [vmem:[%s22628_s1 + $0x5f8] sm:$0xff]  ;;  %v14430_v27 = vld [vmem:[%s14807_s17 + $0x1c8] sm:$0xff] }
 0x101   : > { %v15722_v41 = vpop.permute.xlu0 %12512  ;;  %v10562_v11 = vpack.c.bf16 %v1085_v57, %v1080_v56  ;;  %v15724_v40 = vpack.c.bf16 %v1086_v53, %v1081_v18  ;;  %v10564_v30 = vpack.c.bf16 %v1084_v17, %v1079_v15  ;;  %v15729_v52 = vpack.i.bf16 %v14420_v50, %v14419_v63  ;;  %23103 = vst [vmem:[#allocation49_spill] sm:$0xff] %v15735_v34  ;;  %v14421_v56 = vld [vmem:[%s14807_s17 + $0x180] sm:$0xff]  ;;  %v4371_v17 = vld [vmem:[%s22628_s1 + $0xf8] sm:$0xff]  ;;  %v10041_v53 = vld [vmem:[%s22628_s1 + $0x5f0] sm:$0xff] }
 0x102   : > { %12807 = vrot.lane.b32.xlu1 %v12806_v60, %s14763_s24  ;;  %v1082_v62 = vsel %vm1068_vm1, %v23102_v55, %v12494_v61  ;;  %v15741_v60 = vpack.i.bf16 %v14422_v21, %v14421_v56  ;;  %4900 = vmatprep.mubr.f32.mxu0 %v4371_v17  ;;  %v14424_v15 = vld [vmem:[%s14807_s17 + $0x1b8] sm:$0xff]  ;;  %v14425_v63 = vld [vmem:[%s14807_s17 + $0x1a0] sm:$0xff]  ;;  %v12519_v55 = vunpack.i.l.bf16 %v15713_v22  ;;  %v4381_v17 = vld [vmem:[%s22628_s1 + $0x148] sm:$0xff]  ;;  %v12514_v34 = vunpack.i.l.bf16 %v15722_v41 }
 0x103   : > { %23101 = vst [vmem:[#allocation48_spill] sm:$0xff] %v15724_v40  ;;  %12802 = vrot.lane.b32.xlu0 %v15698_v0, %s14763_s24  ;;  %10563 = vmatprep.subr.bf16.mxu0 %v10562_v11  ;;  %v15749_v18 = vpack.c.bf16 %v1087_v26, %v1082_v62  ;;  %v14423_v26 = vld [vmem:[%s14807_s17 + $0x1b0] sm:$0xff]  ;;  %v12515_v62 = vunpack.i.h.bf16 %v15722_v41  ;;  %v23105_v42 = vunpack.i.h.bf16 %v15713_v22 }
 0x104   : > { %10883 = vmatprep.subr.bf16.mxu1 %v15724_v40  ;;  %10565 = vmatpush1.bf16.msra.mxu0 %v10564_v30  ;;  %v12528_v61 = vpop.permute.xlu1 %12527  ;;  %v15767_v30 = vpack.i.bf16 %v14424_v15, %v14423_v26  ;;  %v10052_v26 = vld [vmem:[%s22628_s1 + $0x648] sm:$0xff] }
 0x105   : > { %23104 = vst [vmem:[#allocation50_spill] sm:$0xff] %v15749_v18  ;;  %10885 = vmatpush1.bf16.msra.mxu1 %v10562_v11  ;;  %v15757_v57 = vpop.permute.xlu0 %12522  ;;  %v14426_v11 = vld [vmem:[%s14807_s17 + $0x1a8] sm:$0xff]  ;;  %6321 = vmatprep.mubr.f32.mxu1 %v10042_v43  ;;  %v12530_v56 = vunpack.i.h.bf16 %v12528_v61  ;;  %v12529_v21 = vunpack.i.l.bf16 %v12528_v61  ;;  %v14427_v43 = vld [vmem:[%s14807_s17 + $0x1d0] sm:$0xff]  ;;  %v15789_v61 = vpack.i.bf16 %v14430_v27, %v14429_v13  ;;  %v10051_v13 = vld [vmem:[%s22628_s1 + $0x640] sm:$0xff]  ;;  %v1089_v23 = vsel %vm1068_vm1, %v12514_v34, %v12515_v62 }
 0x106   : > { %12817 = vrot.lane.b32.xlu1 %v15729_v52, %s14763_s24  ;;  %v15771_v50 = vpack.i.bf16 %v14426_v11, %v14425_v63  ;;  %4901 = vmatmul.mubr.f32.gmra.mrb[6].mxu0 %v4370_v47  ;;  %v14428_v63 = vld [vmem:[%s14807_s17 + $0x1d8] sm:$0xff]  ;;  %v4380_v47 = vld [vmem:[%s22628_s1 + $0x140] sm:$0xff]  ;;  %v12524_v27 = vunpack.i.l.bf16 %v15757_v57  ;;  %v23108_v34 = vunpack.i.h.bf16 %v15713_v22 }
 0x107   : > { %12812 = vrot.lane.b32.xlu0 %v15741_v60, %s14763_s24  ;;  %v15785_v11 = vpack.i.bf16 %v14428_v63, %v14427_v43  ;;  %6322 = vmatmul.mubr.f32.gmra.mrb[6].mxu1 %v10041_v53  ;;  %v1091_v43 = vsel %vm1068_vm1, %v12519_v55, %v23105_v42  ;;  %v12525_v53 = vunpack.i.h.bf16 %v15757_v57  ;;  %v1094_v41 = vsel %vm1068_vm1, %v12529_v21, %v12530_v56 }
 0x108   : > { %v12538_v15 = vpop.permute.xlu1 %12537  ;;  %4906 = vmatprep.mubr.f32.mxu0 %v4381_v17  ;;  %6327 = vmatprep.mubr.f32.mxu1 %v10052_v26  ;;  %v1090_v42 = vsel %vm1068_vm1, %v12515_v62, %v12519_v55  ;;  %v4391_v26 = vld [vmem:[%s22628_s1 + $0x198] sm:$0xff]  ;;  %v1092_v62 = vsel %vm1068_vm1, %v23108_v34, %v12524_v27  ;;  %v14438_v34 = vld [vmem:[%s14807_s17 + $0x208] sm:$0xff] }
 0x109   : > { %v12540_v35 = vunpack.i.h.bf16 %v12538_v15  ;;  %v12539_v29 = vunpack.i.l.bf16 %v12538_v15  ;;  %v12533_v3 = vpop.permute.xlu0 %12532 }
 0x10a   : > { %v12535_v17 = vunpack.i.h.bf16 %v12533_v3  ;;  %v12534_v63 = vunpack.i.l.bf16 %v12533_v3  ;;  %12827 = vrot.lane.b32.xlu1 %v15767_v30, %s14763_s24  ;;  %4907 = vmatmul.mubr.f32.gmra.mrb[8].mxu0 %v4380_v47  ;;  %v10062_v3 = vld [vmem:[%s22628_s1 + $0x698] sm:$0xff] }
 0x10b   : > { %12822 = vrot.lane.b32.xlu0 %v15771_v50, %s14763_s24  ;;  %v15816_v57 = vsel %vm1068_vm1, %v12539_v29, %v12540_v35  ;;  %6328 = vmatmul.mubr.f32.gmra.mrb[8].mxu1 %v10051_v13  ;;  %v10568_v35 = vpack.c.bf16 %v1094_v41, %v1089_v23  ;;  %v14433_v23 = vld [vmem:[%s14807_s17 + $0x1e0] sm:$0xff] }
 0x10c   : > { %23106 = vst [vmem:[#allocation51_spill] sm:$0xff] %v15816_v57  ;;  %v15818_v21 = vpop.permute.xlu1 %12547  ;;  %v1095_v15 = vsel %vm1068_vm1, %v12530_v56, %v12534_v63  ;;  %v1096_v55 = vsel %vm1068_vm1, %v12534_v63, %v12535_v17  ;;  %4912 = vmatprep.mubr.f32.mxu0 %v4391_v26  ;;  %v1097_v47 = vsel %vm1068_vm1, %v12535_v17, %v12539_v29  ;;  %v14431_v56 = vld [vmem:[%s14807_s17 + $0x1f0] sm:$0xff]  ;;  %v14432_v63 = vld [vmem:[%s14807_s17 + $0x1f8] sm:$0xff]  ;;  %v14434_v17 = vld [vmem:[%s14807_s17 + $0x1e8] sm:$0xff] }
 0x10d   : > { %v15824_v7 = vpop.permute.xlu0 %12542  ;;  %v10566_v40 = vpack.c.bf16 %v1095_v15, %v1090_v42  ;;  %v15826_v18 = vpack.c.bf16 %v1096_v55, %v1091_v43  ;;  %6333 = vmatprep.mubr.f32.mxu1 %v10062_v3  ;;  %v15832_v13 = vpack.i.bf16 %v14432_v63, %v14431_v56  ;;  %v4390_v29 = vld [vmem:[%s22628_s1 + $0x190] sm:$0xff]  ;;  %v15841_v43 = vsel %vm1068_vm1, %v12524_v27, %v12525_v53  ;;  %v4401_v26 = vld [vmem:[%s22628_s1 + $0x1e8] sm:$0xff]  ;;  %v14436_v56 = vld [vmem:[%s14807_s17 + $0x218] sm:$0xff] }
 0x10e   : > { %12837 = vrot.lane.b32.xlu1 %v15785_v11, %s14763_s24  ;;  %23109 = vst [vmem:[#allocation53_spill] sm:$0xff] %v15841_v43  ;;  %v15847_v41 = vpack.i.bf16 %v14434_v17, %v14433_v23  ;;  %v10061_v42 = vld [vmem:[%s22628_s1 + $0x690] sm:$0xff]  ;;  %v15852_v22 = vpack.c.bf16 %v1097_v47, %v1092_v62  ;;  %4913 = vmatmul.mubr.f32.gmra.mrb[10].mxu0 %v4390_v29  ;;  %v10072_v15 = vld [vmem:[%s22628_s1 + $0x6e8] sm:$0xff]  ;;  %v12549_v55 = vunpack.i.l.bf16 %v15818_v21  ;;  %v12545_v47 = vunpack.i.h.bf16 %v15824_v7  ;;  %v4400_v62 = vld [vmem:[%s22628_s1 + $0x1e0] sm:$0xff] }
 0x10f   : > { %23107 = vst [vmem:[#allocation52_spill] sm:$0xff] %v15826_v18  ;;  %12832 = vrot.lane.b32.xlu0 %v15789_v61, %s14763_s24  ;;  %10567 = vmatprep.subr.bf16.mxu0 %v10566_v40  ;;  %v12544_v57 = vunpack.i.l.bf16 %v15824_v7 }
 0x110   : > { %23110 = vst [vmem:[#allocation54_spill] sm:$0xff] %v15852_v22  ;;  %10887 = vmatprep.subr.bf16.mxu1 %v15826_v18  ;;  %10569 = vmatpush1.bf16.msra.mxu0 %v10568_v35  ;;  %v12558_v27 = vpop.permute.xlu1 %12557  ;;  %v14435_v35 = vld [vmem:[%s14807_s17 + $0x210] sm:$0xff] }
 0x111   : > { %10889 = vmatpush1.bf16.msra.mxu1 %v10566_v40  ;;  %v15860_v3 = vpop.permute.xlu0 %12552  ;;  %v15871_v63 = vpack.i.bf16 %v14436_v56, %v14435_v35  ;;  %v14437_v40 = vld [vmem:[%s14807_s17 + $0x200] sm:$0xff]  ;;  %v12560_v23 = vunpack.i.h.bf16 %v12558_v27  ;;  %v12559_v17 = vunpack.i.l.bf16 %v12558_v27  ;;  %4918 = vmatprep.mubr.f32.mxu0 %v4401_v26  ;;  %v12550_v35 = vunpack.i.h.bf16 %v15818_v21  ;;  %v10082_v21 = vld [vmem:[%s22628_s1 + $0x738] sm:$0xff] }
 0x112   : > { %12847 = vrot.lane.b32.xlu1 %v15832_v13, %s14763_s24  ;;  %v15875_v29 = vpack.i.bf16 %v14438_v34, %v14437_v40  ;;  %6334 = vmatmul.mubr.f32.gmra.mrb[10].mxu1 %v10061_v42  ;;  %v12555_v53 = vunpack.i.h.bf16 %v15860_v3  ;;  %v12554_v43 = vunpack.i.l.bf16 %v15860_v3  ;;  %v10071_v42 = vld [vmem:[%s22628_s1 + $0x6e0] sm:$0xff]  ;;  %v14439_v40 = vld [vmem:[%s14807_s17 + $0x230] sm:$0xff]  ;;  %v14440_v34 = vld [vmem:[%s14807_s17 + $0x238] sm:$0xff] }
 0x113   : > { %12842 = vrot.lane.b32.xlu0 %v15847_v41, %s14763_s24  ;;  %v15890_v27 = vpack.i.bf16 %v14440_v34, %v14439_v40  ;;  %6339 = vmatprep.mubr.f32.mxu1 %v10072_v15  ;;  %v4411_v3 = vld [vmem:[%s22628_s1 + $0x238] sm:$0xff]  ;;  %v1100_v34 = vsel %vm1068_vm1, %v12545_v47, %v12549_v55  ;;  %v1101_v7 = vsel %vm1068_vm1, %v12549_v55, %v12550_v35 }
 0x114   : > { %v12568_v56 = vpop.permute.xlu1 %12567  ;;  %4919 = vmatmul.mubr.f32.gmra.mrb[12].mxu0 %v4400_v62  ;;  %v1104_v10 = vsel %vm1068_vm1, %v12559_v17, %v12560_v23  ;;  %v15917_v62 = vsel %vm1068_vm1, %v12554_v43, %v12555_v53  ;;  %v1099_v53 = vsel %vm1068_vm1, %v12544_v57, %v12545_v47  ;;  %v4421_v57 = vld [vmem:[%s22628_s1 + $0x288] sm:$0xff]  ;;  %v1102_v47 = vsel %vm1068_vm1, %v12550_v35, %v12554_v43  ;;  %v4420_v35 = vld [vmem:[%s22628_s1 + $0x280] sm:$0xff] }
 0x115   : > { %v12570_v18 = vunpack.i.h.bf16 %v12568_v56  ;;  %v12569_v26 = vunpack.i.l.bf16 %v12568_v56  ;;  %v12563_v22 = vpop.permute.xlu0 %12562  ;;  %4924 = vmatprep.mubr.f32.mxu0 %v4411_v3  ;;  %23111 = vst [vmem:[#allocation55_spill] sm:$0xff] %v15917_v62  ;;  %v14452_v62 = vld [vmem:[%s14807_s17 + $0x298] sm:$0xff] }
 0x116   : > { %v12565_v40 = vunpack.i.h.bf16 %v12563_v22  ;;  %v12564_v15 = vunpack.i.l.bf16 %v12563_v22  ;;  %12857 = vrot.lane.b32.xlu1 %v15871_v63, %s14763_s24  ;;  %6340 = vmatmul.mubr.f32.gmra.mrb[12].mxu1 %v10071_v42  ;;  %v10081_v22 = vld [vmem:[%s22628_s1 + $0x730] sm:$0xff] }
 0x117   : > { %12852 = vrot.lane.b32.xlu0 %v15875_v29, %s14763_s24  ;;  %v15920_v55 = vsel %vm1068_vm1, %v12569_v26, %v12570_v18  ;;  %6345 = vmatprep.mubr.f32.mxu1 %v10082_v21  ;;  %v14443_v21 = vld [vmem:[%s14807_s17 + $0x250] sm:$0xff] }
 0x118   : > { %23112 = vst [vmem:[#allocation56_spill] sm:$0xff] %v15920_v55  ;;  %v15922_v42 = vpop.permute.xlu1 %12577  ;;  %v1105_v17 = vsel %vm1068_vm1, %v12560_v23, %v12564_v15  ;;  %v1106_v56 = vsel %vm1068_vm1, %v12564_v15, %v12565_v40  ;;  %v1107_v3 = vsel %vm1068_vm1, %v12565_v40, %v12569_v26  ;;  %4925 = vmatmul.mubr.f32.gmra.mrb[14].mxu0 %v4410_v1  ;;  %v14444_v15 = vld [vmem:[%s14807_s17 + $0x258] sm:$0xff]  ;;  %v14445_v40 = vld [vmem:[%s14807_s17 + $0x240] sm:$0xff]  ;;  %v10092_v1 = vld [vmem:[%s22628_s1 + $0x788] sm:$0xff] }
 0x119   : > { %v15930_v38 = vpop.permute.xlu0 %12572  ;;  %v10570_v18 = vpack.c.bf16 %v1105_v17, %v1100_v34  ;;  %v15932_v36 = vpack.c.bf16 %v1106_v56, %v1101_v7  ;;  %v10572_v23 = vpack.c.bf16 %v1104_v10, %v1099_v53  ;;  %v15938_v26 = vpack.i.bf16 %v14444_v15, %v14443_v21  ;;  %v14446_v34 = vld [vmem:[%s14807_s17 + $0x248] sm:$0xff]  ;;  %4930 = vmatprep.mubr.f32.mxu0 %v4421_v57  ;;  %v10091_v17 = vld [vmem:[%s22628_s1 + $0x780] sm:$0xff]  ;;  %v4431_v56 = vld [vmem:[%s22628_s1 + $0x2d8] sm:$0xff] }
 0x11a   : > { %12867 = vrot.lane.b32.xlu1 %v15890_v27, %s14763_s24  ;;  %6346 = vmatmul.mubr.f32.gmra.mrb[14].mxu1 %v10081_v22  ;;  %v15948_v7 = vpack.i.bf16 %v14446_v34, %v14445_v40  ;;  %v15953_v10 = vpack.c.bf16 %v1107_v3, %v1102_v47  ;;  %v14447_v53 = vld [vmem:[%s14807_s17 + $0x270] sm:$0xff]  ;;  %v14449_v21 = vld [vmem:[%s14807_s17 + $0x260] sm:$0xff]  ;;  %v14450_v15 = vld [vmem:[%s14807_s17 + $0x268] sm:$0xff]  ;;  %v12579_v40 = vunpack.i.l.bf16 %v15922_v42  ;;  %v12575_v34 = vunpack.i.h.bf16 %v15930_v38 }
 0x11b   : > { %23113 = vst [vmem:[#allocation57_spill] sm:$0xff] %v15932_v36  ;;  %12862 = vrot.lane.b32.xlu0 %v15898_v46, %s14763_s24  ;;  %10571 = vmatprep.subr.bf16.mxu0 %v10570_v18  ;;  %v15976_v57 = vpack.i.bf16 %v14450_v15, %v14449_v21  ;;  %v10102_v47 = vld [vmem:[%s22628_s1 + $0x7d8] sm:$0xff]  ;;  %v14454_v15 = vld [vmem:[%s14807_s17 + $0x288] sm:$0xff]  ;;  %v23115_v51 = vunpack.i.h.bf16 %v15922_v42 }
 0x11c   : > { %23114 = vst [vmem:[#allocation58_spill] sm:$0xff] %v15953_v10  ;;  %10891 = vmatprep.subr.bf16.mxu1 %v15932_v36  ;;  %10573 = vmatpush1.bf16.msra.mxu0 %v10572_v23  ;;  %v12588_v43 = vpop.permute.xlu1 %12587  ;;  %v4430_v36 = vld [vmem:[%s22628_s1 + $0x2d0] sm:$0xff] }
 0x11d   : > { %10893 = vmatpush1.bf16.msra.mxu1 %v10570_v18  ;;  %v15959_v22 = vpop.permute.xlu0 %12582  ;;  %v14448_v18 = vld [vmem:[%s14807_s17 + $0x278] sm:$0xff]  ;;  %6351 = vmatprep.mubr.f32.mxu1 %v10092_v1  ;;  %v12590_v48 = vunpack.i.h.bf16 %v12588_v43  ;;  %v12589_v3 = vunpack.i.l.bf16 %v12588_v43  ;;  %v14453_v1 = vld [vmem:[%s14807_s17 + $0x280] sm:$0xff]  ;;  %v12574_v43 = vunpack.i.l.bf16 %v15930_v38 }
 0x11e   : > { %12877 = vrot.lane.b32.xlu1 %v15938_v26, %s14763_s24  ;;  %v15972_v23 = vpack.i.bf16 %v14448_v18, %v14447_v53  ;;  %4931 = vmatmul.mubr.f32.gmra.mrb[16].mxu0 %v4420_v35  ;;  %v14451_v18 = vld [vmem:[%s14807_s17 + $0x290] sm:$0xff]  ;;  %v15991_v55 = vpack.i.bf16 %v14454_v15, %v14453_v1  ;;  %v12584_v38 = vunpack.i.l.bf16 %v15959_v22  ;;  %v1110_v15 = vsel %vm1068_vm1, %v12575_v34, %v12579_v40 }
 0x11f   : > { %12872 = vrot.lane.b32.xlu0 %v15948_v7, %s14763_s24  ;;  %v15987_v21 = vpack.i.bf16 %v14452_v62, %v14451_v18  ;;  %6352 = vmatmul.mubr.f32.gmra.mrb[16].mxu1 %v10091_v17  ;;  %v1111_v62 = vsel %vm1068_vm1, %v12579_v40, %v23115_v51  ;;  %v10101_v18 = vld [vmem:[%s22628_s1 + $0x7d0] sm:$0xff]  ;;  %v4441_v17 = vld [vmem:[%s22628_s1 + $0x328] sm:$0xff]  ;;  %v1109_v39 = vsel %vm1068_vm1, %v12574_v43, %v12575_v34  ;;  %v23118_v34 = vunpack.i.h.bf16 %v15922_v42 }
 0x120   : > { %v12598_v53 = vpop.permute.xlu1 %12597  ;;  %4936 = vmatprep.mubr.f32.mxu0 %v4431_v56  ;;  %6357 = vmatprep.mubr.f32.mxu1 %v10102_v47  ;;  %v12585_v56 = vunpack.i.h.bf16 %v15959_v22  ;;  %v10112_v51 = vld [vmem:[%s22628_s1 + $0x828] sm:$0xff]  ;;  %v1114_v47 = vsel %vm1068_vm1, %v12589_v3, %v12590_v48 }
 0x121   : > { %v12600_v10 = vunpack.i.h.bf16 %v12598_v53  ;;  %v12599_v4 = vunpack.i.l.bf16 %v12598_v53  ;;  %v12593_v35 = vpop.permute.xlu0 %12592  ;;  %v1112_v43 = vsel %vm1068_vm1, %v23118_v34, %v12584_v38  ;;  %v14462_v34 = vld [vmem:[%s14807_s17 + $0x2c8] sm:$0xff] }
 0x122   : > { %v12595_v1 = vunpack.i.h.bf16 %v12593_v35  ;;  %v12594_v53 = vunpack.i.l.bf16 %v12593_v35  ;;  %12887 = vrot.lane.b32.xlu1 %v15972_v23, %s14763_s24  ;;  %4937 = vmatmul.mubr.f32.gmra.mrb[18].mxu0 %v4430_v36 }
 0x123   : > { %12882 = vrot.lane.b32.xlu0 %v15976_v57, %s14763_s24  ;;  %v16018_v22 = vsel %vm1068_vm1, %v12599_v4, %v12600_v10  ;;  %6358 = vmatmul.mubr.f32.gmra.mrb[18].mxu1 %v10101_v18  ;;  %v14455_v10 = vld [vmem:[%s14807_s17 + $0x2b0] sm:$0xff] }
 0x124   : > { %23116 = vst [vmem:[#allocation59_spill] sm:$0xff] %v16018_v22  ;;  %v16020_v35 = vpop.permute.xlu1 %12607  ;;  %v1115_v49 = vsel %vm1068_vm1, %v12590_v48, %v12594_v53  ;;  %v1116_v9 = vsel %vm1068_vm1, %v12594_v53, %v12595_v1  ;;  %4942 = vmatprep.mubr.f32.mxu0 %v4441_v17  ;;  %v1117_v3 = vsel %vm1068_vm1, %v12595_v1, %v12599_v4  ;;  %v14456_v53 = vld [vmem:[%s14807_s17 + $0x2b8] sm:$0xff]  ;;  %v4440_v4 = vld [vmem:[%s22628_s1 + $0x320] sm:$0xff] }
 0x125   : > { %v16026_v40 = vpop.permute.xlu0 %12602  ;;  %v10574_v36 = vpack.c.bf16 %v1115_v49, %v1110_v15  ;;  %v16028_v59 = vpack.c.bf16 %v1116_v9, %v1111_v62  ;;  %6363 = vmatprep.mubr.f32.mxu1 %v10112_v51  ;;  %v10576_v48 = vpack.c.bf16 %v1114_v47, %v1109_v39  ;;  %v16034_v18 = vpack.i.bf16 %v14456_v53, %v14455_v10  ;;  %v14457_v39 = vld [vmem:[%s14807_s17 + $0x2a0] sm:$0xff]  ;;  %v14458_v9 = vld [vmem:[%s14807_s17 + $0x2a8] sm:$0xff]  ;;  %v4451_v1 = vld [vmem:[%s22628_s1 + $0x378] sm:$0xff] }
 0x126   : > { %12897 = vrot.lane.b32.xlu1 %v15987_v21, %s14763_s24  ;;  %v16043_v49 = vsel %vm1068_vm1, %v12584_v38, %v12585_v56  ;;  %v16049_v62 = vpack.i.bf16 %v14458_v9, %v14457_v39  ;;  %v10111_v17 = vld [vmem:[%s22628_s1 + $0x820] sm:$0xff]  ;;  %v16054_v42 = vpack.c.bf16 %v1117_v3, %v1112_v43  ;;  %4943 = vmatmul.mubr.f32.gmra.mrb[20].mxu0 %v4440_v4  ;;  %v10122_v47 = vld [vmem:[%s22628_s1 + $0x878] sm:$0xff]  ;;  %v12609_v15 = vunpack.i.l.bf16 %v16020_v35  ;;  %v4450_v43 = vld [vmem:[%s22628_s1 + $0x370] sm:$0xff] }
 0x127   : > { %23117 = vst [vmem:[#allocation60_spill] sm:$0xff] %v16028_v59  ;;  %23119 = vst [vmem:[#allocation61_spill] sm:$0xff] %v16043_v49  ;;  %12892 = vrot.lane.b32.xlu0 %v15991_v55, %s14763_s24  ;;  %10575 = vmatprep.subr.bf16.mxu0 %v10574_v36  ;;  %v12605_v3 = vunpack.i.h.bf16 %v16026_v40  ;;  %v14460_v10 = vld [vmem:[%s14807_s17 + $0x2d8] sm:$0xff]  ;;  %v12604_v22 = vunpack.i.l.bf16 %v16026_v40 }
 0x128   : > { %23120 = vst [vmem:[#allocation62_spill] sm:$0xff] %v16054_v42  ;;  %10895 = vmatprep.subr.bf16.mxu1 %v16028_v59  ;;  %10577 = vmatpush1.bf16.msra.mxu0 %v10576_v48  ;;  %v12618_v38 = vpop.permute.xlu1 %12617  ;;  %v14459_v48 = vld [vmem:[%s14807_s17 + $0x2d0] sm:$0xff] }
 0x129   : > { %10897 = vmatpush1.bf16.msra.mxu1 %v10574_v36  ;;  %v16062_v51 = vpop.permute.xlu0 %12612  ;;  %v16073_v53 = vpack.i.bf16 %v14460_v10, %v14459_v48  ;;  %v14461_v36 = vld [vmem:[%s14807_s17 + $0x2c0] sm:$0xff]  ;;  %v12620_v39 = vunpack.i.h.bf16 %v12618_v38  ;;  %v12619_v9 = vunpack.i.l.bf16 %v12618_v38  ;;  %4948 = vmatprep.mubr.f32.mxu0 %v4451_v1  ;;  %v12610_v48 = vunpack.i.h.bf16 %v16020_v35  ;;  %v10132_v35 = vld [vmem:[%s22628_s1 + $0x8c8] sm:$0xff] }
 0x12a   : > { %12907 = vrot.lane.b32.xlu1 %v16034_v18, %s14763_s24  ;;  %v16077_v4 = vpack.i.bf16 %v14462_v34, %v14461_v36  ;;  %6364 = vmatmul.mubr.f32.gmra.mrb[20].mxu1 %v10111_v17  ;;  %v12615_v56 = vunpack.i.h.bf16 %v16062_v51  ;;  %v12614_v49 = vunpack.i.l.bf16 %v16062_v51  ;;  %v10121_v17 = vld [vmem:[%s22628_s1 + $0x870] sm:$0xff]  ;;  %v14464_v34 = vld [vmem:[%s14807_s17 + $0x2f8] sm:$0xff]  ;;  %v4461_v51 = vld [vmem:[%s22628_s1 + $0x3c8] sm:$0xff]  ;;  %v1119_v6 = vsel %vm1068_vm1, %v12604_v22, %v12605_v3 }
 0x12b   : > { %12902 = vrot.lane.b32.xlu0 %v16049_v62, %s14763_s24  ;;  %v14463_v36 = vld [vmem:[%s14807_s17 + $0x2f0] sm:$0xff]  ;;  %6369 = vmatprep.mubr.f32.mxu1 %v10122_v47  ;;  %v1121_v40 = vsel %vm1068_vm1, %v12609_v15, %v12610_v48  ;;  %v1124_v45 = vsel %vm1068_vm1, %v12619_v9, %v12620_v39  ;;  %v10142_v22 = vld [vmem:[%s22628_s1 + $0x918] sm:$0xff] }
 0x12c   : > { %v12628_v10 = vpop.permute.xlu1 %12627  ;;  %v16092_v38 = vpack.i.bf16 %v14464_v34, %v14463_v36  ;;  %4949 = vmatmul.mubr.f32.gmra.mrb[22].mxu0 %v4450_v43  ;;  %v1120_v34 = vsel %vm1068_vm1, %v12605_v3, %v12609_v15  ;;  %v16119_v43 = vsel %vm1068_vm1, %v12614_v49, %v12615_v56 }
 0x12d   : > { %v12630_v59 = vunpack.i.h.bf16 %v12628_v10  ;;  %v12629_v1 = vunpack.i.l.bf16 %v12628_v10  ;;  %v12623_v42 = vpop.permute.xlu0 %12622  ;;  %4954 = vmatprep.mubr.f32.mxu0 %v4461_v51  ;;  %23121 = vst [vmem:[#allocation63_spill] sm:$0xff] %v16119_v43  ;;  %v14476_v51 = vld [vmem:[%s14807_s17 + $0xb8] sm:$0xff] }
 0x12e   : > { %v12625_v36 = vunpack.i.h.bf16 %v12623_v42  ;;  %v12624_v47 = vunpack.i.l.bf16 %v12623_v42  ;;  %12917 = vrot.lane.b32.xlu1 %v16073_v53, %s14763_s24  ;;  %6370 = vmatmul.mubr.f32.gmra.mrb[22].mxu1 %v10121_v17  ;;  %v10131_v42 = vld [vmem:[%s22628_s1 + $0x8c0] sm:$0xff] }
 0x12f   : > { %12912 = vrot.lane.b32.xlu0 %v16077_v4, %s14763_s24  ;;  %v16122_v15 = vsel %vm1068_vm1, %v12629_v1, %v12630_v59  ;;  %6375 = vmatprep.mubr.f32.mxu1 %v10132_v35  ;;  %v10580_v59 = vpack.c.bf16 %v1124_v45, %v1119_v6  ;;  %v4470_v35 = vld [vmem:[%s22628_s1 + $0x410] sm:$0xff] }
 0x130   : > { %23122 = vst [vmem:[#allocation64_spill] sm:$0xff] %v16122_v15  ;;  %v16124_v17 = vpop.permute.xlu1 %12637  ;;  %v1125_v10 = vsel %vm1068_vm1, %v12620_v39, %v12624_v47  ;;  %v1126_v9 = vsel %vm1068_vm1, %v12624_v47, %v12625_v36  ;;  %v1127_v5 = vsel %vm1068_vm1, %v12625_v36, %v12629_v1  ;;  %4955 = vmatmul.mubr.f32.gmra.mrb[24].mxu0 %v4460_v25  ;;  %v4471_v39 = vld [vmem:[%s22628_s1 + $0x418] sm:$0xff]  ;;  %v10152_v47 = vld [vmem:[%s22628_s1 + $0x968] sm:$0xff] }
 0x131   : > { %v16132_v37 = vpop.permute.xlu0 %12632  ;;  %v10578_v56 = vpack.c.bf16 %v1125_v10, %v1120_v34  ;;  %v16134_v32 = vpack.c.bf16 %v1126_v9, %v1121_v40  ;;  %v1122_v1 = vsel %vm1068_vm1, %v12610_v48, %v12614_v49  ;;  %4960 = vmatprep.mubr.f32.mxu0 %v4471_v39  ;;  %v10141_v48 = vld [vmem:[%s22628_s1 + $0x910] sm:$0xff]  ;;  %v12640_v36 = vunpack.i.h.bf16 %v16124_v17  ;;  %v4491_v39 = vld [vmem:[%s22628_s1 + $0x4b8] sm:$0xff] }
 0x132   : > { %12927 = vrot.lane.b32.xlu1 %v16092_v38, %s14763_s24  ;;  %6376 = vmatmul.mubr.f32.gmra.mrb[24].mxu1 %v10131_v42  ;;  %v16147_v3 = vpack.c.bf16 %v1127_v5, %v1122_v1  ;;  %v4481_v5 = vld [vmem:[%s22628_s1 + $0x468] sm:$0xff]  ;;  %v12639_v34 = vunpack.i.l.bf16 %v16124_v17  ;;  %v12635_v40 = vunpack.i.h.bf16 %v16132_v37  ;;  %v12634_v10 = vunpack.i.l.bf16 %v16132_v37  ;;  %v10162_v37 = vld [vmem:[%s22628_s1 + $0x9b8] sm:$0xff] }
 0x133   : > { %23123 = vst [vmem:[#allocation65_spill] sm:$0xff] %v16134_v32  ;;  %12922 = vrot.lane.b32.xlu0 %v16100_v16, %s14763_s24  ;;  %10579 = vmatprep.subr.bf16.mxu0 %v10578_v56 }
 0x134   : > { %23124 = vst [vmem:[#allocation66_spill] sm:$0xff] %v16147_v3  ;;  %10899 = vmatprep.subr.bf16.mxu1 %v16134_v32  ;;  %10581 = vmatpush1.bf16.msra.mxu0 %v10580_v59  ;;  %v12648_v6 = vpop.permute.xlu1 %12647  ;;  %v1131_v59 = vsel %vm1068_vm1, %v12639_v34, %v12640_v36  ;;  %v14490_v32 = vld [vmem:[%s14807_s17 + $0x108] sm:$0xff] }
 0x135   : > { %10901 = vmatpush1.bf16.msra.mxu1 %v10578_v56  ;;  %v12643_v49 = vpop.permute.xlu0 %12642  ;;  %6381 = vmatprep.mubr.f32.mxu1 %v10142_v22  ;;  %v12650_v25 = vunpack.i.h.bf16 %v12648_v6  ;;  %v12649_v45 = vunpack.i.l.bf16 %v12648_v6 }
 0x136   : > { %12937 = vrot.lane.b32.xlu1 %v15489_v28, %s14764_s18  ;;  %4961 = vmatmul.mubr.f32.gmra.mrb[26].mxu0 %v4470_v35  ;;  %v4480_v28 = vld [vmem:[%s22628_s1 + $0x460] sm:$0xff]  ;;  %v12645_v1 = vunpack.i.h.bf16 %v12643_v49  ;;  %v12644_v22 = vunpack.i.l.bf16 %v12643_v49 }
 0x137   : > { %12932 = vrot.lane.b32.xlu0 %v15496_v54, %s14764_s18  ;;  %6382 = vmatmul.mubr.f32.gmra.mrb[26].mxu1 %v10141_v48  ;;  %v10151_v54 = vld [vmem:[%s22628_s1 + $0x960] sm:$0xff]  ;;  %v1134_v48 = vsel %vm1068_vm1, %v12649_v45, %v12650_v25 }
 0x138   : > { %v12658_v42 = vpop.permute.xlu1 %12657  ;;  %4966 = vmatprep.mubr.f32.mxu0 %v4481_v5  ;;  %6387 = vmatprep.mubr.f32.mxu1 %v10152_v47  ;;  %v1130_v5 = vsel %vm1068_vm1, %v12635_v40, %v12639_v34 }
 0x139   : > { %v12660_v9 = vunpack.i.h.bf16 %v12658_v42  ;;  %v12659_v56 = vunpack.i.l.bf16 %v12658_v42  ;;  %v12653_v17 = vpop.permute.xlu0 %12652 }
 0x13a   : > { %v12655_v6 = vunpack.i.h.bf16 %v12653_v17  ;;  %v12654_v35 = vunpack.i.l.bf16 %v12653_v17  ;;  %12947 = vrot.lane.b32.xlu1 %v15507_v2, %s14764_s18  ;;  %4967 = vmatmul.mubr.f32.gmra.mrb[28].mxu0 %v4480_v28 }
 0x13b   : > { %12942 = vrot.lane.b32.xlu0 %v15511_v14, %s14764_s18  ;;  %v16190_v49 = vsel %vm1068_vm1, %v12659_v56, %v12660_v9  ;;  %6388 = vmatmul.mubr.f32.gmra.mrb[28].mxu1 %v10151_v54  ;;  %v1129_v14 = vsel %vm1068_vm1, %v12634_v10, %v12635_v40  ;;  %v14467_v9 = vld [vmem:[%s14807_s17 + $0x70] sm:$0xff]  ;;  %v1132_v40 = vsel %vm1068_vm1, %v12640_v36, %v12644_v22 }
 0x13c   : > { %23125 = vst [vmem:[#allocation67_spill] sm:$0xff] %v16190_v49  ;;  %v16192_v47 = vpop.permute.xlu1 %12667  ;;  %v1135_v2 = vsel %vm1068_vm1, %v12650_v25, %v12654_v35  ;;  %v1136_v42 = vsel %vm1068_vm1, %v12654_v35, %v12655_v6  ;;  %4972 = vmatprep.mubr.f32.mxu0 %v4491_v39  ;;  %v1137_v45 = vsel %vm1068_vm1, %v12655_v6, %v12659_v56  ;;  %v14468_v35 = vld [vmem:[%s14807_s17 + $0x78] sm:$0xff]  ;;  %v4490_v56 = vld [vmem:[%s22628_s1 + $0x4b0] sm:$0xff]  ;;  %v14477_v49 = vld [vmem:[%s14807_s17 + $0xa0] sm:$0xff] }
 0x13d   : > { %v16198_v34 = vpop.permute.xlu0 %12662  ;;  %v10582_v28 = vpack.c.bf16 %v1135_v2, %v1130_v5  ;;  %v16200_v17 = vpack.c.bf16 %v1136_v42, %v1131_v59  ;;  %6393 = vmatprep.mubr.f32.mxu1 %v10162_v37  ;;  %v10584_v25 = vpack.c.bf16 %v1134_v48, %v1129_v14  ;;  %v16206_v54 = vpack.i.bf16 %v14468_v35, %v14467_v9  ;;  %v14469_v59 = vld [vmem:[%s14807_s17 + $0x60] sm:$0xff]  ;;  %v10161_v6 = vld [vmem:[%s22628_s1 + $0x9b0] sm:$0xff]  ;;  %v10014_v48 = vld [vmem:[%s22628_s1 + $0x518] sm:$0xff] }
 0x13e   : > { %12957 = vrot.lane.b32.xlu1 %v15519_v20, %s14764_s18  ;;  %v16213_v10 = vsel %vm1068_vm1, %v12644_v22, %v12645_v1  ;;  %v14470_v20 = vld [vmem:[%s14807_s17 + $0x68] sm:$0xff]  ;;  %v16224_v37 = vpack.c.bf16 %v1137_v45, %v1132_v40  ;;  %v4343_v1 = vld [vmem:[%s22628_s1 + $0x18] sm:$0xff]  ;;  %4973 = vmatmul.mubr.f32.gmra.mrb[30].mxu0 %v4490_v56  ;;  %v12669_v5 = vunpack.i.l.bf16 %v16192_v47  ;;  %v12665_v2 = vunpack.i.h.bf16 %v16198_v34  ;;  %v14471_v42 = vld [vmem:[%s14807_s17 + $0x90] sm:$0xff] }
 0x13f   : > { %23126 = vst [vmem:[#allocation68_spill] sm:$0xff] %v16200_v17  ;;  %23127 = vst [vmem:[#allocation69_spill] sm:$0xff] %v16213_v10  ;;  %12952 = vrot.lane.b32.xlu0 %v15525_v12, %s14764_s18  ;;  %10583 = vmatprep.subr.bf16.mxu0 %v10582_v28  ;;  %v16219_v39 = vpack.i.bf16 %v14470_v20, %v14469_v59  ;;  %v14472_v45 = vld [vmem:[%s14807_s17 + $0x98] sm:$0xff]  ;;  %v14474_v9 = vld [vmem:[%s14807_s17 + $0x88] sm:$0xff]  ;;  %v12670_v20 = vunpack.i.h.bf16 %v16192_v47 }
 0x140   : > { %23128 = vst [vmem:[#allocation70_spill] sm:$0xff] %v16224_v37  ;;  %10903 = vmatprep.subr.bf16.mxu1 %v16200_v17  ;;  %10585 = vmatpush1.bf16.msra.mxu0 %v10584_v25  ;;  %v12678_v12 = vpop.permute.xlu1 %12677  ;;  %v16241_v14 = vpack.i.bf16 %v14472_v45, %v14471_v42  ;;  %v14473_v25 = vld [vmem:[%s14807_s17 + $0x80] sm:$0xff]  ;;  %v12664_v45 = vunpack.i.l.bf16 %v16198_v34  ;;  %v14479_v17 = vld [vmem:[%s14807_s17 + $0xd0] sm:$0xff]  ;;  %v14480_v37 = vld [vmem:[%s14807_s17 + $0xd8] sm:$0xff] }
 0x141   : > { %10905 = vmatpush1.bf16.msra.mxu1 %v10582_v28  ;;  %v12673_v22 = vpop.permute.xlu0 %12672  ;;  %v16245_v28 = vpack.i.bf16 %v14474_v9, %v14473_v25  ;;  %v12680_v35 = vunpack.i.h.bf16 %v12678_v12  ;;  %v12679_v56 = vunpack.i.l.bf16 %v12678_v12  ;;  %5043 = vmatprep.mubr.f32.mxu0 %v4343_v1  ;;  %v14478_v1 = vld [vmem:[%s14807_s17 + $0xa8] sm:$0xff]  ;;  %v1141_v47 = vsel %vm1068_vm1, %v12669_v5, %v12670_v20 }
 0x142   : > { %12967 = vrot.lane.b32.xlu1 %v16206_v54, %s14764_s18  ;;  %6394 = vmatmul.mubr.f32.gmra.mrb[30].mxu1 %v10161_v6  ;;  %v12675_v40 = vunpack.i.h.bf16 %v12673_v22  ;;  %v12674_v59 = vunpack.i.l.bf16 %v12673_v22  ;;  %v14475_v6 = vld [vmem:[%s14807_s17 + $0xb0] sm:$0xff]  ;;  %v16259_v43 = vpack.i.bf16 %v14478_v1, %v14477_v49 }
 0x143   : > { %12962 = vrot.lane.b32.xlu0 %v16219_v39, %s14764_s18  ;;  %6464 = vmatprep.mubr.f32.mxu1 %v10014_v48  ;;  %v16253_v12 = vpack.i.bf16 %v14476_v51, %v14475_v6  ;;  %v1144_v34 = vsel %vm1068_vm1, %v12679_v56, %v12680_v35  ;;  %v1140_v51 = vsel %vm1068_vm1, %v12665_v2, %v12669_v5 }
 0x144   : > { %v12688_v42 = vpop.permute.xlu1 %12687  ;;  %v1139_v5 = vsel %vm1068_vm1, %v12664_v45, %v12665_v2  ;;  %v14481_v2 = vld [vmem:[%s14807_s17 + $0xc0] sm:$0xff]  ;;  %v14482_v45 = vld [vmem:[%s14807_s17 + $0xc8] sm:$0xff] }
 0x145   : > { %v12690_v25 = vunpack.i.h.bf16 %v12688_v42  ;;  %v12689_v9 = vunpack.i.l.bf16 %v12688_v42  ;;  %v12683_v36 = vpop.permute.xlu0 %12682 }
 0x146   : > { %v12685_v22 = vunpack.i.h.bf16 %v12683_v36  ;;  %v12684_v10 = vunpack.i.l.bf16 %v12683_v36  ;;  %12977 = vrot.lane.b32.xlu1 %v16241_v14, %s14764_s18  ;;  %v16267_v36 = vsel %vm1068_vm1, %v12674_v59, %v12675_v40 }
 0x147   : > { %12972 = vrot.lane.b32.xlu0 %v16245_v28, %s14764_s18  ;;  %23129 = vst [vmem:[#allocation71_spill] sm:$0xff] %v16267_v36  ;;  %v16270_v48 = vsel %vm1068_vm1, %v12689_v9, %v12690_v25 }
 0x148   : > { %23130 = vst [vmem:[#allocation72_spill] sm:$0xff] %v16270_v48  ;;  %v16272_v42 = vpop.permute.xlu1 %12697  ;;  %v1145_v49 = vsel %vm1068_vm1, %v12680_v35, %v12684_v10  ;;  %v1146_v56 = vsel %vm1068_vm1, %v12684_v10, %v12685_v22  ;;  %v1147_v6 = vsel %vm1068_vm1, %v12685_v22, %v12689_v9  ;;  %v10588_v35 = vpack.c.bf16 %v1144_v34, %v1139_v5  ;;  %v14483_v34 = vld [vmem:[%s14807_s17 + $0xf0] sm:$0xff] }
 0x149   : > { %v16280_v40 = vpop.permute.xlu0 %12692  ;;  %v10586_v15 = vpack.c.bf16 %v1145_v49, %v1140_v51  ;;  %v16282_v25 = vpack.c.bf16 %v1146_v56, %v1141_v47  ;;  %v16288_v10 = vpack.i.bf16 %v14480_v37, %v14479_v17  ;;  %v1142_v9 = vsel %vm1068_vm1, %v12670_v20, %v12674_v59  ;;  %v14484_v51 = vld [vmem:[%s14807_s17 + $0xf8] sm:$0xff]  ;;  %v14485_v56 = vld [vmem:[%s14807_s17 + $0xe0] sm:$0xff] }
 0x14a   : > { %12987 = vrot.lane.b32.xlu1 %v16253_v12, %s14764_s18  ;;  %v16295_v22 = vpack.i.bf16 %v14482_v45, %v14481_v2  ;;  %v16297_v47 = vpack.c.bf16 %v1147_v6, %v1142_v9  ;;  %v12699_v59 = vunpack.i.l.bf16 %v16272_v42  ;;  %v12695_v20 = vunpack.i.h.bf16 %v16280_v40  ;;  %v14486_v6 = vld [vmem:[%s14807_s17 + $0xe8] sm:$0xff] }
 0x14b   : > { %23131 = vst [vmem:[#allocation73_spill] sm:$0xff] %v16282_v25  ;;  %12982 = vrot.lane.b32.xlu0 %v16259_v43, %s14764_s18  ;;  %10587 = vmatprep.subr.bf16.mxu0 %v10586_v15  ;;  %v16306_v49 = vpack.i.bf16 %v14484_v51, %v14483_v34  ;;  %v16310_v5 = vpack.i.bf16 %v14486_v6, %v14485_v56  ;;  %v12700_v45 = vunpack.i.h.bf16 %v16272_v42  ;;  %v12694_v51 = vunpack.i.l.bf16 %v16280_v40  ;;  %v14487_v56 = vld [vmem:[%s14807_s17 + $0x110] sm:$0xff]  ;;  %v14488_v6 = vld [vmem:[%s14807_s17 + $0x118] sm:$0xff] }
 0x14c   : > { %23132 = vst [vmem:[#allocation74_spill] sm:$0xff] %v16297_v47  ;;  %10907 = vmatprep.subr.bf16.mxu1 %v16282_v25  ;;  %10589 = vmatpush1.bf16.msra.mxu0 %v10588_v35  ;;  %v12708_v17 = vpop.permute.xlu1 %12707  ;;  %v16318_v25 = vpack.i.bf16 %v14488_v6, %v14487_v56 }
 0x14d   : > { %10909 = vmatpush1.bf16.msra.mxu1 %v10586_v15  ;;  %v12703_v37 = vpop.permute.xlu0 %12702  ;;  %v12710_v35 = vunpack.i.h.bf16 %v12708_v17  ;;  %v12709_v15 = vunpack.i.l.bf16 %v12708_v17  ;;  %v1504_v42 = vsel %vm1501_vm2, %v12699_v59, %v12700_v45 }
 0x14e   : > { %12997 = vrot.lane.b32.xlu1 %v16288_v10, %s14764_s18  ;;  %v12705_v9 = vunpack.i.h.bf16 %v12703_v37  ;;  %v12704_v2 = vunpack.i.l.bf16 %v12703_v37  ;;  %v14489_v37 = vld [vmem:[%s14807_s17 + $0x100] sm:$0xff] }
 0x14f   : > { %12992 = vrot.lane.b32.xlu0 %v16295_v22, %s14764_s18  ;;  %v16324_v3 = vpack.i.bf16 %v14490_v32, %v14489_v37  ;;  %v1507_v40 = vsel %vm1501_vm2, %v12709_v15, %v12710_v35 }
 0x150   : > { %v12718_v34 = vpop.permute.xlu1 %12717 }
 0x151   : > { %v12720_v1 = vunpack.i.h.bf16 %v12718_v34  ;;  %v12719_v36 = vunpack.i.l.bf16 %v12718_v34  ;;  %v12713_v48 = vpop.permute.xlu0 %12712  ;;  %v1503_v34 = vsel %vm1501_vm2, %v12695_v20, %v12699_v59  ;;  %v1502_v59 = vsel %vm1501_vm2, %v12694_v51, %v12695_v20  ;;  %v14494_v20 = vld [vmem:[%s14807_s17 + $0x128] sm:$0xff] }
 0x152   : > { %v12715_v17 = vunpack.i.h.bf16 %v12713_v48  ;;  %v12714_v47 = vunpack.i.l.bf16 %v12713_v48  ;;  %13007 = vrot.lane.b32.xlu1 %v16306_v49, %s14764_s18  ;;  %v16332_v48 = vsel %vm1501_vm2, %v12704_v2, %v12705_v9 }
 0x153   : > { %13002 = vrot.lane.b32.xlu0 %v16310_v5, %s14764_s18  ;;  %23133 = vst [vmem:[#allocation75_spill] sm:$0xff] %v16332_v48  ;;  %v16335_v56 = vsel %vm1501_vm2, %v12719_v36, %v12720_v1  ;;  %v10592_v1 = vpack.c.bf16 %v1507_v40, %v1502_v59  ;;  %v14495_v40 = vld [vmem:[%s14807_s17 + $0x150] sm:$0xff] }
 0x154   : > { %23134 = vst [vmem:[#allocation76_spill] sm:$0xff] %v16335_v56  ;;  %v16337_v6 = vpop.permute.xlu1 %12727  ;;  %v1508_v32 = vsel %vm1501_vm2, %v12710_v35, %v12714_v47  ;;  %v1509_v15 = vsel %vm1501_vm2, %v12714_v47, %v12715_v17  ;;  %v1510_v37 = vsel %vm1501_vm2, %v12715_v17, %v12719_v36  ;;  %v14491_v35 = vld [vmem:[%s14807_s17 + $0x130] sm:$0xff]  ;;  %v1505_v36 = vsel %vm1501_vm2, %v12700_v45, %v12704_v2  ;;  %v14493_v47 = vld [vmem:[%s14807_s17 + $0x120] sm:$0xff] }
 0x155   : > { %v12723_v9 = vpop.permute.xlu0 %12722  ;;  %v10590_v24 = vpack.c.bf16 %v1508_v32, %v1503_v34  ;;  %v16345_v8 = vpack.c.bf16 %v1509_v15, %v1504_v42  ;;  %v16351_v44 = vpack.i.bf16 %v14492_v58, %v14491_v35  ;;  %v16358_v51 = vpack.i.bf16 %v14494_v20, %v14493_v47  ;;  %v14496_v34 = vld [vmem:[%s14807_s17 + $0x158] sm:$0xff]  ;;  %v14497_v15 = vld [vmem:[%s14807_s17 + $0x140] sm:$0xff] }
 0x156   : > { %13017 = vrot.lane.b32.xlu1 %v16318_v25, %s14764_s18  ;;  %v16360_v17 = vpack.c.bf16 %v1510_v37, %v1505_v36  ;;  %v12729_v2 = vunpack.i.l.bf16 %v16337_v6  ;;  %v12725_v45 = vunpack.i.h.bf16 %v12723_v9  ;;  %v16368_v32 = vpack.i.bf16 %v14496_v34, %v14495_v40  ;;  %v14498_v37 = vld [vmem:[%s14807_s17 + $0x148] sm:$0xff]  ;;  %v14499_v34 = vld [vmem:[%s14807_s17 + $0x170] sm:$0xff] }
 0x157   : > { %23135 = vst [vmem:[#allocation77_spill] sm:$0xff] %v16345_v8  ;;  %13012 = vrot.lane.b32.xlu0 %v16324_v3, %s14764_s18  ;;  %10591 = vmatprep.subr.bf16.mxu0 %v10590_v24  ;;  %v16372_v59 = vpack.i.bf16 %v14498_v37, %v14497_v15  ;;  %v12730_v47 = vunpack.i.h.bf16 %v16337_v6  ;;  %v12724_v33 = vunpack.i.l.bf16 %v12723_v9 }
 0x158   : > { %23136 = vst [vmem:[#allocation78_spill] sm:$0xff] %v16360_v17  ;;  %10911 = vmatprep.subr.bf16.mxu1 %v16345_v8  ;;  %10593 = vmatpush1.bf16.msra.mxu0 %v10592_v1  ;;  %v12738_v58 = vpop.permute.xlu1 %12737  ;;  %23137 = vst [vmem:[#allocation79_spill] sm:$0xff] %v16368_v32  ;;  %v14500_v8 = vld [vmem:[%s14807_s17 + $0x178] sm:$0xff]  ;;  %v1513_v6 = vsel %vm1501_vm2, %v12725_v45, %v12729_v2 }
 0x159   : > { %10913 = vmatpush1.bf16.msra.mxu1 %v10590_v24  ;;  %v12733_v42 = vpop.permute.xlu0 %12732  ;;  %23138 = vst [vmem:[#allocation80_spill] sm:$0xff] %v16372_v59  ;;  %v12740_v1 = vunpack.i.h.bf16 %v12738_v58  ;;  %v12739_v35 = vunpack.i.l.bf16 %v12738_v58  ;;  %v16379_v17 = vpack.i.bf16 %v14500_v8, %v14499_v34  ;;  %v1514_v58 = vsel %vm1501_vm2, %v12729_v2, %v12730_v47 }
 0x15a   : > { %13027 = vrot.lane.b32.xlu1 %v16351_v44, %s14764_s18  ;;  %v12735_v24 = vunpack.i.h.bf16 %v12733_v42  ;;  %v12734_v36 = vunpack.i.l.bf16 %v12733_v42  ;;  %v1512_v19 = vsel %vm1501_vm2, %v12724_v33, %v12725_v45 }
 0x15b   : > { %13022 = vrot.lane.b32.xlu0 %v16358_v51, %s14764_s18  ;;  %v1517_v42 = vsel %vm1501_vm2, %v12739_v35, %v12740_v1 }
 0x15c   : > { %v12748_v20 = vpop.permute.xlu1 %12747  ;;  %v16389_v9 = vsel %vm1501_vm2, %v12734_v36, %v12735_v24  ;;  %v1515_v24 = vsel %vm1501_vm2, %v12730_v47, %v12734_v36 }
 0x15d   : > { %v12750_v48 = vunpack.i.h.bf16 %v12748_v20  ;;  %v12749_v56 = vunpack.i.l.bf16 %v12748_v20  ;;  %v12743_v40 = vpop.permute.xlu0 %12742  ;;  %23139 = vst [vmem:[#allocation81_spill] sm:$0xff] %v16389_v9 }
 0x15e   : > { %v12745_v15 = vunpack.i.h.bf16 %v12743_v40  ;;  %v12744_v37 = vunpack.i.l.bf16 %v12743_v40  ;;  %13037 = vrot.lane.b32.xlu1 %v16368_v32, %s14764_s18 }
 0x15f   : > { %13032 = vrot.lane.b32.xlu0 %v16372_v59, %s14764_s18  ;;  %v16392_v8 = vsel %vm1501_vm2, %v12749_v56, %v12750_v48  ;;  %v10596_v48 = vpack.c.bf16 %v1517_v42, %v1512_v19 }
 0x160   : > { %23140 = vst [vmem:[#allocation82_spill] sm:$0xff] %v16392_v8  ;;  %v12758_v20 = vpop.permute.xlu1 %12757  ;;  %v1518_v40 = vsel %vm1501_vm2, %v12740_v1, %v12744_v37  ;;  %v1519_v34 = vsel %vm1501_vm2, %v12744_v37, %v12745_v15  ;;  %v1520_v31 = vsel %vm1501_vm2, %v12745_v15, %v12749_v56 }
 0x161   : > { %v12753_v59 = vpop.permute.xlu0 %12752  ;;  %v10594_v2 = vpack.c.bf16 %v1518_v40, %v1513_v6  ;;  %v16400_v32 = vpack.c.bf16 %v1519_v34, %v1514_v58  ;;  %v16407_v56 = vpack.c.bf16 %v1520_v31, %v1515_v24  ;;  %v12759_v1 = vunpack.i.l.bf16 %v12758_v20 }
 0x162   : > { %13047 = vrot.lane.b32.xlu1 %v16379_v17, %s14764_s18  ;;  %v12755_v15 = vunpack.i.h.bf16 %v12753_v59  ;;  %v12760_v31 = vunpack.i.h.bf16 %v12758_v20  ;;  %v12754_v58 = vunpack.i.l.bf16 %v12753_v59 }
 0x163   : > { %23141 = vst [vmem:[#allocation83_spill] sm:$0xff] %v16400_v32  ;;  %13042 = vrot.lane.b32.xlu0 %v15698_v0, %s14764_s18  ;;  %10595 = vmatprep.subr.bf16.mxu0 %v10594_v2  ;;  %23142 = vst [vmem:[#allocation84_spill] sm:$0xff] %v16407_v56 }
 0x164   : > { %10915 = vmatprep.subr.bf16.mxu1 %v16400_v32  ;;  %10597 = vmatpush1.bf16.msra.mxu0 %v10596_v48  ;;  %v12768_v33 = vpop.permute.xlu1 %12767 }
 0x165   : > { %10917 = vmatpush1.bf16.msra.mxu1 %v10594_v2  ;;  %v12763_v45 = vpop.permute.xlu0 %12762  ;;  %v12770_v19 = vunpack.i.h.bf16 %v12768_v33  ;;  %v12769_v37 = vunpack.i.l.bf16 %v12768_v33 }
 0x166   : > { %13057 = vrot.lane.b32.xlu1 %v15729_v52, %s14764_s18  ;;  %v12765_v36 = vunpack.i.h.bf16 %v12763_v45  ;;  %v12764_v47 = vunpack.i.l.bf16 %v12763_v45  ;;  %v1524_v52 = vsel %vm1501_vm2, %v12759_v1, %v12760_v31 }
 0x167   : > { %13052 = vrot.lane.b32.xlu0 %v15741_v60, %s14764_s18  ;;  %v1527_v48 = vsel %vm1501_vm2, %v12769_v37, %v12770_v19  ;;  %v1523_v60 = vsel %vm1501_vm2, %v12755_v15, %v12759_v1 }
 0x168   : > { %v12778_v0 = vpop.permute.xlu1 %12777  ;;  %v16422_v20 = vsel %vm1501_vm2, %v12764_v47, %v12765_v36 }
 0x169   : > { %v12780_v42 = vunpack.i.h.bf16 %v12778_v0  ;;  %v12779_v6 = vunpack.i.l.bf16 %v12778_v0  ;;  %v12773_v40 = vpop.permute.xlu0 %12772  ;;  %23143 = vst [vmem:[#allocation85_spill] sm:$0xff] %v16422_v20  ;;  %v16884_v20 = vld [vmem:[%s14807_s17 + $0x220] sm:$0xff] }
 0x16a   : > { %v12775_v34 = vunpack.i.h.bf16 %v12773_v40  ;;  %v12774_v2 = vunpack.i.l.bf16 %v12773_v40  ;;  %13067 = vrot.lane.b32.xlu1 %v15767_v30, %s14764_s18 }
 0x16b   : > { %13062 = vrot.lane.b32.xlu0 %v15771_v50, %s14764_s18  ;;  %v16425_v59 = vsel %vm1501_vm2, %v12779_v6, %v12780_v42  ;;  %v1522_v50 = vsel %vm1501_vm2, %v12754_v58, %v12755_v15  ;;  %v1525_v42 = vsel %vm1501_vm2, %v12760_v31, %v12764_v47 }
 0x16c   : > { %23144 = vst [vmem:[#allocation86_spill] sm:$0xff] %v16425_v59  ;;  %v12788_v24 = vpop.permute.xlu1 %12787  ;;  %v1528_v33 = vsel %vm1501_vm2, %v12770_v19, %v12774_v2  ;;  %v1529_v30 = vsel %vm1501_vm2, %v12774_v2, %v12775_v34  ;;  %v1530_v45 = vsel %vm1501_vm2, %v12775_v34, %v12779_v6  ;;  %v10600_v36 = vpack.c.bf16 %v1527_v48, %v1522_v50 }
 0x16d   : > { %v12783_v0 = vpop.permute.xlu0 %12782  ;;  %v10598_v1 = vpack.c.bf16 %v1528_v33, %v1523_v60  ;;  %v16433_v40 = vpack.c.bf16 %v1529_v30, %v1524_v52  ;;  %v16440_v19 = vpack.c.bf16 %v1530_v45, %v1525_v42  ;;  %v12789_v6 = vunpack.i.l.bf16 %v12788_v24 }
 0x16e   : > { %13077 = vrot.lane.b32.xlu1 %v15785_v11, %s14764_s18  ;;  %v12785_v34 = vunpack.i.h.bf16 %v12783_v0  ;;  %v12784_v48 = vunpack.i.l.bf16 %v12783_v0 }
 0x16f   : > { %23145 = vst [vmem:[#allocation87_spill] sm:$0xff] %v16433_v40  ;;  %13072 = vrot.lane.b32.xlu0 %v15789_v61, %s14764_s18  ;;  %10599 = vmatprep.subr.bf16.mxu0 %v10598_v1  ;;  %23146 = vst [vmem:[#allocation88_spill] sm:$0xff] %v16440_v19  ;;  %v12790_v61 = vunpack.i.h.bf16 %v12788_v24 }
 0x170   : > { %10919 = vmatprep.subr.bf16.mxu1 %v16433_v40  ;;  %10601 = vmatpush1.bf16.msra.mxu0 %v10600_v36  ;;  %v12798_v15 = vpop.permute.xlu1 %12797 }
 0x171   : > { %10921 = vmatpush1.bf16.msra.mxu1 %v10598_v1  ;;  %v12793_v58 = vpop.permute.xlu0 %12792  ;;  %v12800_v11 = vunpack.i.h.bf16 %v12798_v15  ;;  %v12799_v2 = vunpack.i.l.bf16 %v12798_v15 }
 0x172   : > { %13087 = vrot.lane.b32.xlu1 %v15832_v13, %s14764_s18  ;;  %v12795_v47 = vunpack.i.h.bf16 %v12793_v58  ;;  %v12794_v31 = vunpack.i.l.bf16 %v12793_v58  ;;  %v1534_v13 = vsel %vm1501_vm2, %v12789_v6, %v12790_v61  ;;  %v16576_v58 = vld [vmem:[%s14807_s17 + $0x40] sm:$0xff] }
 0x173   : > { %13082 = vrot.lane.b32.xlu0 %v15847_v41, %s14764_s18  ;;  %v1537_v1 = vsel %vm1501_vm2, %v12799_v2, %v12800_v11  ;;  %v1533_v41 = vsel %vm1501_vm2, %v12785_v34, %v12789_v6 }
 0x174   : > { %v12808_v52 = vpop.permute.xlu1 %12807  ;;  %v16455_v24 = vsel %vm1501_vm2, %v12794_v31, %v12795_v47 }
 0x175   : > { %v12810_v60 = vunpack.i.h.bf16 %v12808_v52  ;;  %v12809_v33 = vunpack.i.l.bf16 %v12808_v52  ;;  %v12803_v30 = vpop.permute.xlu0 %12802  ;;  %23147 = vst [vmem:[#allocation89_spill] sm:$0xff] %v16455_v24 }
 0x176   : > { %v12805_v45 = vunpack.i.h.bf16 %v12803_v30  ;;  %v12804_v50 = vunpack.i.l.bf16 %v12803_v30  ;;  %13097 = vrot.lane.b32.xlu1 %v15871_v63, %s14764_s18 }
 0x177   : > { %13092 = vrot.lane.b32.xlu0 %v15875_v29, %s14764_s18  ;;  %v16458_v0 = vsel %vm1501_vm2, %v12809_v33, %v12810_v60  ;;  %v1532_v29 = vsel %vm1501_vm2, %v12784_v48, %v12785_v34  ;;  %v1535_v60 = vsel %vm1501_vm2, %v12790_v61, %v12794_v31 }
 0x178   : > { %23148 = vst [vmem:[#allocation90_spill] sm:$0xff] %v16458_v0  ;;  %v12818_v36 = vpop.permute.xlu1 %12817  ;;  %v1538_v42 = vsel %vm1501_vm2, %v12800_v11, %v12804_v50  ;;  %v1539_v63 = vsel %vm1501_vm2, %v12804_v50, %v12805_v45  ;;  %v1540_v15 = vsel %vm1501_vm2, %v12805_v45, %v12809_v33  ;;  %v10604_v47 = vpack.c.bf16 %v1537_v1, %v1532_v29 }
 0x179   : > { %v12813_v2 = vpop.permute.xlu0 %12812  ;;  %v10602_v6 = vpack.c.bf16 %v1538_v42, %v1533_v41  ;;  %v16466_v52 = vpack.c.bf16 %v1539_v63, %v1534_v13  ;;  %v16473_v11 = vpack.c.bf16 %v1540_v15, %v1535_v60  ;;  %v12819_v33 = vunpack.i.l.bf16 %v12818_v36 }
 0x17a   : > { %13107 = vrot.lane.b32.xlu1 %v15890_v27, %s14764_s18  ;;  %v12815_v30 = vunpack.i.h.bf16 %v12813_v2  ;;  %v12814_v13 = vunpack.i.l.bf16 %v12813_v2 }
 0x17b   : > { %23149 = vst [vmem:[#allocation91_spill] sm:$0xff] %v16466_v52  ;;  %13102 = vrot.lane.b32.xlu0 %v15898_v46, %s14764_s18  ;;  %10603 = vmatprep.subr.bf16.mxu0 %v10602_v6  ;;  %23150 = vst [vmem:[#allocation92_spill] sm:$0xff] %v16473_v11  ;;  %v12820_v46 = vunpack.i.h.bf16 %v12818_v36 }
 0x17c   : > { %10923 = vmatprep.subr.bf16.mxu1 %v16466_v52  ;;  %10605 = vmatpush1.bf16.msra.mxu0 %v10604_v47  ;;  %v12828_v34 = vpop.permute.xlu1 %12827 }
 0x17d   : > { %10925 = vmatpush1.bf16.msra.mxu1 %v10602_v6  ;;  %v12823_v48 = vpop.permute.xlu0 %12822  ;;  %v12830_v27 = vunpack.i.h.bf16 %v12828_v34  ;;  %v12829_v45 = vunpack.i.l.bf16 %v12828_v34  ;;  %v14510_v34 = vld [vmem:[%s14807_s17 + $0x58] sm:$0xff] }
 0x17e   : > { %13117 = vrot.lane.b32.xlu1 %v15938_v26, %s14764_s18  ;;  %v12825_v31 = vunpack.i.h.bf16 %v12823_v48  ;;  %v12824_v61 = vunpack.i.l.bf16 %v12823_v48  ;;  %v1544_v26 = vsel %vm1501_vm2, %v12819_v33, %v12820_v46 }
 0x17f   : > { %13112 = vrot.lane.b32.xlu0 %v15948_v7, %s14764_s18  ;;  %v1547_v29 = vsel %vm1501_vm2, %v12829_v45, %v12830_v27  ;;  %v1543_v7 = vsel %vm1501_vm2, %v12815_v30, %v12819_v33 }
 0x180   : > { %v12838_v50 = vpop.permute.xlu1 %12837  ;;  %v16488_v36 = vsel %vm1501_vm2, %v12824_v61, %v12825_v31 }
 0x181   : > { %v12840_v1 = vunpack.i.h.bf16 %v12838_v50  ;;  %v12839_v41 = vunpack.i.l.bf16 %v12838_v50  ;;  %v12833_v42 = vpop.permute.xlu0 %12832  ;;  %23151 = vst [vmem:[#allocation93_spill] sm:$0xff] %v16488_v36  ;;  %v1545_v50 = vsel %vm1501_vm2, %v12820_v46, %v12824_v61 }
 0x182   : > { %v12835_v63 = vunpack.i.h.bf16 %v12833_v42  ;;  %v12834_v15 = vunpack.i.l.bf16 %v12833_v42  ;;  %13127 = vrot.lane.b32.xlu1 %v15972_v23, %s14764_s18 }
 0x183   : > { %13122 = vrot.lane.b32.xlu0 %v15976_v57, %s14764_s18  ;;  %v16491_v2 = vsel %vm1501_vm2, %v12839_v41, %v12840_v1  ;;  %v1542_v57 = vsel %vm1501_vm2, %v12814_v13, %v12815_v30 }
 0x184   : > { %23152 = vst [vmem:[#allocation94_spill] sm:$0xff] %v16491_v2  ;;  %v12848_v6 = vpop.permute.xlu1 %12847  ;;  %v1548_v47 = vsel %vm1501_vm2, %v12830_v27, %v12834_v15  ;;  %v1549_v23 = vsel %vm1501_vm2, %v12834_v15, %v12835_v63  ;;  %v1550_v60 = vsel %vm1501_vm2, %v12835_v63, %v12839_v41  ;;  %v10608_v31 = vpack.c.bf16 %v1547_v29, %v1542_v57 }
 0x185   : > { %v12843_v48 = vpop.permute.xlu0 %12842  ;;  %v10606_v33 = vpack.c.bf16 %v1548_v47, %v1543_v7  ;;  %v16499_v45 = vpack.c.bf16 %v1549_v23, %v1544_v26  ;;  %v16506_v27 = vpack.c.bf16 %v1550_v60, %v1545_v50  ;;  %v12849_v1 = vunpack.i.l.bf16 %v12848_v6 }
 0x186   : > { %13137 = vrot.lane.b32.xlu1 %v15987_v21, %s14764_s18  ;;  %v12845_v41 = vunpack.i.h.bf16 %v12843_v48  ;;  %v12844_v15 = vunpack.i.l.bf16 %v12843_v48 }
 0x187   : > { %23153 = vst [vmem:[#allocation95_spill] sm:$0xff] %v16499_v45  ;;  %13132 = vrot.lane.b32.xlu0 %v15991_v55, %s14764_s18  ;;  %10607 = vmatprep.subr.bf16.mxu0 %v10606_v33  ;;  %23154 = vst [vmem:[#allocation96_spill] sm:$0xff] %v16506_v27  ;;  %v12850_v55 = vunpack.i.h.bf16 %v12848_v6 }
 0x188   : > { %10927 = vmatprep.subr.bf16.mxu1 %v16499_v45  ;;  %10609 = vmatpush1.bf16.msra.mxu0 %v10608_v31  ;;  %v12858_v30 = vpop.permute.xlu1 %12857  ;;  %v1552_v50 = vsel %vm1501_vm2, %v12844_v15, %v12845_v41  ;;  %v14504_v15 = vld [vmem:[%s14807_s17 + $0x8] sm:$0xff] }
 0x189   : > { %10929 = vmatpush1.bf16.msra.mxu1 %v10606_v33  ;;  %v12853_v13 = vpop.permute.xlu0 %12852  ;;  %v12860_v21 = vunpack.i.h.bf16 %v12858_v30  ;;  %v12859_v42 = vunpack.i.l.bf16 %v12858_v30 }
 0x18a   : > { %13147 = vrot.lane.b32.xlu1 %v16034_v18, %s14764_s18  ;;  %v12855_v61 = vunpack.i.h.bf16 %v12853_v13  ;;  %v12854_v46 = vunpack.i.l.bf16 %v12853_v13  ;;  %v1554_v18 = vsel %vm1501_vm2, %v12849_v1, %v12850_v55 }
 0x18b   : > { %13142 = vrot.lane.b32.xlu0 %v16049_v62, %s14764_s18  ;;  %v1557_v60 = vsel %vm1501_vm2, %v12859_v42, %v12860_v21  ;;  %v1553_v62 = vsel %vm1501_vm2, %v12845_v41, %v12849_v1  ;;  %v16541_v42 = vld [vmem:[%s14807_s17 + $0x10] sm:$0xff]  ;;  %v14503_v41 = vld [vmem:[%s14807_s17] sm:$0xff] }
 0x18c   : > { %v12868_v63 = vpop.permute.xlu1 %12867  ;;  %v16521_v6 = vsel %vm1501_vm2, %v12854_v46, %v12855_v61  ;;  %v14502_v61 = vld [vmem:[%s14807_s17 + $0x18] sm:$0xff] }
 0x18d   : > { %v12870_v26 = vunpack.i.h.bf16 %v12868_v63  ;;  %v12869_v29 = vunpack.i.l.bf16 %v12868_v63  ;;  %v12863_v7 = vpop.permute.xlu0 %12862  ;;  %23155 = vst [vmem:[#allocation97_spill] sm:$0xff] %v16521_v6  ;;  %v13176_v63 = vpack.i.bf16 %v14502_v61, %v16541_v42 }
 0x18e   : > { %v12865_v47 = vunpack.i.h.bf16 %v12863_v7  ;;  %v12864_v23 = vunpack.i.l.bf16 %v12863_v7  ;;  %13157 = vrot.lane.b32.xlu1 %v16073_v53, %s14764_s18 }
 0x18f   : > { %13152 = vrot.lane.b32.xlu0 %v16077_v4, %s14764_s18  ;;  %v16524_v57 = vsel %vm1501_vm2, %v12869_v29, %v12870_v26  ;;  %v1555_v26 = vsel %vm1501_vm2, %v12850_v55, %v12854_v46  ;;  %v14509_v4 = vld [vmem:[%s14807_s17 + $0x50] sm:$0xff] }
 0x190   : > { %23156 = vst [vmem:[#allocation98_spill] sm:$0xff] %v16524_v57  ;;  %v16526_v48 = vpop.permute.xlu1 %12877  ;;  %v1558_v53 = vsel %vm1501_vm2, %v12860_v21, %v12864_v23  ;;  %v1559_v33 = vsel %vm1501_vm2, %v12864_v23, %v12865_v47  ;;  %v1560_v31 = vsel %vm1501_vm2, %v12865_v47, %v12869_v29  ;;  %v10612_v21 = vpack.c.bf16 %v1557_v60, %v1552_v50  ;;  %v16559_v47 = vld [vmem:[%s14807_s17 + $0x30] sm:$0xff]  ;;  %v16562_v23 = vld [vmem:[%s14807_s17 + $0x38] sm:$0xff]  ;;  %v14507_v60 = vld [vmem:[%s14807_s17 + $0x20] sm:$0xff] }
 0x191   : > { %v16534_v30 = vpop.permute.xlu0 %12872  ;;  %v10610_v13 = vpack.c.bf16 %v1558_v53, %v1553_v62  ;;  %v16536_v1 = vpack.c.bf16 %v1559_v33, %v1554_v18  ;;  %v16550_v29 = vpack.i.bf16 %v14504_v15, %v14503_v41  ;;  %v12879_v55 = vunpack.i.l.bf16 %v16526_v48  ;;  %v14508_v62 = vld [vmem:[%s14807_s17 + $0x28] sm:$0xff] }
 0x192   : > { %13167 = vrot.lane.b32.xlu1 %v16092_v38, %s14764_s18  ;;  %v16552_v38 = vpack.c.bf16 %v1560_v31, %v1555_v26  ;;  %v13186_v18 = vpack.i.bf16 %v16562_v23, %v16559_v47  ;;  %v13181_v53 = vpack.i.bf16 %v14508_v62, %v14507_v60  ;;  %v13196_v60 = vpack.i.bf16 %v14510_v34, %v14509_v4 }
 0x193   : > { %23157 = vst [vmem:[#allocation99_spill] sm:$0xff] %v16536_v1  ;;  %13162 = vrot.lane.b32.xlu0 %v16100_v16, %s14764_s18  ;;  %10611 = vmatprep.subr.bf16.mxu0 %v10610_v13  ;;  %v12875_v16 = vunpack.i.h.bf16 %v16534_v30  ;;  %s14767_s18 = smov 121  }
 0x194   : > { %23158 = vst [vmem:[#allocation100_spill] sm:$0xff] %v16552_v38  ;;  %10931 = vmatprep.subr.bf16.mxu1 %v16536_v1  ;;  %10613 = vmatpush1.bf16.msra.mxu0 %v10612_v21  ;;  %v12888_v7 = vpop.permute.xlu1 %12887  ;;  %v12880_v21 = vunpack.i.h.bf16 %v16526_v48 }
 0x195   : > { %10933 = vmatpush1.bf16.msra.mxu1 %v10610_v13  ;;  %v12883_v46 = vpop.permute.xlu0 %12882  ;;  %v12890_v33 = vunpack.i.h.bf16 %v12888_v7  ;;  %v12889_v31 = vunpack.i.l.bf16 %v12888_v7 }
 0x196   : > { %13177 = vrot.lane.b32.xlu1 %v13176_v63, %s14765_s11  ;;  %v12885_v50 = vunpack.i.h.bf16 %v12883_v46  ;;  %v12884_v13 = vunpack.i.l.bf16 %v12883_v46  ;;  %v12874_v63 = vunpack.i.l.bf16 %v16534_v30  ;;  %v14512_v46 = vld [vmem:[%s14807_s17 + $0x48] sm:$0xff]  ;;  %v1564_v48 = vsel %vm1501_vm2, %v12879_v55, %v12880_v21 }
 0x197   : > { %13172 = vrot.lane.b32.xlu0 %v16550_v29, %s14765_s11  ;;  %v13191_v37 = vpack.i.bf16 %v14512_v46, %v16576_v58  ;;  %v1567_v35 = vsel %vm1501_vm2, %v12889_v31, %v12890_v33  ;;  %v1563_v30 = vsel %vm1501_vm2, %v12875_v16, %v12879_v55  ;;  %v14524_v31 = vld [vmem:[%s14807_s17 + $0x1d8] sm:$0xff] }
 0x198   : > { %v12898_v61 = vpop.permute.xlu1 %12897 }
 0x199   : > { %v12900_v26 = vunpack.i.h.bf16 %v12898_v61  ;;  %v12899_v41 = vunpack.i.l.bf16 %v12898_v61  ;;  %v12893_v15 = vpop.permute.xlu0 %12892  ;;  %v16585_v61 = vsel %vm1501_vm2, %v12884_v13, %v12885_v50 }
 0x19a   : > { %v12895_v62 = vunpack.i.h.bf16 %v12893_v15  ;;  %v12894_v7 = vunpack.i.l.bf16 %v12893_v15  ;;  %13187 = vrot.lane.b32.xlu1 %v13186_v18, %s14765_s11  ;;  %23159 = vst [vmem:[#allocation101_spill] sm:$0xff] %v16585_v61 }
 0x19b   : > { %13182 = vrot.lane.b32.xlu0 %v13181_v53, %s14765_s11  ;;  %v16588_v34 = vsel %vm1501_vm2, %v12899_v41, %v12900_v26  ;;  %v1562_v53 = vsel %vm1501_vm2, %v12874_v63, %v12875_v16  ;;  %v1565_v26 = vsel %vm1501_vm2, %v12880_v21, %v12884_v13 }
 0x19c   : > { %23160 = vst [vmem:[#allocation102_spill] sm:$0xff] %v16588_v34  ;;  %v12908_v4 = vpop.permute.xlu1 %12907  ;;  %v1568_v18 = vsel %vm1501_vm2, %v12890_v33, %v12894_v7  ;;  %v1569_v15 = vsel %vm1501_vm2, %v12894_v7, %v12895_v62  ;;  %v1570_v46 = vsel %vm1501_vm2, %v12895_v62, %v12899_v41  ;;  %v10616_v50 = vpack.c.bf16 %v1567_v35, %v1562_v53 }
 0x19d   : > { %v12903_v6 = vpop.permute.xlu0 %12902  ;;  %v10614_v55 = vpack.c.bf16 %v1568_v18, %v1563_v30  ;;  %v16596_v57 = vpack.c.bf16 %v1569_v15, %v1564_v48  ;;  %v16601_v33 = vpack.c.bf16 %v1570_v46, %v1565_v26  ;;  %v12909_v63 = vunpack.i.l.bf16 %v12908_v4 }
 0x19e   : > { %13197 = vrot.lane.b32.xlu1 %v13196_v60, %s14765_s11  ;;  %v12905_v62 = vunpack.i.h.bf16 %v12903_v6  ;;  %v12904_v48 = vunpack.i.l.bf16 %v12903_v6 }
 0x19f   : > { %23161 = vst [vmem:[#allocation103_spill] sm:$0xff] %v16596_v57  ;;  %13192 = vrot.lane.b32.xlu0 %v13191_v37, %s14765_s11  ;;  %10615 = vmatprep.subr.bf16.mxu0 %v10614_v55  ;;  %23162 = vst [vmem:[#allocation104_spill] sm:$0xff] %v16601_v33  ;;  %v12910_v37 = vunpack.i.h.bf16 %v12908_v4 }
 0x1a0   : > { %10935 = vmatprep.subr.bf16.mxu1 %v16596_v57  ;;  %10617 = vmatpush1.bf16.msra.mxu0 %v10616_v50  ;;  %v12918_v41 = vpop.permute.xlu1 %12917  ;;  %v17054_v57 = vld [vmem:[%s14807_s17 + $0x2e0] sm:$0xff] }
 0x1a1   : > { %10937 = vmatpush1.bf16.msra.mxu1 %v10614_v55  ;;  %v12913_v16 = vpop.permute.xlu0 %12912  ;;  %v12920_v60 = vunpack.i.h.bf16 %v12918_v41  ;;  %v12919_v35 = vunpack.i.l.bf16 %v12918_v41 }
 0x1a2   : > { %13207 = vrot.lane.b32.xlu1 %v16206_v54, %s14765_s11  ;;  %v12915_v7 = vunpack.i.h.bf16 %v12913_v16  ;;  %v12914_v13 = vunpack.i.l.bf16 %v12913_v16  ;;  %v1574_v54 = vsel %vm1501_vm2, %v12909_v63, %v12910_v37  ;;  %v14523_v16 = vld [vmem:[%s14807_s17 + $0x1d0] sm:$0xff] }
 0x1a3   : > { %13202 = vrot.lane.b32.xlu0 %v16219_v39, %s14765_s11  ;;  %v1577_v55 = vsel %vm1501_vm2, %v12919_v35, %v12920_v60  ;;  %v1573_v39 = vsel %vm1501_vm2, %v12905_v62, %v12909_v63 }
 0x1a4   : > { %v12928_v21 = vpop.permute.xlu1 %12927  ;;  %v16616_v4 = vsel %vm1501_vm2, %v12914_v13, %v12915_v7 }
 0x1a5   : > { %v12930_v30 = vunpack.i.h.bf16 %v12928_v21  ;;  %v12929_v18 = vunpack.i.l.bf16 %v12928_v21  ;;  %v12923_v15 = vpop.permute.xlu0 %12922  ;;  %23163 = vst [vmem:[#allocation105_spill] sm:$0xff] %v16616_v4  ;;  %v16797_v4 = vld [vmem:[%s14807_s17 + $0x1c0] sm:$0xff] }
 0x1a6   : > { %v12925_v46 = vunpack.i.h.bf16 %v12923_v15  ;;  %v12924_v53 = vunpack.i.l.bf16 %v12923_v15  ;;  %13217 = vrot.lane.b32.xlu1 %v16241_v14, %s14765_s11 }
 0x1a7   : > { %13212 = vrot.lane.b32.xlu0 %v16245_v28, %s14765_s11  ;;  %v16619_v6 = vsel %vm1501_vm2, %v12929_v18, %v12930_v30  ;;  %v1572_v28 = vsel %vm1501_vm2, %v12904_v48, %v12905_v62  ;;  %v1575_v30 = vsel %vm1501_vm2, %v12910_v37, %v12914_v13  ;;  %v4342_v48 = vld [vmem:[%s22628_s1 + $0x10] sm:$0xff] }
 0x1a8   : > { %23164 = vst [vmem:[#allocation106_spill] sm:$0xff] %v16619_v6  ;;  %v16621_v50 = vpop.permute.xlu1 %12937  ;;  %v1578_v26 = vsel %vm1501_vm2, %v12920_v60, %v12924_v53  ;;  %v1579_v14 = vsel %vm1501_vm2, %v12924_v53, %v12925_v46  ;;  %v1580_v41 = vsel %vm1501_vm2, %v12925_v46, %v12929_v18  ;;  %v10620_v21 = vpack.c.bf16 %v1577_v55, %v1572_v28  ;;  %v10013_v13 = vld [vmem:[%s22628_s1 + $0x510] sm:$0xff] }
 0x1a9   : > { %v12933_v63 = vpop.permute.xlu0 %12932  ;;  %v10618_v35 = vpack.c.bf16 %v1578_v26, %v1573_v39  ;;  %v16629_v7 = vpack.c.bf16 %v1579_v14, %v1574_v54  ;;  %v16636_v60 = vpack.c.bf16 %v1580_v41, %v1575_v30  ;;  %v12940_v54 = vunpack.i.h.bf16 %v16621_v50 }
 0x1aa   : > { %13227 = vrot.lane.b32.xlu1 %v16253_v12, %s14765_s11  ;;  %v12935_v37 = vunpack.i.h.bf16 %v12933_v63  ;;  %v12934_v39 = vunpack.i.l.bf16 %v12933_v63  ;;  %v4352_v63 = vld [vmem:[%s22628_s1 + $0x60] sm:$0xff] }
 0x1ab   : > { %23165 = vst [vmem:[#allocation107_spill] sm:$0xff] %v16629_v7  ;;  %13222 = vrot.lane.b32.xlu0 %v16259_v43, %s14765_s11  ;;  %10619 = vmatprep.subr.bf16.mxu0 %v10618_v35  ;;  %23166 = vst [vmem:[#allocation108_spill] sm:$0xff] %v16636_v60  ;;  %v12939_v43 = vunpack.i.l.bf16 %v16621_v50 }
 0x1ac   : > { %10939 = vmatprep.subr.bf16.mxu1 %v16629_v7  ;;  %10621 = vmatpush1.bf16.msra.mxu0 %v10620_v21  ;;  %v12948_v62 = vpop.permute.xlu1 %12947 }
 0x1ad   : > { %10941 = vmatpush1.bf16.msra.mxu1 %v10618_v35  ;;  %v12943_v12 = vpop.permute.xlu0 %12942  ;;  %v12950_v18 = vunpack.i.h.bf16 %v12948_v62  ;;  %v12949_v15 = vunpack.i.l.bf16 %v12948_v62  ;;  %v1937_v21 = vsel %vm1934_vm3, %v12939_v43, %v12940_v54 }
 0x1ae   : > { %13237 = vrot.lane.b32.xlu1 %v16288_v10, %s14765_s11  ;;  %v12945_v46 = vunpack.i.h.bf16 %v12943_v12  ;;  %v12944_v53 = vunpack.i.l.bf16 %v12943_v12  ;;  %v1936_v10 = vsel %vm1934_vm3, %v12935_v37, %v12939_v43  ;;  %v1935_v43 = vsel %vm1934_vm3, %v12934_v39, %v12935_v37  ;;  %v4362_v37 = vld [vmem:[%s22628_s1 + $0xb0] sm:$0xff] }
 0x1af   : > { %13232 = vrot.lane.b32.xlu0 %v16295_v22, %s14765_s11  ;;  %5044 = vmatmul.mubr.f32.vlgmr.msra.gmra.mrb[32].mxu0 %v4342_v48  ;;  %v4353_v22 = vld [vmem:[%s22628_s1 + $0x68] sm:$0xff]  ;;  %v1940_v50 = vsel %vm1934_vm3, %v12949_v15, %v12950_v18 }
 0x1b0   : > { %v12958_v55 = vpop.permute.xlu1 %12957  ;;  %6465 = vmatmul.mubr.f32.vlgmr.msra.gmra.mrb[32].mxu1 %v10013_v13  ;;  %5048 = vmatprep.mubr.f32.mxu0 %v4353_v22  ;;  %v4372_v22 = vld [vmem:[%s22628_s1 + $0x100] sm:$0xff]  ;;  %v16745_v13 = vld [vmem:[%s14807_s17 + $0x190] sm:$0xff] }
 0x1b1   : > { %v12960_v26 = vunpack.i.h.bf16 %v12958_v55  ;;  %v12959_v14 = vunpack.i.l.bf16 %v12958_v55  ;;  %v12953_v41 = vpop.permute.xlu0 %12952 }
 0x1b2   : > { %v12955_v28 = vunpack.i.h.bf16 %v12953_v41  ;;  %v12954_v35 = vunpack.i.l.bf16 %v12953_v41  ;;  %13247 = vrot.lane.b32.xlu1 %v16306_v49, %s14765_s11  ;;  %v16665_v49 = vsel %vm1934_vm3, %v12944_v53, %v12945_v46  ;;  %v1938_v41 = vsel %vm1934_vm3, %v12940_v54, %v12944_v53 }
 0x1b3   : > { %13242 = vrot.lane.b32.xlu0 %v16310_v5, %s14765_s11  ;;  %23167 = vst [vmem:[#allocation109_spill] sm:$0xff] %v16665_v49  ;;  %v16668_v30 = vsel %vm1934_vm3, %v12959_v14, %v12960_v26  ;;  %5049 = vmatmul.mubr.f32.gmra.mrb[34].mxu0 %v4352_v63  ;;  %v10624_v26 = vpack.c.bf16 %v1940_v50, %v1935_v43  ;;  %v16707_v43 = vld [vmem:[%s14807_s17 + $0x160] sm:$0xff] }
 0x1b4   : > { %23168 = vst [vmem:[#allocation110_spill] sm:$0xff] %v16668_v30  ;;  %v16670_v62 = vpop.permute.xlu1 %12967  ;;  %v1941_v48 = vsel %vm1934_vm3, %v12950_v18, %v12954_v35  ;;  %v1942_v12 = vsel %vm1934_vm3, %v12954_v35, %v12955_v28  ;;  %v1943_v5 = vsel %vm1934_vm3, %v12955_v28, %v12959_v14  ;;  %v4363_v18 = vld [vmem:[%s22628_s1 + $0xb8] sm:$0xff] }
 0x1b5   : > { %v12963_v15 = vpop.permute.xlu0 %12962  ;;  %v10622_v46 = vpack.c.bf16 %v1941_v48, %v1936_v10  ;;  %v16678_v55 = vpack.c.bf16 %v1942_v12, %v1937_v21  ;;  %v16691_v39 = vpack.c.bf16 %v1943_v5, %v1938_v41  ;;  %5053 = vmatprep.mubr.f32.mxu0 %v4363_v18  ;;  %v12969_v28 = vunpack.i.l.bf16 %v16670_v62 }
 0x1b6   : > { %13257 = vrot.lane.b32.xlu1 %v16318_v25, %s14765_s11  ;;  %v12965_v53 = vunpack.i.h.bf16 %v12963_v15  ;;  %v12964_v63 = vunpack.i.l.bf16 %v12963_v15 }
 0x1b7   : > { %23169 = vst [vmem:[#allocation111_spill] sm:$0xff] %v16678_v55  ;;  %13252 = vrot.lane.b32.xlu0 %v16324_v3, %s14765_s11  ;;  %10623 = vmatprep.subr.bf16.mxu0 %v10622_v46  ;;  %23170 = vst [vmem:[#allocation112_spill] sm:$0xff] %v16691_v39  ;;  %v4373_v3 = vld [vmem:[%s22628_s1 + $0x108] sm:$0xff] }
 0x1b8   : > { %10943 = vmatprep.subr.bf16.mxu1 %v16678_v55  ;;  %10625 = vmatpush1.bf16.msra.mxu0 %v10624_v26  ;;  %v12978_v25 = vpop.permute.xlu1 %12977 }
 0x1b9   : > { %10945 = vmatpush1.bf16.msra.mxu1 %v10622_v46  ;;  %v12973_v14 = vpop.permute.xlu0 %12972  ;;  %5054 = vmatmul.mubr.f32.gmra.mrb[4].mxu0 %v4362_v37  ;;  %v12980_v54 = vunpack.i.h.bf16 %v12978_v25  ;;  %v12979_v35 = vunpack.i.l.bf16 %v12978_v25  ;;  %v14514_v46 = vld [vmem:[%s14807_s17 + $0x168] sm:$0xff]  ;;  %v1946_v37 = vsel %vm1934_vm3, %v12965_v53, %v12969_v28 }
 0x1ba   : > { %13267 = vrot.lane.b32.xlu1 %v16351_v44, %s14765_s11  ;;  %v12975_v10 = vunpack.i.h.bf16 %v12973_v14  ;;  %v12974_v21 = vunpack.i.l.bf16 %v12973_v14  ;;  %5059 = vmatprep.mubr.f32.mxu0 %v4373_v3  ;;  %v12970_v44 = vunpack.i.h.bf16 %v16670_v62  ;;  %v13281_v26 = vpack.i.bf16 %v14514_v46, %v16707_v43  ;;  %v4383_v62 = vld [vmem:[%s22628_s1 + $0x158] sm:$0xff]  ;;  %v23172_v14 = vld [vmem:[#allocation80_spill] sm:$0xff]  ;;  %v4382_v3 = vld [vmem:[%s22628_s1 + $0x150] sm:$0xff] }
 0x1bb   : > { %13262 = vrot.lane.b32.xlu0 %v16358_v51, %s14765_s11  ;;  %v23171_v51 = vld [vmem:[#allocation79_spill] sm:$0xff]  ;;  %v1950_v15 = vsel %vm1934_vm3, %v12979_v35, %v12980_v54 }
 0x1bc   : > { %v12988_v50 = vpop.permute.xlu1 %12987  ;;  %v1947_v25 = vsel %vm1934_vm3, %v12969_v28, %v12970_v44 }
 0x1bd   : > { %v12990_v48 = vunpack.i.h.bf16 %v12988_v50  ;;  %v12989_v12 = vunpack.i.l.bf16 %v12988_v50  ;;  %v12983_v5 = vpop.permute.xlu0 %12982  ;;  %5060 = vmatmul.mubr.f32.gmra.mrb[6].mxu0 %v4372_v22  ;;  %v16725_v50 = vsel %vm1934_vm3, %v12974_v21, %v12975_v10 }
 0x1be   : > { %v12985_v18 = vunpack.i.h.bf16 %v12983_v5  ;;  %v12984_v41 = vunpack.i.l.bf16 %v12983_v5  ;;  %13277 = vrot.lane.b32.xlu1 %v23171_v51, %s14765_s11  ;;  %5065 = vmatprep.mubr.f32.mxu0 %v4383_v62  ;;  %23173 = vst [vmem:[#allocation79_spill] sm:$0xff] %v16725_v50  ;;  %v1945_v62 = vsel %vm1934_vm3, %v12964_v63, %v12965_v53  ;;  %v1948_v53 = vsel %vm1934_vm3, %v12970_v44, %v12974_v21  ;;  %v16755_v63 = vld [vmem:[%s14807_s17 + $0x180] sm:$0xff] }
 0x1bf   : > { %13272 = vrot.lane.b32.xlu0 %v23172_v14, %s14765_s11  ;;  %v16728_v28 = vsel %vm1934_vm3, %v12989_v12, %v12990_v48  ;;  %v13316_v50 = vpack.i.bf16 %v14524_v31, %v14523_v16  ;;  %v4413_v31 = vld [vmem:[%s22628_s1 + $0x248] sm:$0xff] }
 0x1c0   : > { %23174 = vst [vmem:[#allocation80_spill] sm:$0xff] %v16728_v28  ;;  %v16730_v22 = vpop.permute.xlu1 %12997  ;;  %v1951_v35 = vsel %vm1934_vm3, %v12980_v54, %v12984_v41  ;;  %v1952_v5 = vsel %vm1934_vm3, %v12984_v41, %v12985_v18  ;;  %v1953_v46 = vsel %vm1934_vm3, %v12985_v18, %v12989_v12  ;;  %v10628_v54 = vpack.c.bf16 %v1950_v15, %v1945_v62  ;;  %v14516_v41 = vld [vmem:[%s14807_s17 + $0x198] sm:$0xff]  ;;  %v4393_v18 = vld [vmem:[%s22628_s1 + $0x1a8] sm:$0xff]  ;;  %v14521_v62 = vld [vmem:[%s14807_s17 + $0x1a0] sm:$0xff] }
 0x1c1   : > { %v16738_v10 = vpop.permute.xlu0 %12992  ;;  %v10626_v14 = vpack.c.bf16 %v1951_v35, %v1946_v37  ;;  %v16740_v48 = vpack.c.bf16 %v1952_v5, %v1947_v25  ;;  %v13296_v12 = vpack.i.bf16 %v14516_v41, %v16745_v13  ;;  %5066 = vmatmul.mubr.f32.gmra.mrb[8].mxu0 %v4382_v3  ;;  %v4392_v25 = vld [vmem:[%s22628_s1 + $0x1a0] sm:$0xff]  ;;  %v16765_v15 = vpack.c.bf16 %v1953_v46, %v1948_v53  ;;  %v16774_v35 = vld [vmem:[%s14807_s17 + $0x1b0] sm:$0xff]  ;;  %v16777_v5 = vld [vmem:[%s14807_s17 + $0x1b8] sm:$0xff] }
 0x1c2   : > { %13287 = vrot.lane.b32.xlu1 %v16379_v17, %s14765_s11  ;;  %v16758_v17 = vld [vmem:[%s14807_s17 + $0x188] sm:$0xff]  ;;  %5071 = vmatprep.mubr.f32.mxu0 %v4393_v18  ;;  %v12995_v3 = vunpack.i.h.bf16 %v16738_v10  ;;  %v13306_v46 = vpack.i.bf16 %v16777_v5, %v16774_v35  ;;  %v4403_v41 = vld [vmem:[%s22628_s1 + $0x1f8] sm:$0xff] }
 0x1c3   : > { %23175 = vst [vmem:[#allocation113_spill] sm:$0xff] %v16740_v48  ;;  %13282 = vrot.lane.b32.xlu0 %v13281_v26, %s14765_s11  ;;  %10627 = vmatprep.subr.bf16.mxu0 %v10626_v14  ;;  %v13291_v37 = vpack.i.bf16 %v16758_v17, %v16755_v63  ;;  %23176 = vst [vmem:[#allocation114_spill] sm:$0xff] %v16765_v15  ;;  %v12999_v26 = vunpack.i.l.bf16 %v16730_v22 }
 0x1c4   : > { %10947 = vmatprep.subr.bf16.mxu1 %v16740_v48  ;;  %10629 = vmatpush1.bf16.msra.mxu0 %v10628_v54  ;;  %v13008_v21 = vpop.permute.xlu1 %13007  ;;  %v16971_v48 = vld [vmem:[%s14807_s17 + $0x280] sm:$0xff] }
 0x1c5   : > { %10949 = vmatpush1.bf16.msra.mxu1 %v10626_v14  ;;  %v16768_v44 = vpop.permute.xlu0 %13002  ;;  %v14522_v14 = vld [vmem:[%s14807_s17 + $0x1a8] sm:$0xff]  ;;  %5072 = vmatmul.mubr.f32.gmra.mrb[10].mxu0 %v4392_v25  ;;  %v13010_v18 = vunpack.i.h.bf16 %v13008_v21  ;;  %v13000_v25 = vunpack.i.h.bf16 %v16730_v22  ;;  %v1956_v22 = vsel %vm1934_vm3, %v12995_v3, %v12999_v26 }
 0x1c6   : > { %13297 = vrot.lane.b32.xlu1 %v13296_v12, %s14765_s11  ;;  %v13301_v54 = vpack.i.bf16 %v14522_v14, %v14521_v62  ;;  %v13009_v12 = vunpack.i.l.bf16 %v13008_v21  ;;  %v13005_v53 = vunpack.i.h.bf16 %v16768_v44  ;;  %v13004_v51 = vunpack.i.l.bf16 %v16768_v44  ;;  %5077 = vmatprep.mubr.f32.mxu0 %v4403_v41  ;;  %v4402_v62 = vld [vmem:[%s22628_s1 + $0x1f0] sm:$0xff]  ;;  %v14526_v44 = vld [vmem:[%s14807_s17 + $0x1c8] sm:$0xff] }
 0x1c7   : > { %13292 = vrot.lane.b32.xlu0 %v13291_v37, %s14765_s11  ;;  %v12994_v21 = vunpack.i.l.bf16 %v16738_v10  ;;  %v13311_v37 = vpack.i.bf16 %v14526_v44, %v16797_v4  ;;  %v1957_v61 = vsel %vm1934_vm3, %v12999_v26, %v13000_v25 }
 0x1c8   : > { %v13018_v14 = vpop.permute.xlu1 %13017  ;;  %v1960_v16 = vsel %vm1934_vm3, %v13009_v12, %v13010_v18  ;;  %v16813_v10 = vsel %vm1934_vm3, %v13004_v51, %v13005_v53 }
 0x1c9   : > { %v13020_v28 = vunpack.i.h.bf16 %v13018_v14  ;;  %v13019_v49 = vunpack.i.l.bf16 %v13018_v14  ;;  %v13013_v30 = vpop.permute.xlu0 %13012  ;;  %5078 = vmatmul.mubr.f32.gmra.mrb[12].mxu0 %v4402_v62  ;;  %23177 = vst [vmem:[#allocation115_spill] sm:$0xff] %v16813_v10  ;;  %v1955_v44 = vsel %vm1934_vm3, %v12994_v21, %v12995_v3  ;;  %v1958_v3 = vsel %vm1934_vm3, %v13000_v25, %v13004_v51  ;;  %v14535_v10 = vld [vmem:[%s14807_s17 + $0x230] sm:$0xff] }
 0x1ca   : > { %v13015_v41 = vunpack.i.h.bf16 %v13013_v30  ;;  %v13014_v6 = vunpack.i.l.bf16 %v13013_v30  ;;  %13307 = vrot.lane.b32.xlu1 %v13306_v46, %s14765_s11  ;;  %5083 = vmatprep.mubr.f32.mxu0 %v4413_v31  ;;  %v4412_v30 = vld [vmem:[%s22628_s1 + $0x240] sm:$0xff]  ;;  %v10632_v34 = vpack.c.bf16 %v1960_v16, %v1955_v44  ;;  %v14534_v44 = vld [vmem:[%s14807_s17 + $0x208] sm:$0xff] }
 0x1cb   : > { %13302 = vrot.lane.b32.xlu0 %v13301_v54, %s14765_s11  ;;  %v16816_v26 = vsel %vm1934_vm3, %v13019_v49, %v13020_v28 }
 0x1cc   : > { %23178 = vst [vmem:[#allocation116_spill] sm:$0xff] %v16816_v26  ;;  %v16818_v46 = vpop.permute.xlu1 %13027  ;;  %v1961_v62 = vsel %vm1934_vm3, %v13010_v18, %v13014_v6  ;;  %v1962_v12 = vsel %vm1934_vm3, %v13014_v6, %v13015_v41  ;;  %v1963_v54 = vsel %vm1934_vm3, %v13015_v41, %v13019_v49  ;;  %v16832_v18 = vld [vmem:[%s14807_s17 + $0x1f0] sm:$0xff]  ;;  %v14528_v6 = vld [vmem:[%s14807_s17 + $0x1f8] sm:$0xff] }
 0x1cd   : > { %v16826_v53 = vpop.permute.xlu0 %13022  ;;  %v10630_v31 = vpack.c.bf16 %v1961_v62, %v1956_v22  ;;  %v16828_v28 = vpack.c.bf16 %v1962_v12, %v1957_v61  ;;  %v13326_v49 = vpack.i.bf16 %v14528_v6, %v16832_v18  ;;  %5084 = vmatmul.mubr.f32.gmra.mrb[14].mxu0 %v4412_v30  ;;  %v4423_v41 = vld [vmem:[%s22628_s1 + $0x298] sm:$0xff]  ;;  %v16842_v61 = vld [vmem:[%s14807_s17 + $0x1e0] sm:$0xff]  ;;  %v4422_v22 = vld [vmem:[%s22628_s1 + $0x290] sm:$0xff]  ;;  %v16852_v16 = vpack.c.bf16 %v1963_v54, %v1958_v3 }
 0x1ce   : > { %13317 = vrot.lane.b32.xlu1 %v13316_v50, %s14765_s11  ;;  %v16845_v50 = vld [vmem:[%s14807_s17 + $0x1e8] sm:$0xff]  ;;  %5089 = vmatprep.mubr.f32.mxu0 %v4423_v41  ;;  %v13025_v30 = vunpack.i.h.bf16 %v16826_v53  ;;  %v16861_v62 = vld [vmem:[%s14807_s17 + $0x210] sm:$0xff]  ;;  %v16864_v12 = vld [vmem:[%s14807_s17 + $0x218] sm:$0xff] }
 0x1cf   : > { %23179 = vst [vmem:[#allocation117_spill] sm:$0xff] %v16828_v28  ;;  %13312 = vrot.lane.b32.xlu0 %v13311_v37, %s14765_s11  ;;  %10631 = vmatprep.subr.bf16.mxu0 %v10630_v31  ;;  %v13321_v21 = vpack.i.bf16 %v16845_v50, %v16842_v61  ;;  %23180 = vst [vmem:[#allocation118_spill] sm:$0xff] %v16852_v16  ;;  %v13029_v37 = vunpack.i.l.bf16 %v16818_v46  ;;  %v13336_v54 = vpack.i.bf16 %v16864_v12, %v16861_v62  ;;  %v4433_v6 = vld [vmem:[%s22628_s1 + $0x2e8] sm:$0xff]  ;;  %v14536_v26 = vld [vmem:[%s14807_s17 + $0x238] sm:$0xff] }
 0x1d0   : > { %10951 = vmatprep.subr.bf16.mxu1 %v16828_v28  ;;  %10633 = vmatpush1.bf16.msra.mxu0 %v10632_v34  ;;  %v13038_v51 = vpop.permute.xlu1 %13037  ;;  %v14533_v34 = vld [vmem:[%s14807_s17 + $0x200] sm:$0xff]  ;;  %v13346_v36 = vpack.i.bf16 %v14536_v26, %v14535_v10  ;;  %v4443_v10 = vld [vmem:[%s22628_s1 + $0x338] sm:$0xff] }
 0x1d1   : > { %10953 = vmatpush1.bf16.msra.mxu1 %v10630_v31  ;;  %v16855_v25 = vpop.permute.xlu0 %13032  ;;  %v13331_v31 = vpack.i.bf16 %v14534_v44, %v14533_v34  ;;  %5090 = vmatmul.mubr.f32.gmra.mrb[16].mxu0 %v4422_v22  ;;  %v13040_v41 = vunpack.i.h.bf16 %v13038_v51  ;;  %v4432_v34 = vld [vmem:[%s22628_s1 + $0x2e0] sm:$0xff]  ;;  %v13030_v22 = vunpack.i.h.bf16 %v16818_v46  ;;  %v1966_v46 = vsel %vm1934_vm3, %v13025_v30, %v13029_v37 }
 0x1d2   : > { %13327 = vrot.lane.b32.xlu1 %v13326_v49, %s14765_s11  ;;  %v13039_v49 = vunpack.i.l.bf16 %v13038_v51  ;;  %v13035_v3 = vunpack.i.h.bf16 %v16855_v25  ;;  %v13034_v14 = vunpack.i.l.bf16 %v16855_v25  ;;  %5095 = vmatprep.mubr.f32.mxu0 %v4433_v6  ;;  %v13024_v51 = vunpack.i.l.bf16 %v16826_v53  ;;  %v14538_v25 = vld [vmem:[%s14807_s17 + $0x228] sm:$0xff] }
 0x1d3   : > { %13322 = vrot.lane.b32.xlu0 %v13321_v21, %s14765_s11  ;;  %v13341_v21 = vpack.i.bf16 %v14538_v25, %v16884_v20  ;;  %v1967_v9 = vsel %vm1934_vm3, %v13029_v37, %v13030_v22 }
 0x1d4   : > { %v13048_v44 = vpop.permute.xlu1 %13047  ;;  %v1970_v26 = vsel %vm1934_vm3, %v13039_v49, %v13040_v41  ;;  %v16900_v53 = vsel %vm1934_vm3, %v13034_v14, %v13035_v3  ;;  %v1965_v25 = vsel %vm1934_vm3, %v13024_v51, %v13025_v30  ;;  %v1968_v30 = vsel %vm1934_vm3, %v13030_v22, %v13034_v14 }
 0x1d5   : > { %v13050_v2 = vunpack.i.h.bf16 %v13048_v44  ;;  %v13049_v24 = vunpack.i.l.bf16 %v13048_v44  ;;  %v13043_v0 = vpop.permute.xlu0 %13042  ;;  %5096 = vmatmul.mubr.f32.gmra.mrb[18].mxu0 %v4432_v34  ;;  %23181 = vst [vmem:[#allocation119_spill] sm:$0xff] %v16900_v53  ;;  %v10636_v8 = vpack.c.bf16 %v1970_v26, %v1965_v25  ;;  %v14546_v25 = vld [vmem:[%s14807_s17 + $0x268] sm:$0xff]  ;;  %v14547_v53 = vld [vmem:[%s14807_s17 + $0x290] sm:$0xff] }
 0x1d6   : > { %v13045_v6 = vunpack.i.h.bf16 %v13043_v0  ;;  %v13044_v59 = vunpack.i.l.bf16 %v13043_v0  ;;  %13337 = vrot.lane.b32.xlu1 %v13336_v54, %s14765_s11  ;;  %5101 = vmatprep.mubr.f32.mxu0 %v4443_v10  ;;  %v4442_v0 = vld [vmem:[%s22628_s1 + $0x330] sm:$0xff] }
 0x1d7   : > { %13332 = vrot.lane.b32.xlu0 %v13331_v31, %s14765_s11  ;;  %v16903_v37 = vsel %vm1934_vm3, %v13049_v24, %v13050_v2 }
 0x1d8   : > { %23182 = vst [vmem:[#allocation120_spill] sm:$0xff] %v16903_v37  ;;  %v16905_v54 = vpop.permute.xlu1 %13057  ;;  %v1971_v34 = vsel %vm1934_vm3, %v13040_v41, %v13044_v59  ;;  %v1972_v49 = vsel %vm1934_vm3, %v13044_v59, %v13045_v6  ;;  %v1973_v31 = vsel %vm1934_vm3, %v13045_v6, %v13049_v24  ;;  %v16919_v41 = vld [vmem:[%s14807_s17 + $0x250] sm:$0xff]  ;;  %v14540_v59 = vld [vmem:[%s14807_s17 + $0x258] sm:$0xff]  ;;  %v4453_v6 = vld [vmem:[%s22628_s1 + $0x388] sm:$0xff] }
 0x1d9   : > { %v16913_v3 = vpop.permute.xlu0 %13052  ;;  %v10634_v10 = vpack.c.bf16 %v1971_v34, %v1966_v46  ;;  %v16915_v2 = vpack.c.bf16 %v1972_v49, %v1967_v9  ;;  %v13356_v24 = vpack.i.bf16 %v14540_v59, %v16919_v41  ;;  %5102 = vmatmul.mubr.f32.gmra.mrb[20].mxu0 %v4442_v0  ;;  %v16929_v9 = vld [vmem:[%s14807_s17 + $0x240] sm:$0xff]  ;;  %v16939_v26 = vpack.c.bf16 %v1973_v31, %v1968_v30  ;;  %v16948_v34 = vld [vmem:[%s14807_s17 + $0x270] sm:$0xff]  ;;  %v16951_v49 = vld [vmem:[%s14807_s17 + $0x278] sm:$0xff] }
 0x1da   : > { %13347 = vrot.lane.b32.xlu1 %v13346_v36, %s14765_s11  ;;  %v16932_v36 = vld [vmem:[%s14807_s17 + $0x248] sm:$0xff]  ;;  %v4452_v46 = vld [vmem:[%s22628_s1 + $0x380] sm:$0xff]  ;;  %5107 = vmatprep.mubr.f32.mxu0 %v4453_v6  ;;  %v13055_v0 = vunpack.i.h.bf16 %v16913_v3  ;;  %v13366_v31 = vpack.i.bf16 %v16951_v49, %v16948_v34  ;;  %v4463_v59 = vld [vmem:[%s22628_s1 + $0x3d8] sm:$0xff] }
 0x1db   : > { %23183 = vst [vmem:[#allocation121_spill] sm:$0xff] %v16915_v2  ;;  %13342 = vrot.lane.b32.xlu0 %v13341_v21, %s14765_s11  ;;  %10635 = vmatprep.subr.bf16.mxu0 %v10634_v10  ;;  %v13351_v51 = vpack.i.bf16 %v16932_v36, %v16929_v9  ;;  %23184 = vst [vmem:[#allocation122_spill] sm:$0xff] %v16939_v26  ;;  %v13059_v21 = vunpack.i.l.bf16 %v16905_v54  ;;  %v14548_v37 = vld [vmem:[%s14807_s17 + $0x298] sm:$0xff] }
 0x1dc   : > { %10955 = vmatprep.subr.bf16.mxu1 %v16915_v2  ;;  %10637 = vmatpush1.bf16.msra.mxu0 %v10636_v8  ;;  %v13068_v14 = vpop.permute.xlu1 %13067  ;;  %v14545_v8 = vld [vmem:[%s14807_s17 + $0x260] sm:$0xff]  ;;  %v13376_v2 = vpack.i.bf16 %v14548_v37, %v14547_v53  ;;  %v4473_v53 = vld [vmem:[%s22628_s1 + $0x428] sm:$0xff] }
 0x1dd   : > { %10957 = vmatpush1.bf16.msra.mxu1 %v10634_v10  ;;  %v16942_v22 = vpop.permute.xlu0 %13062  ;;  %v13361_v10 = vpack.i.bf16 %v14546_v25, %v14545_v8  ;;  %5108 = vmatmul.mubr.f32.gmra.mrb[22].mxu0 %v4452_v46  ;;  %v13070_v6 = vunpack.i.h.bf16 %v13068_v14  ;;  %v4462_v8 = vld [vmem:[%s22628_s1 + $0x3d0] sm:$0xff]  ;;  %v13060_v46 = vunpack.i.h.bf16 %v16905_v54  ;;  %v1976_v54 = vsel %vm1934_vm3, %v13055_v0, %v13059_v21 }
 0x1de   : > { %13357 = vrot.lane.b32.xlu1 %v13356_v24, %s14765_s11  ;;  %v13069_v24 = vunpack.i.l.bf16 %v13068_v14  ;;  %v13065_v30 = vunpack.i.h.bf16 %v16942_v22  ;;  %v13064_v44 = vunpack.i.l.bf16 %v16942_v22  ;;  %5113 = vmatprep.mubr.f32.mxu0 %v4463_v59  ;;  %v13054_v14 = vunpack.i.l.bf16 %v16913_v3  ;;  %v14550_v22 = vld [vmem:[%s14807_s17 + $0x288] sm:$0xff] }
 0x1df   : > { %13352 = vrot.lane.b32.xlu0 %v13351_v51, %s14765_s11  ;;  %v13371_v51 = vpack.i.bf16 %v14550_v22, %v16971_v48  ;;  %v1977_v55 = vsel %vm1934_vm3, %v13059_v21, %v13060_v46 }
 0x1e0   : > { %v13078_v25 = vpop.permute.xlu1 %13077  ;;  %v1980_v37 = vsel %vm1934_vm3, %v13069_v24, %v13070_v6  ;;  %v16987_v3 = vsel %vm1934_vm3, %v13064_v44, %v13065_v30  ;;  %v1975_v22 = vsel %vm1934_vm3, %v13054_v14, %v13055_v0  ;;  %v1978_v0 = vsel %vm1934_vm3, %v13060_v46, %v13064_v44 }
 0x1e1   : > { %v13080_v26 = vunpack.i.h.bf16 %v13078_v25  ;;  %v13079_v28 = vunpack.i.l.bf16 %v13078_v25  ;;  %v13073_v16 = vpop.permute.xlu0 %13072  ;;  %5114 = vmatmul.mubr.f32.gmra.mrb[24].mxu0 %v4462_v8  ;;  %23185 = vst [vmem:[#allocation123_spill] sm:$0xff] %v16987_v3  ;;  %v10640_v39 = vpack.c.bf16 %v1980_v37, %v1975_v22  ;;  %v14558_v22 = vld [vmem:[%s14807_s17 + $0x2c8] sm:$0xff]  ;;  %v4492_v3 = vld [vmem:[%s22628_s1 + $0x4c0] sm:$0xff] }
 0x1e2   : > { %v13075_v59 = vunpack.i.h.bf16 %v13073_v16  ;;  %v13074_v15 = vunpack.i.l.bf16 %v13073_v16  ;;  %13367 = vrot.lane.b32.xlu1 %v13366_v31, %s14765_s11  ;;  %5119 = vmatprep.mubr.f32.mxu0 %v4473_v53  ;;  %v4472_v16 = vld [vmem:[%s22628_s1 + $0x420] sm:$0xff] }
 0x1e3   : > { %13362 = vrot.lane.b32.xlu0 %v13361_v10, %s14765_s11  ;;  %v16990_v21 = vsel %vm1934_vm3, %v13079_v28, %v13080_v26 }
 0x1e4   : > { %23186 = vst [vmem:[#allocation124_spill] sm:$0xff] %v16990_v21  ;;  %v16992_v31 = vpop.permute.xlu1 %13087  ;;  %v1981_v8 = vsel %vm1934_vm3, %v13070_v6, %v13074_v15  ;;  %v1982_v24 = vsel %vm1934_vm3, %v13074_v15, %v13075_v59  ;;  %v1983_v10 = vsel %vm1934_vm3, %v13075_v59, %v13079_v28  ;;  %v17006_v6 = vld [vmem:[%s14807_s17 + $0x2b0] sm:$0xff]  ;;  %v14552_v15 = vld [vmem:[%s14807_s17 + $0x2b8] sm:$0xff] }
 0x1e5   : > { %v17000_v30 = vpop.permute.xlu0 %13082  ;;  %v10638_v53 = vpack.c.bf16 %v1981_v8, %v1976_v54  ;;  %v17002_v26 = vpack.c.bf16 %v1982_v24, %v1977_v55  ;;  %v13386_v28 = vpack.i.bf16 %v14552_v15, %v17006_v6  ;;  %5120 = vmatmul.mubr.f32.gmra.mrb[26].mxu0 %v4472_v16  ;;  %v4483_v59 = vld [vmem:[%s22628_s1 + $0x478] sm:$0xff]  ;;  %v17016_v55 = vld [vmem:[%s14807_s17 + $0x2a0] sm:$0xff]  ;;  %v4482_v54 = vld [vmem:[%s22628_s1 + $0x470] sm:$0xff]  ;;  %v17026_v37 = vpack.c.bf16 %v1983_v10, %v1978_v0 }
 0x1e6   : > { %13377 = vrot.lane.b32.xlu1 %v13376_v2, %s14765_s11  ;;  %v17019_v2 = vld [vmem:[%s14807_s17 + $0x2a8] sm:$0xff]  ;;  %5125 = vmatprep.mubr.f32.mxu0 %v4483_v59  ;;  %v13085_v16 = vunpack.i.h.bf16 %v17000_v30  ;;  %v17033_v8 = vld [vmem:[%s14807_s17 + $0x2d0] sm:$0xff]  ;;  %v17036_v24 = vld [vmem:[%s14807_s17 + $0x2d8] sm:$0xff] }
 0x1e7   : > { %23187 = vst [vmem:[#allocation125_spill] sm:$0xff] %v17002_v26  ;;  %13372 = vrot.lane.b32.xlu0 %v13371_v51, %s14765_s11  ;;  %10639 = vmatprep.subr.bf16.mxu0 %v10638_v53  ;;  %v13381_v14 = vpack.i.bf16 %v17019_v2, %v17016_v55  ;;  %23188 = vst [vmem:[#allocation126_spill] sm:$0xff] %v17026_v37  ;;  %v13089_v51 = vunpack.i.l.bf16 %v16992_v31  ;;  %v13396_v10 = vpack.i.bf16 %v17036_v24, %v17033_v8  ;;  %v4493_v15 = vld [vmem:[%s22628_s1 + $0x4c8] sm:$0xff]  ;;  %v14560_v21 = vld [vmem:[%s14807_s17 + $0x2f8] sm:$0xff] }
 0x1e8   : > { %10959 = vmatprep.subr.bf16.mxu1 %v17002_v26  ;;  %10641 = vmatpush1.bf16.msra.mxu0 %v10640_v39  ;;  %v13098_v44 = vpop.permute.xlu1 %13097  ;;  %v14557_v39 = vld [vmem:[%s14807_s17 + $0x2c0] sm:$0xff]  ;;  %v13084_v37 = vunpack.i.l.bf16 %v17000_v30 }
 0x1e9   : > { %10961 = vmatpush1.bf16.msra.mxu1 %v10638_v53  ;;  %v13093_v46 = vpop.permute.xlu0 %13092  ;;  %v13391_v53 = vpack.i.bf16 %v14558_v22, %v14557_v39  ;;  %5126 = vmatmul.mubr.f32.gmra.mrb[28].mxu0 %v4482_v54  ;;  %v13100_v59 = vunpack.i.h.bf16 %v13098_v44  ;;  %v13090_v39 = vunpack.i.h.bf16 %v16992_v31  ;;  %v14559_v22 = vld [vmem:[%s14807_s17 + $0x2f0] sm:$0xff]  ;;  %v1986_v31 = vsel %vm1934_vm3, %v13085_v16, %v13089_v51 }
 0x1ea   : > { %13387 = vrot.lane.b32.xlu1 %v13386_v28, %s14765_s11  ;;  %v13099_v28 = vunpack.i.l.bf16 %v13098_v44  ;;  %v13095_v0 = vunpack.i.h.bf16 %v13093_v46  ;;  %v13094_v25 = vunpack.i.l.bf16 %v13093_v46  ;;  %5131 = vmatprep.mubr.f32.mxu0 %v4493_v15  ;;  %v13406_v26 = vpack.i.bf16 %v14560_v21, %v14559_v22  ;;  %v14562_v46 = vld [vmem:[%s14807_s17 + $0x2e8] sm:$0xff] }
 0x1eb   : > { %13382 = vrot.lane.b32.xlu0 %v13381_v14, %s14765_s11  ;;  %v13401_v14 = vpack.i.bf16 %v14562_v46, %v17054_v57  ;;  %v1987_v1 = vsel %vm1934_vm3, %v13089_v51, %v13090_v39  ;;  %v4345_v21 = vld [vmem:[%s22628_s1 + $0x28] sm:$0xff] }
 0x1ec   : > { %v13108_v54 = vpop.permute.xlu1 %13107  ;;  %v1990_v30 = vsel %vm1934_vm3, %v13099_v28, %v13100_v59 }
 0x1ed   : > { %v13110_v7 = vunpack.i.h.bf16 %v13108_v54  ;;  %v13109_v44 = vunpack.i.l.bf16 %v13108_v54  ;;  %v13103_v60 = vpop.permute.xlu0 %13102  ;;  %5132 = vmatmul.mubr.f32.gmra.mrb[30].mxu0 %v4492_v3  ;;  %v17067_v54 = vsel %vm1934_vm3, %v13094_v25, %v13095_v0 }
 0x1ee   : > { %v13105_v15 = vunpack.i.h.bf16 %v13103_v60  ;;  %v13104_v33 = vunpack.i.l.bf16 %v13103_v60  ;;  %13397 = vrot.lane.b32.xlu1 %v13396_v10, %s14765_s11  ;;  %5202 = vmatprep.mubr.f32.mxu0 %v4345_v21  ;;  %23189 = vst [vmem:[#allocation127_spill] sm:$0xff] %v17067_v54  ;;  %v14570_v54 = vld [vmem:[%s14807_s17 + $0x100] sm:$0xff] }
 0x1ef   : > { %13392 = vrot.lane.b32.xlu0 %v13391_v53, %s14765_s11  ;;  %v17070_v60 = vsel %vm1934_vm3, %v13109_v44, %v13110_v7  ;;  %v1985_v53 = vsel %vm1934_vm3, %v13084_v37, %v13085_v16 }
 0x1f0   : > { %23190 = vst [vmem:[#allocation128_spill] sm:$0xff] %v17070_v60  ;;  %v17072_v10 = vpop.permute.xlu1 %13117  ;;  %v1991_v51 = vsel %vm1934_vm3, %v13100_v59, %v13104_v33  ;;  %v1992_v3 = vsel %vm1934_vm3, %v13104_v33, %v13105_v15  ;;  %v1993_v22 = vsel %vm1934_vm3, %v13105_v15, %v13109_v44  ;;  %v10644_v7 = vpack.c.bf16 %v1990_v30, %v1985_v53 }
 0x1f1   : > { %v13113_v46 = vpop.permute.xlu0 %13112  ;;  %v10642_v21 = vpack.c.bf16 %v1991_v51, %v1986_v31  ;;  %v17080_v0 = vpack.c.bf16 %v1992_v3, %v1987_v1  ;;  %v13416_v59 = vpack.i.bf16 %v16562_v23, %v16541_v42  ;;  %v1988_v33 = vsel %vm1934_vm3, %v13090_v39, %v13094_v25  ;;  %v14563_v42 = vld [vmem:[%s14807_s17 + $0x68] sm:$0xff]  ;;  %v14564_v23 = vld [vmem:[%s14807_s17 + $0x70] sm:$0xff] }
 0x1f2   : > { %13407 = vrot.lane.b32.xlu1 %v13406_v26, %s14765_s11  ;;  %v17087_v44 = vpack.c.bf16 %v1993_v22, %v1988_v33  ;;  %v13119_v26 = vunpack.i.l.bf16 %v17072_v10  ;;  %v13115_v16 = vunpack.i.h.bf16 %v13113_v46  ;;  %v17094_v25 = vpack.i.bf16 %v14564_v23, %v14563_v42  ;;  %v14566_v33 = vld [vmem:[%s14807_s17 + $0x90] sm:$0xff] }
 0x1f3   : > { %23191 = vst [vmem:[#allocation129_spill] sm:$0xff] %v17080_v0  ;;  %13402 = vrot.lane.b32.xlu0 %v13401_v14, %s14765_s11  ;;  %10643 = vmatprep.subr.bf16.mxu0 %v10642_v21  ;;  %v13421_v39 = vpack.i.bf16 %v16559_v47, %v16576_v58  ;;  %v13120_v51 = vunpack.i.h.bf16 %v17072_v10  ;;  %v13114_v22 = vunpack.i.l.bf16 %v13113_v46 }
 0x1f4   : > { %23192 = vst [vmem:[#allocation130_spill] sm:$0xff] %v17087_v44  ;;  %10963 = vmatprep.subr.bf16.mxu1 %v17080_v0  ;;  %10645 = vmatpush1.bf16.msra.mxu0 %v10644_v7  ;;  %v13128_v1 = vpop.permute.xlu1 %13127  ;;  %v1996_v46 = vsel %vm1934_vm3, %v13115_v16, %v13119_v26 }
 0x1f5   : > { %10965 = vmatpush1.bf16.msra.mxu1 %v10642_v21  ;;  %v13123_v37 = vpop.permute.xlu0 %13122  ;;  %v13130_v14 = vunpack.i.h.bf16 %v13128_v1  ;;  %v13129_v15 = vunpack.i.l.bf16 %v13128_v1  ;;  %v14567_v1 = vld [vmem:[%s14807_s17 + $0x98] sm:$0xff] }
 0x1f6   : > { %13417 = vrot.lane.b32.xlu1 %v13416_v59, %s14766_s8  ;;  %v13125_v31 = vunpack.i.h.bf16 %v13123_v37  ;;  %v13124_v30 = vunpack.i.l.bf16 %v13123_v37  ;;  %v14565_v59 = vld [vmem:[%s14807_s17 + $0x60] sm:$0xff] }
 0x1f7   : > { %13412 = vrot.lane.b32.xlu0 %v16550_v29, %s14766_s8  ;;  %v17103_v42 = vpack.i.bf16 %v14566_v33, %v14565_v59  ;;  %v14568_v37 = vld [vmem:[%s14807_s17 + $0xa0] sm:$0xff]  ;;  %v1997_v29 = vsel %vm1934_vm3, %v13119_v26, %v13120_v51  ;;  %v2000_v10 = vsel %vm1934_vm3, %v13129_v15, %v13130_v14  ;;  %v1995_v26 = vsel %vm1934_vm3, %v13114_v22, %v13115_v16  ;;  %v14571_v16 = vld [vmem:[%s14807_s17 + $0xc8] sm:$0xff]  ;;  %v14572_v22 = vld [vmem:[%s14807_s17 + $0xd0] sm:$0xff] }
 0x1f8   : > { %v13138_v3 = vpop.permute.xlu1 %13137  ;;  %v17109_v23 = vpack.i.bf16 %v14568_v37, %v14567_v1 }
 0x1f9   : > { %v13140_v53 = vunpack.i.h.bf16 %v13138_v3  ;;  %v13139_v21 = vunpack.i.l.bf16 %v13138_v3  ;;  %v13133_v7 = vpop.permute.xlu0 %13132  ;;  %v17116_v3 = vsel %vm1934_vm3, %v13124_v30, %v13125_v31 }
 0x1fa   : > { %v13135_v58 = vunpack.i.h.bf16 %v13133_v7  ;;  %v13134_v47 = vunpack.i.l.bf16 %v13133_v7  ;;  %13427 = vrot.lane.b32.xlu1 %v17094_v25, %s14766_s8  ;;  %23193 = vst [vmem:[#allocation131_spill] sm:$0xff] %v17116_v3 }
 0x1fb   : > { %13422 = vrot.lane.b32.xlu0 %v13421_v39, %s14766_s8  ;;  %v17119_v7 = vsel %vm1934_vm3, %v13139_v21, %v13140_v53  ;;  %v10648_v53 = vpack.c.bf16 %v2000_v10, %v1995_v26  ;;  %v14573_v10 = vld [vmem:[%s14807_s17 + $0x128] sm:$0xff] }
 0x1fc   : > { %23194 = vst [vmem:[#allocation132_spill] sm:$0xff] %v17119_v7  ;;  %v17121_v59 = vpop.permute.xlu1 %13147  ;;  %v2001_v33 = vsel %vm1934_vm3, %v13130_v14, %v13134_v47  ;;  %v2002_v1 = vsel %vm1934_vm3, %v13134_v47, %v13135_v58  ;;  %v2003_v15 = vsel %vm1934_vm3, %v13135_v58, %v13139_v21  ;;  %v14569_v14 = vld [vmem:[%s14807_s17 + $0xf8] sm:$0xff]  ;;  %v1998_v21 = vsel %vm1934_vm3, %v13120_v51, %v13124_v30  ;;  %v14577_v7 = vld [vmem:[%s14807_s17 + $0x120] sm:$0xff] }
 0x1fd   : > { %v13143_v31 = vpop.permute.xlu0 %13142  ;;  %v10646_v37 = vpack.c.bf16 %v2001_v33, %v1996_v46  ;;  %v17129_v28 = vpack.c.bf16 %v2002_v1, %v1997_v29  ;;  %v17135_v60 = vpack.i.bf16 %v14570_v54, %v14569_v14  ;;  %v17142_v58 = vpack.i.bf16 %v14572_v22, %v14571_v16  ;;  %v14574_v46 = vld [vmem:[%s14807_s17 + $0x130] sm:$0xff]  ;;  %v14575_v1 = vld [vmem:[%s14807_s17 + $0xc0] sm:$0xff] }
 0x1fe   : > { %13437 = vrot.lane.b32.xlu1 %v17103_v42, %s14766_s8  ;;  %v17144_v47 = vpack.c.bf16 %v2003_v15, %v1998_v21  ;;  %v13149_v30 = vunpack.i.l.bf16 %v17121_v59  ;;  %v13145_v51 = vunpack.i.h.bf16 %v13143_v31  ;;  %v17152_v33 = vpack.i.bf16 %v14574_v46, %v14573_v10  ;;  %v14576_v15 = vld [vmem:[%s14807_s17 + $0xf0] sm:$0xff] }
 0x1ff   : > { %23195 = vst [vmem:[#allocation133_spill] sm:$0xff] %v17129_v28  ;;  %13432 = vrot.lane.b32.xlu0 %v17109_v23, %s14766_s8  ;;  %10647 = vmatprep.subr.bf16.mxu0 %v10646_v37  ;;  %v17156_v26 = vpack.i.bf16 %v14576_v15, %v14575_v1  ;;  %v13150_v16 = vunpack.i.h.bf16 %v17121_v59  ;;  %v13144_v39 = vunpack.i.l.bf16 %v13143_v31 }
 0x200   : > { %23196 = vst [vmem:[#allocation134_spill] sm:$0xff] %v17144_v47  ;;  %10967 = vmatprep.subr.bf16.mxu1 %v17129_v28  ;;  %10649 = vmatpush1.bf16.msra.mxu0 %v10648_v53  ;;  %v13158_v54 = vpop.permute.xlu1 %13157  ;;  %v14578_v28 = vld [vmem:[%s14807_s17 + $0x150] sm:$0xff] }
 0x201   : > { %10969 = vmatpush1.bf16.msra.mxu1 %v10646_v37  ;;  %v13153_v29 = vpop.permute.xlu0 %13152  ;;  %v13160_v53 = vunpack.i.h.bf16 %v13158_v54  ;;  %v13159_v14 = vunpack.i.l.bf16 %v13158_v54  ;;  %v17163_v47 = vpack.i.bf16 %v14578_v28, %v14577_v7  ;;  %v17168_v54 = vld [vmem:[%s14807_s17 + $0x158] sm:$0xff]  ;;  %v2007_v59 = vsel %vm1934_vm3, %v13149_v30, %v13150_v16 }
 0x202   : > { %13447 = vrot.lane.b32.xlu1 %v17135_v60, %s14766_s8  ;;  %v13155_v37 = vunpack.i.h.bf16 %v13153_v29  ;;  %v13154_v21 = vunpack.i.l.bf16 %v13153_v29  ;;  %v13461_v29 = vpack.i.bf16 %v16707_v43, %v17168_v54  ;;  %v2006_v28 = vsel %vm1934_vm3, %v13145_v51, %v13149_v30 }
 0x203   : > { %13442 = vrot.lane.b32.xlu0 %v17142_v58, %s14766_s8  ;;  %v2010_v31 = vsel %vm1934_vm3, %v13159_v14, %v13160_v53  ;;  %v2005_v38 = vsel %vm1934_vm3, %v13144_v39, %v13145_v51  ;;  %v10023_v39 = vld [vmem:[%s22628_s1 + $0x560] sm:$0xff] }
 0x204   : > { %v13168_v22 = vpop.permute.xlu1 %13167  ;;  %v17178_v7 = vsel %vm1934_vm3, %v13154_v21, %v13155_v37 }
 0x205   : > { %v13170_v3 = vunpack.i.h.bf16 %v13168_v22  ;;  %v13169_v10 = vunpack.i.l.bf16 %v13168_v22  ;;  %v13163_v46 = vpop.permute.xlu0 %13162  ;;  %23197 = vst [vmem:[#allocation135_spill] sm:$0xff] %v17178_v7 }
 0x206   : > { %v13165_v1 = vunpack.i.h.bf16 %v13163_v46  ;;  %v13164_v15 = vunpack.i.l.bf16 %v13163_v46  ;;  %13457 = vrot.lane.b32.xlu1 %v17152_v33, %s14766_s8 }
 0x207   : > { %13452 = vrot.lane.b32.xlu0 %v17156_v26, %s14766_s8  ;;  %v17181_v22 = vsel %vm1934_vm3, %v13169_v10, %v13170_v3  ;;  %v10024_v3 = vld [vmem:[%s22628_s1 + $0x568] sm:$0xff] }
 0x208   : > { %23198 = vst [vmem:[#allocation136_spill] sm:$0xff] %v17181_v22  ;;  %v17183_v46 = vpop.permute.xlu1 %13177  ;;  %v2011_v0 = vsel %vm1934_vm3, %v13160_v53, %v13164_v15  ;;  %v2012_v43 = vsel %vm1934_vm3, %v13164_v15, %v13165_v1  ;;  %v2013_v44 = vsel %vm1934_vm3, %v13165_v1, %v13169_v10  ;;  %v10652_v53 = vpack.c.bf16 %v2010_v31, %v2005_v38 }
 0x209   : > { %v13173_v30 = vpop.permute.xlu0 %13172  ;;  %v10650_v45 = vpack.c.bf16 %v2011_v0, %v2006_v28  ;;  %v17191_v37 = vpack.c.bf16 %v2012_v43, %v2007_v59  ;;  %v13476_v10 = vpack.i.bf16 %v16797_v4, %v16777_v5  ;;  %6469 = vmatprep.mubr.f32.mxu1 %v10024_v3  ;;  %v2008_v1 = vsel %vm1934_vm3, %v13150_v16, %v13154_v21  ;;  %v10034_v5 = vld [vmem:[%s22628_s1 + $0x5b8] sm:$0xff]  ;;  %v10033_v59 = vld [vmem:[%s22628_s1 + $0x5b0] sm:$0xff] }
 0x20a   : > { %13467 = vrot.lane.b32.xlu1 %v17163_v47, %s14766_s8  ;;  %v13471_v0 = vpack.i.bf16 %v16745_v13, %v16758_v17  ;;  %v17207_v51 = vpack.c.bf16 %v2013_v44, %v2008_v1  ;;  %v13179_v21 = vunpack.i.l.bf16 %v17183_v46  ;;  %v13175_v13 = vunpack.i.h.bf16 %v13173_v30  ;;  %6470 = vmatmul.mubr.f32.gmra.mrb[34].mxu1 %v10023_v39 }
 0x20b   : > { %23199 = vst [vmem:[#allocation137_spill] sm:$0xff] %v17191_v37  ;;  %13462 = vrot.lane.b32.xlu0 %v13461_v29, %s14766_s8  ;;  %10651 = vmatprep.subr.bf16.mxu0 %v10650_v45  ;;  %v13486_v17 = vpack.i.bf16 %v16832_v18, %v16845_v50  ;;  %v13481_v44 = vpack.i.bf16 %v16774_v35, %v16755_v63  ;;  %v13180_v31 = vunpack.i.h.bf16 %v17183_v46  ;;  %v13174_v50 = vunpack.i.l.bf16 %v13173_v30 }
 0x20c   : > { %23200 = vst [vmem:[#allocation138_spill] sm:$0xff] %v17207_v51  ;;  %10971 = vmatprep.subr.bf16.mxu1 %v17191_v37  ;;  %10653 = vmatpush1.bf16.msra.mxu0 %v10652_v53  ;;  %v13188_v38 = vpop.permute.xlu1 %13187  ;;  %v13496_v18 = vpack.i.bf16 %v16861_v62, %v16842_v61  ;;  %v13491_v3 = vpack.i.bf16 %v16884_v20, %v16864_v12  ;;  %v10044_v53 = vld [vmem:[%s22628_s1 + $0x608] sm:$0xff]  ;;  %v10043_v20 = vld [vmem:[%s22628_s1 + $0x600] sm:$0xff]  ;;  %v14637_v37 = vld [vmem:[%s14807_s17 + $0x2b8] sm:$0xff] }
 0x20d   : > { %10973 = vmatpush1.bf16.msra.mxu1 %v10650_v45  ;;  %v13183_v4 = vpop.permute.xlu0 %13182  ;;  %v13190_v16 = vunpack.i.h.bf16 %v13188_v38  ;;  %v13189_v15 = vunpack.i.l.bf16 %v13188_v38  ;;  %6474 = vmatprep.mubr.f32.mxu1 %v10034_v5  ;;  %v2369_v46 = vsel %vm2367_vm4, %v13175_v13, %v13179_v21  ;;  %v14587_v5 = vld [vmem:[%s14807_s17 + $0x1b8] sm:$0xff]  ;;  %v14638_v51 = vld [vmem:[%s14807_s17 + $0x2e8] sm:$0xff] }
 0x20e   : > { %13477 = vrot.lane.b32.xlu1 %v13476_v10, %s14766_s8  ;;  %v13185_v45 = vunpack.i.h.bf16 %v13183_v4  ;;  %v13184_v29 = vunpack.i.l.bf16 %v13183_v4  ;;  %6475 = vmatmul.mubr.f32.gmra.mrb[4].mxu1 %v10033_v59  ;;  %v17258_v59 = vpack.i.bf16 %v16971_v48, %v16951_v49 }
 0x20f   : > { %13472 = vrot.lane.b32.xlu0 %v13471_v0, %s14766_s8  ;;  %v2370_v0 = vsel %vm2367_vm4, %v13179_v21, %v13180_v31  ;;  %v2373_v61 = vsel %vm2367_vm4, %v13189_v15, %v13190_v16  ;;  %6480 = vmatprep.mubr.f32.mxu1 %v10044_v53  ;;  %v2368_v21 = vsel %vm2367_vm4, %v13174_v50, %v13175_v13 }
 0x210   : > { %v13198_v28 = vpop.permute.xlu1 %13197  ;;  %v17240_v62 = vsel %vm2367_vm4, %v13184_v29, %v13185_v45  ;;  %v10656_v45 = vpack.c.bf16 %v2373_v61, %v2368_v21  ;;  %v13501_v13 = vpack.i.bf16 %v16919_v41, %v16932_v36  ;;  %v17281_v36 = vpack.i.bf16 %v17006_v6, %v17019_v2 }
 0x211   : > { %v13200_v63 = vunpack.i.h.bf16 %v13198_v28  ;;  %v13199_v35 = vunpack.i.l.bf16 %v13198_v28  ;;  %v13193_v43 = vpop.permute.xlu0 %13192  ;;  %23201 = vst [vmem:[#allocation139_spill] sm:$0xff] %v17240_v62  ;;  %v2371_v28 = vsel %vm2367_vm4, %v13180_v31, %v13184_v29  ;;  %v10064_v29 = vld [vmem:[%s22628_s1 + $0x6a8] sm:$0xff]  ;;  %v17292_v6 = vpack.i.bf16 %v17033_v8, %v17016_v55 }
 0x212   : > { %v13195_v10 = vunpack.i.h.bf16 %v13193_v43  ;;  %v13194_v1 = vunpack.i.l.bf16 %v13193_v43  ;;  %13487 = vrot.lane.b32.xlu1 %v13486_v17, %s14766_s8  ;;  %6481 = vmatmul.mubr.f32.gmra.mrb[6].mxu1 %v10043_v20  ;;  %v17296_v61 = vpack.i.bf16 %v17054_v57, %v17036_v24  ;;  %v10074_v20 = vld [vmem:[%s22628_s1 + $0x6f8] sm:$0xff]  ;;  %v10073_v57 = vld [vmem:[%s22628_s1 + $0x6f0] sm:$0xff] }
 0x213   : > { %13482 = vrot.lane.b32.xlu0 %v13481_v44, %s14766_s8  ;;  %v17243_v12 = vsel %vm2367_vm4, %v13199_v35, %v13200_v63  ;;  %v13511_v63 = vpack.i.bf16 %v16948_v34, %v16929_v9 }
 0x214   : > { %23202 = vst [vmem:[#allocation140_spill] sm:$0xff] %v17243_v12  ;;  %v17245_v30 = vpop.permute.xlu1 %13207  ;;  %v2374_v39 = vsel %vm2367_vm4, %v13190_v16, %v13194_v1  ;;  %v2375_v38 = vsel %vm2367_vm4, %v13194_v1, %v13195_v10  ;;  %v2376_v4 = vsel %vm2367_vm4, %v13195_v10, %v13199_v35  ;;  %v10054_v16 = vld [vmem:[%s22628_s1 + $0x658] sm:$0xff]  ;;  %v10063_v10 = vld [vmem:[%s22628_s1 + $0x6a0] sm:$0xff] }
 0x215   : > { %v13203_v17 = vpop.permute.xlu0 %13202  ;;  %v10654_v44 = vpack.c.bf16 %v2374_v39, %v2369_v46  ;;  %v17253_v15 = vpack.c.bf16 %v2375_v38, %v2370_v0  ;;  %v17270_v50 = vpack.c.bf16 %v2376_v4, %v2371_v28  ;;  %6486 = vmatprep.mubr.f32.mxu1 %v10054_v16  ;;  %v13209_v31 = vunpack.i.l.bf16 %v17245_v30 }
 0x216   : > { %13497 = vrot.lane.b32.xlu1 %v13496_v18, %s14766_s8  ;;  %v10053_v18 = vld [vmem:[%s22628_s1 + $0x650] sm:$0xff]  ;;  %v13205_v41 = vunpack.i.h.bf16 %v13203_v17  ;;  %v13210_v1 = vunpack.i.h.bf16 %v17245_v30  ;;  %v13204_v9 = vunpack.i.l.bf16 %v13203_v17 }
 0x217   : > { %23203 = vst [vmem:[#allocation141_spill] sm:$0xff] %v17253_v15  ;;  %13492 = vrot.lane.b32.xlu0 %v13491_v3, %s14766_s8  ;;  %10655 = vmatprep.subr.bf16.mxu0 %v10654_v44  ;;  %23204 = vst [vmem:[#allocation142_spill] sm:$0xff] %v17270_v50 }
 0x218   : > { %10975 = vmatprep.subr.bf16.mxu1 %v17253_v15  ;;  %10657 = vmatpush1.bf16.msra.mxu0 %v10656_v45  ;;  %v13218_v48 = vpop.permute.xlu1 %13217  ;;  %v2379_v55 = vsel %vm2367_vm4, %v13205_v41, %v13209_v31  ;;  %v2380_v8 = vsel %vm2367_vm4, %v13209_v31, %v13210_v1  ;;  %v2378_v28 = vsel %vm2367_vm4, %v13204_v9, %v13205_v41  ;;  %v14581_v31 = vld [vmem:[%s14807_s17 + $0x40] sm:$0xff] }
 0x219   : > { %10977 = vmatpush1.bf16.msra.mxu1 %v10654_v44  ;;  %v13213_v49 = vpop.permute.xlu0 %13212  ;;  %v13220_v35 = vunpack.i.h.bf16 %v13218_v48  ;;  %v13219_v43 = vunpack.i.l.bf16 %v13218_v48 }
 0x21a   : > { %13507 = vrot.lane.b32.xlu1 %v17258_v59, %s14766_s8  ;;  %6487 = vmatmul.mubr.f32.gmra.mrb[8].mxu1 %v10053_v18  ;;  %v13215_v3 = vunpack.i.h.bf16 %v13213_v49  ;;  %v13214_v53 = vunpack.i.l.bf16 %v13213_v49 }
 0x21b   : > { %13502 = vrot.lane.b32.xlu0 %v13501_v13, %s14766_s8  ;;  %6492 = vmatprep.mubr.f32.mxu1 %v10064_v29  ;;  %v2383_v30 = vsel %vm2367_vm4, %v13219_v43, %v13220_v35  ;;  %v14580_v29 = vld [vmem:[%s14807_s17 + $0x38] sm:$0xff]  ;;  %v14582_v43 = vld [vmem:[%s14807_s17 + $0x8] sm:$0xff] }
 0x21c   : > { %v13228_v46 = vpop.permute.xlu1 %13227  ;;  %v17311_v24 = vsel %vm2367_vm4, %v13214_v53, %v13215_v3  ;;  %v10660_v49 = vpack.c.bf16 %v2383_v30, %v2378_v28  ;;  %v2381_v41 = vsel %vm2367_vm4, %v13210_v1, %v13214_v53  ;;  %v14583_v3 = vld [vmem:[%s14807_s17 + $0x10] sm:$0xff] }
 0x21d   : > { %v13230_v34 = vunpack.i.h.bf16 %v13228_v46  ;;  %v13229_v2 = vunpack.i.l.bf16 %v13228_v46  ;;  %v13223_v0 = vpop.permute.xlu0 %13222  ;;  %23205 = vst [vmem:[#allocation143_spill] sm:$0xff] %v17311_v24  ;;  %v10083_v46 = vld [vmem:[%s22628_s1 + $0x740] sm:$0xff] }
 0x21e   : > { %v13225_v39 = vunpack.i.h.bf16 %v13223_v0  ;;  %v13224_v38 = vunpack.i.l.bf16 %v13223_v0  ;;  %13517 = vrot.lane.b32.xlu1 %v17281_v36, %s14766_s8  ;;  %6493 = vmatmul.mubr.f32.gmra.mrb[10].mxu1 %v10063_v10  ;;  %v17342_v10 = vpack.i.bf16 %v14583_v3, %v14582_v43 }
 0x21f   : > { %13512 = vrot.lane.b32.xlu0 %v13511_v63, %s14766_s8  ;;  %6498 = vmatprep.mubr.f32.mxu1 %v10074_v20  ;;  %v17314_v4 = vsel %vm2367_vm4, %v13229_v2, %v13230_v34  ;;  %v17332_v63 = vpack.i.bf16 %v14581_v31, %v14580_v29  ;;  %v10094_v34 = vld [vmem:[%s22628_s1 + $0x798] sm:$0xff]  ;;  %v14584_v20 = vld [vmem:[%s14807_s17] sm:$0xff]  ;;  %v10104_v31 = vld [vmem:[%s22628_s1 + $0x7e8] sm:$0xff] }
 0x220   : > { %23206 = vst [vmem:[#allocation144_spill] sm:$0xff] %v17314_v4  ;;  %v17316_v21 = vpop.permute.xlu1 %13237  ;;  %v2384_v17 = vsel %vm2367_vm4, %v13220_v35, %v13224_v38  ;;  %v2385_v44 = vsel %vm2367_vm4, %v13224_v38, %v13225_v39  ;;  %v2386_v45 = vsel %vm2367_vm4, %v13225_v39, %v13229_v2  ;;  %v10084_v35 = vld [vmem:[%s22628_s1 + $0x748] sm:$0xff]  ;;  %v14585_v39 = vld [vmem:[%s14807_s17 + $0x30] sm:$0xff] }
 0x221   : > { %v17324_v13 = vpop.permute.xlu0 %13232  ;;  %v10658_v18 = vpack.c.bf16 %v2384_v17, %v2379_v55  ;;  %v17326_v48 = vpack.c.bf16 %v2385_v44, %v2380_v8  ;;  %v17347_v9 = vpack.c.bf16 %v2386_v45, %v2381_v41  ;;  %v13239_v2 = vunpack.i.l.bf16 %v17316_v21  ;;  %v10093_v17 = vld [vmem:[%s22628_s1 + $0x790] sm:$0xff] }
 0x222   : > { %13527 = vrot.lane.b32.xlu1 %v17292_v6, %s14766_s8  ;;  %6499 = vmatmul.mubr.f32.gmra.mrb[12].mxu1 %v10073_v57  ;;  %v13235_v0 = vunpack.i.h.bf16 %v17324_v13  ;;  %v17359_v38 = vpack.i.bf16 %v14585_v39, %v14584_v20  ;;  %v13240_v44 = vunpack.i.h.bf16 %v17316_v21  ;;  %v13234_v28 = vunpack.i.l.bf16 %v17324_v13  ;;  %v10103_v13 = vld [vmem:[%s22628_s1 + $0x7e0] sm:$0xff] }
 0x223   : > { %23207 = vst [vmem:[#allocation145_spill] sm:$0xff] %v17326_v48  ;;  %13522 = vrot.lane.b32.xlu0 %v17296_v61, %s14766_s8  ;;  %10659 = vmatprep.subr.bf16.mxu0 %v10658_v18  ;;  %23208 = vst [vmem:[#allocation146_spill] sm:$0xff] %v17347_v9 }
 0x224   : > { %10979 = vmatprep.subr.bf16.mxu1 %v17326_v48  ;;  %10661 = vmatpush1.bf16.msra.mxu0 %v10660_v49  ;;  %v13248_v53 = vpop.permute.xlu1 %13247  ;;  %v2389_v43 = vsel %vm2367_vm4, %v13235_v0, %v13239_v2  ;;  %v2390_v3 = vsel %vm2367_vm4, %v13239_v2, %v13240_v44  ;;  %v14630_v48 = vld [vmem:[%s14807_s17 + $0x288] sm:$0xff] }
 0x225   : > { %10981 = vmatpush1.bf16.msra.mxu1 %v10658_v18  ;;  %v13243_v1 = vpop.permute.xlu0 %13242  ;;  %6504 = vmatprep.mubr.f32.mxu1 %v10084_v35  ;;  %v13250_v55 = vunpack.i.h.bf16 %v13248_v53  ;;  %v13249_v8 = vunpack.i.l.bf16 %v13248_v53 }
 0x226   : > { %13537 = vrot.lane.b32.xlu1 %v17332_v63, %s14767_s18  ;;  %6505 = vmatmul.mubr.f32.gmra.mrb[14].mxu1 %v10083_v46  ;;  %v13245_v30 = vunpack.i.h.bf16 %v13243_v1  ;;  %v13244_v57 = vunpack.i.l.bf16 %v13243_v1 }
 0x227   : > { %13532 = vrot.lane.b32.xlu0 %v17342_v10, %s14767_s18  ;;  %6510 = vmatprep.mubr.f32.mxu1 %v10094_v34  ;;  %v2393_v21 = vsel %vm2367_vm4, %v13249_v8, %v13250_v55  ;;  %v2388_v8 = vsel %vm2367_vm4, %v13234_v28, %v13235_v0  ;;  %v10113_v0 = vld [vmem:[%s22628_s1 + $0x830] sm:$0xff] }
 0x228   : > { %v13258_v45 = vpop.permute.xlu1 %13257  ;;  %v17382_v46 = vsel %vm2367_vm4, %v13244_v57, %v13245_v30 }
 0x229   : > { %v13260_v18 = vunpack.i.h.bf16 %v13258_v45  ;;  %v13259_v49 = vunpack.i.l.bf16 %v13258_v45  ;;  %v13253_v29 = vpop.permute.xlu0 %13252  ;;  %23209 = vst [vmem:[#allocation147_spill] sm:$0xff] %v17382_v46  ;;  %v14597_v46 = vld [vmem:[%s14807_s17 + $0x218] sm:$0xff] }
 0x22a   : > { %v13255_v35 = vunpack.i.h.bf16 %v13253_v29  ;;  %v13254_v41 = vunpack.i.l.bf16 %v13253_v29  ;;  %13547 = vrot.lane.b32.xlu1 %v17094_v25, %s14767_s18  ;;  %6511 = vmatmul.mubr.f32.gmra.mrb[16].mxu1 %v10093_v17 }
 0x22b   : > { %13542 = vrot.lane.b32.xlu0 %v17359_v38, %s14767_s18  ;;  %6516 = vmatprep.mubr.f32.mxu1 %v10104_v31  ;;  %v17385_v53 = vsel %vm2367_vm4, %v13259_v49, %v13260_v18  ;;  %v10664_v18 = vpack.c.bf16 %v2393_v21, %v2388_v8 }
 0x22c   : > { %23210 = vst [vmem:[#allocation148_spill] sm:$0xff] %v17385_v53  ;;  %v17387_v1 = vpop.permute.xlu1 %13267  ;;  %v2394_v34 = vsel %vm2367_vm4, %v13250_v55, %v13254_v41  ;;  %v2395_v2 = vsel %vm2367_vm4, %v13254_v41, %v13255_v35  ;;  %v2396_v20 = vsel %vm2367_vm4, %v13255_v35, %v13259_v49  ;;  %v10114_v55 = vld [vmem:[%s22628_s1 + $0x838] sm:$0xff]  ;;  %v2391_v49 = vsel %vm2367_vm4, %v13240_v44, %v13244_v57  ;;  %v10124_v57 = vld [vmem:[%s22628_s1 + $0x888] sm:$0xff]  ;;  %v14598_v53 = vld [vmem:[%s14807_s17 + $0x220] sm:$0xff] }
 0x22d   : > { %v13263_v17 = vpop.permute.xlu0 %13262  ;;  %v10662_v45 = vpack.c.bf16 %v2394_v34, %v2389_v43  ;;  %v17395_v30 = vpack.c.bf16 %v2395_v2, %v2390_v3  ;;  %v17408_v28 = vpack.c.bf16 %v2396_v20, %v2391_v49  ;;  %v13269_v44 = vunpack.i.l.bf16 %v17387_v1 }
 0x22e   : > { %13557 = vrot.lane.b32.xlu1 %v17103_v42, %s14767_s18  ;;  %6517 = vmatmul.mubr.f32.gmra.mrb[18].mxu1 %v10103_v13  ;;  %v13265_v35 = vunpack.i.h.bf16 %v13263_v17  ;;  %v10123_v13 = vld [vmem:[%s22628_s1 + $0x880] sm:$0xff]  ;;  %v13270_v34 = vunpack.i.h.bf16 %v17387_v1  ;;  %v13264_v20 = vunpack.i.l.bf16 %v13263_v17  ;;  %v17508_v24 = vpack.i.bf16 %v14598_v53, %v14597_v46 }
 0x22f   : > { %23211 = vst [vmem:[#allocation149_spill] sm:$0xff] %v17395_v30  ;;  %13552 = vrot.lane.b32.xlu0 %v17109_v23, %s14767_s18  ;;  %10663 = vmatprep.subr.bf16.mxu0 %v10662_v45  ;;  %23212 = vst [vmem:[#allocation150_spill] sm:$0xff] %v17408_v28  ;;  %v10163_v46 = vld [vmem:[%s22628_s1 + $0x9c0] sm:$0xff] }
 0x230   : > { %10983 = vmatprep.subr.bf16.mxu1 %v17395_v30  ;;  %10665 = vmatpush1.bf16.msra.mxu0 %v10664_v18  ;;  %v13278_v29 = vpop.permute.xlu1 %13277  ;;  %v2399_v1 = vsel %vm2367_vm4, %v13265_v35, %v13269_v44  ;;  %v2400_v17 = vsel %vm2367_vm4, %v13269_v44, %v13270_v34  ;;  %v2398_v39 = vsel %vm2367_vm4, %v13264_v20, %v13265_v35  ;;  %v14589_v20 = vld [vmem:[%s14807_s17 + $0x188] sm:$0xff] }
 0x231   : > { %10985 = vmatpush1.bf16.msra.mxu1 %v10662_v45  ;;  %v13273_v31 = vpop.permute.xlu0 %13272  ;;  %6522 = vmatprep.mubr.f32.mxu1 %v10114_v55  ;;  %v13280_v41 = vunpack.i.h.bf16 %v13278_v29  ;;  %v13279_v43 = vunpack.i.l.bf16 %v13278_v29  ;;  %v14586_v55 = vld [vmem:[%s14807_s17 + $0x160] sm:$0xff] }
 0x232   : > { %13567 = vrot.lane.b32.xlu1 %v17135_v60, %s14767_s18  ;;  %6523 = vmatmul.mubr.f32.gmra.mrb[20].mxu1 %v10113_v0  ;;  %v13275_v3 = vunpack.i.h.bf16 %v13273_v31  ;;  %v13274_v21 = vunpack.i.l.bf16 %v13273_v31  ;;  %v17425_v49 = vpack.i.bf16 %v14586_v55, %v17168_v54  ;;  %v10134_v0 = vld [vmem:[%s22628_s1 + $0x8d8] sm:$0xff]  ;;  %v10133_v54 = vld [vmem:[%s22628_s1 + $0x8d0] sm:$0xff] }
 0x233   : > { %13562 = vrot.lane.b32.xlu0 %v17142_v58, %s14767_s18  ;;  %6528 = vmatprep.mubr.f32.mxu1 %v10124_v57  ;;  %v2403_v57 = vsel %vm2367_vm4, %v13279_v43, %v13280_v41 }
 0x234   : > { %v13288_v2 = vpop.permute.xlu1 %13287  ;;  %v2401_v35 = vsel %vm2367_vm4, %v13270_v34, %v13274_v21 }
 0x235   : > { %v13290_v8 = vunpack.i.h.bf16 %v13288_v2  ;;  %v13289_v45 = vunpack.i.l.bf16 %v13288_v2  ;;  %v13283_v18 = vpop.permute.xlu0 %13282  ;;  %v17441_v2 = vsel %vm2367_vm4, %v13274_v21, %v13275_v3 }
 0x236   : > { %v13285_v29 = vunpack.i.h.bf16 %v13283_v18  ;;  %v13284_v31 = vunpack.i.l.bf16 %v13283_v18  ;;  %13577 = vrot.lane.b32.xlu1 %v17152_v33, %s14767_s18  ;;  %6529 = vmatmul.mubr.f32.gmra.mrb[22].mxu1 %v10123_v13  ;;  %23213 = vst [vmem:[#allocation151_spill] sm:$0xff] %v17441_v2 }
 0x237   : > { %13572 = vrot.lane.b32.xlu0 %v17156_v26, %s14767_s18  ;;  %6534 = vmatprep.mubr.f32.mxu1 %v10134_v0  ;;  %v17444_v18 = vsel %vm2367_vm4, %v13289_v45, %v13290_v8 }
 0x238   : > { %23214 = vst [vmem:[#allocation152_spill] sm:$0xff] %v17444_v18  ;;  %v17446_v44 = vpop.permute.xlu1 %13297  ;;  %v2404_v43 = vsel %vm2367_vm4, %v13280_v41, %v13284_v31  ;;  %v2405_v13 = vsel %vm2367_vm4, %v13284_v31, %v13285_v29  ;;  %v2406_v55 = vsel %vm2367_vm4, %v13285_v29, %v13289_v45  ;;  %v10668_v41 = vpack.c.bf16 %v2403_v57, %v2398_v39  ;;  %v14588_v31 = vld [vmem:[%s14807_s17 + $0x1c0] sm:$0xff]  ;;  %v10144_v45 = vld [vmem:[%s22628_s1 + $0x928] sm:$0xff]  ;;  %v14590_v29 = vld [vmem:[%s14807_s17 + $0x190] sm:$0xff] }
 0x239   : > { %v17454_v3 = vpop.permute.xlu0 %13292  ;;  %v10666_v16 = vpack.c.bf16 %v2404_v43, %v2399_v1  ;;  %v17456_v8 = vpack.c.bf16 %v2405_v13, %v2400_v17  ;;  %v17462_v14 = vpack.i.bf16 %v14588_v31, %v14587_v5  ;;  %v17472_v39 = vpack.i.bf16 %v14590_v29, %v14589_v20  ;;  %v10143_v5 = vld [vmem:[%s22628_s1 + $0x920] sm:$0xff]  ;;  %v10154_v17 = vld [vmem:[%s22628_s1 + $0x978] sm:$0xff]  ;;  %v14591_v43 = vld [vmem:[%s14807_s17 + $0x1e8] sm:$0xff] }
 0x23a   : > { %13587 = vrot.lane.b32.xlu1 %v17163_v47, %s14767_s18  ;;  %6535 = vmatmul.mubr.f32.gmra.mrb[24].mxu1 %v10133_v54  ;;  %v17477_v1 = vpack.c.bf16 %v2406_v55, %v2401_v35  ;;  %v13299_v57 = vunpack.i.l.bf16 %v17446_v44  ;;  %v13295_v54 = vunpack.i.h.bf16 %v17454_v3  ;;  %v14592_v13 = vld [vmem:[%s14807_s17 + $0x1f0] sm:$0xff] }
 0x23b   : > { %23215 = vst [vmem:[#allocation153_spill] sm:$0xff] %v17456_v8  ;;  %13582 = vrot.lane.b32.xlu0 %v17425_v49, %s14767_s18  ;;  %10667 = vmatprep.subr.bf16.mxu0 %v10666_v16  ;;  %v17489_v55 = vpack.i.bf16 %v14592_v13, %v14591_v43  ;;  %v10153_v43 = vld [vmem:[%s22628_s1 + $0x970] sm:$0xff]  ;;  %v13300_v13 = vunpack.i.h.bf16 %v17446_v44 }
 0x23c   : > { %23216 = vst [vmem:[#allocation154_spill] sm:$0xff] %v17477_v1  ;;  %10987 = vmatprep.subr.bf16.mxu1 %v17456_v8  ;;  %10669 = vmatpush1.bf16.msra.mxu0 %v10668_v41  ;;  %v13308_v21 = vpop.permute.xlu1 %13307  ;;  %v14594_v41 = vld [vmem:[%s14807_s17 + $0x1b0] sm:$0xff] }
 0x23d   : > { %10989 = vmatpush1.bf16.msra.mxu1 %v10666_v16  ;;  %v13303_v34 = vpop.permute.xlu0 %13302  ;;  %6540 = vmatprep.mubr.f32.mxu1 %v10144_v45  ;;  %v14593_v16 = vld [vmem:[%s14807_s17 + $0x180] sm:$0xff]  ;;  %v13310_v45 = vunpack.i.h.bf16 %v13308_v21  ;;  %v13309_v35 = vunpack.i.l.bf16 %v13308_v21  ;;  %v13294_v21 = vunpack.i.l.bf16 %v17454_v3  ;;  %v2410_v3 = vsel %vm2367_vm4, %v13299_v57, %v13300_v13 }
 0x23e   : > { %13597 = vrot.lane.b32.xlu1 %v17462_v14, %s14767_s18  ;;  %v17493_v31 = vpack.i.bf16 %v14594_v41, %v14593_v16  ;;  %6541 = vmatmul.mubr.f32.gmra.mrb[26].mxu1 %v10143_v5  ;;  %v13305_v20 = vunpack.i.h.bf16 %v13303_v34  ;;  %v13304_v29 = vunpack.i.l.bf16 %v13303_v34  ;;  %v14595_v16 = vld [vmem:[%s14807_s17 + $0x1e0] sm:$0xff]  ;;  %v14596_v41 = vld [vmem:[%s14807_s17 + $0x210] sm:$0xff] }
 0x23f   : > { %13592 = vrot.lane.b32.xlu0 %v17472_v39, %s14767_s18  ;;  %6546 = vmatprep.mubr.f32.mxu1 %v10154_v17  ;;  %v17503_v5 = vpack.i.bf16 %v14596_v41, %v14595_v16  ;;  %v10164_v17 = vld [vmem:[%s22628_s1 + $0x9c8] sm:$0xff]  ;;  %v2409_v16 = vsel %vm2367_vm4, %v13295_v54, %v13299_v57  ;;  %v2408_v62 = vsel %vm2367_vm4, %v13294_v21, %v13295_v54  ;;  %v14600_v54 = vld [vmem:[%s14807_s17 + $0x250] sm:$0xff] }
 0x240   : > { %v13318_v0 = vpop.permute.xlu1 %13317  ;;  %v17524_v53 = vsel %vm2367_vm4, %v13304_v29, %v13305_v20 }
 0x241   : > { %v13320_v2 = vunpack.i.h.bf16 %v13318_v0  ;;  %v13319_v18 = vunpack.i.l.bf16 %v13318_v0  ;;  %v13313_v34 = vpop.permute.xlu0 %13312  ;;  %v2413_v0 = vsel %vm2367_vm4, %v13309_v35, %v13310_v45  ;;  %23217 = vst [vmem:[#allocation155_spill] sm:$0xff] %v17524_v53 }
 0x242   : > { %v13315_v4 = vunpack.i.h.bf16 %v13313_v34  ;;  %v13314_v44 = vunpack.i.l.bf16 %v13313_v34  ;;  %13607 = vrot.lane.b32.xlu1 %v17489_v55, %s14767_s18  ;;  %6547 = vmatmul.mubr.f32.gmra.mrb[28].mxu1 %v10153_v43 }
 0x243   : > { %13602 = vrot.lane.b32.xlu0 %v17493_v31, %s14767_s18  ;;  %6552 = vmatprep.mubr.f32.mxu1 %v10164_v17  ;;  %v17527_v41 = vsel %vm2367_vm4, %v13319_v18, %v13320_v2  ;;  %v10672_v2 = vpack.c.bf16 %v2413_v0, %v2408_v62  ;;  %v14602_v0 = vld [vmem:[%s14807_s17 + $0x270] sm:$0xff] }
 0x244   : > { %23218 = vst [vmem:[#allocation156_spill] sm:$0xff] %v17527_v41  ;;  %v17529_v34 = vpop.permute.xlu1 %13327  ;;  %v2414_v57 = vsel %vm2367_vm4, %v13310_v45, %v13314_v44  ;;  %v2415_v35 = vsel %vm2367_vm4, %v13314_v44, %v13315_v4  ;;  %v2416_v43 = vsel %vm2367_vm4, %v13315_v4, %v13319_v18  ;;  %v10016_v45 = vld [vmem:[%s22628_s1 + $0x528] sm:$0xff]  ;;  %v2411_v4 = vsel %vm2367_vm4, %v13300_v13, %v13304_v29 }
 0x245   : > { %v13323_v20 = vpop.permute.xlu0 %13322  ;;  %v10670_v12 = vpack.c.bf16 %v2414_v57, %v2409_v16  ;;  %v17537_v7 = vpack.c.bf16 %v2415_v35, %v2410_v3  ;;  %v14599_v18 = vld [vmem:[%s14807_s17 + $0x248] sm:$0xff]  ;;  %v17551_v44 = vpack.c.bf16 %v2416_v43, %v2411_v4  ;;  %v13329_v29 = vunpack.i.l.bf16 %v17529_v34  ;;  %v14601_v3 = vld [vmem:[%s14807_s17 + $0x240] sm:$0xff] }
 0x246   : > { %13617 = vrot.lane.b32.xlu1 %v17503_v5, %s14767_s18  ;;  %6553 = vmatmul.mubr.f32.gmra.mrb[30].mxu1 %v10163_v46  ;;  %v17549_v21 = vpack.i.bf16 %v14600_v54, %v14599_v18  ;;  %v13325_v13 = vunpack.i.h.bf16 %v13323_v20  ;;  %v17559_v46 = vpack.i.bf16 %v14602_v0, %v14601_v3 }
 0x247   : > { %23219 = vst [vmem:[#allocation157_spill] sm:$0xff] %v17537_v7  ;;  %13612 = vrot.lane.b32.xlu0 %v17508_v24, %s14767_s18  ;;  %10671 = vmatprep.subr.bf16.mxu0 %v10670_v12  ;;  %23220 = vst [vmem:[#allocation158_spill] sm:$0xff] %v17551_v44 }
 0x248   : > { %10991 = vmatprep.subr.bf16.mxu1 %v17537_v7  ;;  %10673 = vmatpush1.bf16.msra.mxu0 %v10672_v2  ;;  %v13338_v62 = vpop.permute.xlu1 %13337 }
 0x249   : > { %10993 = vmatpush1.bf16.msra.mxu1 %v10670_v12  ;;  %v13333_v16 = vpop.permute.xlu0 %13332  ;;  %6623 = vmatprep.mubr.f32.mxu1 %v10016_v45  ;;  %v13340_v57 = vunpack.i.h.bf16 %v13338_v62  ;;  %v13339_v35 = vunpack.i.l.bf16 %v13338_v62  ;;  %v13330_v12 = vunpack.i.h.bf16 %v17529_v34  ;;  %v13324_v45 = vunpack.i.l.bf16 %v13323_v20 }
 0x24a   : > { %13627 = vrot.lane.b32.xlu1 %v17258_v59, %s14767_s18  ;;  %v13335_v43 = vunpack.i.h.bf16 %v13333_v16  ;;  %v13334_v4 = vunpack.i.l.bf16 %v13333_v16  ;;  %v2419_v16 = vsel %vm2367_vm4, %v13325_v13, %v13329_v29 }
 0x24b   : > { %13622 = vrot.lane.b32.xlu0 %v17549_v21, %s14767_s18  ;;  %v2420_v3 = vsel %vm2367_vm4, %v13329_v29, %v13330_v12  ;;  %v2423_v62 = vsel %vm2367_vm4, %v13339_v35, %v13340_v57  ;;  %v2418_v41 = vsel %vm2367_vm4, %v13324_v45, %v13325_v13 }
 0x24c   : > { %v13348_v2 = vpop.permute.xlu1 %13347  ;;  %v17572_v34 = vsel %vm2367_vm4, %v13334_v4, %v13335_v43  ;;  %v10676_v43 = vpack.c.bf16 %v2423_v62, %v2418_v41 }
 0x24d   : > { %v13350_v18 = vunpack.i.h.bf16 %v13348_v2  ;;  %v13349_v54 = vunpack.i.l.bf16 %v13348_v2  ;;  %v13343_v17 = vpop.permute.xlu0 %13342  ;;  %23221 = vst [vmem:[#allocation159_spill] sm:$0xff] %v17572_v34 }
 0x24e   : > { %v13345_v53 = vunpack.i.h.bf16 %v13343_v17  ;;  %v13344_v59 = vunpack.i.l.bf16 %v13343_v17  ;;  %13637 = vrot.lane.b32.xlu1 %v17281_v36, %s14767_s18 }
 0x24f   : > { %13632 = vrot.lane.b32.xlu0 %v17559_v46, %s14767_s18  ;;  %v17575_v20 = vsel %vm2367_vm4, %v13349_v54, %v13350_v18  ;;  %v2421_v18 = vsel %vm2367_vm4, %v13330_v12, %v13334_v4 }
 0x250   : > { %23222 = vst [vmem:[#allocation160_spill] sm:$0xff] %v17575_v20  ;;  %v13358_v0 = vpop.permute.xlu1 %13357  ;;  %v2424_v17 = vsel %vm2367_vm4, %v13340_v57, %v13344_v59  ;;  %v2425_v36 = vsel %vm2367_vm4, %v13344_v59, %v13345_v53  ;;  %v2426_v2 = vsel %vm2367_vm4, %v13345_v53, %v13349_v54 }
 0x251   : > { %v13353_v22 = vpop.permute.xlu0 %13352  ;;  %v10674_v29 = vpack.c.bf16 %v2424_v17, %v2419_v16  ;;  %v17583_v7 = vpack.c.bf16 %v2425_v36, %v2420_v3  ;;  %v17590_v53 = vpack.c.bf16 %v2426_v2, %v2421_v18  ;;  %v13359_v45 = vunpack.i.l.bf16 %v13358_v0 }
 0x252   : > { %13647 = vrot.lane.b32.xlu1 %v17292_v6, %s14767_s18  ;;  %v13355_v54 = vunpack.i.h.bf16 %v13353_v22  ;;  %v13354_v3 = vunpack.i.l.bf16 %v13353_v22 }
 0x253   : > { %23223 = vst [vmem:[#allocation161_spill] sm:$0xff] %v17583_v7  ;;  %13642 = vrot.lane.b32.xlu0 %v17296_v61, %s14767_s18  ;;  %10675 = vmatprep.subr.bf16.mxu0 %v10674_v29  ;;  %23224 = vst [vmem:[#allocation162_spill] sm:$0xff] %v17590_v53  ;;  %v13360_v61 = vunpack.i.h.bf16 %v13358_v0 }
 0x254   : > { %10995 = vmatprep.subr.bf16.mxu1 %v17583_v7  ;;  %10677 = vmatpush1.bf16.msra.mxu0 %v10676_v43  ;;  %v13368_v13 = vpop.permute.xlu1 %13367  ;;  %v2429_v43 = vsel %vm2367_vm4, %v13355_v54, %v13359_v45 }
 0x255   : > { %10997 = vmatpush1.bf16.msra.mxu1 %v10674_v29  ;;  %v13363_v57 = vpop.permute.xlu0 %13362  ;;  %v13370_v6 = vunpack.i.h.bf16 %v13368_v13  ;;  %v13369_v41 = vunpack.i.l.bf16 %v13368_v13 }
 0x256   : > { %13657 = vrot.lane.b32.xlu1 %v17332_v63, %s14768_s30  ;;  %v13365_v4 = vunpack.i.h.bf16 %v13363_v57  ;;  %v13364_v12 = vunpack.i.l.bf16 %v13363_v57  ;;  %v2430_v63 = vsel %vm2367_vm4, %v13359_v45, %v13360_v61 }
 0x257   : > { %13652 = vrot.lane.b32.xlu0 %v17342_v10, %s14768_s30  ;;  %v2433_v29 = vsel %vm2367_vm4, %v13369_v41, %v13370_v6  ;;  %v4365_v41 = vld [vmem:[%s22628_s1 + $0xc8] sm:$0xff] }
 0x258   : > { %v13378_v59 = vpop.permute.xlu1 %13377  ;;  %v17605_v0 = vsel %vm2367_vm4, %v13364_v12, %v13365_v4 }
 0x259   : > { %v13380_v62 = vunpack.i.h.bf16 %v13378_v59  ;;  %v13379_v16 = vunpack.i.l.bf16 %v13378_v59  ;;  %v13373_v17 = vpop.permute.xlu0 %13372  ;;  %23225 = vst [vmem:[#allocation163_spill] sm:$0xff] %v17605_v0 }
 0x25a   : > { %v13375_v36 = vunpack.i.h.bf16 %v13373_v17  ;;  %v13374_v2 = vunpack.i.l.bf16 %v13373_v17  ;;  %13667 = vrot.lane.b32.xlu1 %v17094_v25, %s14768_s30 }
 0x25b   : > { %13662 = vrot.lane.b32.xlu0 %v17359_v38, %s14768_s30  ;;  %v17608_v22 = vsel %vm2367_vm4, %v13379_v16, %v13380_v62  ;;  %v2428_v38 = vsel %vm2367_vm4, %v13354_v3, %v13355_v54  ;;  %v2431_v62 = vsel %vm2367_vm4, %v13360_v61, %v13364_v12 }
 0x25c   : > { %23226 = vst [vmem:[#allocation164_spill] sm:$0xff] %v17608_v22  ;;  %v13388_v18 = vpop.permute.xlu1 %13387  ;;  %v2434_v13 = vsel %vm2367_vm4, %v13370_v6, %v13374_v2  ;;  %v2435_v25 = vsel %vm2367_vm4, %v13374_v2, %v13375_v36  ;;  %v2436_v57 = vsel %vm2367_vm4, %v13375_v36, %v13379_v16  ;;  %v10680_v4 = vpack.c.bf16 %v2433_v29, %v2428_v38  ;;  %v14604_v38 = vld [vmem:[%s14807_s17 + $0x48] sm:$0xff] }
 0x25d   : > { %v13383_v59 = vpop.permute.xlu0 %13382  ;;  %v10678_v45 = vpack.c.bf16 %v2434_v13, %v2429_v43  ;;  %v17616_v17 = vpack.c.bf16 %v2435_v25, %v2430_v63  ;;  %v17623_v6 = vpack.c.bf16 %v2436_v57, %v2431_v62  ;;  %v13389_v16 = vunpack.i.l.bf16 %v13388_v18  ;;  %v14603_v57 = vld [vmem:[%s14807_s17 + $0x18] sm:$0xff] }
 0x25e   : > { %13677 = vrot.lane.b32.xlu1 %v17103_v42, %s14768_s30  ;;  %v13385_v36 = vunpack.i.h.bf16 %v13383_v59  ;;  %v13390_v2 = vunpack.i.h.bf16 %v13388_v18  ;;  %v13384_v29 = vunpack.i.l.bf16 %v13383_v59 }
 0x25f   : > { %23227 = vst [vmem:[#allocation165_spill] sm:$0xff] %v17616_v17  ;;  %13672 = vrot.lane.b32.xlu0 %v17109_v23, %s14768_s30  ;;  %10679 = vmatprep.subr.bf16.mxu0 %v10678_v45  ;;  %23228 = vst [vmem:[#allocation166_spill] sm:$0xff] %v17623_v6 }
 0x260   : > { %10999 = vmatprep.subr.bf16.mxu1 %v17616_v17  ;;  %10681 = vmatpush1.bf16.msra.mxu0 %v10680_v4  ;;  %v13398_v54 = vpop.permute.xlu1 %13397 }
 0x261   : > { %11001 = vmatpush1.bf16.msra.mxu1 %v10678_v45  ;;  %v13393_v3 = vpop.permute.xlu0 %13392  ;;  %v13400_v42 = vunpack.i.h.bf16 %v13398_v54  ;;  %v13399_v12 = vunpack.i.l.bf16 %v13398_v54  ;;  %v17632_v45 = vpack.i.bf16 %v14604_v38, %v14603_v57 }
 0x262   : > { %13687 = vrot.lane.b32.xlu1 %v17135_v60, %s14768_s30  ;;  %v13395_v61 = vunpack.i.h.bf16 %v13393_v3  ;;  %v13394_v23 = vunpack.i.l.bf16 %v13393_v3  ;;  %v2440_v60 = vsel %vm2367_vm4, %v13389_v16, %v13390_v2 }
 0x263   : > { %13682 = vrot.lane.b32.xlu0 %v17142_v58, %s14768_s30  ;;  %v2443_v54 = vsel %vm2367_vm4, %v13399_v12, %v13400_v42  ;;  %v2439_v58 = vsel %vm2367_vm4, %v13385_v36, %v13389_v16 }
 0x264   : > { %v13408_v63 = vpop.permute.xlu1 %13407  ;;  %v17642_v18 = vsel %vm2367_vm4, %v13394_v23, %v13395_v61  ;;  %v2441_v38 = vsel %vm2367_vm4, %v13390_v2, %v13394_v23  ;;  %v4344_v23 = vld [vmem:[%s22628_s1 + $0x20] sm:$0xff] }
 0x265   : > { %v13410_v43 = vunpack.i.h.bf16 %v13408_v63  ;;  %v13409_v13 = vunpack.i.l.bf16 %v13408_v63  ;;  %v13403_v25 = vpop.permute.xlu0 %13402  ;;  %23229 = vst [vmem:[#allocation167_spill] sm:$0xff] %v17642_v18 }
 0x266   : > { %v13405_v4 = vunpack.i.h.bf16 %v13403_v25  ;;  %v13404_v62 = vunpack.i.l.bf16 %v13403_v25  ;;  %13697 = vrot.lane.b32.xlu1 %v17152_v33, %s14768_s30 }
 0x267   : > { %13692 = vrot.lane.b32.xlu0 %v17156_v26, %s14768_s30  ;;  %v17645_v59 = vsel %vm2367_vm4, %v13409_v13, %v13410_v43  ;;  %v2438_v26 = vsel %vm2367_vm4, %v13384_v29, %v13385_v36 }
 0x268   : > { %23230 = vst [vmem:[#allocation168_spill] sm:$0xff] %v17645_v59  ;;  %v17647_v3 = vpop.permute.xlu1 %13417  ;;  %v2444_v63 = vsel %vm2367_vm4, %v13400_v42, %v13404_v62  ;;  %v2445_v33 = vsel %vm2367_vm4, %v13404_v62, %v13405_v4  ;;  %v2446_v25 = vsel %vm2367_vm4, %v13405_v4, %v13409_v13  ;;  %v10684_v43 = vpack.c.bf16 %v2443_v54, %v2438_v26  ;;  %v14606_v54 = vld [vmem:[%s14807_s17 + $0xa8] sm:$0xff] }
 0x269   : > { %v13413_v16 = vpop.permute.xlu0 %13412  ;;  %v10682_v57 = vpack.c.bf16 %v2444_v63, %v2439_v58  ;;  %v17655_v61 = vpack.c.bf16 %v2445_v33, %v2440_v60  ;;  %v17662_v13 = vpack.c.bf16 %v2446_v25, %v2441_v38  ;;  %v13420_v36 = vunpack.i.h.bf16 %v17647_v3  ;;  %v14605_v60 = vld [vmem:[%s14807_s17 + $0x78] sm:$0xff]  ;;  %v10015_v63 = vld [vmem:[%s22628_s1 + $0x520] sm:$0xff]  ;;  %v14616_v59 = vld [vmem:[%s14807_s17 + $0x1c8] sm:$0xff] }
 0x26a   : > { %13707 = vrot.lane.b32.xlu1 %v17632_v45, %s14766_s8  ;;  %v13415_v42 = vunpack.i.h.bf16 %v13413_v16  ;;  %v13414_v62 = vunpack.i.l.bf16 %v13413_v16  ;;  %v22777_v29 = vunpack.i.l.bf16 %v17647_v3  ;;  %v17679_v58 = vpack.i.bf16 %v14606_v54, %v14605_v60  ;;  %v4354_v54 = vld [vmem:[%s22628_s1 + $0x70] sm:$0xff] }
 0x26b   : > { %23231 = vst [vmem:[#allocation169_spill] sm:$0xff] %v17655_v61  ;;  %13702 = vrot.lane.b32.xlu0 %v17425_v49, %s14768_s30  ;;  %10683 = vmatprep.subr.bf16.mxu0 %v10682_v57  ;;  %23232 = vst [vmem:[#allocation170_spill] sm:$0xff] %v17662_v13  ;;  %v4355_v49 = vld [vmem:[%s22628_s1 + $0x78] sm:$0xff] }
 0x26c   : > { %11003 = vmatprep.subr.bf16.mxu1 %v17655_v61  ;;  %10685 = vmatpush1.bf16.msra.mxu0 %v10684_v43  ;;  %v17667_v4 = vpop.permute.xlu1 %13427  ;;  %v2801_v43 = vsel %vm2800_vm5, %v13414_v62, %v13415_v42 }
 0x26d   : > { %11005 = vmatpush1.bf16.msra.mxu1 %v10682_v57  ;;  %v17672_v2 = vpop.permute.xlu0 %13422  ;;  %v22774_v33 = vunpack.i.h.bf16 %v17667_v4  ;;  %v13429_v25 = vunpack.i.l.bf16 %v17667_v4  ;;  %v10026_v57 = vld [vmem:[%s22628_s1 + $0x578] sm:$0xff] }
 0x26e   : > { %v13425_v26 = vunpack.i.h.bf16 %v17672_v2  ;;  %v22776_v16 = vunpack.i.l.bf16 %v17672_v2  ;;  %13717 = vrot.lane.b32.xlu1 %v17472_v39, %s14768_s30  ;;  %v2802_v39 = vsel %vm2800_vm5, %v13415_v42, %v22777_v29 }
 0x26f   : > { %13712 = vrot.lane.b32.xlu0 %v17163_v47, %s14768_s30  ;;  %5203 = vmatmul.mubr.f32.vlgmr.msra.gmra.mrb[36].mxu0 %v4344_v23 }
 0x270   : > { %v2806_v38 = vsel %vm2800_vm5, %v13425_v26, %v13420_v36  ;;  %v13438_v60 = vpop.permute.xlu1 %13437  ;;  %5207 = vmatprep.mubr.f32.mxu0 %v4355_v49  ;;  %v2807_v62 = vsel %vm2800_vm5, %v13420_v36, %v22776_v16  ;;  %6624 = vmatmul.mubr.f32.vlgmr.msra.gmra.mrb[36].mxu1 %v10015_v63  ;;  %v2812_v36 = vsel %vm2800_vm5, %v13429_v25, %v22774_v33  ;;  %v10025_v63 = vld [vmem:[%s22628_s1 + $0x570] sm:$0xff] }
 0x271   : > { %v13440_v12 = vunpack.i.h.bf16 %v13438_v60  ;;  %v13439_v47 = vunpack.i.l.bf16 %v13438_v60  ;;  %v17706_v23 = vpop.permute.xlu0 %13432  ;;  %v17708_v26 = vpack.c.bf16 %v2807_v62, %v2802_v39  ;;  %v10688_v49 = vpack.c.bf16 %v2806_v38, %v2801_v43  ;;  %6628 = vmatprep.mubr.f32.mxu1 %v10026_v57  ;;  %v4364_v62 = vld [vmem:[%s22628_s1 + $0xc0] sm:$0xff] }
 0x272   : > { %v22772_v35 = vunpack.i.h.bf16 %v17706_v23  ;;  %v13434_v42 = vunpack.i.l.bf16 %v17706_v23  ;;  %13727 = vrot.lane.b32.xlu1 %v17679_v58, %s14766_s8 }
 0x273   : > { %v2811_v43 = vsel %vm2800_vm5, %v13439_v47, %v13429_v25  ;;  %13722 = vrot.lane.b32.xlu0 %v17462_v14, %s14768_s30  ;;  %5208 = vmatmul.mubr.f32.gmra.mrb[38].mxu0 %v4354_v54 }
 0x274   : > { %v2816_v57 = vsel %vm2800_vm5, %v13440_v12, %v13434_v42  ;;  %10687 = vmatprep.subr.bf16.mxu0 %v17708_v26  ;;  %v17728_v38 = vpop.permute.xlu1 %13447  ;;  %v2817_v60 = vsel %vm2800_vm5, %v13434_v42, %v22772_v35  ;;  %5212 = vmatprep.mubr.f32.mxu0 %v4365_v41  ;;  %v14607_v41 = vld [vmem:[%s14807_s17 + $0xd8] sm:$0xff] }
 0x275   : > { %10689 = vmatpush1.bf16.msra.mxu0 %v10688_v49  ;;  %v22773_v25 = vunpack.i.h.bf16 %v17728_v38  ;;  %v13449_v39 = vunpack.i.l.bf16 %v17728_v38  ;;  %v17735_v14 = vpop.permute.xlu0 %13442  ;;  %v17737_v54 = vpack.c.bf16 %v2817_v60, %v2812_v36  ;;  %v10692_v12 = vpack.c.bf16 %v2816_v57, %v2811_v43  ;;  %6629 = vmatmul.mubr.f32.gmra.mrb[38].mxu1 %v10025_v63  ;;  %v14608_v49 = vld [vmem:[%s14807_s17 + $0x108] sm:$0xff]  ;;  %v4375_v36 = vld [vmem:[%s22628_s1 + $0x118] sm:$0xff] }
 0x276   : > { %v22775_v47 = vunpack.i.h.bf16 %v17735_v14  ;;  %v13444_v42 = vunpack.i.l.bf16 %v17735_v14  ;;  %13737 = vrot.lane.b32.xlu1 %v17489_v55, %s14768_s30  ;;  %v17748_v35 = vpack.i.bf16 %v14608_v49, %v14607_v41 }
 0x277   : > { %13732 = vrot.lane.b32.xlu0 %v17493_v31, %s14768_s30  ;;  %10691 = vmatprep.subr.bf16.mxu0 %v17737_v54  ;;  %v2827_v63 = vsel %vm2800_vm5, %v13449_v39, %v22773_v25  ;;  %v4374_v31 = vld [vmem:[%s22628_s1 + $0x110] sm:$0xff] }
 0x278   : > { %v17759_v43 = vpop.permute.xlu1 %13457  ;;  %v2822_v55 = vsel %vm2800_vm5, %v13444_v42, %v22775_v47  ;;  %5213 = vmatmul.mubr.f32.gmra.mrb[4].mxu0 %v4364_v62 }
 0x279   : > { %10693 = vmatpush1.bf16.msra.mxu0 %v10692_v12  ;;  %v13453_v57 = vpop.permute.xlu0 %13452  ;;  %v17764_v60 = vpack.c.bf16 %v2827_v63, %v2822_v55  ;;  %5218 = vmatprep.mubr.f32.mxu0 %v4375_v36  ;;  %v22778_v41 = vunpack.i.h.bf16 %v17759_v43  ;;  %v13459_v49 = vunpack.i.l.bf16 %v17759_v43  ;;  %v4385_v12 = vld [vmem:[%s22628_s1 + $0x168] sm:$0xff] }
 0x27a   : > { %v13455_v25 = vunpack.i.h.bf16 %v13453_v57  ;;  %v13454_v33 = vunpack.i.l.bf16 %v13453_v57  ;;  %13747 = vrot.lane.b32.xlu1 %v17748_v35, %s14766_s8 }
 0x27b   : > { %13742 = vrot.lane.b32.xlu0 %v17508_v24, %s14768_s30  ;;  %10695 = vmatprep.subr.bf16.mxu0 %v17764_v60  ;;  %v4384_v24 = vld [vmem:[%s22628_s1 + $0x160] sm:$0xff] }
 0x27c   : > { %v2826_v62 = vsel %vm2800_vm5, %v13455_v25, %v13449_v39  ;;  %v2821_v36 = vsel %vm2800_vm5, %v13454_v33, %v13444_v42  ;;  %v13468_v63 = vpop.permute.xlu1 %13467  ;;  %5219 = vmatmul.mubr.f32.gmra.mrb[6].mxu0 %v4374_v31  ;;  %v14609_v33 = vld [vmem:[%s14807_s17 + $0x138] sm:$0xff]  ;;  %v14610_v39 = vld [vmem:[%s14807_s17 + $0x168] sm:$0xff]  ;;  %v2832_v31 = vsel %vm2800_vm5, %v13459_v49, %v22778_v41 }
 0x27d   : > { %v13470_v55 = vunpack.i.h.bf16 %v13468_v63  ;;  %v13469_v57 = vunpack.i.l.bf16 %v13468_v63  ;;  %v17781_v47 = vpop.permute.xlu0 %13462  ;;  %v10696_v16 = vpack.c.bf16 %v2826_v62, %v2821_v36  ;;  %5224 = vmatprep.mubr.f32.mxu0 %v4385_v12  ;;  %v17792_v42 = vpack.i.bf16 %v14610_v39, %v14609_v33  ;;  %v4395_v12 = vld [vmem:[%s22628_s1 + $0x1b8] sm:$0xff] }
 0x27e   : > { %v22780_v29 = vunpack.i.h.bf16 %v17781_v47  ;;  %v13464_v25 = vunpack.i.l.bf16 %v17781_v47  ;;  %13757 = vrot.lane.b32.xlu1 %v17549_v21, %s14768_s30  ;;  %v14611_v36 = vld [vmem:[%s14807_s17 + $0x278] sm:$0xff]  ;;  %v14612_v21 = vld [vmem:[%s14807_s17 + $0x280] sm:$0xff] }
 0x27f   : > { %v2831_v62 = vsel %vm2800_vm5, %v13469_v57, %v13459_v49  ;;  %13752 = vrot.lane.b32.xlu0 %v17503_v5, %s14768_s30  ;;  %10697 = vmatpush1.bf16.msra.mxu0 %v10696_v16  ;;  %v17805_v63 = vpack.i.bf16 %v14612_v21, %v14611_v36 }
 0x280   : > { %v2836_v33 = vsel %vm2800_vm5, %v13470_v55, %v13464_v25  ;;  %v17808_v39 = vpop.permute.xlu1 %13477  ;;  %v2837_v41 = vsel %vm2800_vm5, %v13464_v25, %v22780_v29  ;;  %5225 = vmatmul.mubr.f32.gmra.mrb[8].mxu0 %v4384_v24  ;;  %v14613_v24 = vld [vmem:[%s14807_s17 + $0x2a8] sm:$0xff]  ;;  %v14614_v25 = vld [vmem:[%s14807_s17 + $0x2b0] sm:$0xff]  ;;  %v14615_v29 = vld [vmem:[%s14807_s17 + $0x198] sm:$0xff] }
 0x281   : > { %v22783_v49 = vunpack.i.h.bf16 %v17808_v39  ;;  %v13479_v5 = vunpack.i.l.bf16 %v17808_v39  ;;  %v17815_v16 = vpop.permute.xlu0 %13472  ;;  %v17817_v57 = vpack.c.bf16 %v2837_v41, %v2832_v31  ;;  %v10700_v18 = vpack.c.bf16 %v2836_v33, %v2831_v62  ;;  %5230 = vmatprep.mubr.f32.mxu0 %v4395_v12  ;;  %v4394_v41 = vld [vmem:[%s22628_s1 + $0x1b0] sm:$0xff]  ;;  %v4405_v12 = vld [vmem:[%s22628_s1 + $0x208] sm:$0xff] }
 0x282   : > { %v22786_v36 = vunpack.i.h.bf16 %v17815_v16  ;;  %v13474_v55 = vunpack.i.l.bf16 %v17815_v16  ;;  %13767 = vrot.lane.b32.xlu1 %v17792_v42, %s14766_s8  ;;  %v17825_v21 = vpack.i.bf16 %v14614_v25, %v14613_v24  ;;  %v17848_v0 = vpack.i.bf16 %v14616_v59, %v14615_v29  ;;  %v14617_v59 = vld [vmem:[%s14807_s17 + $0x2d8] sm:$0xff]  ;;  %v14618_v29 = vld [vmem:[%s14807_s17 + $0x2e0] sm:$0xff] }
 0x283   : > { %13762 = vrot.lane.b32.xlu0 %v17805_v63, %s14768_s30  ;;  %10699 = vmatprep.subr.bf16.mxu0 %v17817_v57  ;;  %v2847_v31 = vsel %vm2800_vm5, %v13479_v5, %v22783_v49 }
 0x284   : > { %10701 = vmatpush1.bf16.msra.mxu0 %v10700_v18  ;;  %v17839_v62 = vpop.permute.xlu1 %13487  ;;  %v2842_v33 = vsel %vm2800_vm5, %v13474_v55, %v22786_v36 }
 0x285   : > { %v13483_v24 = vpop.permute.xlu0 %13482  ;;  %v17844_v25 = vpack.c.bf16 %v2847_v31, %v2842_v33  ;;  %5231 = vmatmul.mubr.f32.gmra.mrb[10].mxu0 %v4394_v41  ;;  %v13489_v18 = vunpack.i.l.bf16 %v17839_v62  ;;  %v4404_v31 = vld [vmem:[%s22628_s1 + $0x200] sm:$0xff]  ;;  %v17862_v41 = vpack.i.bf16 %v14618_v29, %v14617_v59  ;;  %v4415_v33 = vld [vmem:[%s22628_s1 + $0x258] sm:$0xff] }
 0x286   : > { %v13485_v22 = vunpack.i.h.bf16 %v13483_v24  ;;  %v13484_v34 = vunpack.i.l.bf16 %v13483_v24  ;;  %13777 = vrot.lane.b32.xlu1 %v17825_v21, %s14768_s30  ;;  %5236 = vmatprep.mubr.f32.mxu0 %v4405_v12 }
 0x287   : > { %13772 = vrot.lane.b32.xlu0 %v17559_v46, %s14768_s30  ;;  %10703 = vmatprep.subr.bf16.mxu0 %v17844_v25 }
 0x288   : > { %v2846_v24 = vsel %vm2800_vm5, %v13485_v22, %v13479_v5  ;;  %v2841_v12 = vsel %vm2800_vm5, %v13484_v34, %v13474_v55  ;;  %v13498_v36 = vpop.permute.xlu1 %13497  ;;  %v23233_v22 = vunpack.i.h.bf16 %v17839_v62  ;;  %v4414_v5 = vld [vmem:[%s22628_s1 + $0x250] sm:$0xff]  ;;  %v14619_v55 = vld [vmem:[%s14807_s17 + $0x2a0] sm:$0xff] }
 0x289   : > { %v13500_v49 = vunpack.i.h.bf16 %v13498_v36  ;;  %v13499_v20 = vunpack.i.l.bf16 %v13498_v36  ;;  %v17869_v46 = vpop.permute.xlu0 %13492  ;;  %v10704_v61 = vpack.c.bf16 %v2846_v24, %v2841_v12  ;;  %5237 = vmatmul.mubr.f32.gmra.mrb[12].mxu0 %v4404_v31  ;;  %v14620_v31 = vld [vmem:[%s14807_s17 + $0x2d0] sm:$0xff] }
 0x28a   : > { %v22791_v59 = vunpack.i.h.bf16 %v17869_v46  ;;  %v13494_v29 = vunpack.i.l.bf16 %v17869_v46  ;;  %13787 = vrot.lane.b32.xlu1 %v17848_v0, %s14766_s8  ;;  %v2852_v34 = vsel %vm2800_vm5, %v13489_v18, %v23233_v22  ;;  %5242 = vmatprep.mubr.f32.mxu0 %v4415_v33  ;;  %v17886_v24 = vpack.i.bf16 %v14620_v31, %v14619_v55  ;;  %v4425_v33 = vld [vmem:[%s22628_s1 + $0x2a8] sm:$0xff] }
 0x28b   : > { %v2851_v36 = vsel %vm2800_vm5, %v13499_v20, %v13489_v18  ;;  %13782 = vrot.lane.b32.xlu0 %v17862_v41, %s14768_s30  ;;  %10705 = vmatpush1.bf16.msra.mxu0 %v10704_v61 }
 0x28c   : > { %v2856_v12 = vsel %vm2800_vm5, %v13500_v49, %v13494_v29  ;;  %v17892_v22 = vpop.permute.xlu1 %13507  ;;  %v2857_v20 = vsel %vm2800_vm5, %v13494_v29, %v22791_v59  ;;  %v14621_v29 = vld [vmem:[%s14807_s17 + $0x1f8] sm:$0xff]  ;;  %v14622_v59 = vld [vmem:[%s14807_s17 + $0x228] sm:$0xff] }
 0x28d   : > { %v13509_v18 = vunpack.i.l.bf16 %v17892_v22  ;;  %v17899_v55 = vpop.permute.xlu0 %13502  ;;  %v17901_v31 = vpack.c.bf16 %v2857_v20, %v2852_v34  ;;  %v10708_v13 = vpack.c.bf16 %v2856_v12, %v2851_v36  ;;  %5243 = vmatmul.mubr.f32.gmra.mrb[14].mxu0 %v4414_v5  ;;  %v17909_v61 = vpack.i.bf16 %v14622_v59, %v14621_v29  ;;  %v4424_v34 = vld [vmem:[%s22628_s1 + $0x2a0] sm:$0xff]  ;;  %v14623_v5 = vld [vmem:[%s14807_s17 + $0x38] sm:$0xff] }
 0x28e   : > { %v22797_v49 = vunpack.i.h.bf16 %v17899_v55  ;;  %v13504_v17 = vunpack.i.l.bf16 %v17899_v55  ;;  %13797 = vrot.lane.b32.xlu1 %v17342_v10, %s14769_s26  ;;  %5248 = vmatprep.mubr.f32.mxu0 %v4425_v33  ;;  %v14624_v36 = vld [vmem:[%s14807_s17 + $0x40] sm:$0xff]  ;;  %v23234_v10 = vunpack.i.h.bf16 %v17892_v22  ;;  %v4435_v59 = vld [vmem:[%s22628_s1 + $0x2f8] sm:$0xff] }
 0x28f   : > { %13792 = vrot.lane.b32.xlu0 %v17886_v24, %s14768_s30  ;;  %10707 = vmatprep.subr.bf16.mxu0 %v17901_v31  ;;  %v13801_v12 = vpack.i.bf16 %v14624_v36, %v14623_v5  ;;  %v14625_v5 = vld [vmem:[%s14807_s17 + $0x68] sm:$0xff]  ;;  %v14626_v36 = vld [vmem:[%s14807_s17 + $0x70] sm:$0xff] }
 0x290   : > { %v2867_v20 = vsel %vm2800_vm5, %v13509_v18, %v23234_v10  ;;  %10709 = vmatpush1.bf16.msra.mxu0 %v10708_v13  ;;  %v17925_v33 = vpop.permute.xlu1 %13517  ;;  %v2862_v29 = vsel %vm2800_vm5, %v13504_v17, %v22797_v49  ;;  %v13816_v53 = vpack.i.bf16 %v14626_v36, %v14625_v5  ;;  %v4434_v49 = vld [vmem:[%s22628_s1 + $0x2f0] sm:$0xff] }
 0x291   : > { %v13513_v6 = vpop.permute.xlu0 %13512  ;;  %v17930_v7 = vpack.c.bf16 %v2867_v20, %v2862_v29  ;;  %5249 = vmatmul.mubr.f32.gmra.mrb[16].mxu0 %v4424_v34  ;;  %v13519_v44 = vunpack.i.l.bf16 %v17925_v33  ;;  %v14627_v34 = vld [vmem:[%s14807_s17] sm:$0xff]  ;;  %v14628_v20 = vld [vmem:[%s14807_s17 + $0x30] sm:$0xff] }
 0x292   : > { %v13515_v13 = vunpack.i.h.bf16 %v13513_v6  ;;  %v13514_v8 = vunpack.i.l.bf16 %v13513_v6  ;;  %13807 = vrot.lane.b32.xlu1 %v17909_v61, %s14766_s8  ;;  %5254 = vmatprep.mubr.f32.mxu0 %v4435_v59  ;;  %v13811_v29 = vpack.i.bf16 %v14628_v20, %v14627_v34  ;;  %v4445_v6 = vld [vmem:[%s22628_s1 + $0x348] sm:$0xff]  ;;  %v14629_v20 = vld [vmem:[%s14807_s17 + $0x258] sm:$0xff] }
 0x293   : > { %13802 = vrot.lane.b32.xlu0 %v13801_v12, %s14769_s26  ;;  %10711 = vmatprep.subr.bf16.mxu0 %v17930_v7 }
 0x294   : > { %v2866_v5 = vsel %vm2800_vm5, %v13515_v13, %v13509_v18  ;;  %v2861_v59 = vsel %vm2800_vm5, %v13514_v8, %v13504_v17  ;;  %v13528_v36 = vpop.permute.xlu1 %13527  ;;  %v17957_v18 = vpack.i.bf16 %v14630_v48, %v14629_v20  ;;  %v23235_v8 = vunpack.i.h.bf16 %v17925_v33  ;;  %v4444_v13 = vld [vmem:[%s22628_s1 + $0x340] sm:$0xff]  ;;  %v4455_v48 = vld [vmem:[%s22628_s1 + $0x398] sm:$0xff] }
 0x295   : > { %v13530_v10 = vunpack.i.h.bf16 %v13528_v36  ;;  %v13529_v1 = vunpack.i.l.bf16 %v13528_v36  ;;  %v17950_v12 = vpop.permute.xlu0 %13522  ;;  %v10712_v30 = vpack.c.bf16 %v2866_v5, %v2861_v59  ;;  %5255 = vmatmul.mubr.f32.gmra.mrb[18].mxu0 %v4434_v49  ;;  %v14631_v5 = vld [vmem:[%s14807_s17 + $0x98] sm:$0xff] }
 0x296   : > { %v22802_v28 = vunpack.i.h.bf16 %v17950_v12  ;;  %v13524_v34 = vunpack.i.l.bf16 %v17950_v12  ;;  %13817 = vrot.lane.b32.xlu1 %v13816_v53, %s14769_s26  ;;  %v2872_v17 = vsel %vm2800_vm5, %v13519_v44, %v23235_v8  ;;  %5260 = vmatprep.mubr.f32.mxu0 %v4445_v6  ;;  %v14632_v53 = vld [vmem:[%s14807_s17 + $0xa0] sm:$0xff] }
 0x297   : > { %v2871_v49 = vsel %vm2800_vm5, %v13529_v1, %v13519_v44  ;;  %13812 = vrot.lane.b32.xlu0 %v13811_v29, %s14769_s26  ;;  %10713 = vmatpush1.bf16.msra.mxu0 %v10712_v30  ;;  %v13821_v59 = vpack.i.bf16 %v14632_v53, %v14631_v5  ;;  %v14634_v53 = vld [vmem:[%s14807_s17 + $0xd0] sm:$0xff] }
 0x298   : > { %v2876_v6 = vsel %vm2800_vm5, %v13530_v10, %v13524_v34  ;;  %v17973_v36 = vpop.permute.xlu1 %13537  ;;  %v2877_v1 = vsel %vm2800_vm5, %v13524_v34, %v22802_v28  ;;  %v14633_v34 = vld [vmem:[%s14807_s17 + $0xc8] sm:$0xff]  ;;  %v4454_v30 = vld [vmem:[%s22628_s1 + $0x390] sm:$0xff] }
 0x299   : > { %v13539_v44 = vunpack.i.l.bf16 %v17973_v36  ;;  %v17980_v29 = vpop.permute.xlu0 %13532  ;;  %v17982_v20 = vpack.c.bf16 %v2877_v1, %v2872_v17  ;;  %v10716_v8 = vpack.c.bf16 %v2876_v6, %v2871_v49  ;;  %5261 = vmatmul.mubr.f32.gmra.mrb[20].mxu0 %v4444_v13  ;;  %v13836_v28 = vpack.i.bf16 %v14634_v53, %v14633_v34  ;;  %v4886_v17 = vpop.f32.mrb[0].mxu0  ;;  %v10036_v13 = vld [vmem:[%s22628_s1 + $0x5c8] sm:$0xff]  ;;  %v14635_v49 = vld [vmem:[%s14807_s17 + $0x60] sm:$0xff]  ;;  %v14636_v6 = vld [vmem:[%s14807_s17 + $0x90] sm:$0xff] }
 0x29a   : > { %v13534_v5 = vunpack.i.l.bf16 %v17980_v29  ;;  %13827 = vrot.lane.b32.xlu1 %v17957_v18, %s14766_s8  ;;  %5266 = vmatprep.mubr.f32.mxu0 %v4455_v48  ;;  %v13831_v1 = vpack.i.bf16 %v14636_v6, %v14635_v49  ;;  %v23236_v48 = vunpack.i.h.bf16 %v17973_v36  ;;  %v4465_v53 = vld [vmem:[%s22628_s1 + $0x3e8] sm:$0xff]  ;;  %v4888_v10 = vpop.f32.mrb[1].mxu0  ;;  %v23237_v15 = vunpack.i.h.bf16 %v17980_v29 }
 0x29b   : > { %13822 = vrot.lane.b32.xlu0 %v13821_v59, %s14769_s26  ;;  %10715 = vmatprep.subr.bf16.mxu0 %v17982_v20  ;;  %v10035_v59 = vld [vmem:[%s22628_s1 + $0x5c0] sm:$0xff]  ;;  %v4891_v6 = vpop.f32.mrb[2].mxu0  ;;  %v18018_v10 = vpack.i.bf16 %v14638_v51, %v14637_v37  ;;  %v10046_v37 = vld [vmem:[%s22628_s1 + $0x618] sm:$0xff] }
 0x29c   : > { %v3240_v34 = vsel %vm3233_vm6, %v13539_v44, %v23236_v48  ;;  %10717 = vmatpush1.bf16.msra.mxu0 %v10716_v8  ;;  %v18009_v9 = vpop.permute.xlu1 %13547  ;;  %v3235_v49 = vsel %vm3233_vm6, %v13534_v5, %v23237_v15  ;;  %6633 = vmatprep.mubr.f32.mxu1 %v10036_v13  ;;  %v4893_v8 = vpop.f32.mrb[3].mxu0  ;;  %v4464_v13 = vld [vmem:[%s22628_s1 + $0x3e0] sm:$0xff]  ;;  %v14639_v51 = vld [vmem:[%s14807_s17 + $0xf8] sm:$0xff] }
 0x29d   : > { %v13543_v50 = vpop.permute.xlu0 %13542  ;;  %v18014_v48 = vpack.c.bf16 %v3240_v34, %v3235_v49  ;;  %5267 = vmatmul.mubr.f32.gmra.mrb[22].mxu0 %v4454_v30  ;;  %6634 = vmatmul.mubr.f32.gmra.mrb[4].mxu1 %v10035_v59  ;;  %v13549_v52 = vunpack.i.l.bf16 %v18009_v9  ;;  %v5045_v34 = vpop.f32.mrb[32].mxu0  ;;  %v14640_v30 = vld [vmem:[%s14807_s17 + $0x100] sm:$0xff] }
 0x29e   : > { %v13545_v11 = vunpack.i.h.bf16 %v13543_v50  ;;  %v13544_v15 = vunpack.i.l.bf16 %v13543_v50  ;;  %13837 = vrot.lane.b32.xlu1 %v13836_v28, %s14769_s26  ;;  %5272 = vmatprep.mubr.f32.mxu0 %v4465_v53  ;;  %v13841_v59 = vpack.i.bf16 %v14640_v30, %v14639_v51  ;;  %v4475_v50 = vld [vmem:[%s22628_s1 + $0x438] sm:$0xff]  ;;  %v18036_v28 = vadd.f32 %v5045_v34, %v4886_v17  ;;  %v10045_v53 = vld [vmem:[%s22628_s1 + $0x610] sm:$0xff]  ;;  %v5047_v49 = vpop.f32.mrb[33].mxu0 }
 0x29f   : > { %13832 = vrot.lane.b32.xlu0 %v13831_v1, %s14769_s26  ;;  %10719 = vmatprep.subr.bf16.mxu0 %v18014_v48 }
 0x2a0   : > { %23238 = vst [vmem:[#allocation171_spill] sm:$0xff] %v18036_v28  ;;  %v3239_v1 = vsel %vm3233_vm6, %v13545_v11, %v13539_v44  ;;  %v3234_v8 = vsel %vm3233_vm6, %v13544_v15, %v13534_v5  ;;  %v13558_v27 = vpop.permute.xlu1 %13557  ;;  %6639 = vmatprep.mubr.f32.mxu1 %v10046_v37  ;;  %v14641_v11 = vld [vmem:[%s14807_s17 + $0x128] sm:$0xff]  ;;  %v14642_v44 = vld [vmem:[%s14807_s17 + $0x130] sm:$0xff]  ;;  %v23239_v15 = vunpack.i.h.bf16 %v18009_v9  ;;  %v5050_v37 = vpop.f32.mrb[34].mxu0 }
 0x2a1   : > { %v13560_v51 = vunpack.i.h.bf16 %v13558_v27  ;;  %v13559_v30 = vunpack.i.l.bf16 %v13558_v27  ;;  %v18043_v40 = vpop.permute.xlu0 %13552  ;;  %v10720_v19 = vpack.c.bf16 %v3239_v1, %v3234_v8  ;;  %5273 = vmatmul.mubr.f32.gmra.mrb[24].mxu0 %v4464_v13  ;;  %6640 = vmatmul.mubr.f32.gmra.mrb[6].mxu1 %v10045_v53  ;;  %v13856_v5 = vpack.i.bf16 %v14642_v44, %v14641_v11  ;;  %v4474_v13 = vld [vmem:[%s22628_s1 + $0x430] sm:$0xff]  ;;  %v10056_v53 = vld [vmem:[%s22628_s1 + $0x668] sm:$0xff]  ;;  %v14643_v1 = vld [vmem:[%s14807_s17 + $0xc0] sm:$0xff]  ;;  %v5052_v17 = vpop.f32.mrb[35].mxu0 }
 0x2a2   : > { %v13554_v34 = vunpack.i.l.bf16 %v18043_v40  ;;  %13847 = vrot.lane.b32.xlu1 %v18018_v10, %s14766_s8  ;;  %v3245_v27 = vsel %vm3233_vm6, %v13549_v52, %v23239_v15  ;;  %5278 = vmatprep.mubr.f32.mxu0 %v4475_v50  ;;  %v14644_v8 = vld [vmem:[%s14807_s17 + $0xf0] sm:$0xff]  ;;  %v4485_v50 = vld [vmem:[%s22628_s1 + $0x488] sm:$0xff]  ;;  %v18067_v44 = vadd.f32 %v5050_v37, %v4891_v6  ;;  %v10055_v15 = vld [vmem:[%s22628_s1 + $0x660] sm:$0xff] }
 0x2a3   : > { %v3244_v49 = vsel %vm3233_vm6, %v13559_v30, %v13549_v52  ;;  %13842 = vrot.lane.b32.xlu0 %v13841_v59, %s14769_s26  ;;  %10721 = vmatpush1.bf16.msra.mxu0 %v10720_v19  ;;  %v13851_v11 = vpack.i.bf16 %v14644_v8, %v14643_v1  ;;  %v23241_v19 = vunpack.i.h.bf16 %v18043_v40 }
 0x2a4   : > { %23240 = vst [vmem:[#allocation172_spill] sm:$0xff] %v18067_v44  ;;  %v3249_v32 = vsel %vm3233_vm6, %v13560_v51, %v13554_v34  ;;  %v18073_v52 = vpop.permute.xlu1 %13567  ;;  %6645 = vmatprep.mubr.f32.mxu1 %v10056_v53 }
 0x2a5   : > { %v3250_v59 = vsel %vm3233_vm6, %v13554_v34, %v23241_v19  ;;  %v22814_v30 = vunpack.i.h.bf16 %v18073_v52  ;;  %v13569_v6 = vunpack.i.l.bf16 %v18073_v52  ;;  %v18080_v37 = vpop.permute.xlu0 %13562  ;;  %v10724_v17 = vpack.c.bf16 %v3249_v32, %v3244_v49  ;;  %5279 = vmatmul.mubr.f32.gmra.mrb[26].mxu0 %v4474_v13  ;;  %6646 = vmatmul.mubr.f32.gmra.mrb[8].mxu1 %v10055_v15  ;;  %v4484_v34 = vld [vmem:[%s22628_s1 + $0x480] sm:$0xff]  ;;  %v14645_v32 = vld [vmem:[%s14807_s17 + $0x158] sm:$0xff] }
 0x2a6   : > { %v18082_v1 = vpack.c.bf16 %v3250_v59, %v3245_v27  ;;  %v22816_v51 = vunpack.i.h.bf16 %v18080_v37  ;;  %v13564_v8 = vunpack.i.l.bf16 %v18080_v37  ;;  %13857 = vrot.lane.b32.xlu1 %v13856_v5, %s14769_s26  ;;  %5284 = vmatprep.mubr.f32.mxu0 %v4485_v50  ;;  %v10066_v27 = vld [vmem:[%s22628_s1 + $0x6b8] sm:$0xff]  ;;  %v14646_v13 = vld [vmem:[%s14807_s17 + $0x160] sm:$0xff]  ;;  %v10065_v50 = vld [vmem:[%s22628_s1 + $0x6b0] sm:$0xff] }
 0x2a7   : > { %13852 = vrot.lane.b32.xlu0 %v13851_v11, %s14769_s26  ;;  %v13861_v53 = vpack.i.bf16 %v14646_v13, %v14645_v32  ;;  %v3260_v5 = vsel %vm3233_vm6, %v13569_v6, %v22814_v30  ;;  %v4495_v49 = vld [vmem:[%s22628_s1 + $0x4d8] sm:$0xff]  ;;  %6651 = vmatprep.mubr.f32.mxu1 %v10066_v27  ;;  %v14647_v32 = vld [vmem:[%s14807_s17 + $0x188] sm:$0xff]  ;;  %v14648_v13 = vld [vmem:[%s14807_s17 + $0x190] sm:$0xff] }
 0x2a8   : > { %10723 = vmatprep.subr.bf16.mxu0 %v18082_v1  ;;  %v18106_v15 = vpop.permute.xlu1 %13577  ;;  %v3255_v11 = vsel %vm3233_vm6, %v13564_v8, %v22816_v51  ;;  %v13876_v30 = vpack.i.bf16 %v14648_v13, %v14647_v32  ;;  %v4494_v27 = vld [vmem:[%s22628_s1 + $0x4d0] sm:$0xff] }
 0x2a9   : > { %10725 = vmatpush1.bf16.msra.mxu0 %v10724_v17  ;;  %v13573_v19 = vpop.permute.xlu0 %13572  ;;  %v18111_v59 = vpack.c.bf16 %v3260_v5, %v3255_v11  ;;  %6652 = vmatmul.mubr.f32.gmra.mrb[10].mxu1 %v10065_v50  ;;  %v13579_v17 = vunpack.i.l.bf16 %v18106_v15  ;;  %v10076_v5 = vld [vmem:[%s22628_s1 + $0x708] sm:$0xff]  ;;  %v14650_v50 = vld [vmem:[%s14807_s17 + $0x150] sm:$0xff] }
 0x2aa   : > { %5285 = vmatmul.mubr.f32.gmra.mrb[28].mxu0 %v4484_v34  ;;  %v13575_v44 = vunpack.i.h.bf16 %v13573_v19  ;;  %v13574_v28 = vunpack.i.l.bf16 %v13573_v19  ;;  %13867 = vrot.lane.b32.xlu1 %v17632_v45, %s14767_s18  ;;  %v14649_v34 = vld [vmem:[%s14807_s17 + $0x120] sm:$0xff]  ;;  %v4347_v45 = vld [vmem:[%s22628_s1 + $0x38] sm:$0xff] }
 0x2ab   : > { %23242 = vst [vmem:[#allocation173_spill] sm:$0xff] %v18111_v59  ;;  %5290 = vmatprep.mubr.f32.mxu0 %v4495_v49  ;;  %13862 = vrot.lane.b32.xlu0 %v13861_v53, %s14769_s26  ;;  %v13871_v11 = vpack.i.bf16 %v14650_v50, %v14649_v34  ;;  %v10075_v49 = vld [vmem:[%s22628_s1 + $0x700] sm:$0xff] }
 0x2ac   : > { %10727 = vmatprep.subr.bf16.mxu0 %v18111_v59  ;;  %v3259_v19 = vsel %vm3233_vm6, %v13575_v44, %v13569_v6  ;;  %v3254_v32 = vsel %vm3233_vm6, %v13574_v28, %v13564_v8  ;;  %v13588_v13 = vpop.permute.xlu1 %13587  ;;  %6657 = vmatprep.mubr.f32.mxu1 %v10076_v5  ;;  %v23243_v44 = vunpack.i.h.bf16 %v18106_v15  ;;  %v10086_v6 = vld [vmem:[%s22628_s1 + $0x758] sm:$0xff]  ;;  %v14652_v5 = vld [vmem:[%s14807_s17 + $0x1c0] sm:$0xff] }
 0x2ad   : > { %v13590_v53 = vunpack.i.h.bf16 %v13588_v13  ;;  %v13589_v51 = vunpack.i.l.bf16 %v13588_v13  ;;  %v18137_v56 = vpop.permute.xlu0 %13582  ;;  %v10728_v34 = vpack.c.bf16 %v3259_v19, %v3254_v32  ;;  %6658 = vmatmul.mubr.f32.gmra.mrb[12].mxu1 %v10075_v49 }
 0x2ae   : > { %5291 = vmatmul.mubr.f32.gmra.mrb[30].mxu0 %v4494_v27  ;;  %v22819_v50 = vunpack.i.h.bf16 %v18137_v56  ;;  %v13584_v59 = vunpack.i.l.bf16 %v18137_v56  ;;  %13877 = vrot.lane.b32.xlu1 %v13876_v30, %s14769_s26  ;;  %v3265_v28 = vsel %vm3233_vm6, %v13579_v17, %v23243_v44  ;;  %v14651_v27 = vld [vmem:[%s14807_s17 + $0x1b8] sm:$0xff]  ;;  %v10085_v30 = vld [vmem:[%s22628_s1 + $0x750] sm:$0xff] }
 0x2af   : > { %5361 = vmatprep.mubr.f32.mxu0 %v4347_v45  ;;  %v3264_v8 = vsel %vm3233_vm6, %v13589_v51, %v13579_v17  ;;  %13872 = vrot.lane.b32.xlu0 %v13871_v11, %s14769_s26  ;;  %v13881_v49 = vpack.i.bf16 %v14652_v5, %v14651_v27  ;;  %v10096_v5 = vld [vmem:[%s22628_s1 + $0x7a8] sm:$0xff] }
 0x2b0   : > { %10729 = vmatpush1.bf16.msra.mxu0 %v10728_v34  ;;  %v3269_v45 = vsel %vm3233_vm6, %v13590_v53, %v13584_v59  ;;  %v18156_v19 = vpop.permute.xlu1 %13597  ;;  %v3270_v51 = vsel %vm3233_vm6, %v13584_v59, %v22819_v50  ;;  %6663 = vmatprep.mubr.f32.mxu1 %v10086_v6  ;;  %v14653_v59 = vld [vmem:[%s14807_s17 + $0x1e8] sm:$0xff]  ;;  %v14654_v6 = vld [vmem:[%s14807_s17 + $0x1f0] sm:$0xff] }
 0x2b1   : > { %23244 = vst [vmem:[#allocation174_spill] sm:$0xff] %v18156_v19  ;;  %v22818_v17 = vunpack.i.h.bf16 %v18156_v19  ;;  %v13599_v11 = vunpack.i.l.bf16 %v18156_v19  ;;  %v18163_v32 = vpop.permute.xlu0 %13592  ;;  %v18165_v13 = vpack.c.bf16 %v3270_v51, %v3265_v28  ;;  %v10732_v34 = vpack.c.bf16 %v3269_v45, %v3264_v8  ;;  %6664 = vmatmul.mubr.f32.gmra.mrb[14].mxu1 %v10085_v30  ;;  %v14655_v28 = vld [vmem:[%s14807_s17 + $0x180] sm:$0xff]  ;;  %v14656_v8 = vld [vmem:[%s14807_s17 + $0x1b0] sm:$0xff] }
 0x2b2   : > { %23245 = vst [vmem:[#allocation175_spill] sm:$0xff] %v18163_v32  ;;  %v22820_v53 = vunpack.i.h.bf16 %v18163_v32  ;;  %v13594_v44 = vunpack.i.l.bf16 %v18163_v32  ;;  %13887 = vrot.lane.b32.xlu1 %v17679_v58, %s14767_s18  ;;  %v13896_v27 = vpack.i.bf16 %v14654_v6, %v14653_v59  ;;  %v13891_v30 = vpack.i.bf16 %v14656_v8, %v14655_v28  ;;  %v10095_v58 = vld [vmem:[%s22628_s1 + $0x7a0] sm:$0xff]  ;;  %6669 = vmatprep.mubr.f32.mxu1 %v10096_v5  ;;  %v14657_v5 = vld [vmem:[%s14807_s17 + $0x218] sm:$0xff] }
 0x2b3   : > { %13882 = vrot.lane.b32.xlu0 %v13881_v49, %s14769_s26  ;;  %10731 = vmatprep.subr.bf16.mxu0 %v18165_v13  ;;  %v3280_v45 = vsel %vm3233_vm6, %v13599_v11, %v22818_v17 }
 0x2b4   : > { %10733 = vmatpush1.bf16.msra.mxu0 %v10732_v34  ;;  %v18186_v51 = vpop.permute.xlu1 %13607  ;;  %v3275_v49 = vsel %vm3233_vm6, %v13594_v44, %v22820_v53  ;;  %v10106_v34 = vld [vmem:[%s22628_s1 + $0x7f8] sm:$0xff] }
 0x2b5   : > { %23246 = vst [vmem:[#allocation176_spill] sm:$0xff] %v18186_v51  ;;  %v13603_v59 = vpop.permute.xlu0 %13602  ;;  %v18191_v6 = vpack.c.bf16 %v3280_v45, %v3275_v49  ;;  %6670 = vmatmul.mubr.f32.gmra.mrb[16].mxu1 %v10095_v58  ;;  %v13609_v8 = vunpack.i.l.bf16 %v18186_v51  ;;  %v14658_v45 = vld [vmem:[%s14807_s17 + $0x220] sm:$0xff]  ;;  %v10105_v49 = vld [vmem:[%s22628_s1 + $0x7f0] sm:$0xff] }
 0x2b6   : > { %v13605_v17 = vunpack.i.h.bf16 %v13603_v59  ;;  %v13604_v50 = vunpack.i.l.bf16 %v13603_v59  ;;  %13897 = vrot.lane.b32.xlu1 %v13896_v27, %s14769_s26  ;;  %v13901_v58 = vpack.i.bf16 %v14658_v45, %v14657_v5  ;;  %6675 = vmatprep.mubr.f32.mxu1 %v10106_v34 }
 0x2b7   : > { %23247 = vst [vmem:[#allocation177_spill] sm:$0xff] %v18191_v6  ;;  %13892 = vrot.lane.b32.xlu0 %v13891_v30, %s14769_s26  ;;  %10735 = vmatprep.subr.bf16.mxu0 %v18191_v6 }
 0x2b8   : > { %v3279_v59 = vsel %vm3233_vm6, %v13605_v17, %v13599_v11  ;;  %v3274_v27 = vsel %vm3233_vm6, %v13604_v50, %v13594_v44  ;;  %v13618_v53 = vpop.permute.xlu1 %13617  ;;  %v14659_v17 = vld [vmem:[%s14807_s17 + $0x248] sm:$0xff]  ;;  %v14660_v11 = vld [vmem:[%s14807_s17 + $0x250] sm:$0xff]  ;;  %v23248_v44 = vunpack.i.h.bf16 %v18186_v51 }
 0x2b9   : > { %v13620_v28 = vunpack.i.h.bf16 %v13618_v53  ;;  %v13619_v30 = vunpack.i.l.bf16 %v13618_v53  ;;  %v18208_v6 = vpop.permute.xlu0 %13612  ;;  %v10736_v19 = vpack.c.bf16 %v3279_v59, %v3274_v27  ;;  %6676 = vmatmul.mubr.f32.gmra.mrb[18].mxu1 %v10105_v49  ;;  %v13916_v50 = vpack.i.bf16 %v14660_v11, %v14659_v17  ;;  %v10116_v53 = vld [vmem:[%s22628_s1 + $0x848] sm:$0xff]  ;;  %v14661_v59 = vld [vmem:[%s14807_s17 + $0x1e0] sm:$0xff]  ;;  %v14662_v27 = vld [vmem:[%s14807_s17 + $0x210] sm:$0xff] }
 0x2ba   : > { %v13614_v45 = vunpack.i.l.bf16 %v18208_v6  ;;  %13907 = vrot.lane.b32.xlu1 %v17748_v35, %s14767_s18  ;;  %v3285_v34 = vsel %vm3233_vm6, %v13609_v8, %v23248_v44  ;;  %v13911_v5 = vpack.i.bf16 %v14662_v27, %v14661_v59  ;;  %v10115_v17 = vld [vmem:[%s22628_s1 + $0x840] sm:$0xff]  ;;  %v23250_v44 = vunpack.i.h.bf16 %v18208_v6  ;;  %6681 = vmatprep.mubr.f32.mxu1 %v10116_v53 }
 0x2bb   : > { %v3284_v49 = vsel %vm3233_vm6, %v13619_v30, %v13609_v8  ;;  %13902 = vrot.lane.b32.xlu0 %v13901_v58, %s14769_s26  ;;  %10737 = vmatpush1.bf16.msra.mxu0 %v10736_v19 }
 0x2bc   : > { %v3289_v11 = vsel %vm3233_vm6, %v13620_v28, %v13614_v45  ;;  %v18230_v51 = vpop.permute.xlu1 %13627  ;;  %v3290_v32 = vsel %vm3233_vm6, %v13614_v45, %v23250_v44  ;;  %v10126_v45 = vld [vmem:[%s22628_s1 + $0x898] sm:$0xff] }
 0x2bd   : > { %23249 = vst [vmem:[#allocation178_spill] sm:$0xff] %v18230_v51  ;;  %v22825_v8 = vunpack.i.h.bf16 %v18230_v51  ;;  %v13629_v19 = vunpack.i.l.bf16 %v18230_v51  ;;  %v18237_v58 = vpop.permute.xlu0 %13622  ;;  %v18239_v30 = vpack.c.bf16 %v3290_v32, %v3285_v34  ;;  %v10740_v59 = vpack.c.bf16 %v3289_v11, %v3284_v49  ;;  %6682 = vmatmul.mubr.f32.gmra.mrb[20].mxu1 %v10115_v17  ;;  %v10125_v34 = vld [vmem:[%s22628_s1 + $0x890] sm:$0xff] }
 0x2be   : > { %23251 = vst [vmem:[#allocation179_spill] sm:$0xff] %v18237_v58  ;;  %v22826_v27 = vunpack.i.h.bf16 %v18237_v58  ;;  %v13624_v28 = vunpack.i.l.bf16 %v18237_v58  ;;  %13917 = vrot.lane.b32.xlu1 %v13916_v50, %s14769_s26  ;;  %6687 = vmatprep.mubr.f32.mxu1 %v10126_v45  ;;  %v14663_v45 = vld [vmem:[%s14807_s17 + $0x240] sm:$0xff] }
 0x2bf   : > { %23252 = vst [vmem:[#allocation180_spill] sm:$0xff] %v18239_v30  ;;  %13912 = vrot.lane.b32.xlu0 %v13911_v5, %s14769_s26  ;;  %10739 = vmatprep.subr.bf16.mxu0 %v18239_v30  ;;  %v3300_v32 = vsel %vm3233_vm6, %v13629_v19, %v22825_v8 }
 0x2c0   : > { %10741 = vmatpush1.bf16.msra.mxu0 %v10740_v59  ;;  %v18255_v50 = vpop.permute.xlu1 %13637  ;;  %v3295_v53 = vsel %vm3233_vm6, %v13624_v28, %v22826_v27  ;;  %v10136_v59 = vld [vmem:[%s22628_s1 + $0x8e8] sm:$0xff] }
 0x2c1   : > { %v13633_v5 = vpop.permute.xlu0 %13632  ;;  %v18260_v49 = vpack.c.bf16 %v3300_v32, %v3295_v53  ;;  %6688 = vmatmul.mubr.f32.gmra.mrb[22].mxu1 %v10125_v34  ;;  %v13639_v11 = vunpack.i.l.bf16 %v18255_v50  ;;  %v14664_v32 = vld [vmem:[%s14807_s17 + $0x270] sm:$0xff]  ;;  %v10135_v53 = vld [vmem:[%s22628_s1 + $0x8e0] sm:$0xff] }
 0x2c2   : > { %v13635_v44 = vunpack.i.h.bf16 %v13633_v5  ;;  %v13634_v8 = vunpack.i.l.bf16 %v13633_v5  ;;  %13927 = vrot.lane.b32.xlu1 %v17792_v42, %s14767_s18  ;;  %v13931_v34 = vpack.i.bf16 %v14664_v32, %v14663_v45  ;;  %6693 = vmatprep.mubr.f32.mxu1 %v10136_v59  ;;  %v23254_v32 = vunpack.i.h.bf16 %v18255_v50 }
 0x2c3   : > { %23253 = vst [vmem:[#allocation181_spill] sm:$0xff] %v18260_v49  ;;  %13922 = vrot.lane.b32.xlu0 %v17805_v63, %s14769_s26  ;;  %10743 = vmatprep.subr.bf16.mxu0 %v18260_v49 }
 0x2c4   : > { %v3299_v5 = vsel %vm3233_vm6, %v13635_v44, %v13629_v19  ;;  %v3294_v27 = vsel %vm3233_vm6, %v13634_v8, %v13624_v28  ;;  %v13648_v17 = vpop.permute.xlu1 %13647  ;;  %v3305_v19 = vsel %vm3233_vm6, %v13639_v11, %v23254_v32  ;;  %v10146_v8 = vld [vmem:[%s22628_s1 + $0x938] sm:$0xff] }
 0x2c5   : > { %v13650_v51 = vunpack.i.h.bf16 %v13648_v17  ;;  %v13649_v58 = vunpack.i.l.bf16 %v13648_v17  ;;  %v18279_v30 = vpop.permute.xlu0 %13642  ;;  %v10744_v63 = vpack.c.bf16 %v3299_v5, %v3294_v27  ;;  %6694 = vmatmul.mubr.f32.gmra.mrb[24].mxu1 %v10135_v53  ;;  %v10145_v27 = vld [vmem:[%s22628_s1 + $0x930] sm:$0xff] }
 0x2c6   : > { %v22832_v49 = vunpack.i.h.bf16 %v18279_v30  ;;  %v13644_v45 = vunpack.i.l.bf16 %v18279_v30  ;;  %13937 = vrot.lane.b32.xlu1 %v17825_v21, %s14769_s26  ;;  %6699 = vmatprep.mubr.f32.mxu1 %v10146_v8  ;;  %v4346_v8 = vld [vmem:[%s22628_s1 + $0x30] sm:$0xff] }
 0x2c7   : > { %v3304_v28 = vsel %vm3233_vm6, %v13649_v58, %v13639_v11  ;;  %13932 = vrot.lane.b32.xlu0 %v13931_v34, %s14769_s26  ;;  %10745 = vmatpush1.bf16.msra.mxu0 %v10744_v63  ;;  %v10156_v63 = vld [vmem:[%s22628_s1 + $0x988] sm:$0xff] }
 0x2c8   : > { %v3309_v17 = vsel %vm3233_vm6, %v13650_v51, %v13644_v45  ;;  %v18297_v21 = vpop.permute.xlu1 %13657  ;;  %v3310_v44 = vsel %vm3233_vm6, %v13644_v45, %v22832_v49  ;;  %v10155_v45 = vld [vmem:[%s22628_s1 + $0x980] sm:$0xff] }
 0x2c9   : > { %23255 = vst [vmem:[#allocation182_spill] sm:$0xff] %v18297_v21  ;;  %v22831_v59 = vunpack.i.h.bf16 %v18297_v21  ;;  %v13659_v58 = vunpack.i.l.bf16 %v18297_v21  ;;  %v18304_v11 = vpop.permute.xlu0 %13652  ;;  %v18306_v34 = vpack.c.bf16 %v3310_v44, %v3305_v19  ;;  %v10748_v53 = vpack.c.bf16 %v3309_v17, %v3304_v28  ;;  %6700 = vmatmul.mubr.f32.gmra.mrb[26].mxu1 %v10145_v27  ;;  %v4357_v17 = vld [vmem:[%s22628_s1 + $0x88] sm:$0xff] }
 0x2ca   : > { %23256 = vst [vmem:[#allocation183_spill] sm:$0xff] %v18304_v11  ;;  %v22833_v51 = vunpack.i.h.bf16 %v18304_v11  ;;  %v13654_v5 = vunpack.i.l.bf16 %v18304_v11  ;;  %13947 = vrot.lane.b32.xlu1 %v17848_v0, %s14767_s18  ;;  %6705 = vmatprep.mubr.f32.mxu1 %v10156_v63  ;;  %v10166_v63 = vld [vmem:[%s22628_s1 + $0x9d8] sm:$0xff]  ;;  %v14668_v21 = vld [vmem:[%s14807_s17 + $0x48] sm:$0xff] }
 0x2cb   : > { %23257 = vst [vmem:[#allocation184_spill] sm:$0xff] %v18306_v34  ;;  %13942 = vrot.lane.b32.xlu0 %v17862_v41, %s14769_s26  ;;  %10747 = vmatprep.subr.bf16.mxu0 %v18306_v34  ;;  %v3673_v32 = vsel %vm3666_vm7, %v13659_v58, %v22831_v59 }
 0x2cc   : > { %10749 = vmatpush1.bf16.msra.mxu0 %v10748_v53  ;;  %v18324_v19 = vpop.permute.xlu1 %13667  ;;  %v3668_v28 = vsel %vm3666_vm7, %v13654_v5, %v22833_v51  ;;  %v4356_v51 = vld [vmem:[%s22628_s1 + $0x80] sm:$0xff] }
 0x2cd   : > { %23258 = vst [vmem:[#allocation185_spill] sm:$0xff] %v18324_v19  ;;  %v13663_v27 = vpop.permute.xlu0 %13662  ;;  %v18332_v41 = vpack.c.bf16 %v3673_v32, %v3668_v28  ;;  %6706 = vmatmul.mubr.f32.gmra.mrb[28].mxu1 %v10155_v45  ;;  %v13669_v53 = vunpack.i.l.bf16 %v18324_v19  ;;  %v10165_v45 = vld [vmem:[%s22628_s1 + $0x9d0] sm:$0xff] }
 0x2ce   : > { %v13665_v59 = vunpack.i.h.bf16 %v13663_v27  ;;  %v13664_v49 = vunpack.i.l.bf16 %v13663_v27  ;;  %13957 = vrot.lane.b32.xlu1 %v17909_v61, %s14767_s18  ;;  %6711 = vmatprep.mubr.f32.mxu1 %v10166_v63  ;;  %v10018_v63 = vld [vmem:[%s22628_s1 + $0x538] sm:$0xff] }
 0x2cf   : > { %23259 = vst [vmem:[#allocation186_spill] sm:$0xff] %v18332_v41  ;;  %13952 = vrot.lane.b32.xlu0 %v17886_v24, %s14769_s26  ;;  %5362 = vmatmul.mubr.f32.vlgmr.msra.gmra.mrb[40].mxu0 %v4346_v8 }
 0x2d0   : > { %v3672_v32 = vsel %vm3666_vm7, %v13665_v59, %v13659_v58  ;;  %v3667_v28 = vsel %vm3666_vm7, %v13664_v49, %v13654_v5  ;;  %10751 = vmatprep.subr.bf16.mxu0 %v18332_v41  ;;  %v13678_v27 = vpop.permute.xlu1 %13677  ;;  %5366 = vmatprep.mubr.f32.mxu0 %v4357_v17  ;;  %v4367_v59 = vld [vmem:[%s22628_s1 + $0xd8] sm:$0xff]  ;;  %v14666_v17 = vld [vmem:[%s14807_s17 + $0xa8] sm:$0xff]  ;;  %v23260_v41 = vunpack.i.h.bf16 %v18324_v19 }
 0x2d1   : > { %v13680_v24 = vunpack.i.h.bf16 %v13678_v27  ;;  %v13679_v8 = vunpack.i.l.bf16 %v13678_v27  ;;  %v18355_v44 = vpop.permute.xlu0 %13672  ;;  %v10752_v34 = vpack.c.bf16 %v3672_v32, %v3667_v28  ;;  %v14665_v5 = vld [vmem:[%s14807_s17 + $0x78] sm:$0xff]  ;;  %6712 = vmatmul.mubr.f32.gmra.mrb[30].mxu1 %v10165_v45 }
 0x2d2   : > { %v13674_v58 = vunpack.i.l.bf16 %v18355_v44  ;;  %13967 = vrot.lane.b32.xlu1 %v18018_v10, %s14767_s18  ;;  %v18366_v27 = vpack.i.bf16 %v14666_v17, %v14665_v5  ;;  %v3678_v32 = vsel %vm3666_vm7, %v13669_v53, %v23260_v41  ;;  %v14667_v49 = vld [vmem:[%s14807_s17 + $0x18] sm:$0xff]  ;;  %v23261_v41 = vunpack.i.h.bf16 %v18355_v44  ;;  %6782 = vmatprep.mubr.f32.mxu1 %v10018_v63 }
 0x2d3   : > { %v3677_v28 = vsel %vm3666_vm7, %v13679_v8, %v13669_v53  ;;  %13962 = vrot.lane.b32.xlu0 %v17957_v18, %s14767_s18  ;;  %5367 = vmatmul.mubr.f32.gmra.mrb[42].mxu0 %v4356_v51  ;;  %v18379_v11 = vpack.i.bf16 %v14668_v21, %v14667_v49 }
 0x2d4   : > { %v3682_v5 = vsel %vm3666_vm7, %v13680_v24, %v13674_v58  ;;  %10753 = vmatpush1.bf16.msra.mxu0 %v10752_v34  ;;  %v18382_v17 = vpop.permute.xlu1 %13687  ;;  %v3683_v45 = vsel %vm3666_vm7, %v13674_v58, %v23261_v41  ;;  %5371 = vmatprep.mubr.f32.mxu0 %v4367_v59  ;;  %v4366_v59 = vld [vmem:[%s22628_s1 + $0xd0] sm:$0xff]  ;;  %v4377_v58 = vld [vmem:[%s22628_s1 + $0x128] sm:$0xff] }
 0x2d5   : > { %v22839_v53 = vunpack.i.h.bf16 %v18382_v17  ;;  %v13689_v8 = vunpack.i.l.bf16 %v18382_v17  ;;  %v18389_v19 = vpop.permute.xlu0 %13682  ;;  %v18391_v51 = vpack.c.bf16 %v3683_v45, %v3678_v32  ;;  %v10756_v21 = vpack.c.bf16 %v3682_v5, %v3677_v28 }
 0x2d6   : > { %v22841_v24 = vunpack.i.h.bf16 %v18389_v19  ;;  %v13684_v34 = vunpack.i.l.bf16 %v18389_v19  ;;  %13977 = vrot.lane.b32.xlu1 %v18366_v27, %s14768_s30 }
 0x2d7   : > { %23262 = vst [vmem:[#allocation187_spill] sm:$0xff] %v18391_v51  ;;  %13972 = vrot.lane.b32.xlu0 %v18379_v11, %s14768_s30  ;;  %10755 = vmatprep.subr.bf16.mxu0 %v18391_v51  ;;  %v3693_v49 = vsel %vm3666_vm7, %v13689_v8, %v22839_v53 }
 0x2d8   : > { %10757 = vmatpush1.bf16.msra.mxu0 %v10756_v21  ;;  %v18409_v32 = vpop.permute.xlu1 %13697  ;;  %v3688_v63 = vsel %vm3666_vm7, %v13684_v34, %v22841_v24  ;;  %v4376_v21 = vld [vmem:[%s22628_s1 + $0x120] sm:$0xff] }
 0x2d9   : > { %23263 = vst [vmem:[#allocation188_spill] sm:$0xff] %v18409_v32  ;;  %v13693_v28 = vpop.permute.xlu0 %13692  ;;  %v18414_v5 = vpack.c.bf16 %v3693_v49, %v3688_v63  ;;  %5372 = vmatmul.mubr.f32.gmra.mrb[4].mxu0 %v4366_v59  ;;  %v13699_v45 = vunpack.i.l.bf16 %v18409_v32  ;;  %v4387_v59 = vld [vmem:[%s22628_s1 + $0x178] sm:$0xff] }
 0x2da   : > { %v13695_v53 = vunpack.i.h.bf16 %v13693_v28  ;;  %v13694_v51 = vunpack.i.l.bf16 %v13693_v28  ;;  %13987 = vrot.lane.b32.xlu1 %v17792_v42, %s14768_s30  ;;  %5377 = vmatprep.mubr.f32.mxu0 %v4377_v58 }
 0x2db   : > { %23264 = vst [vmem:[#allocation189_spill] sm:$0xff] %v18414_v5  ;;  %13982 = vrot.lane.b32.xlu0 %v17748_v35, %s14768_s30  ;;  %10759 = vmatprep.subr.bf16.mxu0 %v18414_v5 }
 0x2dc   : > { %v3692_v49 = vsel %vm3666_vm7, %v13695_v53, %v13689_v8  ;;  %v3687_v63 = vsel %vm3666_vm7, %v13694_v51, %v13684_v34  ;;  %v18431_v28 = vpop.permute.xlu1 %13707  ;;  %v23266_v53 = vunpack.i.h.bf16 %v18409_v32  ;;  %v4386_v51 = vld [vmem:[%s22628_s1 + $0x170] sm:$0xff]  ;;  %v23267_v34 = vunpack.i.l.bf16 %v17647_v3  ;;  %v4397_v3 = vld [vmem:[%s22628_s1 + $0x1c8] sm:$0xff] }
 0x2dd   : > { %23265 = vst [vmem:[#allocation190_spill] sm:$0xff] %v18431_v28  ;;  %v22844_v42 = vunpack.i.h.bf16 %v18431_v28  ;;  %v22845_v58 = vunpack.i.l.bf16 %v18431_v28  ;;  %v18435_v24 = vpop.permute.xlu0 %13702  ;;  %v10760_v41 = vpack.c.bf16 %v3692_v49, %v3687_v63  ;;  %5378 = vmatmul.mubr.f32.gmra.mrb[6].mxu0 %v4376_v21  ;;  %v23268_v49 = vunpack.i.l.bf16 %v17672_v2 }
 0x2de   : > { %v22846_v35 = vunpack.i.h.bf16 %v18435_v24  ;;  %v13704_v5 = vunpack.i.l.bf16 %v18435_v24  ;;  %13997 = vrot.lane.b32.xlu1 %v17909_v61, %s14768_s30  ;;  %v3698_v8 = vsel %vm3666_vm7, %v13699_v45, %v23266_v53  ;;  %5383 = vmatprep.mubr.f32.mxu0 %v4387_v59 }
 0x2df   : > { %13992 = vrot.lane.b32.xlu0 %v17848_v0, %s14768_s30  ;;  %10761 = vmatpush1.bf16.msra.mxu0 %v10760_v41  ;;  %v2803_v21 = vsel %vm2800_vm5, %v23267_v34, %v22845_v58  ;;  %v2808_v59 = vsel %vm2800_vm5, %v23268_v49, %v22844_v42 }
 0x2e0   : > { %v18459_v63 = vpop.permute.xlu1 %13717  ;;  %v3703_v53 = vsel %vm3666_vm7, %v13704_v5, %v22846_v35  ;;  %v18464_v0 = vpack.c.bf16 %v2808_v59, %v2803_v21 }
 0x2e1   : > { %v13713_v41 = vpop.permute.xlu0 %13712  ;;  %v18466_v32 = vpack.c.bf16 %v3703_v53, %v3698_v8  ;;  %5384 = vmatmul.mubr.f32.gmra.mrb[8].mxu0 %v4386_v51  ;;  %v13719_v34 = vunpack.i.l.bf16 %v18459_v63  ;;  %v4396_v8 = vld [vmem:[%s22628_s1 + $0x1c0] sm:$0xff]  ;;  %v4407_v51 = vld [vmem:[%s22628_s1 + $0x218] sm:$0xff] }
 0x2e2   : > { %23269 = vst [vmem:[#allocation191_spill] sm:$0xff] %v18464_v0  ;;  %v13715_v49 = vunpack.i.h.bf16 %v13713_v41  ;;  %v13714_v42 = vunpack.i.l.bf16 %v13713_v41  ;;  %14007 = vrot.lane.b32.xlu1 %v18018_v10, %s14768_s30  ;;  %11007 = vmatprep.subr.bf16.mxu1 %v18464_v0 }
 0x2e3   : > { %23270 = vst [vmem:[#allocation192_spill] sm:$0xff] %v18466_v32  ;;  %14002 = vrot.lane.b32.xlu0 %v17957_v18, %s14768_s30  ;;  %10763 = vmatprep.subr.bf16.mxu0 %v18466_v32 }
 0x2e4   : > { %v3697_v21 = vsel %vm3666_vm7, %v13714_v42, %v13699_v45  ;;  %v3702_v59 = vsel %vm3666_vm7, %v13715_v49, %v13704_v5  ;;  %11009 = vmatpush1.bf16.msra.mxu1 %v17708_v26  ;;  %v18488_v53 = vpop.permute.xlu1 %13727  ;;  %5389 = vmatprep.mubr.f32.mxu0 %v4397_v3  ;;  %v14669_v26 = vld [vmem:[%s14807_s17 + $0x138] sm:$0xff]  ;;  %v14670_v5 = vld [vmem:[%s14807_s17 + $0x168] sm:$0xff]  ;;  %v23272_v3 = vunpack.i.h.bf16 %v18459_v63 }
 0x2e5   : > { %23271 = vst [vmem:[#allocation193_spill] sm:$0xff] %v18488_v53  ;;  %v22851_v41 = vunpack.i.h.bf16 %v18488_v53  ;;  %v22852_v58 = vunpack.i.l.bf16 %v18488_v53  ;;  %v18492_v35 = vpop.permute.xlu0 %13722  ;;  %v10764_v2 = vpack.c.bf16 %v3702_v59, %v3697_v21  ;;  %5390 = vmatmul.mubr.f32.gmra.mrb[10].mxu0 %v4396_v8  ;;  %v14026_v42 = vpack.i.bf16 %v14670_v5, %v14669_v26  ;;  %v4406_v21 = vld [vmem:[%s22628_s1 + $0x210] sm:$0xff]  ;;  %v18509_v8 = vld [vmem:[%s14807_s17 + $0xd8] sm:$0xff]  ;;  %v18512_v59 = vld [vmem:[%s14807_s17 + $0x108] sm:$0xff] }
 0x2e6   : > { %v22853_v0 = vunpack.i.h.bf16 %v18492_v35  ;;  %v13724_v45 = vunpack.i.l.bf16 %v18492_v35  ;;  %14017 = vrot.lane.b32.xlu1 %v18366_v27, %s14769_s26  ;;  %v3708_v49 = vsel %vm3666_vm7, %v13719_v34, %v23272_v3  ;;  %5395 = vmatprep.mubr.f32.mxu0 %v4407_v51  ;;  %v14021_v27 = vpack.i.bf16 %v18512_v59, %v18509_v8 }
 0x2e7   : > { %14012 = vrot.lane.b32.xlu0 %v18379_v11, %s14769_s26  ;;  %10765 = vmatpush1.bf16.msra.mxu0 %v10764_v2  ;;  %v23273_v26 = vunpack.i.h.bf16 %v17667_v4  ;;  %v23274_v5 = vunpack.i.h.bf16 %v17706_v23  ;;  %v4417_v23 = vld [vmem:[%s22628_s1 + $0x268] sm:$0xff] }
 0x2e8   : > { %v18526_v2 = vpop.permute.xlu1 %13737  ;;  %v3713_v3 = vsel %vm3666_vm7, %v13724_v45, %v22853_v0 }
 0x2e9   : > { %v2813_v51 = vsel %vm2800_vm5, %v23273_v26, %v22852_v58  ;;  %v2818_v11 = vsel %vm2800_vm5, %v23274_v5, %v22851_v41  ;;  %v13733_v32 = vpop.permute.xlu0 %13732  ;;  %v18533_v4 = vpack.c.bf16 %v3713_v3, %v3708_v49  ;;  %5396 = vmatmul.mubr.f32.gmra.mrb[12].mxu0 %v4406_v21  ;;  %v13739_v5 = vunpack.i.l.bf16 %v18526_v2  ;;  %v4416_v49 = vld [vmem:[%s22628_s1 + $0x260] sm:$0xff]  ;;  %v14673_v21 = vld [vmem:[%s14807_s17 + $0x198] sm:$0xff] }
 0x2ea   : > { %v18531_v28 = vpack.c.bf16 %v2818_v11, %v2813_v51  ;;  %v13735_v41 = vunpack.i.h.bf16 %v13733_v32  ;;  %v13734_v58 = vunpack.i.l.bf16 %v13733_v32  ;;  %14027 = vrot.lane.b32.xlu1 %v14026_v42, %s14769_s26  ;;  %v14674_v51 = vld [vmem:[%s14807_s17 + $0x1c8] sm:$0xff]  ;;  %v4427_v3 = vld [vmem:[%s22628_s1 + $0x2b8] sm:$0xff]  ;;  %5401 = vmatprep.mubr.f32.mxu0 %v4417_v23 }
 0x2eb   : > { %14022 = vrot.lane.b32.xlu0 %v14021_v27, %s14769_s26  ;;  %10767 = vmatprep.subr.bf16.mxu0 %v18533_v4  ;;  %v14031_v11 = vpack.i.bf16 %v14674_v51, %v14673_v21 }
 0x2ec   : > { %23275 = vst [vmem:[#allocation194_spill] sm:$0xff] %v18531_v28  ;;  %11011 = vmatprep.subr.bf16.mxu1 %v18531_v28  ;;  %v3707_v32 = vsel %vm3666_vm7, %v13734_v58, %v13719_v34  ;;  %v3712_v42 = vsel %vm3666_vm7, %v13735_v41, %v13724_v45  ;;  %v18555_v0 = vpop.permute.xlu1 %13747  ;;  %v4426_v41 = vld [vmem:[%s22628_s1 + $0x2b0] sm:$0xff]  ;;  %v23278_v45 = vunpack.i.h.bf16 %v17735_v14  ;;  %v14675_v14 = vld [vmem:[%s14807_s17 + $0x80] sm:$0xff] }
 0x2ed   : > { %11013 = vmatpush1.bf16.msra.mxu1 %v17737_v54  ;;  %23276 = vst [vmem:[#allocation195_spill] sm:$0xff] %v18555_v0  ;;  %v22855_v27 = vunpack.i.h.bf16 %v18555_v0  ;;  %v22856_v26 = vunpack.i.l.bf16 %v18555_v0  ;;  %v18559_v28 = vpop.permute.xlu0 %13742  ;;  %v10768_v21 = vpack.c.bf16 %v3712_v42, %v3707_v32  ;;  %5402 = vmatmul.mubr.f32.gmra.mrb[14].mxu0 %v4416_v49  ;;  %v23277_v54 = vunpack.i.h.bf16 %v18526_v2 }
 0x2ee   : > { %v22857_v51 = vunpack.i.h.bf16 %v18559_v28  ;;  %v13744_v58 = vunpack.i.l.bf16 %v18559_v28  ;;  %14037 = vrot.lane.b32.xlu1 %v17909_v61, %s14769_s26  ;;  %5407 = vmatprep.mubr.f32.mxu0 %v4427_v3  ;;  %v23279_v61 = vunpack.i.h.bf16 %v17728_v38  ;;  %v4437_v38 = vld [vmem:[%s22628_s1 + $0x308] sm:$0xff] }
 0x2ef   : > { %v3718_v34 = vsel %vm3666_vm7, %v13739_v5, %v23277_v54  ;;  %14032 = vrot.lane.b32.xlu0 %v14031_v11, %s14769_s26  ;;  %10769 = vmatpush1.bf16.msra.mxu0 %v10768_v21  ;;  %v2823_v23 = vsel %vm2800_vm5, %v23278_v45, %v22856_v26  ;;  %v14676_v54 = vld [vmem:[%s14807_s17 + $0xb0] sm:$0xff] }
 0x2f0   : > { %v2828_v49 = vsel %vm2800_vm5, %v23279_v61, %v22855_v27  ;;  %v18582_v3 = vpop.permute.xlu1 %13757  ;;  %v3723_v32 = vsel %vm3666_vm7, %v13744_v58, %v22857_v51  ;;  %v18593_v45 = vpack.i.bf16 %v14676_v54, %v14675_v14 }
 0x2f1   : > { %v18587_v11 = vpack.c.bf16 %v2828_v49, %v2823_v23  ;;  %v13753_v42 = vpop.permute.xlu0 %13752  ;;  %v18589_v21 = vpack.c.bf16 %v3723_v32, %v3718_v34  ;;  %5408 = vmatmul.mubr.f32.gmra.mrb[16].mxu0 %v4426_v41  ;;  %v13759_v27 = vunpack.i.l.bf16 %v18582_v3  ;;  %v4436_v34 = vld [vmem:[%s22628_s1 + $0x300] sm:$0xff]  ;;  %v14678_v32 = vld [vmem:[%s14807_s17 + $0x50] sm:$0xff] }
 0x2f2   : > { %v13755_v23 = vunpack.i.h.bf16 %v13753_v42  ;;  %v13754_v49 = vunpack.i.l.bf16 %v13753_v42  ;;  %14047 = vrot.lane.b32.xlu1 %v18018_v10, %s14769_s26  ;;  %v14677_v41 = vld [vmem:[%s14807_s17 + $0x20] sm:$0xff]  ;;  %v4447_v10 = vld [vmem:[%s22628_s1 + $0x358] sm:$0xff]  ;;  %5413 = vmatprep.mubr.f32.mxu0 %v4437_v38 }
 0x2f3   : > { %23280 = vst [vmem:[#allocation196_spill] sm:$0xff] %v18587_v11  ;;  %23281 = vst [vmem:[#allocation197_spill] sm:$0xff] %v18589_v21  ;;  %11015 = vmatprep.subr.bf16.mxu1 %v18587_v11  ;;  %14042 = vrot.lane.b32.xlu0 %v17957_v18, %s14769_s26  ;;  %v18611_v14 = vpack.i.bf16 %v14678_v32, %v14677_v41 }
 0x2f4   : > { %10771 = vmatprep.subr.bf16.mxu0 %v18589_v21  ;;  %v3717_v42 = vsel %vm3666_vm7, %v13754_v49, %v13739_v5  ;;  %v3722_v54 = vsel %vm3666_vm7, %v13755_v23, %v13744_v58  ;;  %11017 = vmatpush1.bf16.msra.mxu1 %v17764_v60  ;;  %v18619_v26 = vpop.permute.xlu1 %13767  ;;  %v14679_v60 = vld [vmem:[%s14807_s17 + $0x140] sm:$0xff]  ;;  %v14680_v58 = vld [vmem:[%s14807_s17 + $0x170] sm:$0xff]  ;;  %v23284_v23 = vunpack.i.h.bf16 %v18582_v3 }
 0x2f5   : > { %23282 = vst [vmem:[#allocation198_spill] sm:$0xff] %v18619_v26  ;;  %v22864_v18 = vunpack.i.h.bf16 %v18619_v26  ;;  %v22863_v41 = vunpack.i.l.bf16 %v18619_v26  ;;  %v18623_v32 = vpop.permute.xlu0 %13762  ;;  %v10772_v51 = vpack.c.bf16 %v3722_v54, %v3717_v42  ;;  %5414 = vmatmul.mubr.f32.gmra.mrb[18].mxu0 %v4436_v34  ;;  %v18631_v38 = vpack.i.bf16 %v14680_v58, %v14679_v60  ;;  %v4446_v34 = vld [vmem:[%s22628_s1 + $0x350] sm:$0xff]  ;;  %v14681_v42 = vld [vmem:[%s14807_s17 + $0xe0] sm:$0xff] }
 0x2f6   : > { %23283 = vst [vmem:[#allocation199_spill] sm:$0xff] %v18623_v32  ;;  %v13764_v5 = vunpack.i.l.bf16 %v18623_v32  ;;  %14057 = vrot.lane.b32.xlu1 %v18593_v45, %s14766_s8  ;;  %v3728_v49 = vsel %vm3666_vm7, %v13759_v27, %v23284_v23  ;;  %5419 = vmatprep.mubr.f32.mxu0 %v4447_v10  ;;  %v14682_v54 = vld [vmem:[%s14807_s17 + $0x110] sm:$0xff]  ;;  %v23285_v60 = vunpack.i.h.bf16 %v17759_v43  ;;  %v23286_v10 = vunpack.i.h.bf16 %v17781_v47  ;;  %v14683_v43 = vld [vmem:[%s14807_s17 + $0x200] sm:$0xff]  ;;  %v4457_v47 = vld [vmem:[%s22628_s1 + $0x3a8] sm:$0xff] }
 0x2f7   : > { %14052 = vrot.lane.b32.xlu0 %v18611_v14, %s14766_s8  ;;  %10773 = vmatpush1.bf16.msra.mxu0 %v10772_v51  ;;  %v18643_v61 = vpack.i.bf16 %v14682_v54, %v14681_v42  ;;  %v23288_v51 = vunpack.i.h.bf16 %v18623_v32 }
 0x2f8   : > { %v2833_v58 = vsel %vm2800_vm5, %v23285_v60, %v22863_v41  ;;  %v2838_v23 = vsel %vm2800_vm5, %v23286_v10, %v22864_v18  ;;  %v18655_v11 = vpop.permute.xlu1 %13777  ;;  %v14684_v60 = vld [vmem:[%s14807_s17 + $0x230] sm:$0xff] }
 0x2f9   : > { %23287 = vst [vmem:[#allocation200_spill] sm:$0xff] %v18655_v11  ;;  %v3733_v0 = vsel %vm3666_vm7, %v13764_v5, %v23288_v51  ;;  %v18660_v42 = vpack.c.bf16 %v2838_v23, %v2833_v58  ;;  %v13773_v54 = vpop.permute.xlu0 %13772  ;;  %v18666_v41 = vpack.i.bf16 %v14684_v60, %v14683_v43  ;;  %5420 = vmatmul.mubr.f32.gmra.mrb[20].mxu0 %v4446_v34  ;;  %v13779_v51 = vunpack.i.l.bf16 %v18655_v11  ;;  %v14686_v34 = vld [vmem:[%s14807_s17 + $0x1d0] sm:$0xff] }
 0x2fa   : > { %v18662_v53 = vpack.c.bf16 %v3733_v0, %v3728_v49  ;;  %v13775_v58 = vunpack.i.h.bf16 %v13773_v54  ;;  %v13774_v23 = vunpack.i.l.bf16 %v13773_v54  ;;  %14067 = vrot.lane.b32.xlu1 %v18631_v38, %s14766_s8  ;;  %v4456_v0 = vld [vmem:[%s22628_s1 + $0x3a0] sm:$0xff]  ;;  %v4467_v54 = vld [vmem:[%s22628_s1 + $0x3f8] sm:$0xff]  ;;  %5425 = vmatprep.mubr.f32.mxu0 %v4457_v47 }
 0x2fb   : > { %23289 = vst [vmem:[#allocation201_spill] sm:$0xff] %v18660_v42  ;;  %11019 = vmatprep.subr.bf16.mxu1 %v18660_v42  ;;  %14062 = vrot.lane.b32.xlu0 %v18643_v61, %s14766_s8  ;;  %v14685_v49 = vld [vmem:[%s14807_s17 + $0x1a0] sm:$0xff] }
 0x2fc   : > { %23290 = vst [vmem:[#allocation202_spill] sm:$0xff] %v18662_v53  ;;  %10775 = vmatprep.subr.bf16.mxu0 %v18662_v53  ;;  %v18684_v43 = vpack.i.bf16 %v14686_v34, %v14685_v49  ;;  %v3727_v60 = vsel %vm3666_vm7, %v13774_v23, %v13759_v27  ;;  %v3732_v18 = vsel %vm3666_vm7, %v13775_v58, %v13764_v5  ;;  %v18692_v10 = vpop.permute.xlu1 %13787  ;;  %v14688_v5 = vld [vmem:[%s14807_s17 + $0x2f0] sm:$0xff]  ;;  %v23292_v58 = vunpack.i.h.bf16 %v18655_v11 }
 0x2fd   : > { %11021 = vmatpush1.bf16.msra.mxu1 %v17817_v57  ;;  %23291 = vst [vmem:[#allocation203_spill] sm:$0xff] %v18692_v10  ;;  %v22872_v42 = vunpack.i.h.bf16 %v18692_v10  ;;  %v22873_v49 = vunpack.i.l.bf16 %v18692_v10  ;;  %v18696_v34 = vpop.permute.xlu0 %13782  ;;  %v10776_v26 = vpack.c.bf16 %v3732_v18, %v3727_v60  ;;  %5426 = vmatmul.mubr.f32.gmra.mrb[22].mxu0 %v4456_v0  ;;  %v14687_v57 = vld [vmem:[%s14807_s17 + $0x2c0] sm:$0xff]  ;;  %v4466_v18 = vld [vmem:[%s22628_s1 + $0x3f0] sm:$0xff] }
 0x2fe   : > { %v13784_v27 = vunpack.i.l.bf16 %v18696_v34  ;;  %14077 = vrot.lane.b32.xlu1 %v18666_v41, %s14766_s8  ;;  %v18704_v47 = vpack.i.bf16 %v14688_v5, %v14687_v57  ;;  %v3738_v23 = vsel %vm3666_vm7, %v13779_v51, %v23292_v58  ;;  %5431 = vmatprep.mubr.f32.mxu0 %v4467_v54  ;;  %v14689_v0 = vld [vmem:[%s14807_s17 + $0x260] sm:$0xff]  ;;  %v14690_v60 = vld [vmem:[%s14807_s17 + $0x290] sm:$0xff]  ;;  %v23293_v57 = vunpack.i.h.bf16 %v17815_v16  ;;  %v4477_v16 = vld [vmem:[%s22628_s1 + $0x448] sm:$0xff] }
 0x2ff   : > { %14072 = vrot.lane.b32.xlu0 %v18684_v43, %s14766_s8  ;;  %10777 = vmatpush1.bf16.msra.mxu0 %v10776_v26  ;;  %v18716_v53 = vpack.i.bf16 %v14690_v60, %v14689_v0  ;;  %v23294_v54 = vunpack.i.h.bf16 %v17808_v39  ;;  %v23295_v26 = vunpack.i.h.bf16 %v18696_v34 }
 0x300   : > { %v2843_v5 = vsel %vm2800_vm5, %v23293_v57, %v22873_v49  ;;  %v18728_v21 = vpop.permute.xlu1 %13797 }
 0x301   : > { %v2848_v58 = vsel %vm2800_vm5, %v23294_v54, %v22872_v42  ;;  %v3743_v11 = vsel %vm3666_vm7, %v13784_v27, %v23295_v26  ;;  %v13793_v60 = vpop.permute.xlu0 %13792  ;;  %5432 = vmatmul.mubr.f32.gmra.mrb[24].mxu0 %v4466_v18  ;;  %v13799_v57 = vunpack.i.l.bf16 %v18728_v21 }
 0x302   : > { %v18733_v0 = vpack.c.bf16 %v2848_v58, %v2843_v5  ;;  %v18735_v32 = vpack.c.bf16 %v3743_v11, %v3738_v23  ;;  %v13795_v54 = vunpack.i.h.bf16 %v13793_v60  ;;  %v13794_v42 = vunpack.i.l.bf16 %v13793_v60  ;;  %14087 = vrot.lane.b32.xlu1 %v18704_v47, %s14766_s8  ;;  %v4476_v11 = vld [vmem:[%s22628_s1 + $0x440] sm:$0xff]  ;;  %v4487_v23 = vld [vmem:[%s22628_s1 + $0x498] sm:$0xff]  ;;  %5437 = vmatprep.mubr.f32.mxu0 %v4477_v16 }
 0x303   : > { %14082 = vrot.lane.b32.xlu0 %v18716_v53, %s14766_s8 }
 0x304   : > { %23296 = vst [vmem:[#allocation204_spill] sm:$0xff] %v18733_v0  ;;  %11023 = vmatprep.subr.bf16.mxu1 %v18733_v0  ;;  %10779 = vmatprep.subr.bf16.mxu0 %v18735_v32  ;;  %v3737_v18 = vsel %vm3666_vm7, %v13794_v42, %v13779_v51  ;;  %v3742_v5 = vsel %vm3666_vm7, %v13795_v54, %v13784_v27  ;;  %v18757_v58 = vpop.permute.xlu1 %13807  ;;  %v4486_v51 = vld [vmem:[%s22628_s1 + $0x490] sm:$0xff]  ;;  %v23299_v27 = vunpack.i.h.bf16 %v17839_v62  ;;  %v23300_v54 = vunpack.i.h.bf16 %v17869_v46  ;;  %v4497_v62 = vld [vmem:[%s22628_s1 + $0x4e8] sm:$0xff] }
 0x305   : > { %11025 = vmatpush1.bf16.msra.mxu1 %v17844_v25  ;;  %23297 = vst [vmem:[#allocation205_spill] sm:$0xff] %v18757_v58  ;;  %v22877_v26 = vunpack.i.h.bf16 %v18757_v58  ;;  %v22878_v60 = vunpack.i.l.bf16 %v18757_v58  ;;  %v18761_v49 = vpop.permute.xlu0 %13802  ;;  %v10780_v39 = vpack.c.bf16 %v3742_v5, %v3737_v18  ;;  %5438 = vmatmul.mubr.f32.gmra.mrb[26].mxu0 %v4476_v11  ;;  %v23298_v25 = vunpack.i.h.bf16 %v18728_v21 }
 0x306   : > { %v22879_v0 = vunpack.i.h.bf16 %v18761_v49  ;;  %v13804_v10 = vunpack.i.l.bf16 %v18761_v49  ;;  %14097 = vrot.lane.b32.xlu1 %v18593_v45, %s14767_s18  ;;  %5443 = vmatprep.mubr.f32.mxu0 %v4487_v23 }
 0x307   : > { %v4101_v42 = vsel %vm4099_vm8, %v13799_v57, %v23298_v25  ;;  %14092 = vrot.lane.b32.xlu0 %v18611_v14, %s14767_s18  ;;  %10781 = vmatpush1.bf16.msra.mxu0 %v10780_v39  ;;  %v2853_v16 = vsel %vm2800_vm5, %v23299_v27, %v22878_v60  ;;  %v2858_v11 = vsel %vm2800_vm5, %v23300_v54, %v22877_v26 }
 0x308   : > { %v18785_v23 = vpop.permute.xlu1 %13817  ;;  %v4106_v18 = vsel %vm4099_vm8, %v13804_v10, %v22879_v0  ;;  %v18790_v5 = vpack.c.bf16 %v2858_v11, %v2853_v16 }
 0x309   : > { %v13813_v39 = vpop.permute.xlu0 %13812  ;;  %v18792_v25 = vpack.c.bf16 %v4106_v18, %v4101_v42  ;;  %5444 = vmatmul.mubr.f32.gmra.mrb[28].mxu0 %v4486_v51  ;;  %v13819_v27 = vunpack.i.l.bf16 %v18785_v23  ;;  %v4496_v42 = vld [vmem:[%s22628_s1 + $0x4e0] sm:$0xff]  ;;  %v4349_v51 = vld [vmem:[%s22628_s1 + $0x48] sm:$0xff] }
 0x30a   : > { %23301 = vst [vmem:[#allocation206_spill] sm:$0xff] %v18790_v5  ;;  %v13815_v54 = vunpack.i.h.bf16 %v13813_v39  ;;  %v13814_v26 = vunpack.i.l.bf16 %v13813_v39  ;;  %14107 = vrot.lane.b32.xlu1 %v18631_v38, %s14767_s18  ;;  %11027 = vmatprep.subr.bf16.mxu1 %v18790_v5 }
 0x30b   : > { %14102 = vrot.lane.b32.xlu0 %v18643_v61, %s14767_s18  ;;  %10783 = vmatprep.subr.bf16.mxu0 %v18792_v25 }
 0x30c   : > { %v4100_v16 = vsel %vm4099_vm8, %v13814_v26, %v13799_v57  ;;  %v4105_v11 = vsel %vm4099_vm8, %v13815_v54, %v13804_v10  ;;  %11029 = vmatpush1.bf16.msra.mxu1 %v17901_v31  ;;  %v18814_v18 = vpop.permute.xlu1 %13827  ;;  %5449 = vmatprep.mubr.f32.mxu0 %v4497_v62  ;;  %v23303_v31 = vunpack.i.h.bf16 %v18785_v23  ;;  %v23304_v57 = vunpack.i.h.bf16 %v17899_v55  ;;  %v6307_v55 = vpop.f32.mrb[0].mxu1 }
 0x30d   : > { %23302 = vst [vmem:[#allocation207_spill] sm:$0xff] %v18814_v18  ;;  %v22884_v39 = vunpack.i.h.bf16 %v18814_v18  ;;  %v22883_v60 = vunpack.i.l.bf16 %v18814_v18  ;;  %v18818_v0 = vpop.permute.xlu0 %13822  ;;  %v10784_v46 = vpack.c.bf16 %v4105_v11, %v4100_v16  ;;  %5450 = vmatmul.mubr.f32.gmra.mrb[30].mxu0 %v4496_v42  ;;  %v23305_v62 = vunpack.i.h.bf16 %v17892_v22 }
 0x30e   : > { %v22885_v5 = vunpack.i.h.bf16 %v18818_v0  ;;  %v13824_v58 = vunpack.i.l.bf16 %v18818_v0  ;;  %14117 = vrot.lane.b32.xlu1 %v18666_v41, %s14767_s18  ;;  %v4111_v10 = vsel %vm4099_vm8, %v13819_v27, %v23303_v31  ;;  %5520 = vmatprep.mubr.f32.mxu0 %v4349_v51 }
 0x30f   : > { %14112 = vrot.lane.b32.xlu0 %v18684_v43, %s14767_s18  ;;  %10785 = vmatpush1.bf16.msra.mxu0 %v10784_v46  ;;  %v2863_v26 = vsel %vm2800_vm5, %v23304_v57, %v22883_v60  ;;  %v2868_v54 = vsel %vm2800_vm5, %v23305_v62, %v22884_v39  ;;  %v6309_v62 = vpop.f32.mrb[1].mxu1 }
 0x310   : > { %v18839_v42 = vpop.permute.xlu1 %13837  ;;  %v4116_v51 = vsel %vm4099_vm8, %v13824_v58, %v22885_v5  ;;  %v18844_v16 = vpack.c.bf16 %v2868_v54, %v2863_v26 }
 0x311   : > { %v13833_v46 = vpop.permute.xlu0 %13832  ;;  %v18846_v11 = vpack.c.bf16 %v4116_v51, %v4111_v10  ;;  %v13839_v57 = vunpack.i.l.bf16 %v18839_v42  ;;  %v6312_v10 = vpop.f32.mrb[2].mxu1 }
 0x312   : > { %23306 = vst [vmem:[#allocation208_spill] sm:$0xff] %v18844_v16  ;;  %v13835_v60 = vunpack.i.h.bf16 %v13833_v46  ;;  %v13834_v22 = vunpack.i.l.bf16 %v13833_v46  ;;  %14127 = vrot.lane.b32.xlu1 %v18704_v47, %s14767_s18  ;;  %11031 = vmatprep.subr.bf16.mxu1 %v18844_v16  ;;  %v6314_v46 = vpop.f32.mrb[3].mxu1 }
 0x313   : > { %23307 = vst [vmem:[#allocation209_spill] sm:$0xff] %v18846_v11  ;;  %14122 = vrot.lane.b32.xlu0 %v18716_v53, %s14767_s18  ;;  %10787 = vmatprep.subr.bf16.mxu0 %v18846_v11  ;;  %v6466_v16 = vpop.f32.mrb[32].mxu1 }
 0x314   : > { %v4110_v26 = vsel %vm4099_vm8, %v13834_v22, %v13819_v27  ;;  %v4115_v54 = vsel %vm4099_vm8, %v13835_v60, %v13824_v58  ;;  %11033 = vmatpush1.bf16.msra.mxu1 %v17930_v7  ;;  %v18859_v51 = vpop.permute.xlu1 %13847  ;;  %v23309_v7 = vunpack.i.h.bf16 %v18839_v42  ;;  %v18872_v60 = vadd.f32 %v6466_v16, %v6307_v55  ;;  %v6468_v27 = vpop.f32.mrb[33].mxu1 }
 0x315   : > { %23308 = vst [vmem:[#allocation210_spill] sm:$0xff] %v18859_v51  ;;  %v22891_v39 = vunpack.i.h.bf16 %v18859_v51  ;;  %v22890_v5 = vunpack.i.l.bf16 %v18859_v51  ;;  %v18863_v62 = vpop.permute.xlu0 %13842  ;;  %v10788_v31 = vpack.c.bf16 %v4115_v54, %v4110_v26  ;;  %v23310_v22 = vunpack.i.h.bf16 %v17925_v33 }
 0x316   : > { %v22894_v18 = vunpack.i.h.bf16 %v18863_v62  ;;  %v13844_v11 = vunpack.i.l.bf16 %v18863_v62  ;;  %14137 = vrot.lane.b32.xlu1 %v18593_v45, %s14768_s30  ;;  %v4121_v58 = vsel %vm4099_vm8, %v13839_v57, %v23309_v7  ;;  %v23311_v54 = vunpack.i.h.bf16 %v17950_v12  ;;  %v6471_v7 = vpop.f32.mrb[34].mxu1 }
 0x317   : > { %14132 = vrot.lane.b32.xlu0 %v18611_v14, %s14768_s30  ;;  %10789 = vmatpush1.bf16.msra.mxu0 %v10788_v31  ;;  %v2873_v26 = vsel %vm2800_vm5, %v23310_v22, %v22890_v5  ;;  %v18893_v33 = vadd.f32 %v6471_v7, %v6312_v10  ;;  %v6473_v27 = vpop.f32.mrb[35].mxu1  ;;  %v14691_v10 = vld [vmem:[%s14807_s17 + $0x28] sm:$0xff] }
 0x318   : > { %v2878_v46 = vsel %vm2800_vm5, %v23311_v54, %v22891_v39  ;;  %v18886_v16 = vpop.permute.xlu1 %13857  ;;  %v4126_v55 = vsel %vm4099_vm8, %v13844_v11, %v22894_v18 }
 0x319   : > { %v18891_v31 = vpack.c.bf16 %v2878_v46, %v2873_v26  ;;  %v13853_v22 = vpop.permute.xlu0 %13852  ;;  %v18895_v5 = vpack.c.bf16 %v4126_v55, %v4121_v58  ;;  %v13859_v54 = vunpack.i.l.bf16 %v18886_v16  ;;  %v14692_v26 = vld [vmem:[%s14807_s17 + $0x58] sm:$0xff] }
 0x31a   : > { %v13855_v39 = vunpack.i.h.bf16 %v13853_v22  ;;  %v13854_v51 = vunpack.i.l.bf16 %v13853_v22  ;;  %14147 = vrot.lane.b32.xlu1 %v18631_v38, %s14768_s30  ;;  %v18907_v58 = vpack.i.bf16 %v14692_v26, %v14691_v10 }
 0x31b   : > { %23312 = vst [vmem:[#allocation211_spill] sm:$0xff] %v18891_v31  ;;  %23313 = vst [vmem:[#allocation212_spill] sm:$0xff] %v18895_v5  ;;  %11035 = vmatprep.subr.bf16.mxu1 %v18891_v31  ;;  %14142 = vrot.lane.b32.xlu0 %v18643_v61, %s14768_s30  ;;  %v14694_v31 = vld [vmem:[%s14807_s17 + $0xb8] sm:$0xff] }
 0x31c   : > { %10791 = vmatprep.subr.bf16.mxu0 %v18895_v5  ;;  %v4120_v46 = vsel %vm4099_vm8, %v13854_v51, %v13839_v57  ;;  %v4125_v7 = vsel %vm4099_vm8, %v13855_v39, %v13844_v11  ;;  %11037 = vmatpush1.bf16.msra.mxu1 %v17982_v20  ;;  %v18912_v55 = vpop.permute.xlu1 %13867  ;;  %v23315_v20 = vunpack.i.h.bf16 %v18886_v16  ;;  %v23316_v11 = vunpack.i.h.bf16 %v17980_v29  ;;  %v14693_v29 = vld [vmem:[%s14807_s17 + $0x88] sm:$0xff] }
 0x31d   : > { %23314 = vst [vmem:[#allocation213_spill] sm:$0xff] %v18912_v55  ;;  %v22897_v27 = vunpack.i.h.bf16 %v18912_v55  ;;  %v22896_v22 = vunpack.i.l.bf16 %v18912_v55  ;;  %v18916_v18 = vpop.permute.xlu0 %13862  ;;  %v10792_v12 = vpack.c.bf16 %v4125_v7, %v4120_v46  ;;  %v23317_v51 = vunpack.i.h.bf16 %v17973_v36 }
 0x31e   : > { %v22901_v10 = vunpack.i.h.bf16 %v18916_v18  ;;  %v13864_v26 = vunpack.i.l.bf16 %v18916_v18  ;;  %14157 = vrot.lane.b32.xlu1 %v18684_v43, %s14768_s30  ;;  %v4131_v39 = vsel %vm4099_vm8, %v13859_v54, %v23315_v20 }
 0x31f   : > { %10793 = vmatpush1.bf16.msra.mxu0 %v10792_v12  ;;  %v3236_v57 = vsel %vm3233_vm6, %v23316_v11, %v22896_v22  ;;  %v3241_v46 = vsel %vm3233_vm6, %v23317_v51, %v22897_v27  ;;  %14152 = vrot.lane.b32.xlu0 %v18907_v58, %s14766_s8  ;;  %v18946_v11 = vpack.i.bf16 %v14694_v31, %v14693_v29 }
 0x320   : > { %v18937_v7 = vpop.permute.xlu1 %13877  ;;  %v4136_v12 = vsel %vm4099_vm8, %v13864_v26, %v22901_v10  ;;  %v18942_v20 = vpack.c.bf16 %v3241_v46, %v3236_v57  ;;  %v14695_v46 = vld [vmem:[%s14807_s17 + $0xe8] sm:$0xff] }
 0x321   : > { %v13873_v36 = vpop.permute.xlu0 %13872  ;;  %v18948_v22 = vpack.c.bf16 %v4136_v12, %v4131_v39  ;;  %v22904_v51 = vunpack.i.h.bf16 %v18937_v7  ;;  %v13879_v27 = vunpack.i.l.bf16 %v18937_v7  ;;  %v14696_v12 = vld [vmem:[%s14807_s17 + $0x118] sm:$0xff] }
 0x322   : > { %23318 = vst [vmem:[#allocation214_spill] sm:$0xff] %v18942_v20  ;;  %v13875_v55 = vunpack.i.h.bf16 %v13873_v36  ;;  %v13874_v5 = vunpack.i.l.bf16 %v13873_v36  ;;  %14167 = vrot.lane.b32.xlu1 %v18666_v41, %s14768_s30  ;;  %11039 = vmatprep.subr.bf16.mxu1 %v18942_v20  ;;  %v18965_v29 = vpack.i.bf16 %v14696_v12, %v14695_v46  ;;  %v23322_v46 = vunpack.i.h.bf16 %v18009_v9  ;;  %v14697_v9 = vld [vmem:[%s14807_s17 + $0x148] sm:$0xff] }
 0x323   : > { %23319 = vst [vmem:[#allocation215_spill] sm:$0xff] %v18948_v22  ;;  %10795 = vmatprep.subr.bf16.mxu0 %v18948_v22  ;;  %11041 = vmatpush1.bf16.msra.mxu1 %v18014_v48 }
 0x324   : > { %v4130_v31 = vsel %vm4099_vm8, %v13874_v5, %v13859_v54  ;;  %v4135_v39 = vsel %vm4099_vm8, %v13875_v55, %v13864_v26  ;;  %v18959_v57 = vpop.permute.xlu1 %13887  ;;  %14162 = vrot.lane.b32.xlu0 %v18946_v11, %s14766_s8  ;;  %v4141_v26 = vsel %vm4099_vm8, %v13879_v27, %v22904_v51 }
 0x325   : > { %23320 = vst [vmem:[#allocation216_spill] sm:$0xff] %v18959_v57  ;;  %v22906_v36 = vunpack.i.h.bf16 %v18959_v57  ;;  %v22905_v10 = vunpack.i.l.bf16 %v18959_v57  ;;  %v18969_v48 = vpop.permute.xlu0 %13882  ;;  %v10796_v5 = vpack.c.bf16 %v4135_v39, %v4130_v31  ;;  %v23323_v31 = vunpack.i.h.bf16 %v18043_v40 }
 0x326   : > { %23321 = vst [vmem:[#allocation217_spill] sm:$0xff] %v18969_v48  ;;  %v13884_v55 = vunpack.i.l.bf16 %v18969_v48  ;;  %14177 = vrot.lane.b32.xlu1 %v18716_v53, %s14768_s30  ;;  %v23324_v20 = vunpack.i.h.bf16 %v18969_v48 }
 0x327   : > { %10797 = vmatpush1.bf16.msra.mxu0 %v10796_v5  ;;  %v3246_v12 = vsel %vm3233_vm6, %v23322_v46, %v22905_v10  ;;  %v3251_v39 = vsel %vm3233_vm6, %v23323_v31, %v22906_v36  ;;  %v14698_v5 = vld [vmem:[%s14807_s17 + $0x178] sm:$0xff] }
 0x328   : > { %v18988_v54 = vpop.permute.xlu1 %13897  ;;  %v4146_v22 = vsel %vm4099_vm8, %v13884_v55, %v23324_v20  ;;  %v18993_v51 = vpack.c.bf16 %v3251_v39, %v3246_v12  ;;  %14172 = vrot.lane.b32.xlu0 %v18965_v29, %s14766_s8  ;;  %v18999_v46 = vpack.i.bf16 %v14698_v5, %v14697_v9  ;;  %v14699_v39 = vld [vmem:[%s14807_s17 + $0x1a8] sm:$0xff]  ;;  %v14700_v9 = vld [vmem:[%s14807_s17 + $0x1d8] sm:$0xff] }
 0x329   : > { %v13893_v40 = vpop.permute.xlu0 %13892  ;;  %v19001_v10 = vpack.c.bf16 %v4146_v22, %v4141_v26  ;;  %v13899_v36 = vunpack.i.l.bf16 %v18988_v54  ;;  %v19018_v5 = vpack.i.bf16 %v14700_v9, %v14699_v39  ;;  %v23329_v9 = vunpack.i.h.bf16 %v18080_v37  ;;  %v14701_v37 = vld [vmem:[%s14807_s17 + $0x208] sm:$0xff] }
 0x32a   : > { %23325 = vst [vmem:[#allocation218_spill] sm:$0xff] %v18993_v51  ;;  %v13895_v57 = vunpack.i.h.bf16 %v13893_v40  ;;  %v13894_v20 = vunpack.i.l.bf16 %v13893_v40  ;;  %14187 = vrot.lane.b32.xlu1 %v18704_v47, %s14768_s30  ;;  %11043 = vmatprep.subr.bf16.mxu1 %v18993_v51 }
 0x32b   : > { %23326 = vst [vmem:[#allocation219_spill] sm:$0xff] %v19001_v10  ;;  %10799 = vmatprep.subr.bf16.mxu0 %v19001_v10  ;;  %11045 = vmatpush1.bf16.msra.mxu1 %v18082_v1 }
 0x32c   : > { %v4140_v12 = vsel %vm4099_vm8, %v13894_v20, %v13879_v27  ;;  %v4145_v22 = vsel %vm4099_vm8, %v13895_v57, %v13884_v55  ;;  %v19012_v26 = vpop.permute.xlu1 %13907  ;;  %14182 = vrot.lane.b32.xlu0 %v18999_v46, %s14766_s8  ;;  %v23328_v20 = vunpack.i.h.bf16 %v18988_v54 }
 0x32d   : > { %23327 = vst [vmem:[#allocation220_spill] sm:$0xff] %v19012_v26  ;;  %v22911_v31 = vunpack.i.l.bf16 %v19012_v26  ;;  %v19022_v1 = vpop.permute.xlu0 %13902  ;;  %v10800_v27 = vpack.c.bf16 %v4145_v22, %v4140_v12  ;;  %v23330_v12 = vunpack.i.h.bf16 %v19012_v26  ;;  %v23331_v22 = vunpack.i.h.bf16 %v18073_v52 }
 0x32e   : > { %v13904_v55 = vunpack.i.l.bf16 %v19022_v1  ;;  %14197 = vrot.lane.b32.xlu1 %v18611_v14, %s14769_s26  ;;  %v4151_v39 = vsel %vm4099_vm8, %v13899_v36, %v23328_v20  ;;  %v23332_v14 = vunpack.i.h.bf16 %v19022_v1 }
 0x32f   : > { %10801 = vmatpush1.bf16.msra.mxu0 %v10800_v27  ;;  %v3256_v40 = vsel %vm3233_vm6, %v23329_v9, %v22911_v31  ;;  %v3261_v57 = vsel %vm3233_vm6, %v23331_v22, %v23330_v12  ;;  %v14702_v27 = vld [vmem:[%s14807_s17 + $0x238] sm:$0xff] }
 0x330   : > { %v19041_v51 = vpop.permute.xlu1 %13917  ;;  %v4156_v10 = vsel %vm4099_vm8, %v13904_v55, %v23332_v14  ;;  %v19046_v20 = vpack.c.bf16 %v3261_v57, %v3256_v40  ;;  %14192 = vrot.lane.b32.xlu0 %v19018_v5, %s14766_s8  ;;  %v19052_v9 = vpack.i.bf16 %v14702_v27, %v14701_v37  ;;  %v23335_v40 = vld [vmem:[#allocation173_spill] sm:$0xff]  ;;  %v14703_v37 = vld [vmem:[%s14807_s17 + $0x268] sm:$0xff]  ;;  %v14704_v27 = vld [vmem:[%s14807_s17 + $0x298] sm:$0xff] }
 0x331   : > { %v13913_v52 = vpop.permute.xlu0 %13912  ;;  %v19054_v31 = vpack.c.bf16 %v4156_v10, %v4151_v39  ;;  %v13919_v22 = vunpack.i.l.bf16 %v19041_v51 }
 0x332   : > { %23333 = vst [vmem:[#allocation221_spill] sm:$0xff] %v19046_v20  ;;  %v13915_v26 = vunpack.i.h.bf16 %v13913_v52  ;;  %v13914_v14 = vunpack.i.l.bf16 %v13913_v52  ;;  %14207 = vrot.lane.b32.xlu1 %v18593_v45, %s14769_s26  ;;  %11047 = vmatprep.subr.bf16.mxu1 %v19046_v20  ;;  %v14211_v52 = vpack.i.bf16 %v14704_v27, %v14703_v37  ;;  %v23338_v37 = vunpack.i.h.bf16 %v18106_v15  ;;  %v14706_v15 = vld [vmem:[%s14807_s17 + $0x2f8] sm:$0xff] }
 0x333   : > { %23334 = vst [vmem:[#allocation222_spill] sm:$0xff] %v19054_v31  ;;  %10803 = vmatprep.subr.bf16.mxu0 %v19054_v31  ;;  %11049 = vmatpush1.bf16.msra.mxu1 %v23335_v40 }
 0x334   : > { %v4150_v57 = vsel %vm4099_vm8, %v13914_v14, %v13899_v36  ;;  %v4155_v10 = vsel %vm4099_vm8, %v13915_v26, %v13904_v55  ;;  %v19065_v39 = vpop.permute.xlu1 %13927  ;;  %14202 = vrot.lane.b32.xlu0 %v19052_v9, %s14766_s8  ;;  %v23337_v55 = vunpack.i.h.bf16 %v19041_v51 }
 0x335   : > { %23336 = vst [vmem:[#allocation173_spill] sm:$0xff] %v19065_v39  ;;  %v22918_v45 = vunpack.i.h.bf16 %v19065_v39  ;;  %v22917_v12 = vunpack.i.l.bf16 %v19065_v39  ;;  %v19073_v20 = vpop.permute.xlu0 %13922  ;;  %v10804_v40 = vpack.c.bf16 %v4155_v10, %v4150_v57  ;;  %v23339_v57 = vunpack.i.h.bf16 %v18137_v56 }
 0x336   : > { %v13924_v26 = vunpack.i.l.bf16 %v19073_v20  ;;  %14217 = vrot.lane.b32.xlu1 %v18643_v61, %s14769_s26  ;;  %v4161_v14 = vsel %vm4099_vm8, %v13919_v22, %v23337_v55  ;;  %v23340_v61 = vunpack.i.h.bf16 %v19073_v20 }
 0x337   : > { %10805 = vmatpush1.bf16.msra.mxu0 %v10804_v40  ;;  %v3266_v27 = vsel %vm3233_vm6, %v23338_v37, %v22917_v12  ;;  %v3271_v10 = vsel %vm3233_vm6, %v23339_v57, %v22918_v45  ;;  %v14705_v40 = vld [vmem:[%s14807_s17 + $0x2c8] sm:$0xff] }
 0x338   : > { %v19092_v36 = vpop.permute.xlu1 %13937  ;;  %v4166_v31 = vsel %vm4099_vm8, %v13924_v26, %v23340_v61  ;;  %v19097_v55 = vpack.c.bf16 %v3271_v10, %v3266_v27  ;;  %14212 = vrot.lane.b32.xlu0 %v14211_v52, %s14766_s8  ;;  %v14221_v48 = vpack.i.bf16 %v14706_v15, %v14705_v40 }
 0x339   : > { %v13933_v37 = vpop.permute.xlu0 %13932  ;;  %v19102_v12 = vpack.c.bf16 %v4166_v31, %v4161_v14  ;;  %v22924_v56 = vunpack.i.h.bf16 %v19092_v36  ;;  %v13939_v57 = vunpack.i.l.bf16 %v19092_v36 }
 0x33a   : > { %23341 = vst [vmem:[#allocation223_spill] sm:$0xff] %v19097_v55  ;;  %v13935_v45 = vunpack.i.h.bf16 %v13933_v37  ;;  %v13934_v39 = vunpack.i.l.bf16 %v13933_v37  ;;  %14227 = vrot.lane.b32.xlu1 %v18631_v38, %s14769_s26  ;;  %11051 = vmatprep.subr.bf16.mxu1 %v19097_v55  ;;  %v23353_v55 = vunpack.i.h.bf16 %v18208_v6 }
 0x33b   : > { %10807 = vmatprep.subr.bf16.mxu0 %v19102_v12  ;;  %11053 = vmatpush1.bf16.msra.mxu1 %v18165_v13  ;;  %v4171_v13 = vsel %vm4099_vm8, %v13939_v57, %v22924_v56 }
 0x33c   : > { %v4160_v52 = vsel %vm4099_vm8, %v13934_v39, %v13919_v22  ;;  %v4165_v31 = vsel %vm4099_vm8, %v13935_v45, %v13924_v26  ;;  %v19113_v14 = vpop.permute.xlu1 %13947  ;;  %14222 = vrot.lane.b32.xlu0 %v14221_v48, %s14766_s8  ;;  %v23343_v48 = vld [vmem:[#allocation175_spill] sm:$0xff]  ;;  %v23345_v45 = vld [vmem:[#allocation174_spill] sm:$0xff]  ;;  %s14771_s8 = smov 96  }
 0x33d   : > { %23342 = vst [vmem:[#allocation224_spill] sm:$0xff] %v19113_v14  ;;  %v22922_v27 = vunpack.i.h.bf16 %v19113_v14  ;;  %v22921_v10 = vunpack.i.l.bf16 %v19113_v14  ;;  %v19118_v61 = vpop.permute.xlu0 %13942  ;;  %v10808_v38 = vpack.c.bf16 %v4165_v31, %v4160_v52  ;;  %v23344_v22 = vunpack.i.h.bf16 %v23343_v48 }
 0x33e   : > { %v22923_v40 = vunpack.i.h.bf16 %v19118_v61  ;;  %v13944_v15 = vunpack.i.l.bf16 %v19118_v61  ;;  %14237 = vrot.lane.b32.xlu1 %v18684_v43, %s14769_s26  ;;  %v23346_v26 = vunpack.i.h.bf16 %v23345_v45 }
 0x33f   : > { %10809 = vmatpush1.bf16.msra.mxu0 %v10808_v38  ;;  %v3276_v39 = vsel %vm3233_vm6, %v23344_v22, %v22921_v10  ;;  %v23349_v38 = vld [vmem:[#allocation177_spill] sm:$0xff] }
 0x340   : > { %v3281_v37 = vsel %vm3233_vm6, %v23346_v26, %v22922_v27  ;;  %v19137_v43 = vpop.permute.xlu1 %13957  ;;  %v4176_v52 = vsel %vm4099_vm8, %v13944_v15, %v22923_v40  ;;  %14232 = vrot.lane.b32.xlu0 %v18907_v58, %s14767_s18  ;;  %v23348_v58 = vld [vmem:[#allocation171_spill] sm:$0xff] }
 0x341   : > { %v19142_v31 = vpack.c.bf16 %v3281_v37, %v3276_v39  ;;  %v22935_v48 = vunpack.i.l.bf16 %v19137_v43  ;;  %v13953_v22 = vpop.permute.xlu0 %13952  ;;  %v19148_v45 = vpack.c.bf16 %v4176_v52, %v4171_v13  ;;  %v14707_v39 = vld [vmem:[%s14807_s17 + $0x18] sm:$0xff]  ;;  %v14708_v37 = vld [vmem:[%s14807_s17 + $0x48] sm:$0xff] }
 0x342   : > { %v13955_v10 = vunpack.i.h.bf16 %v13953_v22  ;;  %v13954_v26 = vunpack.i.l.bf16 %v13953_v22  ;;  %v5204_v27 = vpop.f32.mrb[36].mxu0  ;;  %14247 = vrot.lane.b32.xlu1 %v18666_v41, %s14769_s26  ;;  %v19155_v40 = vpack.c.bf16 %v14708_v37, %v14707_v39  ;;  %v23350_v52 = vld [vmem:[#allocation176_spill] sm:$0xff] }
 0x343   : > { %23347 = vst [vmem:[#allocation175_spill] sm:$0xff] %v19142_v31  ;;  %11055 = vmatprep.subr.bf16.mxu1 %v19142_v31  ;;  %v19158_v56 = vadd.f32 %v5204_v27, %v23348_v58  ;;  %10811 = vmatprep.subr.bf16.mxu0 %v19148_v45  ;;  %v5206_v13 = vpop.f32.mrb[37].mxu0  ;;  %v23351_v22 = vunpack.i.h.bf16 %v23350_v52  ;;  %v23352_v31 = vunpack.i.h.bf16 %v19137_v43  ;;  %v6625_v37 = vpop.f32.mrb[36].mxu1 }
 0x344   : > { %11057 = vmatpush1.bf16.msra.mxu1 %v23349_v38  ;;  %v4170_v27 = vsel %vm4099_vm8, %v13954_v26, %v13939_v57  ;;  %v4175_v58 = vsel %vm4099_vm8, %v13955_v10, %v13944_v15  ;;  %v19174_v14 = vpop.permute.xlu1 %13967  ;;  %v19179_v13 = vadd.f32 %v6625_v37, %v18872_v60  ;;  %v6627_v52 = vpop.f32.mrb[37].mxu1  ;;  %14242 = vrot.lane.b32.xlu0 %v18946_v11, %s14767_s18  ;;  %v23355_v60 = vld [vmem:[#allocation172_spill] sm:$0xff] }
 0x345   : > { %v3286_v41 = vsel %vm3233_vm6, %v23351_v22, %v22935_v48  ;;  %v3291_v39 = vsel %vm3233_vm6, %v23353_v55, %v23352_v31  ;;  %v22932_v6 = vunpack.i.h.bf16 %v19174_v14  ;;  %v22929_v55 = vunpack.i.l.bf16 %v19174_v14  ;;  %v19185_v31 = vpop.permute.xlu0 %13962  ;;  %v23356_v11 = vld [vmem:[#allocation180_spill] sm:$0xff]  ;;  %v4379_v48 = vld [vmem:[%s22628_s1 + $0x138] sm:$0xff] }
 0x346   : > { %v19176_v38 = vpack.c.bf16 %v3291_v39, %v3286_v41  ;;  %v10812_v57 = vpack.c.bf16 %v4175_v58, %v4170_v27  ;;  %v22930_v10 = vunpack.i.h.bf16 %v19185_v31  ;;  %v22931_v15 = vunpack.i.l.bf16 %v19185_v31  ;;  %v5209_v26 = vpop.f32.mrb[38].mxu0  ;;  %14257 = vrot.lane.b32.xlu1 %v18716_v53, %s14769_s26  ;;  %v4348_v41 = vld [vmem:[%s22628_s1 + $0x40] sm:$0xff] }
 0x347   : > { %v19193_v22 = vadd.f32 %v5209_v26, %v23355_v60  ;;  %v23357_v39 = vunpack.i.h.bf16 %v18255_v50  ;;  %v5211_v37 = vpop.f32.mrb[39].mxu0  ;;  %v23358_v58 = vld [vmem:[#allocation179_spill] sm:$0xff]  ;;  %v23360_v26 = vld [vmem:[#allocation178_spill] sm:$0xff]  ;;  %v23362_v50 = vunpack.i.h.bf16 %v18279_v30 }
 0x348   : > { %23354 = vst [vmem:[#allocation174_spill] sm:$0xff] %v19176_v38  ;;  %11059 = vmatprep.subr.bf16.mxu1 %v19176_v38  ;;  %10813 = vmatpush1.bf16.msra.mxu0 %v10812_v57  ;;  %v19204_v27 = vpop.permute.xlu1 %13977  ;;  %v23359_v52 = vunpack.i.h.bf16 %v23358_v58  ;;  %v23361_v60 = vunpack.i.h.bf16 %v23360_v26  ;;  %v6630_v37 = vpop.f32.mrb[38].mxu1  ;;  %v14709_v26 = vld [vmem:[%s14807_s17 + $0x78] sm:$0xff] }
 0x349   : > { %11061 = vmatpush1.bf16.msra.mxu1 %v23356_v11  ;;  %v3306_v53 = vsel %vm3233_vm6, %v23357_v39, %v22929_v55  ;;  %11135 = vmatprep.subr.bf16.mxu0 %v19155_v40  ;;  %v3311_v39 = vsel %vm3233_vm6, %v23362_v50, %v22932_v6  ;;  %v19224_v55 = vpop.permute.xlu0 %13972  ;;  %v19236_v30 = vadd.f32 %v6630_v37, %v18893_v33  ;;  %v6632_v50 = vpop.f32.mrb[39].mxu1  ;;  %v4358_v33 = vld [vmem:[%s22628_s1 + $0x90] sm:$0xff] }
 0x34a   : > { %v3296_v57 = vsel %vm3233_vm6, %v23359_v52, %v22931_v15  ;;  %v3301_v11 = vsel %vm3233_vm6, %v23361_v60, %v22930_v10  ;;  %14252 = vrot.lane.b32.xlu0 %v18965_v29, %s14767_s18  ;;  %v4359_v52 = vld [vmem:[%s22628_s1 + $0x98] sm:$0xff]  ;;  %v14710_v60 = vld [vmem:[%s14807_s17 + $0xa8] sm:$0xff]  ;;  %v22933_v15 = vunpack.i.h.bf16 %v19224_v55  ;;  %v22934_v29 = vunpack.i.l.bf16 %v19224_v55  ;;  %14267 = vrot.lane.b32.xlu1 %v18704_v47, %s14769_s26 }
 0x34b   : > { %v19226_v58 = vpack.c.bf16 %v3301_v11, %v3296_v57  ;;  %v19233_v10 = vpack.c.bf16 %v14710_v60, %v14709_v26  ;;  %5521 = vmatmul.mubr.f32.vlgmr.msra.gmra.mrb[44].mxu0 %v4348_v41  ;;  %v23364_v57 = vld [vmem:[#allocation3_spill] sm:$0xff]  ;;  %v19244_v11 = vpack.c.bf16 %v3311_v39, %v3306_v53  ;;  %v19251_v37 = vpack.c.bf16 %v18512_v59, %v18509_v8  ;;  %v23366_v60 = vld [vmem:[#allocation181_spill] sm:$0xff]  ;;  %v4369_v53 = vld [vmem:[%s22628_s1 + $0xe8] sm:$0xff] }
 0x34c   : > { %11137 = vmatpush1.bf16.msra.mxu0 %v23364_v57  ;;  %v22937_v26 = vunpack.i.h.bf16 %v19204_v27  ;;  %v22936_v41 = vunpack.i.l.bf16 %v19204_v27  ;;  %v19256_v47 = vpop.permute.xlu1 %13987  ;;  %5525 = vmatprep.mubr.f32.mxu0 %v4359_v52  ;;  %v23367_v39 = vld [vmem:[#allocation183_spill] sm:$0xff]  ;;  %v23369_v59 = vld [vmem:[#allocation182_spill] sm:$0xff]  ;;  %v23371_v52 = vld [vmem:[#allocation4_spill] sm:$0xff] }
 0x34d   : > { %23363 = vst [vmem:[#allocation171_spill] sm:$0xff] %v19226_v58  ;;  %11063 = vmatprep.subr.bf16.mxu1 %v19226_v58  ;;  %23365 = vst [vmem:[#allocation177_spill] sm:$0xff] %v19244_v11  ;;  %v23368_v50 = vunpack.i.h.bf16 %v23367_v39  ;;  %v23370_v57 = vunpack.i.h.bf16 %v23369_v59  ;;  %11139 = vmatprep.subr.bf16.mxu0 %v19233_v10 }
 0x34e   : > { %11065 = vmatpush1.bf16.msra.mxu1 %v23366_v60  ;;  %v19271_v60 = vpop.permute.xlu0 %13982  ;;  %14262 = vrot.lane.b32.xlu0 %v18999_v46, %s14767_s18  ;;  %v10017_v46 = vld [vmem:[%s22628_s1 + $0x530] sm:$0xff] }
 0x34f   : > { %v3669_v8 = vsel %vm3666_vm7, %v23368_v50, %v22934_v29  ;;  %v3674_v6 = vsel %vm3666_vm7, %v23370_v57, %v22933_v15  ;;  %11067 = vmatprep.subr.bf16.mxu1 %v19244_v11  ;;  %5526 = vmatmul.mubr.f32.gmra.mrb[46].mxu0 %v4358_v33  ;;  %v4368_v50 = vld [vmem:[%s22628_s1 + $0xe0] sm:$0xff]  ;;  %v22938_v57 = vunpack.i.l.bf16 %v19271_v60  ;;  %v23373_v15 = vld [vmem:[#allocation184_spill] sm:$0xff]  ;;  %v23398_v11 = vld [vmem:[#allocation189_spill] sm:$0xff] }
 0x350   : > { %11141 = vmatpush1.bf16.msra.mxu0 %v23371_v52  ;;  %5530 = vmatprep.mubr.f32.mxu0 %v4369_v53  ;;  %v19278_v39 = vpack.c.bf16 %v3674_v6, %v3669_v8  ;;  %v19286_v33 = vpop.permute.xlu1 %13997  ;;  %v23375_v6 = vld [vmem:[#allocation185_spill] sm:$0xff]  ;;  %v23377_v52 = vunpack.i.h.bf16 %v18355_v44  ;;  %v14712_v44 = vld [vmem:[%s14807_s17 + $0x168] sm:$0xff] }
 0x351   : > { %23374 = vst [vmem:[#allocation172_spill] sm:$0xff] %v19286_v33  ;;  %11143 = vmatprep.subr.bf16.mxu0 %v19251_v37  ;;  %v23376_v53 = vunpack.i.h.bf16 %v23375_v6  ;;  %14277 = vrot.lane.b32.xlu1 %v19052_v9, %s14767_s18  ;;  %v10028_v6 = vld [vmem:[%s22628_s1 + $0x588] sm:$0xff]  ;;  %v4378_v9 = vld [vmem:[%s22628_s1 + $0x130] sm:$0xff] }
 0x352   : > { %23372 = vst [vmem:[#allocation176_spill] sm:$0xff] %v19278_v39  ;;  %11069 = vmatpush1.bf16.msra.mxu1 %v23373_v15  ;;  %v3684_v15 = vsel %vm3666_vm7, %v23377_v52, %v22937_v26  ;;  %v19302_v29 = vpop.permute.xlu0 %13992  ;;  %14272 = vrot.lane.b32.xlu0 %v19018_v5, %s14767_s18  ;;  %v23378_v52 = vld [vmem:[#allocation5_spill] sm:$0xff]  ;;  %v10027_v5 = vld [vmem:[%s22628_s1 + $0x580] sm:$0xff] }
 0x353   : > { %v3679_v8 = vsel %vm3666_vm7, %v23376_v53, %v22936_v41  ;;  %11071 = vmatprep.subr.bf16.mxu1 %v19278_v39  ;;  %5531 = vmatmul.mubr.f32.gmra.mrb[4].mxu0 %v4368_v50  ;;  %v14711_v53 = vld [vmem:[%s14807_s17 + $0x138] sm:$0xff] }
 0x354   : > { %v19315_v41 = vpack.c.bf16 %v14712_v44, %v14711_v53  ;;  %11145 = vmatpush1.bf16.msra.mxu0 %v23378_v52  ;;  %v19320_v26 = vpack.c.bf16 %v3684_v15, %v3679_v8  ;;  %v23380_v53 = vld [vmem:[#allocation186_spill] sm:$0xff]  ;;  %v19328_v44 = vpop.permute.xlu1 %14007  ;;  %5536 = vmatprep.mubr.f32.mxu0 %v4379_v48  ;;  %v23383_v15 = vunpack.i.h.bf16 %v19271_v60  ;;  %v23384_v52 = vunpack.i.h.bf16 %v18382_v17  ;;  %v4389_v48 = vld [vmem:[%s22628_s1 + $0x188] sm:$0xff] }
 0x355   : > { %6783 = vmatmul.mubr.f32.vlgmr.msra.gmra.mrb[40].mxu1 %v10017_v46  ;;  %23381 = vst [vmem:[#allocation179_spill] sm:$0xff] %v19328_v44  ;;  %v23382_v46 = vunpack.i.h.bf16 %v18389_v19  ;;  %v10038_v19 = vld [vmem:[%s22628_s1 + $0x5d8] sm:$0xff]  ;;  %v14714_v17 = vld [vmem:[%s14807_s17 + $0x1c8] sm:$0xff] }
 0x356   : > { %23379 = vst [vmem:[#allocation180_spill] sm:$0xff] %v19320_v26  ;;  %11073 = vmatpush1.bf16.msra.mxu1 %v23380_v53  ;;  %v3694_v50 = vsel %vm3666_vm7, %v23384_v52, %v23383_v15  ;;  %v19343_v53 = vpop.permute.xlu0 %14002  ;;  %6787 = vmatprep.mubr.f32.mxu1 %v10028_v6  ;;  %v23386_v15 = vld [vmem:[#allocation6_spill] sm:$0xff]  ;;  %v4388_v6 = vld [vmem:[%s22628_s1 + $0x180] sm:$0xff] }
 0x357   : > { %v3689_v8 = vsel %vm3666_vm7, %v23382_v46, %v22938_v57  ;;  %23385 = vst [vmem:[#allocation178_spill] sm:$0xff] %v19343_v53  ;;  %11075 = vmatprep.subr.bf16.mxu1 %v19320_v26  ;;  %5537 = vmatmul.mubr.f32.gmra.mrb[6].mxu0 %v4378_v9  ;;  %v14713_v46 = vld [vmem:[%s14807_s17 + $0x198] sm:$0xff]  ;;  %v23388_v26 = vld [vmem:[#allocation187_spill] sm:$0xff]  ;;  %v23394_v9 = vunpack.i.h.bf16 %v18435_v24  ;;  %v14716_v24 = vld [vmem:[%s14807_s17 + $0x228] sm:$0xff] }
 0x358   : > { %11147 = vmatprep.subr.bf16.mxu0 %v19315_v41  ;;  %v19355_v57 = vpack.c.bf16 %v14714_v17, %v14713_v46  ;;  %v19358_v52 = vpack.c.bf16 %v3694_v50, %v3689_v8  ;;  %v19366_v39 = vpop.permute.xlu1 %14017  ;;  %5542 = vmatprep.mubr.f32.mxu0 %v4389_v48  ;;  %v10037_v50 = vld [vmem:[%s22628_s1 + $0x5d0] sm:$0xff]  ;;  %v23391_v8 = vld [vmem:[#allocation188_spill] sm:$0xff]  ;;  %v4399_v48 = vld [vmem:[%s22628_s1 + $0x1d8] sm:$0xff] }
 0x359   : > { %6788 = vmatmul.mubr.f32.gmra.mrb[42].mxu1 %v10027_v5  ;;  %11149 = vmatpush1.bf16.msra.mxu0 %v23386_v15  ;;  %23389 = vst [vmem:[#allocation181_spill] sm:$0xff] %v19366_v39  ;;  %v23390_v5 = vunpack.i.l.bf16 %v19256_v47  ;;  %v23392_v46 = vunpack.i.h.bf16 %v23391_v8  ;;  %v23393_v15 = vunpack.i.h.bf16 %v19256_v47  ;;  %v14715_v8 = vld [vmem:[%s14807_s17 + $0x1f8] sm:$0xff] }
 0x35a   : > { %23387 = vst [vmem:[#allocation3_spill] sm:$0xff] %v19358_v52  ;;  %11077 = vmatpush1.bf16.msra.mxu1 %v23388_v26  ;;  %v19381_v26 = vpop.permute.xlu0 %14012  ;;  %6792 = vmatprep.mubr.f32.mxu1 %v10038_v19  ;;  %v4398_v19 = vld [vmem:[%s22628_s1 + $0x1d0] sm:$0xff] }
 0x35b   : > { %v3699_v17 = vsel %vm3666_vm7, %v23392_v46, %v23390_v5  ;;  %v3704_v59 = vsel %vm3666_vm7, %v23394_v9, %v23393_v15  ;;  %23395 = vst [vmem:[#allocation183_spill] sm:$0xff] %v19381_v26  ;;  %11079 = vmatprep.subr.bf16.mxu1 %v19358_v52  ;;  %5543 = vmatmul.mubr.f32.gmra.mrb[8].mxu0 %v4388_v6  ;;  %v10048_v5 = vld [vmem:[%s22628_s1 + $0x628] sm:$0xff]  ;;  %v23396_v9 = vld [vmem:[#allocation7_spill] sm:$0xff] }
 0x35c   : > { %11151 = vmatprep.subr.bf16.mxu0 %v19355_v57  ;;  %v19393_v46 = vpack.c.bf16 %v14716_v24, %v14715_v8  ;;  %v19396_v15 = vpack.c.bf16 %v3704_v59, %v3699_v17  ;;  %v19404_v58 = vpop.permute.xlu1 %14027  ;;  %5548 = vmatprep.mubr.f32.mxu0 %v4399_v48  ;;  %v10047_v59 = vld [vmem:[%s22628_s1 + $0x620] sm:$0xff]  ;;  %v23401_v17 = vunpack.i.h.bf16 %v18459_v63  ;;  %v23402_v24 = vunpack.i.h.bf16 %v19302_v29  ;;  %v4409_v48 = vld [vmem:[%s22628_s1 + $0x228] sm:$0xff]  ;;  %v10058_v63 = vld [vmem:[%s22628_s1 + $0x678] sm:$0xff] }
 0x35d   : > { %6793 = vmatmul.mubr.f32.gmra.mrb[4].mxu1 %v10037_v50  ;;  %11153 = vmatpush1.bf16.msra.mxu0 %v23396_v9  ;;  %23399 = vst [vmem:[#allocation4_spill] sm:$0xff] %v19404_v58  ;;  %v23400_v50 = vunpack.i.l.bf16 %v19302_v29  ;;  %v23403_v9 = vunpack.i.h.bf16 %v18492_v35  ;;  %v14718_v35 = vld [vmem:[%s14807_s17 + $0x288] sm:$0xff] }
 0x35e   : > { %23397 = vst [vmem:[#allocation182_spill] sm:$0xff] %v19396_v15  ;;  %11081 = vmatpush1.bf16.msra.mxu1 %v23398_v11  ;;  %v19419_v11 = vpop.permute.xlu0 %14022  ;;  %6798 = vmatprep.mubr.f32.mxu1 %v10048_v5  ;;  %v4408_v5 = vld [vmem:[%s22628_s1 + $0x220] sm:$0xff] }
 0x35f   : > { %v3709_v8 = vsel %vm3666_vm7, %v23401_v17, %v23400_v50  ;;  %v3714_v6 = vsel %vm3666_vm7, %v23403_v9, %v23402_v24  ;;  %23404 = vst [vmem:[#allocation184_spill] sm:$0xff] %v19419_v11  ;;  %11083 = vmatprep.subr.bf16.mxu1 %v19396_v15  ;;  %5549 = vmatmul.mubr.f32.gmra.mrb[10].mxu0 %v4398_v19  ;;  %v14717_v50 = vld [vmem:[%s14807_s17 + $0x258] sm:$0xff]  ;;  %v23405_v24 = vld [vmem:[#allocation8_spill] sm:$0xff] }
 0x360   : > { %11155 = vmatprep.subr.bf16.mxu0 %v19393_v46  ;;  %v19431_v17 = vpack.c.bf16 %v14718_v35, %v14717_v50  ;;  %v19434_v9 = vpack.c.bf16 %v3714_v6, %v3709_v8  ;;  %v23407_v15 = vld [vmem:[#allocation192_spill] sm:$0xff]  ;;  %v19442_v38 = vpop.permute.xlu1 %14037  ;;  %5554 = vmatprep.mubr.f32.mxu0 %v4409_v48  ;;  %v10057_v6 = vld [vmem:[%s22628_s1 + $0x670] sm:$0xff]  ;;  %v23410_v8 = vunpack.i.h.bf16 %v18526_v2  ;;  %v23411_v35 = vunpack.i.h.bf16 %v19286_v33  ;;  %v4419_v2 = vld [vmem:[%s22628_s1 + $0x278] sm:$0xff] }
 0x361   : > { %6799 = vmatmul.mubr.f32.gmra.mrb[6].mxu1 %v10047_v59  ;;  %11157 = vmatpush1.bf16.msra.mxu0 %v23405_v24  ;;  %23408 = vst [vmem:[#allocation5_spill] sm:$0xff] %v19442_v38  ;;  %v23409_v59 = vunpack.i.l.bf16 %v19286_v33  ;;  %v23412_v24 = vunpack.i.h.bf16 %v18559_v28  ;;  %v10068_v28 = vld [vmem:[%s22628_s1 + $0x6c8] sm:$0xff]  ;;  %v23418_v33 = vunpack.i.h.bf16 %v19442_v38 }
 0x362   : > { %23406 = vst [vmem:[#allocation185_spill] sm:$0xff] %v19434_v9  ;;  %11085 = vmatpush1.bf16.msra.mxu1 %v23407_v15  ;;  %v19459_v52 = vpop.permute.xlu0 %14032  ;;  %6804 = vmatprep.mubr.f32.mxu1 %v10058_v63  ;;  %v23414_v63 = vld [vmem:[#allocation9_spill] sm:$0xff] }
 0x363   : > { %v3719_v50 = vsel %vm3666_vm7, %v23410_v8, %v23409_v59  ;;  %v3724_v15 = vsel %vm3666_vm7, %v23412_v24, %v23411_v35  ;;  %23413 = vst [vmem:[#allocation186_spill] sm:$0xff] %v19459_v52  ;;  %11087 = vmatprep.subr.bf16.mxu1 %v19434_v9  ;;  %5555 = vmatmul.mubr.f32.gmra.mrb[12].mxu0 %v4408_v5  ;;  %v14719_v35 = vld [vmem:[%s14807_s17 + $0x2b8] sm:$0xff]  ;;  %v14720_v24 = vld [vmem:[%s14807_s17 + $0x2e8] sm:$0xff]  ;;  %v4418_v59 = vld [vmem:[%s22628_s1 + $0x270] sm:$0xff]  ;;  %v23416_v5 = vunpack.i.l.bf16 %v19442_v38  ;;  %v23417_v8 = vunpack.i.h.bf16 %v18988_v54 }
 0x364   : > { %11159 = vmatprep.subr.bf16.mxu0 %v19431_v17  ;;  %v19473_v19 = vpack.c.bf16 %v14720_v24, %v14719_v35  ;;  %v19476_v48 = vpack.c.bf16 %v3724_v15, %v3719_v50  ;;  %v23419_v35 = vunpack.i.h.bf16 %v19022_v1  ;;  %v19492_v50 = vpop.permute.xlu1 %14047  ;;  %5560 = vmatprep.mubr.f32.mxu0 %v4419_v2  ;;  %v10067_v15 = vld [vmem:[%s22628_s1 + $0x6c0] sm:$0xff]  ;;  %v23421_v24 = vunpack.i.l.bf16 %v19343_v53 }
 0x365   : > { %6805 = vmatmul.mubr.f32.gmra.mrb[8].mxu1 %v10057_v6  ;;  %11161 = vmatpush1.bf16.msra.mxu0 %v23414_v63  ;;  %v4152_v9 = vsel %vm4099_vm8, %v23417_v8, %v23416_v5  ;;  %23420 = vst [vmem:[#allocation187_spill] sm:$0xff] %v19492_v50  ;;  %v23422_v54 = vunpack.i.h.bf16 %v18582_v3  ;;  %v23423_v63 = vunpack.i.h.bf16 %v19343_v53  ;;  %v23424_v1 = vld [vmem:[#allocation199_spill] sm:$0xff] }
 0x366   : > { %23415 = vst [vmem:[#allocation6_spill] sm:$0xff] %v19476_v48  ;;  %v4157_v6 = vsel %vm4099_vm8, %v23419_v35, %v23418_v33  ;;  %11089 = vmatpush1.bf16.msra.mxu1 %v18533_v4  ;;  %v23425_v5 = vunpack.i.h.bf16 %v23424_v1  ;;  %v19511_v38 = vpop.permute.xlu0 %14042  ;;  %6810 = vmatprep.mubr.f32.mxu1 %v10068_v28  ;;  %v23432_v28 = vunpack.i.h.bf16 %v18696_v34  ;;  %v4428_v35 = vld [vmem:[%s22628_s1 + $0x2c0] sm:$0xff]  ;;  %v23436_v34 = vunpack.i.h.bf16 %v19092_v36  ;;  %v10077_v36 = vld [vmem:[%s22628_s1 + $0x710] sm:$0xff] }
 0x367   : > { %v3729_v8 = vsel %vm3666_vm7, %v23422_v54, %v23421_v24  ;;  %v19507_v4 = vpack.c.bf16 %v4157_v6, %v4152_v9  ;;  %23427 = vst [vmem:[#allocation7_spill] sm:$0xff] %v19511_v38  ;;  %11091 = vmatprep.subr.bf16.mxu1 %v19476_v48  ;;  %5561 = vmatmul.mubr.f32.gmra.mrb[14].mxu0 %v4418_v59  ;;  %v4429_v9 = vld [vmem:[%s22628_s1 + $0x2c8] sm:$0xff]  ;;  %v23428_v6 = vunpack.i.l.bf16 %v19328_v44  ;;  %v23433_v24 = vld [vmem:[#allocation10_spill] sm:$0xff] }
 0x368   : > { %v3734_v33 = vsel %vm3666_vm7, %v23425_v5, %v23423_v63  ;;  %11163 = vmatprep.subr.bf16.mxu0 %v19473_v19  ;;  %v23429_v54 = vld [vmem:[#allocation200_spill] sm:$0xff]  ;;  %v23431_v5 = vunpack.i.h.bf16 %v19328_v44  ;;  %v19553_v59 = vpop.permute.xlu1 %14057  ;;  %5566 = vmatprep.mubr.f32.mxu0 %v4429_v9 }
 0x369   : > { %23426 = vst [vmem:[#allocation188_spill] sm:$0xff] %v19507_v4  ;;  %v23430_v63 = vunpack.i.h.bf16 %v23429_v54  ;;  %6811 = vmatmul.mubr.f32.gmra.mrb[10].mxu1 %v10067_v15  ;;  %11165 = vmatpush1.bf16.msra.mxu0 %v23433_v24  ;;  %v19532_v2 = vpack.c.bf16 %v3734_v33, %v3729_v8  ;;  %v23435_v54 = vunpack.i.l.bf16 %v19492_v50  ;;  %v23437_v15 = vunpack.i.h.bf16 %v19492_v50  ;;  %v10088_v9 = vld [vmem:[%s22628_s1 + $0x768] sm:$0xff] }
 0x36a   : > { %v3744_v3 = vsel %vm3666_vm7, %v23432_v28, %v23431_v5  ;;  %v23438_v24 = vunpack.i.h.bf16 %v19118_v61  ;;  %v23439_v5 = vld [vmem:[#allocation197_spill] sm:$0xff]  ;;  %v23440_v28 = vld [vmem:[#allocation14_spill] sm:$0xff]  ;;  %v19570_v50 = vpop.permute.xlu0 %14052 }
 0x36b   : > { %v3739_v1 = vsel %vm3666_vm7, %v23430_v63, %v23428_v6  ;;  %23434 = vst [vmem:[#allocation189_spill] sm:$0xff] %v19532_v2  ;;  %v10078_v6 = vld [vmem:[%s22628_s1 + $0x718] sm:$0xff]  ;;  %v4172_v63 = vsel %vm4099_vm8, %v23436_v34, %v23435_v54  ;;  %11093 = vmatpush1.bf16.msra.mxu1 %v23439_v5  ;;  %11167 = vmatprep.subr.bf16.mxu0 %v23440_v28  ;;  %v23441_v54 = vunpack.i.l.bf16 %v19511_v38  ;;  %v23442_v34 = vunpack.i.h.bf16 %v19041_v51 }
 0x36c   : > { %v4177_v8 = vsel %vm4099_vm8, %v23438_v24, %v23437_v15  ;;  %v23443_v15 = vunpack.i.h.bf16 %v19511_v38  ;;  %v23444_v24 = vunpack.i.h.bf16 %v19073_v20  ;;  %11095 = vmatprep.subr.bf16.mxu1 %v19532_v2  ;;  %5567 = vmatmul.mubr.f32.gmra.mrb[16].mxu0 %v4428_v35  ;;  %v4439_v51 = vld [vmem:[%s22628_s1 + $0x318] sm:$0xff]  ;;  %v19579_v20 = vpack.c.bf16 %v3744_v3, %v3739_v1  ;;  %v10087_v3 = vld [vmem:[%s22628_s1 + $0x760] sm:$0xff]  ;;  %v4449_v35 = vld [vmem:[%s22628_s1 + $0x368] sm:$0xff] }
 0x36d   : > { %v4162_v61 = vsel %vm4099_vm8, %v23442_v34, %v23441_v54  ;;  %v19568_v33 = vpack.c.bf16 %v4177_v8, %v4172_v63  ;;  %6816 = vmatprep.mubr.f32.mxu1 %v10078_v6  ;;  %v23447_v54 = vld [vmem:[#allocation13_spill] sm:$0xff]  ;;  %v22955_v6 = vunpack.i.l.bf16 %v19366_v39  ;;  %v23449_v8 = vld [vmem:[#allocation202_spill] sm:$0xff]  ;;  %v23451_v1 = vunpack.i.l.bf16 %v19381_v26  ;;  %5572 = vmatprep.mubr.f32.mxu0 %v4439_v51  ;;  %v4469_v38 = vld [vmem:[%s22628_s1 + $0x408] sm:$0xff] }
 0x36e   : > { %v4167_v5 = vsel %vm4099_vm8, %v23444_v24, %v23443_v15  ;;  %6817 = vmatmul.mubr.f32.gmra.mrb[12].mxu1 %v10077_v36  ;;  %11169 = vmatpush1.bf16.msra.mxu0 %v23447_v54  ;;  %23448 = vst [vmem:[#allocation9_spill] sm:$0xff] %v19579_v20  ;;  %v4438_v63 = vld [vmem:[%s22628_s1 + $0x310] sm:$0xff]  ;;  %v23450_v34 = vld [vmem:[#allocation18_spill] sm:$0xff]  ;;  %v19591_v36 = vpop.permute.xlu1 %14067  ;;  %v23453_v24 = vunpack.i.h.bf16 %v19381_v26 }
 0x36f   : > { %23445 = vst [vmem:[#allocation8_spill] sm:$0xff] %v19568_v33  ;;  %v19573_v44 = vpack.c.bf16 %v4167_v5, %v4162_v61  ;;  %11097 = vmatpush1.bf16.msra.mxu1 %v23449_v8  ;;  %11171 = vmatprep.subr.bf16.mxu0 %v23450_v34  ;;  %v23452_v61 = vunpack.i.h.bf16 %v18728_v21  ;;  %v23454_v5 = vunpack.i.h.bf16 %v18761_v49  ;;  %v19606_v8 = vpop.permute.xlu0 %14062  ;;  %v23455_v21 = vld [vmem:[#allocation17_spill] sm:$0xff]  ;;  %v4448_v49 = vld [vmem:[%s22628_s1 + $0x360] sm:$0xff]  ;;  %v10098_v51 = vld [vmem:[%s22628_s1 + $0x7b8] sm:$0xff] }
 0x370   : > { %11099 = vmatprep.subr.bf16.mxu1 %v19579_v20  ;;  %5573 = vmatmul.mubr.f32.gmra.mrb[18].mxu0 %v4438_v63 }
 0x371   : > { %23446 = vst [vmem:[#allocation192_spill] sm:$0xff] %v19573_v44  ;;  %v4102_v15 = vsel %vm4099_vm8, %v23452_v61, %v23451_v1  ;;  %v4107_v54 = vsel %vm4099_vm8, %v23454_v5, %v23453_v24  ;;  %6822 = vmatprep.mubr.f32.mxu1 %v10088_v9  ;;  %v23457_v61 = vld [vmem:[#allocation22_spill] sm:$0xff]  ;;  %v23458_v24 = vunpack.i.h.bf16 %v18785_v23  ;;  %5578 = vmatprep.mubr.f32.mxu0 %v4449_v35  ;;  %v23461_v23 = vld [vmem:[#allocation21_spill] sm:$0xff]  ;;  %v10108_v35 = vld [vmem:[%s22628_s1 + $0x808] sm:$0xff] }
 0x372   : > { %6823 = vmatmul.mubr.f32.gmra.mrb[14].mxu1 %v10087_v3  ;;  %11173 = vmatpush1.bf16.msra.mxu0 %v23455_v21  ;;  %v19613_v1 = vpack.c.bf16 %v4107_v54, %v4102_v15  ;;  %v19625_v3 = vpop.permute.xlu1 %14077  ;;  %v10097_v15 = vld [vmem:[%s22628_s1 + $0x7b0] sm:$0xff]  ;;  %v23459_v54 = vunpack.i.h.bf16 %v19366_v39  ;;  %v23460_v21 = vunpack.i.h.bf16 %v18818_v0  ;;  %v4459_v9 = vld [vmem:[%s22628_s1 + $0x3b8] sm:$0xff]  ;;  %v10147_v39 = vld [vmem:[%s22628_s1 + $0x940] sm:$0xff] }
 0x373   : > { %11101 = vmatpush1.bf16.msra.mxu1 %v18735_v32  ;;  %11175 = vmatprep.subr.bf16.mxu0 %v23457_v61  ;;  %v4112_v5 = vsel %vm4099_vm8, %v23458_v24, %v22955_v6  ;;  %v19640_v63 = vpop.permute.xlu0 %14072  ;;  %v4458_v0 = vld [vmem:[%s22628_s1 + $0x3b0] sm:$0xff]  ;;  %v23466_v6 = vunpack.i.h.bf16 %v19419_v11 }
 0x374   : > { %23456 = vst [vmem:[#allocation199_spill] sm:$0xff] %v19613_v1  ;;  %v4117_v32 = vsel %vm4099_vm8, %v23460_v21, %v23459_v54  ;;  %11103 = vmatprep.subr.bf16.mxu1 %v19613_v1  ;;  %5579 = vmatmul.mubr.f32.gmra.mrb[20].mxu0 %v4448_v49  ;;  %v23463_v54 = vld [vmem:[#allocation26_spill] sm:$0xff]  ;;  %v23464_v21 = vunpack.i.l.bf16 %v19419_v11  ;;  %v23467_v49 = vunpack.i.h.bf16 %v18863_v62  ;;  %v4468_v62 = vld [vmem:[%s22628_s1 + $0x400] sm:$0xff]  ;;  %v4489_v1 = vld [vmem:[%s22628_s1 + $0x4a8] sm:$0xff] }
 0x375   : > { %6828 = vmatprep.mubr.f32.mxu1 %v10098_v51  ;;  %v19647_v24 = vpack.c.bf16 %v4117_v32, %v4112_v5  ;;  %v10107_v5 = vld [vmem:[%s22628_s1 + $0x800] sm:$0xff]  ;;  %v23465_v32 = vunpack.i.h.bf16 %v18839_v42  ;;  %5584 = vmatprep.mubr.f32.mxu0 %v4459_v9  ;;  %v23468_v42 = vld [vmem:[#allocation25_spill] sm:$0xff]  ;;  %v23474_v9 = vunpack.i.h.bf16 %v19404_v58  ;;  %v4479_v11 = vld [vmem:[%s22628_s1 + $0x458] sm:$0xff] }
 0x376   : > { %6829 = vmatmul.mubr.f32.gmra.mrb[16].mxu1 %v10097_v15  ;;  %11177 = vmatpush1.bf16.msra.mxu0 %v23461_v23  ;;  %v19659_v15 = vpop.permute.xlu1 %14087 }
 0x377   : > { %23462 = vst [vmem:[#allocation200_spill] sm:$0xff] %v19647_v24  ;;  %11105 = vmatpush1.bf16.msra.mxu1 %v18792_v25  ;;  %11179 = vmatprep.subr.bf16.mxu0 %v23463_v54  ;;  %v4122_v23 = vsel %vm4099_vm8, %v23465_v32, %v23464_v21  ;;  %v4127_v25 = vsel %vm4099_vm8, %v23467_v49, %v23466_v6  ;;  %v19674_v51 = vpop.permute.xlu0 %14082  ;;  %v10118_v6 = vld [vmem:[%s22628_s1 + $0x858] sm:$0xff]  ;;  %v10117_v32 = vld [vmem:[%s22628_s1 + $0x850] sm:$0xff] }
 0x378   : > { %11107 = vmatprep.subr.bf16.mxu1 %v19647_v24  ;;  %5585 = vmatmul.mubr.f32.gmra.mrb[22].mxu0 %v4458_v0  ;;  %v19681_v21 = vpack.c.bf16 %v4127_v25, %v4122_v23  ;;  %v23471_v49 = vld [vmem:[#allocation30_spill] sm:$0xff]  ;;  %v23472_v23 = vunpack.i.l.bf16 %v19404_v58  ;;  %v23473_v25 = vunpack.i.h.bf16 %v18886_v16  ;;  %v23475_v0 = vunpack.i.h.bf16 %v18916_v18  ;;  %v23476_v16 = vld [vmem:[#allocation29_spill] sm:$0xff] }
 0x379   : > { %6834 = vmatprep.mubr.f32.mxu1 %v10108_v35  ;;  %v23470_v35 = vld [vmem:[#allocation209_spill] sm:$0xff]  ;;  %5590 = vmatprep.mubr.f32.mxu0 %v4469_v38  ;;  %v10128_v38 = vld [vmem:[%s22628_s1 + $0x8a8] sm:$0xff] }
 0x37a   : > { %6835 = vmatmul.mubr.f32.gmra.mrb[18].mxu1 %v10107_v5  ;;  %11181 = vmatpush1.bf16.msra.mxu0 %v23468_v42  ;;  %23469 = vst [vmem:[#allocation10_spill] sm:$0xff] %v19681_v21  ;;  %v19693_v5 = vpop.permute.xlu1 %14097  ;;  %v4132_v42 = vsel %vm4099_vm8, %v23473_v25, %v23472_v23  ;;  %v4478_v18 = vld [vmem:[%s22628_s1 + $0x450] sm:$0xff]  ;;  %v23481_v25 = vunpack.i.h.bf16 %v18937_v7 }
 0x37b   : > { %11109 = vmatpush1.bf16.msra.mxu1 %v23470_v35  ;;  %11183 = vmatprep.subr.bf16.mxu0 %v23471_v49  ;;  %v4137_v35 = vsel %vm4099_vm8, %v23475_v0, %v23474_v9  ;;  %v19708_v24 = vpop.permute.xlu0 %14092  ;;  %v23478_v9 = vld [vmem:[#allocation212_spill] sm:$0xff]  ;;  %v10127_v0 = vld [vmem:[%s22628_s1 + $0x8a0] sm:$0xff]  ;;  %v23485_v7 = vld [vmem:[#allocation33_spill] sm:$0xff] }
 0x37c   : > { %11111 = vmatprep.subr.bf16.mxu1 %v19681_v21  ;;  %5591 = vmatmul.mubr.f32.gmra.mrb[24].mxu0 %v4468_v62  ;;  %v19715_v23 = vpack.c.bf16 %v4137_v35, %v4132_v42  ;;  %v23479_v62 = vld [vmem:[#allocation34_spill] sm:$0xff]  ;;  %v23482_v35 = vunpack.i.h.bf16 %v19459_v52 }
 0x37d   : > { %6840 = vmatprep.mubr.f32.mxu1 %v10118_v6  ;;  %5596 = vmatprep.mubr.f32.mxu0 %v4479_v11  ;;  %v10138_v11 = vld [vmem:[%s22628_s1 + $0x8f8] sm:$0xff] }
 0x37e   : > { %6841 = vmatmul.mubr.f32.gmra.mrb[20].mxu1 %v10117_v32  ;;  %11185 = vmatpush1.bf16.msra.mxu0 %v23476_v16  ;;  %23477 = vst [vmem:[#allocation197_spill] sm:$0xff] %v19715_v23  ;;  %v19725_v6 = vpop.permute.xlu1 %14107  ;;  %v23480_v32 = vunpack.i.l.bf16 %v19459_v52  ;;  %v23483_v16 = vld [vmem:[#allocation217_spill] sm:$0xff] }
 0x37f   : > { %11113 = vmatpush1.bf16.msra.mxu1 %v23478_v9  ;;  %11187 = vmatprep.subr.bf16.mxu0 %v23479_v62  ;;  %v23484_v21 = vunpack.i.h.bf16 %v23483_v16  ;;  %v19740_v58 = vpop.permute.xlu0 %14102 }
 0x380   : > { %v4142_v42 = vsel %vm4099_vm8, %v23481_v25, %v23480_v32  ;;  %11115 = vmatprep.subr.bf16.mxu1 %v19715_v23  ;;  %5597 = vmatmul.mubr.f32.gmra.mrb[26].mxu0 %v4478_v18  ;;  %v23487_v25 = vld [vmem:[#allocation215_spill] sm:$0xff]  ;;  %v23488_v18 = vld [vmem:[#allocation38_spill] sm:$0xff] }
 0x381   : > { %v4147_v9 = vsel %vm4099_vm8, %v23484_v21, %v23482_v35  ;;  %6846 = vmatprep.mubr.f32.mxu1 %v10128_v38  ;;  %v4488_v21 = vld [vmem:[%s22628_s1 + $0x4a0] sm:$0xff]  ;;  %5602 = vmatprep.mubr.f32.mxu0 %v4489_v1  ;;  %v23491_v1 = vunpack.i.l.bf16 %v19137_v43  ;;  %v23495_v23 = vld [vmem:[#allocation42_spill] sm:$0xff] }
 0x382   : > { %6847 = vmatmul.mubr.f32.gmra.mrb[22].mxu1 %v10127_v0  ;;  %11189 = vmatpush1.bf16.msra.mxu0 %v23485_v7  ;;  %v19747_v32 = vpack.c.bf16 %v4147_v9, %v4142_v42  ;;  %v19757_v38 = vpop.permute.xlu1 %14117  ;;  %v10137_v0 = vld [vmem:[%s22628_s1 + $0x8f0] sm:$0xff]  ;;  %v4499_v9 = vld [vmem:[%s22628_s1 + $0x4f8] sm:$0xff]  ;;  %v10148_v42 = vld [vmem:[%s22628_s1 + $0x948] sm:$0xff] }
 0x383   : > { %11117 = vmatpush1.bf16.msra.mxu1 %v23487_v25  ;;  %11191 = vmatprep.subr.bf16.mxu0 %v23488_v18  ;;  %23489 = vst [vmem:[#allocation13_spill] sm:$0xff] %v19757_v38  ;;  %v22972_v35 = vunpack.i.l.bf16 %v19757_v38  ;;  %v19764_v16 = vpop.permute.xlu0 %14112  ;;  %v23490_v7 = vld [vmem:[#allocation37_spill] sm:$0xff] }
 0x384   : > { %23486 = vst [vmem:[#allocation14_spill] sm:$0xff] %v19747_v32  ;;  %11119 = vmatprep.subr.bf16.mxu1 %v19747_v32  ;;  %5603 = vmatmul.mubr.f32.gmra.mrb[28].mxu0 %v4488_v21  ;;  %v4498_v25 = vld [vmem:[%s22628_s1 + $0x4f0] sm:$0xff]  ;;  %v23494_v32 = vld [vmem:[#allocation219_spill] sm:$0xff] }
 0x385   : > { %6852 = vmatprep.mubr.f32.mxu1 %v10138_v11  ;;  %v3287_v21 = vsel %vm3233_vm6, %v23491_v1, %v22972_v35  ;;  %v23492_v11 = vunpack.i.h.bf16 %v19757_v38  ;;  %5608 = vmatprep.mubr.f32.mxu0 %v4499_v9  ;;  %v10171_v9 = vld [vmem:[%s22628_s1 + $0xa00] sm:$0xff] }
 0x386   : > { %6853 = vmatmul.mubr.f32.gmra.mrb[24].mxu1 %v10137_v0  ;;  %11193 = vmatpush1.bf16.msra.mxu0 %v23490_v7  ;;  %v23493_v0 = vunpack.i.h.bf16 %v19137_v43  ;;  %v19789_v52 = vpop.permute.xlu1 %14127  ;;  %v23502_v43 = vld [vmem:[#allocation46_spill] sm:$0xff] }
 0x387   : > { %11121 = vmatpush1.bf16.msra.mxu1 %v23494_v32  ;;  %11195 = vmatprep.subr.bf16.mxu0 %v23495_v23  ;;  %23496 = vst [vmem:[#allocation202_spill] sm:$0xff] %v19789_v52  ;;  %v22979_v1 = vunpack.i.h.bf16 %v19789_v52  ;;  %v22978_v35 = vunpack.i.l.bf16 %v19789_v52  ;;  %v19798_v38 = vpop.permute.xlu0 %14122 }
 0x388   : > { %v3292_v7 = vsel %vm3233_vm6, %v23493_v0, %v23492_v11  ;;  %23497 = vst [vmem:[#allocation18_spill] sm:$0xff] %v19798_v38  ;;  %11123 = vmatprep.subr.bf16.mxu1 %v19507_v4  ;;  %5609 = vmatmul.mubr.f32.gmra.mrb[30].mxu0 %v4498_v25  ;;  %v23498_v11 = vld [vmem:[#allocation41_spill] sm:$0xff]  ;;  %v10158_v0 = vld [vmem:[%s22628_s1 + $0x998] sm:$0xff]  ;;  %v23499_v25 = vunpack.i.l.bf16 %v19174_v14  ;;  %v23504_v26 = vunpack.i.l.bf16 %v19798_v38 }
 0x389   : > { %v19794_v20 = vpack.c.bf16 %v3292_v7, %v3287_v21  ;;  %6858 = vmatprep.mubr.f32.mxu1 %v10148_v42  ;;  %v10172_v21 = vld [vmem:[%s22628_s1 + $0xa08] sm:$0xff]  ;;  %v10157_v4 = vld [vmem:[%s22628_s1 + $0x990] sm:$0xff] }
 0x38a   : > { %6859 = vmatmul.mubr.f32.gmra.mrb[26].mxu1 %v10147_v39  ;;  %11197 = vmatpush1.bf16.msra.mxu0 %v23498_v11  ;;  %v3307_v42 = vsel %vm3233_vm6, %v23499_v25, %v22978_v35  ;;  %v23500_v39 = vunpack.i.h.bf16 %v19174_v14  ;;  %v23501_v11 = vld [vmem:[#allocation222_spill] sm:$0xff]  ;;  %v19825_v32 = vpop.permute.xlu1 %14137  ;;  %v23505_v25 = vunpack.i.l.bf16 %v19185_v31  ;;  %v23506_v14 = vunpack.i.h.bf16 %v19798_v38 }
 0x38b   : > { %11125 = vmatpush1.bf16.msra.mxu1 %v23501_v11  ;;  %11199 = vmatprep.subr.bf16.mxu0 %v23502_v43  ;;  %23503 = vst [vmem:[#allocation17_spill] sm:$0xff] %v19825_v32  ;;  %v22986_v52 = vunpack.i.h.bf16 %v19825_v32  ;;  %v22987_v2 = vunpack.i.l.bf16 %v19825_v32  ;;  %v19844_v48 = vpop.permute.xlu0 %14132 }
 0x38c   : > { %v3312_v7 = vsel %vm3233_vm6, %v23500_v39, %v22979_v1  ;;  %v3297_v35 = vsel %vm3233_vm6, %v23505_v25, %v23504_v26  ;;  %v23507_v39 = vunpack.i.h.bf16 %v19185_v31  ;;  %23508 = vst [vmem:[#allocation22_spill] sm:$0xff] %v19844_v48  ;;  %11127 = vmatprep.subr.bf16.mxu1 %v19573_v44  ;;  %7723 = vmatprep.mubr.f32.mxu0 %v10172_v21  ;;  %v22992_v26 = vunpack.i.h.bf16 %v19844_v48  ;;  %v10182_v31 = vld [vmem:[%s22628_s1 + $0xa58] sm:$0xff] }
 0x38d   : > { %v19840_v1 = vpack.c.bf16 %v3312_v7, %v3307_v42  ;;  %v22993_v25 = vunpack.i.l.bf16 %v19844_v48  ;;  %6864 = vmatprep.mubr.f32.mxu1 %v10158_v0  ;;  %7724 = vmatmul.mubr.f32.vlgmr.msra.gmra.mrb[48].mxu0 %v10171_v9  ;;  %v23509_v42 = vld [vmem:[#allocation45_spill] sm:$0xff]  ;;  %v10168_v7 = vld [vmem:[%s22628_s1 + $0x9e8] sm:$0xff]  ;;  %v23510_v21 = vunpack.i.l.bf16 %v19204_v27 }
 0x38e   : > { %v3302_v11 = vsel %vm3233_vm6, %v23507_v39, %v23506_v14  ;;  %6865 = vmatmul.mubr.f32.gmra.mrb[28].mxu1 %v10157_v4  ;;  %11201 = vmatpush1.bf16.msra.mxu0 %v23509_v42  ;;  %v23511_v4 = vunpack.i.h.bf16 %v19204_v27  ;;  %v23512_v14 = vld [vmem:[#allocation50_spill] sm:$0xff]  ;;  %v19873_v39 = vpop.permute.xlu1 %14147  ;;  %v23514_v42 = vunpack.i.l.bf16 %v19224_v55  ;;  %v23515_v27 = vunpack.i.h.bf16 %v19224_v55  ;;  %v14724_v55 = vld [vmem:[%s14807_s17 + $0xb0] sm:$0xff] }
 0x38f   : > { %v19847_v53 = vpack.c.bf16 %v3302_v11, %v3297_v35  ;;  %v10181_v35 = vld [vmem:[%s22628_s1 + $0xa50] sm:$0xff]  ;;  %v3680_v0 = vsel %vm3666_vm7, %v23510_v21, %v22987_v2  ;;  %11129 = vmatpush1.bf16.msra.mxu1 %v19102_v12  ;;  %11203 = vmatprep.subr.bf16.mxu0 %v23512_v14  ;;  %23513 = vst [vmem:[#allocation21_spill] sm:$0xff] %v19873_v39  ;;  %v10167_v11 = vld [vmem:[%s22628_s1 + $0x9e0] sm:$0xff]  ;;  %v19890_v2 = vpop.permute.xlu0 %14142 }
 0x390   : > { %v3685_v9 = vsel %vm3666_vm7, %v23511_v4, %v22986_v52  ;;  %v3670_v21 = vsel %vm3666_vm7, %v23514_v42, %v22993_v25  ;;  %v3675_v12 = vsel %vm3666_vm7, %v23515_v27, %v22992_v26  ;;  %v22997_v4 = vunpack.i.h.bf16 %v19873_v39  ;;  %23516 = vst [vmem:[#allocation26_spill] sm:$0xff] %v19890_v2  ;;  %11131 = vmatprep.subr.bf16.mxu1 %v19568_v33  ;;  %v10192_v27 = vld [vmem:[%s22628_s1 + $0xaa8] sm:$0xff] }
 0x391   : > { %v22996_v52 = vunpack.i.l.bf16 %v19873_v39  ;;  %7728 = vmatprep.mubr.f32.mxu0 %v10182_v31  ;;  %v19893_v32 = vpack.c.bf16 %v3675_v12, %v3670_v21  ;;  %v19895_v38 = vpack.c.bf16 %v3685_v9, %v3680_v0  ;;  %6870 = vmatprep.mubr.f32.mxu1 %v10168_v7  ;;  %v10020_v31 = vld [vmem:[%s22628_s1 + $0x548] sm:$0xff]  ;;  %v14721_v21 = vld [vmem:[%s14807_s17 + $0x20] sm:$0xff]  ;;  %v14722_v12 = vld [vmem:[%s14807_s17 + $0x50] sm:$0xff]  ;;  %v23520_v25 = vunpack.i.h.bf16 %v19256_v47 }
 0x392   : > { %7729 = vmatmul.mubr.f32.gmra.mrb[50].mxu0 %v10181_v35  ;;  %v11454_v0 = vpack.c.bf16 %v14722_v12, %v14721_v21  ;;  %6871 = vmatmul.mubr.f32.gmra.mrb[30].mxu1 %v10167_v11  ;;  %v23518_v9 = vld [vmem:[#allocation48_spill] sm:$0xff]  ;;  %v10191_v7 = vld [vmem:[%s22628_s1 + $0xaa0] sm:$0xff]  ;;  %v23519_v35 = vunpack.i.l.bf16 %v19256_v47  ;;  %v23521_v11 = vld [vmem:[#allocation54_spill] sm:$0xff]  ;;  %v19923_v21 = vpop.permute.xlu1 %14157 }
 0x393   : > { %23517 = vst [vmem:[#allocation25_spill] sm:$0xff] %v19895_v38  ;;  %11205 = vmatpush1.bf16.msra.mxu0 %v23518_v9  ;;  %v3705_v42 = vsel %vm3666_vm7, %v23520_v25, %v22997_v4  ;;  %11133 = vmatpush1.bf16.msra.mxu1 %v19148_v45  ;;  %23522 = vst [vmem:[#allocation209_spill] sm:$0xff] %v19923_v21  ;;  %v10019_v12 = vld [vmem:[%s22628_s1 + $0x540] sm:$0xff]  ;;  %v23525_v25 = vunpack.i.h.bf16 %v19890_v2  ;;  %v23526_v45 = vunpack.i.h.bf16 %v19271_v60  ;;  %v23003_v39 = vunpack.i.h.bf16 %v19923_v21  ;;  %v14153_v44 = vpop.permute.xlu0 %14152 }
 0x394   : > { %v3700_v26 = vsel %vm3666_vm7, %v23519_v35, %v22996_v52  ;;  %11207 = vmatprep.subr.bf16.mxu0 %v23521_v11  ;;  %v14723_v9 = vld [vmem:[%s14807_s17 + $0x80] sm:$0xff]  ;;  %v23523_v35 = vunpack.i.l.bf16 %v19890_v2  ;;  %v23524_v52 = vunpack.i.l.bf16 %v19271_v60  ;;  %v23004_v33 = vunpack.i.l.bf16 %v19923_v21  ;;  %7733 = vmatprep.mubr.f32.mxu0 %v10192_v27  ;;  %v10202_v60 = vld [vmem:[%s22628_s1 + $0xaf8] sm:$0xff] }
 0x395   : > { %v11458_v48 = vpack.c.bf16 %v14724_v55, %v14723_v9  ;;  %v3695_v4 = vsel %vm3666_vm7, %v23526_v45, %v23525_v25  ;;  %6941 = vmatprep.mubr.f32.mxu1 %v10020_v31  ;;  %v19944_v9 = vpack.c.bf16 %v3705_v42, %v3700_v26  ;;  %v23007_v38 = vunpack.i.h.bf16 %v19570_v50  ;;  %11455 = vmatprep.subr.bf16.mxu1 %v11454_v0  ;;  %v10030_v27 = vld [vmem:[%s22628_s1 + $0x598] sm:$0xff]  ;;  %v10201_v26 = vld [vmem:[%s22628_s1 + $0xaf0] sm:$0xff] }
 0x396   : > { %v3690_v47 = vsel %vm3666_vm7, %v23524_v52, %v23523_v35  ;;  %v23010_v52 = vunpack.i.l.bf16 %v19570_v50  ;;  %7734 = vmatmul.mubr.f32.gmra.mrb[52].mxu0 %v10191_v7  ;;  %v14155_v31 = vunpack.i.h.bf16 %v14153_v44  ;;  %v14154_v35 = vunpack.i.l.bf16 %v14153_v44  ;;  %6942 = vmatmul.mubr.f32.vlgmr.msra.gmra.mrb[44].mxu1 %v10019_v12  ;;  %v23530_v12 = vld [vmem:[#allocation58_spill] sm:$0xff] }
 0x397   : > { %v19942_v55 = vpack.c.bf16 %v3695_v4, %v3690_v47  ;;  %v23527_v4 = vld [vmem:[#allocation52_spill] sm:$0xff]  ;;  %v23528_v42 = vunpack.i.l.bf16 %v19302_v29  ;;  %v23529_v7 = vunpack.i.h.bf16 %v19302_v29  ;;  %11457 = vmatpush1.bf16.msra.mxu1 %v19155_v40  ;;  %v10029_v47 = vld [vmem:[%s22628_s1 + $0x590] sm:$0xff]  ;;  %7739 = vmatprep.mubr.f32.mxu0 %v10202_v60  ;;  %v23005_v60 = vunpack.i.h.bf16 %v19553_v59 }
 0x398   : > { %11209 = vmatpush1.bf16.msra.mxu0 %v23527_v4  ;;  %v19976_v25 = vsel %vm2800_vm5, %v23010_v52, %v14154_v35  ;;  %v19981_v29 = vsel %vm2800_vm5, %v23007_v38, %v14155_v31  ;;  %6946 = vmatprep.mubr.f32.mxu1 %v10030_v27  ;;  %v10212_v4 = vld [vmem:[%s22628_s1 + $0xb48] sm:$0xff]  ;;  %v14726_v31 = vld [vmem:[%s14807_s17 + $0x110] sm:$0xff]  ;;  %v23006_v27 = vunpack.i.l.bf16 %v19553_v59  ;;  %v23540_v2 = vunpack.i.l.bf16 %v19591_v36 }
 0x399   : > { %v3710_v0 = vsel %vm3666_vm7, %v23528_v42, %v23004_v33  ;;  %v3715_v44 = vsel %vm3666_vm7, %v23529_v7, %v23003_v39  ;;  %11211 = vmatprep.subr.bf16.mxu0 %v23530_v12  ;;  %11459 = vmatprep.subr.bf16.mxu1 %v11458_v48  ;;  %v10040_v35 = vld [vmem:[%s22628_s1 + $0x5e8] sm:$0xff]  ;;  %v14725_v42 = vld [vmem:[%s14807_s17 + $0xe0] sm:$0xff]  ;;  %v23533_v33 = vld [vmem:[#allocation62_spill] sm:$0xff] }
 0x39a   : > { %v19983_v45 = vpack.c.bf16 %v3715_v44, %v3710_v0  ;;  %7740 = vmatmul.mubr.f32.gmra.mrb[54].mxu0 %v10201_v26  ;;  %v11462_v7 = vpack.c.bf16 %v14726_v31, %v14725_v42  ;;  %v14163_v0 = vpop.permute.xlu0 %14162  ;;  %6947 = vmatmul.mubr.f32.gmra.mrb[46].mxu1 %v10029_v47  ;;  %v23532_v44 = vld [vmem:[#allocation57_spill] sm:$0xff]  ;;  %v10211_v48 = vld [vmem:[%s22628_s1 + $0xb40] sm:$0xff] }
 0x39b   : > { %v14165_v26 = vunpack.i.h.bf16 %v14163_v0  ;;  %v14164_v39 = vunpack.i.l.bf16 %v14163_v0  ;;  %11461 = vmatpush1.bf16.msra.mxu1 %v19233_v10  ;;  %v10039_v42 = vld [vmem:[%s22628_s1 + $0x5e0] sm:$0xff]  ;;  %7745 = vmatprep.mubr.f32.mxu0 %v10212_v4  ;;  %v10222_v10 = vld [vmem:[%s22628_s1 + $0xb98] sm:$0xff]  ;;  %v14728_v0 = vld [vmem:[%s14807_s17 + $0x170] sm:$0xff] }
 0x39c   : > { %23531 = vst [vmem:[#allocation30_spill] sm:$0xff] %v19983_v45  ;;  %11213 = vmatpush1.bf16.msra.mxu0 %v23532_v44  ;;  %6951 = vmatprep.mubr.f32.mxu1 %v10040_v35  ;;  %v10050_v4 = vld [vmem:[%s22628_s1 + $0x638] sm:$0xff]  ;;  %v14727_v35 = vld [vmem:[%s14807_s17 + $0x140] sm:$0xff]  ;;  %v14732_v52 = vld [vmem:[%s14807_s17 + $0x230] sm:$0xff] }
 0x39d   : > { %11215 = vmatprep.subr.bf16.mxu0 %v23533_v33  ;;  %v20009_v47 = vsel %vm2800_vm5, %v23006_v27, %v14164_v39  ;;  %v20014_v31 = vsel %vm2800_vm5, %v23005_v60, %v14165_v26  ;;  %11463 = vmatprep.subr.bf16.mxu1 %v11462_v7  ;;  %v11466_v44 = vpack.c.bf16 %v14728_v0, %v14727_v35  ;;  %v23009_v26 = vunpack.i.h.bf16 %v19606_v8  ;;  %v23534_v7 = vld [vmem:[#allocation60_spill] sm:$0xff]  ;;  %v10221_v60 = vld [vmem:[%s22628_s1 + $0xb90] sm:$0xff]  ;;  %v23535_v35 = vld [vmem:[#allocation66_spill] sm:$0xff] }
 0x39e   : > { %7746 = vmatmul.mubr.f32.gmra.mrb[56].mxu0 %v10211_v48  ;;  %v14173_v39 = vpop.permute.xlu0 %14172  ;;  %v23008_v48 = vunpack.i.l.bf16 %v19606_v8  ;;  %6952 = vmatmul.mubr.f32.gmra.mrb[4].mxu1 %v10039_v42  ;;  %v10049_v0 = vld [vmem:[%s22628_s1 + $0x630] sm:$0xff] }
 0x39f   : > { %v14175_v27 = vunpack.i.h.bf16 %v14173_v39  ;;  %v14174_v38 = vunpack.i.l.bf16 %v14173_v39  ;;  %11465 = vmatpush1.bf16.msra.mxu1 %v19251_v37  ;;  %7751 = vmatprep.mubr.f32.mxu0 %v10222_v10  ;;  %v10232_v37 = vld [vmem:[%s22628_s1 + $0xbe8] sm:$0xff]  ;;  %v14730_v39 = vld [vmem:[%s14807_s17 + $0x1d0] sm:$0xff] }
 0x3a0   : > { %11217 = vmatpush1.bf16.msra.mxu0 %v23534_v7  ;;  %6957 = vmatprep.mubr.f32.mxu1 %v10050_v4  ;;  %v10060_v10 = vld [vmem:[%s22628_s1 + $0x688] sm:$0xff]  ;;  %v14729_v4 = vld [vmem:[%s14807_s17 + $0x1a0] sm:$0xff] }
 0x3a1   : > { %11219 = vmatprep.subr.bf16.mxu0 %v23535_v35  ;;  %v20040_v42 = vsel %vm2800_vm5, %v23008_v48, %v14174_v38  ;;  %v20045_v7 = vsel %vm2800_vm5, %v23009_v26, %v14175_v27  ;;  %11467 = vmatprep.subr.bf16.mxu1 %v11466_v44  ;;  %v11470_v40 = vpack.c.bf16 %v14730_v39, %v14729_v4  ;;  %v23538_v27 = vld [vmem:[#allocation65_spill] sm:$0xff]  ;;  %v23539_v4 = vld [vmem:[#allocation70_spill] sm:$0xff]  ;;  %v14731_v48 = vld [vmem:[%s14807_s17 + $0x200] sm:$0xff] }
 0x3a2   : > { %23536 = vst [vmem:[#allocation29_spill] sm:$0xff] %v20040_v42  ;;  %23537 = vst [vmem:[#allocation212_spill] sm:$0xff] %v20045_v7  ;;  %7752 = vmatmul.mubr.f32.gmra.mrb[58].mxu0 %v10221_v60  ;;  %v14183_v38 = vpop.permute.xlu0 %14182  ;;  %6958 = vmatmul.mubr.f32.gmra.mrb[6].mxu1 %v10049_v0  ;;  %v10231_v60 = vld [vmem:[%s22628_s1 + $0xbe0] sm:$0xff]  ;;  %v5363_v39 = vpop.f32.mrb[40].mxu0  ;;  %v23544_v42 = vld [vmem:[#allocation68_spill] sm:$0xff] }
 0x3a3   : > { %v14185_v44 = vunpack.i.h.bf16 %v14183_v38  ;;  %v14184_v26 = vunpack.i.l.bf16 %v14183_v38  ;;  %11469 = vmatpush1.bf16.msra.mxu1 %v19315_v41  ;;  %v10059_v0 = vld [vmem:[%s22628_s1 + $0x680] sm:$0xff]  ;;  %7757 = vmatprep.mubr.f32.mxu0 %v10232_v37  ;;  %v10242_v38 = vld [vmem:[%s22628_s1 + $0xc38] sm:$0xff]  ;;  %v11474_v41 = vpack.c.bf16 %v14732_v52, %v14731_v48  ;;  %v5365_v7 = vpop.f32.mrb[41].mxu0  ;;  %v10241_v52 = vld [vmem:[%s22628_s1 + $0xc30] sm:$0xff] }
 0x3a4   : > { %11221 = vmatpush1.bf16.msra.mxu0 %v23538_v27  ;;  %6963 = vmatprep.mubr.f32.mxu1 %v10060_v10  ;;  %v10070_v27 = vld [vmem:[%s22628_s1 + $0x6d8] sm:$0xff]  ;;  %v23542_v10 = vunpack.i.h.bf16 %v19591_v36 }
 0x3a5   : > { %11223 = vmatprep.subr.bf16.mxu0 %v23539_v4  ;;  %11471 = vmatprep.subr.bf16.mxu1 %v11470_v40  ;;  %v20079_v37 = vsel %vm2800_vm5, %v23540_v2, %v14184_v26  ;;  %v14734_v26 = vld [vmem:[%s14807_s17 + $0x290] sm:$0xff] }
 0x3a6   : > { %7758 = vmatmul.mubr.f32.gmra.mrb[60].mxu0 %v10231_v60  ;;  %v14193_v21 = vpop.permute.xlu0 %14192  ;;  %23541 = vst [vmem:[#allocation34_spill] sm:$0xff] %v20079_v37  ;;  %v20084_v40 = vsel %vm2800_vm5, %v23542_v10, %v14185_v44  ;;  %v20087_v60 = vadd.f32 %v5363_v39, %v19158_v56  ;;  %6964 = vmatmul.mubr.f32.gmra.mrb[8].mxu1 %v10059_v0  ;;  %v23018_v56 = vunpack.i.l.bf16 %v19640_v63  ;;  %v23545_v39 = vld [vmem:[#allocation74_spill] sm:$0xff]  ;;  %v5368_v7 = vpop.f32.mrb[42].mxu0  ;;  %v10080_v0 = vld [vmem:[%s22628_s1 + $0x728] sm:$0xff]  ;;  %v14733_v10 = vld [vmem:[%s14807_s17 + $0x260] sm:$0xff] }
 0x3a7   : > { %23543 = vst [vmem:[#allocation217_spill] sm:$0xff] %v20084_v40  ;;  %v14195_v48 = vunpack.i.h.bf16 %v14193_v21  ;;  %v14194_v2 = vunpack.i.l.bf16 %v14193_v21  ;;  %11473 = vmatpush1.bf16.msra.mxu1 %v19355_v57  ;;  %7763 = vmatprep.mubr.f32.mxu0 %v10242_v38  ;;  %v10252_v21 = vld [vmem:[%s22628_s1 + $0xc88] sm:$0xff]  ;;  %v11478_v57 = vpack.c.bf16 %v14734_v26, %v14733_v10  ;;  %v23549_v37 = vld [vmem:[#allocation73_spill] sm:$0xff]  ;;  %v10251_v26 = vld [vmem:[%s22628_s1 + $0xc80] sm:$0xff]  ;;  %v5370_v10 = vpop.f32.mrb[43].mxu0 }
 0x3a8   : > { %11225 = vmatpush1.bf16.msra.mxu0 %v23544_v42  ;;  %v10069_v42 = vld [vmem:[%s22628_s1 + $0x6d0] sm:$0xff]  ;;  %6969 = vmatprep.mubr.f32.mxu1 %v10070_v27  ;;  %v23547_v27 = vunpack.i.h.bf16 %v19640_v63 }
 0x3a9   : > { %11227 = vmatprep.subr.bf16.mxu0 %v23545_v39  ;;  %11475 = vmatprep.subr.bf16.mxu1 %v11474_v41  ;;  %v20113_v38 = vsel %vm2800_vm5, %v23018_v56, %v14194_v2  ;;  %v14736_v10 = vld [vmem:[%s14807_s17 + $0x2f0] sm:$0xff] }
 0x3aa   : > { %7764 = vmatmul.mubr.f32.gmra.mrb[62].mxu0 %v10241_v52  ;;  %v14203_v44 = vpop.permute.xlu0 %14202  ;;  %23546 = vst [vmem:[#allocation33_spill] sm:$0xff] %v20113_v38  ;;  %v20118_v41 = vsel %vm2800_vm5, %v23547_v27, %v14195_v48  ;;  %v20121_v52 = vadd.f32 %v5368_v7, %v19193_v22  ;;  %6970 = vmatmul.mubr.f32.gmra.mrb[10].mxu1 %v10069_v42  ;;  %v23021_v22 = vunpack.i.l.bf16 %v19625_v3  ;;  %v23550_v7 = vld [vmem:[#allocation78_spill] sm:$0xff]  ;;  %v14735_v27 = vld [vmem:[%s14807_s17 + $0x2c0] sm:$0xff] }
 0x3ab   : > { %23548 = vst [vmem:[#allocation215_spill] sm:$0xff] %v20118_v41  ;;  %v14205_v2 = vunpack.i.h.bf16 %v14203_v44  ;;  %v14204_v56 = vunpack.i.l.bf16 %v14203_v44  ;;  %11477 = vmatpush1.bf16.msra.mxu1 %v19393_v46  ;;  %7769 = vmatprep.mubr.f32.mxu0 %v10252_v21  ;;  %v10262_v44 = vld [vmem:[%s22628_s1 + $0xcd8] sm:$0xff]  ;;  %v11482_v40 = vpack.c.bf16 %v14736_v10, %v14735_v27  ;;  %v23552_v21 = vunpack.i.h.bf16 %v19625_v3  ;;  %v23555_v41 = vld [vmem:[#allocation84_spill] sm:$0xff] }
 0x3ac   : > { %11229 = vmatpush1.bf16.msra.mxu0 %v23549_v37  ;;  %v10079_v37 = vld [vmem:[%s22628_s1 + $0x720] sm:$0xff]  ;;  %6975 = vmatprep.mubr.f32.mxu1 %v10080_v0  ;;  %v10090_v42 = vld [vmem:[%s22628_s1 + $0x778] sm:$0xff]  ;;  %v23027_v10 = vunpack.i.h.bf16 %v19659_v15 }
 0x3ad   : > { %11231 = vmatprep.subr.bf16.mxu0 %v23550_v7  ;;  %11479 = vmatprep.subr.bf16.mxu1 %v11478_v57  ;;  %v20147_v48 = vsel %vm2800_vm5, %v23021_v22, %v14204_v56  ;;  %v20152_v0 = vsel %vm2800_vm5, %v23552_v21, %v14205_v2  ;;  %v23554_v57 = vld [vmem:[#allocation77_spill] sm:$0xff]  ;;  %v23023_v56 = vunpack.i.h.bf16 %v19674_v51  ;;  %v23024_v22 = vunpack.i.l.bf16 %v19674_v51 }
 0x3ae   : > { %7770 = vmatmul.mubr.f32.gmra.mrb[64].mxu0 %v10251_v26  ;;  %v14213_v46 = vpop.permute.xlu0 %14212  ;;  %23551 = vst [vmem:[#allocation38_spill] sm:$0xff] %v20147_v48  ;;  %23553 = vst [vmem:[#allocation37_spill] sm:$0xff] %v20152_v0  ;;  %6976 = vmatmul.mubr.f32.gmra.mrb[12].mxu1 %v10079_v37  ;;  %v10261_v26 = vld [vmem:[%s22628_s1 + $0xcd0] sm:$0xff]  ;;  %v10272_v37 = vld [vmem:[%s22628_s1 + $0xd28] sm:$0xff] }
 0x3af   : > { %v14215_v38 = vunpack.i.h.bf16 %v14213_v46  ;;  %v14214_v27 = vunpack.i.l.bf16 %v14213_v46  ;;  %11481 = vmatpush1.bf16.msra.mxu1 %v19431_v17  ;;  %v10089_v2 = vld [vmem:[%s22628_s1 + $0x770] sm:$0xff]  ;;  %7775 = vmatprep.mubr.f32.mxu0 %v10262_v44  ;;  %v23558_v44 = vld [vmem:[#allocation83_spill] sm:$0xff] }
 0x3b0   : > { %11233 = vmatpush1.bf16.msra.mxu0 %v23554_v57  ;;  %6981 = vmatprep.mubr.f32.mxu1 %v10090_v42  ;;  %v10271_v42 = vld [vmem:[%s22628_s1 + $0xd20] sm:$0xff]  ;;  %v23626_v0 = vld [vmem:[#allocation129_spill] sm:$0xff] }
 0x3b1   : > { %11235 = vmatprep.subr.bf16.mxu0 %v23555_v41  ;;  %11483 = vmatprep.subr.bf16.mxu1 %v11482_v40  ;;  %v20173_v21 = vsel %vm2800_vm5, %v23024_v22, %v14214_v27  ;;  %v20178_v17 = vsel %vm2800_vm5, %v23023_v56, %v14215_v38  ;;  %v10100_v40 = vld [vmem:[%s22628_s1 + $0x7c8] sm:$0xff]  ;;  %v23026_v38 = vunpack.i.l.bf16 %v19659_v15  ;;  %v23561_v22 = vld [vmem:[#allocation11_spill] sm:$0xff] }
 0x3b2   : > { %7776 = vmatmul.mubr.f32.gmra.mrb[66].mxu0 %v10261_v26  ;;  %v14223_v46 = vpop.permute.xlu0 %14222  ;;  %23556 = vst [vmem:[#allocation219_spill] sm:$0xff] %v20173_v21  ;;  %23557 = vst [vmem:[#allocation42_spill] sm:$0xff] %v20178_v17  ;;  %6982 = vmatmul.mubr.f32.gmra.mrb[14].mxu1 %v10089_v2  ;;  %v23559_v2 = vld [vmem:[#allocation88_spill] sm:$0xff]  ;;  %v23568_v21 = vld [vmem:[#allocation15_spill] sm:$0xff] }
 0x3b3   : > { %v14225_v57 = vunpack.i.h.bf16 %v14223_v46  ;;  %v14224_v26 = vunpack.i.l.bf16 %v14223_v46  ;;  %11485 = vmatpush1.bf16.msra.mxu1 %v19473_v19  ;;  %7781 = vmatprep.mubr.f32.mxu0 %v10272_v37  ;;  %v23560_v56 = vld [vmem:[#allocation12_spill] sm:$0xff]  ;;  %v10282_v46 = vld [vmem:[%s22628_s1 + $0xd78] sm:$0xff] }
 0x3b4   : > { %11237 = vmatpush1.bf16.msra.mxu0 %v23558_v44  ;;  %v10099_v44 = vld [vmem:[%s22628_s1 + $0x7c0] sm:$0xff]  ;;  %v23562_v48 = vpack.c.bf16 %v23560_v56, %v23561_v22  ;;  %6987 = vmatprep.mubr.f32.mxu1 %v10100_v40  ;;  %v10281_v56 = vld [vmem:[%s22628_s1 + $0xd70] sm:$0xff] }
 0x3b5   : > { %11239 = vmatprep.subr.bf16.mxu0 %v23559_v2  ;;  %v20205_v19 = vsel %vm2800_vm5, %v23026_v38, %v14224_v26  ;;  %v20210_v37 = vsel %vm2800_vm5, %v23027_v10, %v14225_v57  ;;  %v23565_v22 = vld [vmem:[#allocation87_spill] sm:$0xff]  ;;  %v23031_v38 = vunpack.i.h.bf16 %v19708_v24  ;;  %v23030_v57 = vunpack.i.l.bf16 %v19708_v24  ;;  %v23567_v10 = vld [vmem:[#allocation16_spill] sm:$0xff] }
 0x3b6   : > { %11487 = vmatprep.subr.bf16.mxu1 %v23562_v48  ;;  %7782 = vmatmul.mubr.f32.gmra.mrb[68].mxu0 %v10271_v42  ;;  %v14233_v27 = vpop.permute.xlu0 %14232  ;;  %23563 = vst [vmem:[#allocation41_spill] sm:$0xff] %v20205_v19  ;;  %23564 = vst [vmem:[#allocation222_spill] sm:$0xff] %v20210_v37  ;;  %v10110_v48 = vld [vmem:[%s22628_s1 + $0x818] sm:$0xff]  ;;  %v23569_v17 = vpack.c.bf16 %v23567_v10, %v23568_v21  ;;  %v23572_v10 = vld [vmem:[#allocation91_spill] sm:$0xff] }
 0x3b7   : > { %6988 = vmatmul.mubr.f32.gmra.mrb[16].mxu1 %v10099_v44  ;;  %v14235_v40 = vunpack.i.h.bf16 %v14233_v27  ;;  %v14234_v42 = vunpack.i.l.bf16 %v14233_v27  ;;  %v23566_v44 = vld [vmem:[#allocation92_spill] sm:$0xff]  ;;  %7787 = vmatprep.mubr.f32.mxu0 %v10282_v46  ;;  %v23575_v19 = vld [vmem:[#allocation19_spill] sm:$0xff] }
 0x3b8   : > { %11241 = vmatpush1.bf16.msra.mxu0 %v23565_v22  ;;  %11489 = vmatpush1.bf16.msra.mxu1 %v23440_v28  ;;  %v10109_v22 = vld [vmem:[%s22628_s1 + $0x810] sm:$0xff]  ;;  %v10292_v27 = vld [vmem:[%s22628_s1 + $0xdc8] sm:$0xff] }
 0x3b9   : > { %11243 = vmatprep.subr.bf16.mxu0 %v23566_v44  ;;  %11491 = vmatprep.subr.bf16.mxu1 %v23569_v17  ;;  %v20237_v28 = vsel %vm3233_vm6, %v23030_v57, %v14234_v42  ;;  %v20242_v46 = vsel %vm3233_vm6, %v23031_v38, %v14235_v40  ;;  %v10120_v21 = vld [vmem:[%s22628_s1 + $0x868] sm:$0xff]  ;;  %v10291_v17 = vld [vmem:[%s22628_s1 + $0xdc0] sm:$0xff]  ;;  %v23035_v57 = vunpack.i.h.bf16 %v19693_v5  ;;  %v23034_v40 = vunpack.i.l.bf16 %v19693_v5 }
 0x3ba   : > { %6993 = vmatprep.mubr.f32.mxu1 %v10110_v48  ;;  %7788 = vmatmul.mubr.f32.gmra.mrb[70].mxu0 %v10281_v56  ;;  %v14243_v26 = vpop.permute.xlu0 %14242  ;;  %23570 = vst [vmem:[#allocation46_spill] sm:$0xff] %v20237_v28  ;;  %23571 = vst [vmem:[#allocation45_spill] sm:$0xff] %v20242_v46  ;;  %v23574_v38 = vld [vmem:[#allocation20_spill] sm:$0xff]  ;;  %v23582_v28 = vld [vmem:[#allocation23_spill] sm:$0xff] }
 0x3bb   : > { %6994 = vmatmul.mubr.f32.gmra.mrb[18].mxu1 %v10109_v22  ;;  %v14245_v48 = vunpack.i.h.bf16 %v14243_v26  ;;  %v14244_v56 = vunpack.i.l.bf16 %v14243_v26  ;;  %v23573_v22 = vld [vmem:[#allocation96_spill] sm:$0xff]  ;;  %7793 = vmatprep.mubr.f32.mxu0 %v10292_v27  ;;  %v23576_v37 = vpack.c.bf16 %v23574_v38, %v23575_v19  ;;  %v10302_v26 = vld [vmem:[%s22628_s1 + $0xe18] sm:$0xff]  ;;  %v23579_v38 = vld [vmem:[#allocation95_spill] sm:$0xff] }
 0x3bc   : > { %11245 = vmatpush1.bf16.msra.mxu0 %v23572_v10  ;;  %11493 = vmatpush1.bf16.msra.mxu1 %v23450_v34  ;;  %v10119_v10 = vld [vmem:[%s22628_s1 + $0x860] sm:$0xff]  ;;  %v10130_v19 = vld [vmem:[%s22628_s1 + $0x8b8] sm:$0xff] }
 0x3bd   : > { %11247 = vmatprep.subr.bf16.mxu0 %v23573_v22  ;;  %11495 = vmatprep.subr.bf16.mxu1 %v23576_v37  ;;  %v20269_v34 = vsel %vm3233_vm6, %v23034_v40, %v14244_v56  ;;  %v20274_v27 = vsel %vm3233_vm6, %v23035_v57, %v14245_v48  ;;  %v10301_v37 = vld [vmem:[%s22628_s1 + $0xe10] sm:$0xff]  ;;  %v23038_v40 = vunpack.i.h.bf16 %v19740_v58  ;;  %v23039_v48 = vunpack.i.l.bf16 %v19740_v58  ;;  %v23581_v57 = vld [vmem:[#allocation24_spill] sm:$0xff] }
 0x3be   : > { %6999 = vmatprep.mubr.f32.mxu1 %v10120_v21  ;;  %7794 = vmatmul.mubr.f32.gmra.mrb[72].mxu0 %v10291_v17  ;;  %v14253_v42 = vpop.permute.xlu0 %14252  ;;  %23577 = vst [vmem:[#allocation50_spill] sm:$0xff] %v20269_v34  ;;  %23578 = vst [vmem:[#allocation48_spill] sm:$0xff] %v20274_v27  ;;  %v23583_v46 = vpack.c.bf16 %v23581_v57, %v23582_v28  ;;  %v10140_v57 = vld [vmem:[%s22628_s1 + $0x908] sm:$0xff]  ;;  %v10311_v28 = vld [vmem:[%s22628_s1 + $0xe60] sm:$0xff] }
 0x3bf   : > { %7000 = vmatmul.mubr.f32.gmra.mrb[20].mxu1 %v10119_v10  ;;  %v14255_v21 = vunpack.i.h.bf16 %v14253_v42  ;;  %v14254_v17 = vunpack.i.l.bf16 %v14253_v42  ;;  %v23580_v10 = vld [vmem:[#allocation100_spill] sm:$0xff]  ;;  %7799 = vmatprep.mubr.f32.mxu0 %v10302_v26  ;;  %v23586_v26 = vld [vmem:[#allocation99_spill] sm:$0xff]  ;;  %v23616_v34 = vld [vmem:[#allocation121_spill] sm:$0xff] }
 0x3c0   : > { %11249 = vmatpush1.bf16.msra.mxu0 %v23579_v38  ;;  %11497 = vmatpush1.bf16.msra.mxu1 %v23457_v61  ;;  %v10129_v38 = vld [vmem:[%s22628_s1 + $0x8b0] sm:$0xff]  ;;  %v10312_v42 = vld [vmem:[%s22628_s1 + $0xe68] sm:$0xff] }
 0x3c1   : > { %11251 = vmatprep.subr.bf16.mxu0 %v23580_v10  ;;  %11499 = vmatprep.subr.bf16.mxu1 %v23583_v46  ;;  %v20301_v56 = vsel %vm3233_vm6, %v23039_v48, %v14254_v17  ;;  %v20306_v61 = vsel %vm3233_vm6, %v23038_v40, %v14255_v21  ;;  %v23588_v21 = vld [vmem:[#allocation28_spill] sm:$0xff]  ;;  %v23589_v17 = vld [vmem:[#allocation27_spill] sm:$0xff]  ;;  %v14738_v40 = vld [vmem:[%s14807_s17 + $0x298] sm:$0xff] }
 0x3c2   : > { %7005 = vmatprep.mubr.f32.mxu1 %v10130_v19  ;;  %7800 = vmatmul.mubr.f32.gmra.mrb[74].mxu0 %v10301_v37  ;;  %23584 = vst [vmem:[#allocation54_spill] sm:$0xff] %v20301_v56  ;;  %23585 = vst [vmem:[#allocation52_spill] sm:$0xff] %v20306_v61  ;;  %v23587_v19 = vld [vmem:[#allocation104_spill] sm:$0xff]  ;;  %v10139_v37 = vld [vmem:[%s22628_s1 + $0x900] sm:$0xff] }
 0x3c3   : > { %7006 = vmatmul.mubr.f32.gmra.mrb[22].mxu1 %v10129_v38  ;;  %7805 = vmatprep.mubr.f32.mxu0 %v10312_v42  ;;  %v23590_v38 = vpack.c.bf16 %v23588_v21, %v23589_v17  ;;  %v23591_v46 = vld [vmem:[#allocation103_spill] sm:$0xff]  ;;  %v10321_v42 = vld [vmem:[%s22628_s1 + $0xeb0] sm:$0xff]  ;;  %v23592_v21 = vld [vmem:[#allocation108_spill] sm:$0xff] }
 0x3c4   : > { %11253 = vmatpush1.bf16.msra.mxu0 %v23586_v26  ;;  %11501 = vmatpush1.bf16.msra.mxu1 %v23463_v54  ;;  %v10322_v26 = vld [vmem:[%s22628_s1 + $0xeb8] sm:$0xff]  ;;  %v23596_v48 = vld [vmem:[#allocation107_spill] sm:$0xff]  ;;  %v23606_v56 = vld [vmem:[#allocation113_spill] sm:$0xff] }
 0x3c5   : > { %11255 = vmatprep.subr.bf16.mxu0 %v23587_v19  ;;  %11503 = vmatprep.subr.bf16.mxu1 %v23590_v38  ;;  %v10150_v54 = vld [vmem:[%s22628_s1 + $0x958] sm:$0xff]  ;;  %v14737_v38 = vld [vmem:[%s14807_s17 + $0x268] sm:$0xff] }
 0x3c6   : > { %7011 = vmatprep.mubr.f32.mxu1 %v10140_v57  ;;  %7806 = vmatmul.mubr.f32.gmra.mrb[76].mxu0 %v10311_v28  ;;  %v10149_v57 = vld [vmem:[%s22628_s1 + $0x950] sm:$0xff]  ;;  %v23593_v28 = vld [vmem:[#allocation32_spill] sm:$0xff]  ;;  %v10174_v17 = vld [vmem:[%s22628_s1 + $0xa18] sm:$0xff] }
 0x3c7   : > { %7012 = vmatmul.mubr.f32.gmra.mrb[24].mxu1 %v10139_v37  ;;  %7811 = vmatprep.mubr.f32.mxu0 %v10322_v26  ;;  %v23594_v37 = vld [vmem:[#allocation31_spill] sm:$0xff]  ;;  %v10160_v26 = vld [vmem:[%s22628_s1 + $0x9a8] sm:$0xff] }
 0x3c8   : > { %11257 = vmatpush1.bf16.msra.mxu0 %v23591_v46  ;;  %11505 = vmatpush1.bf16.msra.mxu1 %v23471_v49  ;;  %v23595_v46 = vpack.c.bf16 %v23593_v28, %v23594_v37  ;;  %v20348_v49 = vpack.i.bf16 %v14738_v40, %v14737_v38  ;;  %v23597_v28 = vld [vmem:[#allocation112_spill] sm:$0xff]  ;;  %v10159_v40 = vld [vmem:[%s22628_s1 + $0x9a0] sm:$0xff] }
 0x3c9   : > { %11259 = vmatprep.subr.bf16.mxu0 %v23592_v21  ;;  %7017 = vmatprep.mubr.f32.mxu1 %v10150_v54  ;;  %v10173_v54 = vld [vmem:[%s22628_s1 + $0xa10] sm:$0xff]  ;;  %v14739_v37 = vld [vmem:[%s14807_s17 + $0x2c8] sm:$0xff] }
 0x3ca   : > { %11507 = vmatprep.subr.bf16.mxu1 %v23595_v46  ;;  %7812 = vmatmul.mubr.f32.gmra.mrb[78].mxu0 %v10321_v42  ;;  %v23598_v42 = vld [vmem:[#allocation36_spill] sm:$0xff]  ;;  %v14740_v46 = vld [vmem:[%s14807_s17 + $0x2f8] sm:$0xff] }
 0x3cb   : > { %7018 = vmatmul.mubr.f32.gmra.mrb[26].mxu1 %v10149_v57  ;;  %7882 = vmatprep.mubr.f32.mxu0 %v10174_v17  ;;  %v23599_v57 = vld [vmem:[#allocation35_spill] sm:$0xff]  ;;  %v20372_v38 = vpack.i.bf16 %v14740_v46, %v14739_v37  ;;  %v14741_v46 = vld [vmem:[%s14807_s17 + $0x28] sm:$0xff] }
 0x3cc   : > { %11261 = vmatpush1.bf16.msra.mxu0 %v23596_v48  ;;  %11509 = vmatpush1.bf16.msra.mxu1 %v23479_v62  ;;  %v23600_v48 = vpack.c.bf16 %v23598_v42, %v23599_v57  ;;  %v10184_v62 = vld [vmem:[%s22628_s1 + $0xa68] sm:$0xff]  ;;  %v23601_v17 = vld [vmem:[#allocation111_spill] sm:$0xff]  ;;  %v23602_v57 = vld [vmem:[#allocation114_spill] sm:$0xff] }
 0x3cd   : > { %11263 = vmatprep.subr.bf16.mxu0 %v23597_v28  ;;  %14282 = vrot.lane.b32.xlu0 %v20348_v49, %s14767_s18  ;;  %v10183_v42 = vld [vmem:[%s22628_s1 + $0xa60] sm:$0xff] }
 0x3ce   : > { %11511 = vmatprep.subr.bf16.mxu1 %v23600_v48  ;;  %7023 = vmatprep.mubr.f32.mxu1 %v10160_v26  ;;  %v10170_v26 = vld [vmem:[%s22628_s1 + $0x9f8] sm:$0xff]  ;;  %v23604_v48 = vld [vmem:[#allocation39_spill] sm:$0xff] }
 0x3cf   : > { %7883 = vmatmul.mubr.f32.vlgmr.msra.gmra.mrb[80].mxu0 %v10173_v54  ;;  %7024 = vmatmul.mubr.f32.gmra.mrb[28].mxu1 %v10159_v40  ;;  %v10169_v54 = vld [vmem:[%s22628_s1 + $0x9f0] sm:$0xff]  ;;  %v23603_v40 = vld [vmem:[#allocation40_spill] sm:$0xff] }
 0x3d0   : > { %11265 = vmatpush1.bf16.msra.mxu0 %v23601_v17  ;;  %11513 = vmatpush1.bf16.msra.mxu1 %v23488_v18  ;;  %v23605_v37 = vpack.c.bf16 %v23603_v40, %v23604_v48  ;;  %v10194_v18 = vld [vmem:[%s22628_s1 + $0xab8] sm:$0xff]  ;;  %v10193_v40 = vld [vmem:[%s22628_s1 + $0xab0] sm:$0xff] }
 0x3d1   : > { %11267 = vmatprep.subr.bf16.mxu0 %v23602_v57  ;;  %7887 = vmatprep.mubr.f32.mxu0 %v10184_v62  ;;  %v14742_v62 = vld [vmem:[%s14807_s17 + $0x58] sm:$0xff] }
 0x3d2   : > { %11515 = vmatprep.subr.bf16.mxu1 %v23605_v37  ;;  %14287 = vrot.lane.b32.xlu1 %v20372_v38, %s14767_s18  ;;  %v20396_v17 = vpack.i.bf16 %v14742_v62, %v14741_v46  ;;  %v23607_v48 = vld [vmem:[#allocation118_spill] sm:$0xff]  ;;  %v23609_v37 = vld [vmem:[#allocation43_spill] sm:$0xff] }
 0x3d3   : > { %7029 = vmatprep.mubr.f32.mxu1 %v10170_v26  ;;  %7888 = vmatmul.mubr.f32.gmra.mrb[82].mxu0 %v10183_v42  ;;  %v10332_v26 = vld [vmem:[%s22628_s1 + $0xf08] sm:$0xff]  ;;  %v14744_v62 = vld [vmem:[%s14807_s17 + $0xb8] sm:$0xff] }
 0x3d4   : > { %7030 = vmatmul.mubr.f32.gmra.mrb[30].mxu1 %v10169_v54  ;;  %11269 = vmatpush1.bf16.msra.mxu0 %v23606_v56  ;;  %v23608_v42 = vld [vmem:[#allocation44_spill] sm:$0xff]  ;;  %v10331_v56 = vld [vmem:[%s22628_s1 + $0xf00] sm:$0xff] }
 0x3d5   : > { %11271 = vmatprep.subr.bf16.mxu0 %v23607_v48  ;;  %11517 = vmatpush1.bf16.msra.mxu1 %v23495_v23  ;;  %v23610_v46 = vpack.c.bf16 %v23608_v42, %v23609_v37  ;;  %v10204_v23 = vld [vmem:[%s22628_s1 + $0xb08] sm:$0xff]  ;;  %v23611_v42 = vld [vmem:[#allocation117_spill] sm:$0xff]  ;;  %v23612_v37 = vld [vmem:[#allocation122_spill] sm:$0xff] }
 0x3d6   : > { %7892 = vmatprep.mubr.f32.mxu0 %v10194_v18  ;;  %14292 = vrot.lane.b32.xlu0 %v20396_v17, %s14768_s30  ;;  %v14743_v54 = vld [vmem:[%s14807_s17 + $0x88] sm:$0xff] }
 0x3d7   : > { %11519 = vmatprep.subr.bf16.mxu1 %v23610_v46  ;;  %7893 = vmatmul.mubr.f32.gmra.mrb[52].mxu0 %v10193_v40  ;;  %v20420_v18 = vpack.i.bf16 %v14744_v62, %v14743_v54  ;;  %v10203_v40 = vld [vmem:[%s22628_s1 + $0xb00] sm:$0xff]  ;;  %v10342_v46 = vld [vmem:[%s22628_s1 + $0xf58] sm:$0xff]  ;;  %v23614_v62 = vld [vmem:[#allocation49_spill] sm:$0xff] }
 0x3d8   : > { %9141 = vmatprep.mubr.f32.mxu1 %v10332_v26  ;;  %11273 = vmatpush1.bf16.msra.mxu0 %v23611_v42  ;;  %v10341_v26 = vld [vmem:[%s22628_s1 + $0xf50] sm:$0xff]  ;;  %v23613_v54 = vld [vmem:[#allocation47_spill] sm:$0xff]  ;;  %v10214_v42 = vld [vmem:[%s22628_s1 + $0xb58] sm:$0xff] }
 0x3d9   : > { %9142 = vmatmul.mubr.f32.vlgmr.msra.gmra.mrb[48].mxu1 %v10331_v56  ;;  %11275 = vmatprep.subr.bf16.mxu0 %v23612_v37  ;;  %v23615_v56 = vpack.c.bf16 %v23613_v54, %v23614_v62  ;;  %v10213_v54 = vld [vmem:[%s22628_s1 + $0xb50] sm:$0xff]  ;;  %v23617_v62 = vld [vmem:[#allocation126_spill] sm:$0xff] }
 0x3da   : > { %11521 = vmatpush1.bf16.msra.mxu1 %v23502_v43  ;;  %7898 = vmatprep.mubr.f32.mxu0 %v10204_v23  ;;  %v14745_v43 = vld [vmem:[%s14807_s17 + $0xe8] sm:$0xff]  ;;  %v14746_v23 = vld [vmem:[%s14807_s17 + $0x118] sm:$0xff] }
 0x3db   : > { %11523 = vmatprep.subr.bf16.mxu1 %v23615_v56  ;;  %14297 = vrot.lane.b32.xlu1 %v20420_v18, %s14768_s30  ;;  %v20444_v61 = vpack.i.bf16 %v14746_v23, %v14745_v43  ;;  %v23619_v56 = vld [vmem:[#allocation53_spill] sm:$0xff]  ;;  %v14748_v23 = vld [vmem:[%s14807_s17 + $0x178] sm:$0xff] }
 0x3dc   : > { %7899 = vmatmul.mubr.f32.gmra.mrb[54].mxu0 %v10203_v40  ;;  %9146 = vmatprep.mubr.f32.mxu1 %v10342_v46  ;;  %v10352_v40 = vld [vmem:[%s22628_s1 + $0xfa8] sm:$0xff]  ;;  %v23618_v46 = vld [vmem:[#allocation51_spill] sm:$0xff] }
 0x3dd   : > { %11277 = vmatpush1.bf16.msra.mxu0 %v23616_v34  ;;  %9147 = vmatmul.mubr.f32.gmra.mrb[50].mxu1 %v10341_v26  ;;  %v23620_v43 = vpack.c.bf16 %v23618_v46, %v23619_v56  ;;  %v10351_v34 = vld [vmem:[%s22628_s1 + $0xfa0] sm:$0xff]  ;;  %v14747_v26 = vld [vmem:[%s14807_s17 + $0x148] sm:$0xff]  ;;  %v23621_v46 = vld [vmem:[#allocation125_spill] sm:$0xff] }
 0x3de   : > { %11279 = vmatprep.subr.bf16.mxu0 %v23617_v62  ;;  %11525 = vmatpush1.bf16.msra.mxu1 %v23512_v14  ;;  %v10224_v14 = vld [vmem:[%s22628_s1 + $0xba8] sm:$0xff]  ;;  %v23622_v56 = vld [vmem:[#allocation130_spill] sm:$0xff] }
 0x3df   : > { %7904 = vmatprep.mubr.f32.mxu0 %v10214_v42  ;;  %11527 = vmatprep.subr.bf16.mxu1 %v23620_v43  ;;  %v20468_v42 = vpack.i.bf16 %v14748_v23, %v14747_v26  ;;  %v10362_v43 = vld [vmem:[%s22628_s1 + $0xff8] sm:$0xff]  ;;  %v23623_v26 = vld [vmem:[#allocation56_spill] sm:$0xff]  ;;  %v23624_v23 = vld [vmem:[#allocation55_spill] sm:$0xff] }
 0x3e0   : > { %14302 = vrot.lane.b32.xlu0 %v20444_v61, %s14768_s30  ;;  %7905 = vmatmul.mubr.f32.gmra.mrb[56].mxu0 %v10213_v54  ;;  %v10223_v54 = vld [vmem:[%s22628_s1 + $0xba0] sm:$0xff] }
 0x3e1   : > { %9151 = vmatprep.mubr.f32.mxu1 %v10352_v40  ;;  %11281 = vmatpush1.bf16.msra.mxu0 %v23621_v46  ;;  %v10361_v40 = vld [vmem:[%s22628_s1 + $0xff0] sm:$0xff]  ;;  %v10234_v46 = vld [vmem:[%s22628_s1 + $0xbf8] sm:$0xff] }
 0x3e2   : > { %9152 = vmatmul.mubr.f32.gmra.mrb[52].mxu1 %v10351_v34  ;;  %11283 = vmatprep.subr.bf16.mxu0 %v23622_v56  ;;  %v23625_v34 = vpack.c.bf16 %v23623_v26, %v23624_v23  ;;  %v10233_v26 = vld [vmem:[%s22628_s1 + $0xbf0] sm:$0xff]  ;;  %v23627_v23 = vld [vmem:[#allocation134_spill] sm:$0xff] }
 0x3e3   : > { %11529 = vmatpush1.bf16.msra.mxu1 %v23521_v11  ;;  %7910 = vmatprep.mubr.f32.mxu0 %v10224_v14  ;;  %v14749_v11 = vld [vmem:[%s14807_s17 + $0x1a8] sm:$0xff]  ;;  %v14750_v14 = vld [vmem:[%s14807_s17 + $0x1d8] sm:$0xff] }
 0x3e4   : > { %11531 = vmatprep.subr.bf16.mxu1 %v23625_v34  ;;  %14307 = vrot.lane.b32.xlu1 %v20468_v42, %s14768_s30  ;;  %v20492_v27 = vpack.i.bf16 %v14750_v14, %v14749_v11  ;;  %v23629_v34 = vld [vmem:[#allocation61_spill] sm:$0xff]  ;;  %v14752_v14 = vld [vmem:[%s14807_s17 + $0x238] sm:$0xff] }
 0x3e5   : > { %7911 = vmatmul.mubr.f32.gmra.mrb[58].mxu0 %v10223_v54  ;;  %9157 = vmatprep.mubr.f32.mxu1 %v10362_v43  ;;  %v10372_v54 = vld [vmem:[%s22628_s1 + $0x1048] sm:$0xff]  ;;  %v23628_v43 = vld [vmem:[#allocation59_spill] sm:$0xff] }
 0x3e6   : > { %11285 = vmatpush1.bf16.msra.mxu0 %v23626_v0  ;;  %9158 = vmatmul.mubr.f32.gmra.mrb[54].mxu1 %v10361_v40  ;;  %v23630_v11 = vpack.c.bf16 %v23628_v43, %v23629_v34  ;;  %v10371_v0 = vld [vmem:[%s22628_s1 + $0x1040] sm:$0xff]  ;;  %v14751_v40 = vld [vmem:[%s14807_s17 + $0x208] sm:$0xff]  ;;  %v23632_v43 = vld [vmem:[#allocation138_spill] sm:$0xff]  ;;  %s10493_s17 = sshll.u32 %s24032_s13, 4 }
 0x3e7   : > { %11287 = vmatprep.subr.bf16.mxu0 %v23627_v23  ;;  %11533 = vmatpush1.bf16.msra.mxu1 %v23530_v12  ;;  %v10244_v12 = vld [vmem:[%s22628_s1 + $0xc48] sm:$0xff]  ;;  %v20516_v45 = vpack.i.bf16 %v14752_v14, %v14751_v40  ;;  %v10243_v34 = vld [vmem:[%s22628_s1 + $0xc40] sm:$0xff]  ;;  %v10254_v14 = vld [vmem:[%s22628_s1 + $0xc98] sm:$0xff]  ;;  %s170_s5 = scalar_lea.vmem %s22630_s3, %s10493_s17 }
 0x3e8   : > { %7916 = vmatprep.mubr.f32.mxu0 %v10234_v46  ;;  %11535 = vmatprep.subr.bf16.mxu1 %v23630_v11  ;;  %v23631_v46 = vld [vmem:[#allocation133_spill] sm:$0xff]  ;;  %v23633_v11 = vld [vmem:[#allocation64_spill] sm:$0xff]  ;;  %v23634_v40 = vld [vmem:[#allocation63_spill] sm:$0xff] }
 0x3e9   : > { %14312 = vrot.lane.b32.xlu0 %v20492_v27, %s14768_s30  ;;  %7917 = vmatmul.mubr.f32.gmra.mrb[60].mxu0 %v10233_v26  ;;  %v10382_v26 = vld [vmem:[%s22628_s1 + $0x1098] sm:$0xff] }
 0x3ea   : > { %9163 = vmatprep.mubr.f32.mxu1 %v10372_v54  ;;  %11289 = vmatpush1.bf16.msra.mxu0 %v23631_v46  ;;  %v10381_v54 = vld [vmem:[%s22628_s1 + $0x1090] sm:$0xff] }
 0x3eb   : > { %9164 = vmatmul.mubr.f32.gmra.mrb[56].mxu1 %v10371_v0  ;;  %11291 = vmatprep.subr.bf16.mxu0 %v23632_v43  ;;  %v23635_v0 = vpack.c.bf16 %v23633_v11, %v23634_v40  ;;  %v23636_v46 = vld [vmem:[#allocation137_spill] sm:$0xff] }
 0x3ec   : > { %11537 = vmatpush1.bf16.msra.mxu1 %v23533_v33  ;;  %7922 = vmatprep.mubr.f32.mxu0 %v10244_v12  ;;  %v10253_v33 = vld [vmem:[%s22628_s1 + $0xc90] sm:$0xff]  ;;  %v23637_v12 = vld [vmem:[#allocation142_spill] sm:$0xff] }
 0x3ed   : > { %11539 = vmatprep.subr.bf16.mxu1 %v23635_v0  ;;  %14317 = vrot.lane.b32.xlu1 %v20516_v45, %s14768_s30  ;;  %v23639_v11 = vld [vmem:[#allocation69_spill] sm:$0xff] }
 0x3ee   : > { %7923 = vmatmul.mubr.f32.gmra.mrb[62].mxu0 %v10243_v34  ;;  %9169 = vmatprep.mubr.f32.mxu1 %v10382_v26  ;;  %v10392_v34 = vld [vmem:[%s22628_s1 + $0x10e8] sm:$0xff]  ;;  %v23638_v26 = vld [vmem:[#allocation67_spill] sm:$0xff]  ;;  %v23641_v0 = vld [vmem:[#allocation141_spill] sm:$0xff] }
 0x3ef   : > { %11293 = vmatpush1.bf16.msra.mxu0 %v23636_v46  ;;  %9170 = vmatmul.mubr.f32.gmra.mrb[58].mxu1 %v10381_v54  ;;  %v23640_v40 = vpack.c.bf16 %v23638_v26, %v23639_v11  ;;  %v10391_v54 = vld [vmem:[%s22628_s1 + $0x10e0] sm:$0xff]  ;;  %v10402_v26 = vld [vmem:[%s22628_s1 + $0x1138] sm:$0xff] }
 0x3f0   : > { %11295 = vmatprep.subr.bf16.mxu0 %v23637_v12  ;;  %11541 = vmatpush1.bf16.msra.mxu1 %v23535_v35  ;;  %v10264_v35 = vld [vmem:[%s22628_s1 + $0xce8] sm:$0xff]  ;;  %v10263_v46 = vld [vmem:[%s22628_s1 + $0xce0] sm:$0xff] }
 0x3f1   : > { %7928 = vmatprep.mubr.f32.mxu0 %v10254_v14  ;;  %11543 = vmatprep.subr.bf16.mxu1 %v23640_v40  ;;  %v23642_v14 = vld [vmem:[#allocation146_spill] sm:$0xff]  ;;  %v23644_v11 = vld [vmem:[#allocation71_spill] sm:$0xff] }
 0x3f2   : > { %14322 = vrot.lane.b32.xlu0 %v20348_v49, %s14768_s30  ;;  %7929 = vmatmul.mubr.f32.gmra.mrb[64].mxu0 %v10253_v33  ;;  %v10401_v33 = vld [vmem:[%s22628_s1 + $0x1130] sm:$0xff] }
 0x3f3   : > { %9175 = vmatprep.mubr.f32.mxu1 %v10392_v34  ;;  %11297 = vmatpush1.bf16.msra.mxu0 %v23641_v0  ;;  %v23643_v34 = vld [vmem:[#allocation72_spill] sm:$0xff]  ;;  %v23646_v0 = vld [vmem:[#allocation145_spill] sm:$0xff] }
 0x3f4   : > { %9176 = vmatmul.mubr.f32.gmra.mrb[60].mxu1 %v10391_v54  ;;  %11299 = vmatprep.subr.bf16.mxu0 %v23642_v14  ;;  %v23645_v40 = vpack.c.bf16 %v23643_v34, %v23644_v11  ;;  %v10274_v54 = vld [vmem:[%s22628_s1 + $0xd38] sm:$0xff]  ;;  %v23649_v34 = vld [vmem:[#allocation75_spill] sm:$0xff] }
 0x3f5   : > { %11545 = vmatpush1.bf16.msra.mxu1 %v23539_v4  ;;  %7934 = vmatprep.mubr.f32.mxu0 %v10264_v35  ;;  %v10273_v4 = vld [vmem:[%s22628_s1 + $0xd30] sm:$0xff]  ;;  %v23647_v35 = vld [vmem:[#allocation150_spill] sm:$0xff] }
 0x3f6   : > { %11547 = vmatprep.subr.bf16.mxu1 %v23645_v40  ;;  %14327 = vrot.lane.b32.xlu1 %v20372_v38, %s14768_s30  ;;  %v23651_v40 = vld [vmem:[#allocation149_spill] sm:$0xff] }
 0x3f7   : > { %7935 = vmatmul.mubr.f32.gmra.mrb[66].mxu0 %v10263_v46  ;;  %9181 = vmatprep.mubr.f32.mxu1 %v10402_v26  ;;  %v10412_v46 = vld [vmem:[%s22628_s1 + $0x1188] sm:$0xff] }
 0x3f8   : > { %11301 = vmatpush1.bf16.msra.mxu0 %v23646_v0  ;;  %9182 = vmatmul.mubr.f32.gmra.mrb[62].mxu1 %v10401_v33  ;;  %v23648_v26 = vld [vmem:[#allocation76_spill] sm:$0xff]  ;;  %v10411_v33 = vld [vmem:[%s22628_s1 + $0x1180] sm:$0xff] }
 0x3f9   : > { %11303 = vmatprep.subr.bf16.mxu0 %v23647_v35  ;;  %11549 = vmatpush1.bf16.msra.mxu1 %v23545_v39  ;;  %v23650_v11 = vpack.c.bf16 %v23648_v26, %v23649_v34  ;;  %v10284_v39 = vld [vmem:[%s22628_s1 + $0xd88] sm:$0xff]  ;;  %v10283_v0 = vld [vmem:[%s22628_s1 + $0xd80] sm:$0xff]  ;;  %v10422_v26 = vld [vmem:[%s22628_s1 + $0x11d8] sm:$0xff] }
 0x3fa   : > { %7940 = vmatprep.mubr.f32.mxu0 %v10274_v54  ;;  %14332 = vrot.lane.b32.xlu0 %v20396_v17, %s14769_s26  ;;  %v23652_v54 = vld [vmem:[#allocation154_spill] sm:$0xff]  ;;  %v10421_v17 = vld [vmem:[%s22628_s1 + $0x11d0] sm:$0xff] }
 0x3fb   : > { %11551 = vmatprep.subr.bf16.mxu1 %v23650_v11  ;;  %7941 = vmatmul.mubr.f32.gmra.mrb[68].mxu0 %v10273_v4  ;;  %v23653_v4 = vld [vmem:[#allocation82_spill] sm:$0xff] }
 0x3fc   : > { %9187 = vmatprep.mubr.f32.mxu1 %v10412_v46  ;;  %11305 = vmatpush1.bf16.msra.mxu0 %v23651_v40  ;;  %v23654_v46 = vld [vmem:[#allocation81_spill] sm:$0xff]  ;;  %v10294_v11 = vld [vmem:[%s22628_s1 + $0xdd8] sm:$0xff] }
 0x3fd   : > { %9188 = vmatmul.mubr.f32.gmra.mrb[64].mxu1 %v10411_v33  ;;  %11307 = vmatprep.subr.bf16.mxu0 %v23652_v54  ;;  %v23655_v34 = vpack.c.bf16 %v23653_v4, %v23654_v46  ;;  %v23656_v33 = vld [vmem:[#allocation153_spill] sm:$0xff]  ;;  %v23658_v40 = vld [vmem:[#allocation86_spill] sm:$0xff] }
 0x3fe   : > { %11553 = vmatpush1.bf16.msra.mxu1 %v23550_v7  ;;  %7946 = vmatprep.mubr.f32.mxu0 %v10284_v39  ;;  %v10293_v7 = vld [vmem:[%s22628_s1 + $0xdd0] sm:$0xff]  ;;  %v23657_v39 = vld [vmem:[#allocation158_spill] sm:$0xff] }
 0x3ff   : > { %11555 = vmatprep.subr.bf16.mxu1 %v23655_v34  ;;  %14337 = vrot.lane.b32.xlu1 %v20420_v18, %s14769_s26  ;;  %v10432_v18 = vld [vmem:[%s22628_s1 + $0x1228] sm:$0xff]  ;;  %v23661_v4 = vld [vmem:[#allocation157_spill] sm:$0xff]  ;;  %v23662_v46 = vld [vmem:[#allocation162_spill] sm:$0xff] }
 0x400   : > { %7947 = vmatmul.mubr.f32.gmra.mrb[70].mxu0 %v10283_v0  ;;  %9193 = vmatprep.mubr.f32.mxu1 %v10422_v26  ;;  %v23659_v0 = vld [vmem:[#allocation85_spill] sm:$0xff]  ;;  %v10303_v34 = vld [vmem:[%s22628_s1 + $0xe20] sm:$0xff] }
 0x401   : > { %11309 = vmatpush1.bf16.msra.mxu0 %v23656_v33  ;;  %9194 = vmatmul.mubr.f32.gmra.mrb[66].mxu1 %v10421_v17  ;;  %v23660_v26 = vpack.c.bf16 %v23658_v40, %v23659_v0  ;;  %v10431_v17 = vld [vmem:[%s22628_s1 + $0x1220] sm:$0xff]  ;;  %v23663_v33 = vld [vmem:[#allocation90_spill] sm:$0xff]  ;;  %v23666_v0 = vld [vmem:[#allocation161_spill] sm:$0xff] }
 0x402   : > { %11311 = vmatprep.subr.bf16.mxu0 %v23657_v39  ;;  %11557 = vmatpush1.bf16.msra.mxu1 %v23555_v41  ;;  %v10304_v41 = vld [vmem:[%s22628_s1 + $0xe28] sm:$0xff]  ;;  %v10314_v40 = vld [vmem:[%s22628_s1 + $0xe78] sm:$0xff] }
 0x403   : > { %7952 = vmatprep.mubr.f32.mxu0 %v10294_v11  ;;  %11559 = vmatprep.subr.bf16.mxu1 %v23660_v26  ;;  %v10442_v11 = vld [vmem:[%s22628_s1 + $0x1278] sm:$0xff] }
 0x404   : > { %14342 = vrot.lane.b32.xlu0 %v20444_v61, %s14769_s26  ;;  %7953 = vmatmul.mubr.f32.gmra.mrb[72].mxu0 %v10293_v7  ;;  %v10441_v61 = vld [vmem:[%s22628_s1 + $0x1270] sm:$0xff]  ;;  %v23667_v26 = vld [vmem:[#allocation166_spill] sm:$0xff] }
 0x405   : > { %9199 = vmatprep.mubr.f32.mxu1 %v10432_v18  ;;  %11313 = vmatpush1.bf16.msra.mxu0 %v23661_v4  ;;  %v23664_v7 = vld [vmem:[#allocation89_spill] sm:$0xff] }
 0x406   : > { %9200 = vmatmul.mubr.f32.gmra.mrb[68].mxu1 %v10431_v17  ;;  %11315 = vmatprep.subr.bf16.mxu0 %v23662_v46  ;;  %v23665_v18 = vpack.c.bf16 %v23663_v33, %v23664_v7  ;;  %v23668_v17 = vld [vmem:[#allocation94_spill] sm:$0xff]  ;;  %v10323_v33 = vld [vmem:[%s22628_s1 + $0xec0] sm:$0xff] }
 0x407   : > { %11561 = vmatpush1.bf16.msra.mxu1 %v23559_v2  ;;  %7958 = vmatprep.mubr.f32.mxu0 %v10304_v41  ;;  %v10313_v2 = vld [vmem:[%s22628_s1 + $0xe70] sm:$0xff]  ;;  %v10462_v7 = vld [vmem:[%s22628_s1 + $0x1318] sm:$0xff] }
 0x408   : > { %11563 = vmatprep.subr.bf16.mxu1 %v23665_v18  ;;  %14347 = vrot.lane.b32.xlu1 %v20468_v42, %s14769_s26  ;;  %v10452_v42 = vld [vmem:[%s22628_s1 + $0x12c8] sm:$0xff]  ;;  %v23669_v41 = vld [vmem:[#allocation93_spill] sm:$0xff]  ;;  %v23674_v18 = vld [vmem:[#allocation190_spill] sm:$0xff] }
 0x409   : > { %7959 = vmatmul.mubr.f32.gmra.mrb[74].mxu0 %v10303_v34  ;;  %9205 = vmatprep.mubr.f32.mxu1 %v10442_v11  ;;  %v23670_v4 = vpack.c.bf16 %v23668_v17, %v23669_v41  ;;  %v10451_v34 = vld [vmem:[%s22628_s1 + $0x12c0] sm:$0xff]  ;;  %v23671_v11 = vld [vmem:[#allocation165_spill] sm:$0xff] }
 0x40a   : > { %11317 = vmatpush1.bf16.msra.mxu0 %v23666_v0  ;;  %9206 = vmatmul.mubr.f32.gmra.mrb[70].mxu1 %v10441_v61  ;;  %v23672_v61 = vld [vmem:[#allocation170_spill] sm:$0xff]  ;;  %v10461_v41 = vld [vmem:[%s22628_s1 + $0x1310] sm:$0xff] }
 0x40b   : > { %11319 = vmatprep.subr.bf16.mxu0 %v23667_v26  ;;  %11565 = vmatpush1.bf16.msra.mxu1 %v23566_v44  ;;  %v10324_v44 = vld [vmem:[%s22628_s1 + $0xec8] sm:$0xff] }
 0x40c   : > { %7964 = vmatprep.mubr.f32.mxu0 %v10314_v40  ;;  %11567 = vmatprep.subr.bf16.mxu1 %v23670_v4  ;;  %v23675_v40 = vunpack.i.l.bf16 %v23674_v18  ;;  %v23678_v4 = vld [vmem:[#allocation98_spill] sm:$0xff] }
 0x40d   : > { %14352 = vrot.lane.b32.xlu0 %v20492_v27, %s14769_s26  ;;  %7965 = vmatmul.mubr.f32.gmra.mrb[76].mxu0 %v10313_v2  ;;  %v23673_v27 = vunpack.i.l.bf16 %v19570_v50  ;;  %v23676_v2 = vunpack.i.h.bf16 %v19570_v50 }
 0x40e   : > { %9211 = vmatprep.mubr.f32.mxu1 %v10452_v42  ;;  %11321 = vmatpush1.bf16.msra.mxu0 %v23671_v11  ;;  %v23677_v42 = vunpack.i.h.bf16 %v23674_v18  ;;  %v23682_v18 = vunpack.i.l.bf16 %v19553_v59 }
 0x40f   : > { %9212 = vmatmul.mubr.f32.gmra.mrb[72].mxu1 %v10451_v34  ;;  %11323 = vmatprep.subr.bf16.mxu0 %v23672_v61  ;;  %v2804_v0 = vsel %vm2800_vm5, %v23675_v40, %v23673_v27  ;;  %v23679_v34 = vld [vmem:[#allocation97_spill] sm:$0xff]  ;;  %v10175_v27 = vld [vmem:[%s22628_s1 + $0xa20] sm:$0xff] }
 0x410   : > { %v2809_v17 = vsel %vm2800_vm5, %v23677_v42, %v23676_v2  ;;  %11569 = vmatpush1.bf16.msra.mxu1 %v23573_v22  ;;  %7970 = vmatprep.mubr.f32.mxu0 %v10324_v44  ;;  %v23680_v11 = vpack.c.bf16 %v23678_v4, %v23679_v34  ;;  %v10176_v22 = vld [vmem:[%s22628_s1 + $0xa28] sm:$0xff]  ;;  %v23681_v44 = vld [vmem:[#allocation169_spill] sm:$0xff] }
 0x411   : > { %14357 = vrot.lane.b32.xlu1 %v20516_v45, %s14769_s26  ;;  %7971 = vmatmul.mubr.f32.gmra.mrb[78].mxu0 %v10323_v33  ;;  %v20705_v50 = vpack.c.bf16 %v2809_v17, %v2804_v0  ;;  %v23683_v40 = vld [vmem:[#allocation193_spill] sm:$0xff]  ;;  %v23685_v33 = vunpack.i.h.bf16 %v19553_v59  ;;  %v10472_v42 = vld [vmem:[%s22628_s1 + $0x1368] sm:$0xff]  ;;  %v23687_v17 = vld [vmem:[#allocation102_spill] sm:$0xff] }
 0x412   : > { %11571 = vmatprep.subr.bf16.mxu1 %v23680_v11  ;;  %9215 = vmatprep.mubr.f32.mxu1 %v10462_v7  ;;  %v23684_v2 = vunpack.i.l.bf16 %v23683_v40  ;;  %v23686_v7 = vunpack.i.h.bf16 %v23683_v40  ;;  %v10471_v59 = vld [vmem:[%s22628_s1 + $0x1360] sm:$0xff] }
 0x413   : > { %11325 = vmatpush1.bf16.msra.mxu0 %v23681_v44  ;;  %9216 = vmatmul.mubr.f32.gmra.mrb[74].mxu1 %v10461_v41  ;;  %v23688_v41 = vld [vmem:[#allocation101_spill] sm:$0xff]  ;;  %v23690_v11 = vld [vmem:[#allocation191_spill] sm:$0xff]  ;;  %v23691_v44 = vunpack.i.l.bf16 %v19606_v8 }
 0x414   : > { %v2814_v45 = vsel %vm2800_vm5, %v23684_v2, %v23682_v18  ;;  %v2819_v0 = vsel %vm2800_vm5, %v23686_v7, %v23685_v33  ;;  %11327 = vmatprep.subr.bf16.mxu0 %v20705_v50  ;;  %11573 = vmatpush1.bf16.msra.mxu1 %v23580_v10  ;;  %v23689_v4 = vpack.c.bf16 %v23687_v17, %v23688_v41  ;;  %v10186_v10 = vld [vmem:[%s22628_s1 + $0xa78] sm:$0xff]  ;;  %v23694_v2 = vunpack.i.h.bf16 %v19606_v8  ;;  %v10481_v7 = vld [vmem:[%s22628_s1 + $0x13b0] sm:$0xff] }
 0x415   : > { %8041 = vmatprep.mubr.f32.mxu0 %v10176_v22  ;;  %14362 = vrot.lane.b32.xlu0 %v20348_v49, %s14769_s26  ;;  %v20737_v34 = vpack.c.bf16 %v2819_v0, %v2814_v45  ;;  %v10185_v22 = vld [vmem:[%s22628_s1 + $0xa70] sm:$0xff]  ;;  %v10482_v49 = vld [vmem:[%s22628_s1 + $0x13b8] sm:$0xff] }
 0x416   : > { %11575 = vmatprep.subr.bf16.mxu1 %v23689_v4  ;;  %8042 = vmatmul.mubr.f32.vlgmr.msra.gmra.mrb[84].mxu0 %v10175_v27  ;;  %v23692_v27 = vld [vmem:[#allocation195_spill] sm:$0xff]  ;;  %v23696_v0 = vld [vmem:[#allocation106_spill] sm:$0xff] }
 0x417   : > { %9219 = vmatprep.mubr.f32.mxu1 %v10472_v42  ;;  %11329 = vmatpush1.bf16.msra.mxu0 %v23690_v11  ;;  %v23693_v18 = vunpack.i.l.bf16 %v23692_v27  ;;  %v23695_v45 = vunpack.i.h.bf16 %v23692_v27  ;;  %v23697_v42 = vld [vmem:[#allocation105_spill] sm:$0xff]  ;;  %v23699_v41 = vld [vmem:[#allocation194_spill] sm:$0xff]  ;;  %v10195_v4 = vld [vmem:[%s22628_s1 + $0xac0] sm:$0xff] }
 0x418   : > { %9220 = vmatmul.mubr.f32.gmra.mrb[76].mxu1 %v10471_v59  ;;  %11331 = vmatprep.subr.bf16.mxu0 %v20737_v34  ;;  %v23698_v17 = vpack.c.bf16 %v23696_v0, %v23697_v42  ;;  %v10334_v59 = vld [vmem:[%s22628_s1 + $0xf18] sm:$0xff]  ;;  %v10344_v0 = vld [vmem:[%s22628_s1 + $0xf68] sm:$0xff]  ;;  %v23709_v42 = vunpack.i.l.bf16 %v19640_v63 }
 0x419   : > { %v2824_v40 = vsel %vm2800_vm5, %v23693_v18, %v23691_v44  ;;  %v2829_v33 = vsel %vm2800_vm5, %v23695_v45, %v23694_v2  ;;  %11577 = vmatpush1.bf16.msra.mxu1 %v23587_v19  ;;  %8046 = vmatprep.mubr.f32.mxu0 %v10186_v10  ;;  %v10196_v19 = vld [vmem:[%s22628_s1 + $0xac8] sm:$0xff]  ;;  %v23701_v10 = vld [vmem:[#allocation198_spill] sm:$0xff]  ;;  %v10333_v18 = vld [vmem:[%s22628_s1 + $0xf10] sm:$0xff] }
 0x41a   : > { %11579 = vmatprep.subr.bf16.mxu1 %v23698_v17  ;;  %14367 = vrot.lane.b32.xlu1 %v20372_v38, %s14769_s26  ;;  %v20769_v8 = vpack.c.bf16 %v2829_v33, %v2824_v40  ;;  %v23700_v38 = vunpack.i.l.bf16 %v19591_v36  ;;  %v23702_v11 = vunpack.i.l.bf16 %v23701_v10  ;;  %v23704_v44 = vunpack.i.h.bf16 %v23701_v10  ;;  %v23705_v40 = vld [vmem:[#allocation110_spill] sm:$0xff]  ;;  %v23706_v2 = vld [vmem:[#allocation109_spill] sm:$0xff]  ;;  %v23710_v17 = vld [vmem:[#allocation203_spill] sm:$0xff] }
 0x41b   : > { %8047 = vmatmul.mubr.f32.gmra.mrb[86].mxu0 %v10185_v22  ;;  %9223 = vmatprep.mubr.f32.mxu1 %v10482_v49  ;;  %v23703_v49 = vunpack.i.h.bf16 %v19591_v36  ;;  %v23707_v45 = vpack.c.bf16 %v23705_v40, %v23706_v2  ;;  %v10206_v33 = vld [vmem:[%s22628_s1 + $0xb18] sm:$0xff]  ;;  %v10343_v10 = vld [vmem:[%s22628_s1 + $0xf60] sm:$0xff]  ;;  %v23718_v40 = vld [vmem:[#allocation201_spill] sm:$0xff] }
 0x41c   : > { %11333 = vmatpush1.bf16.msra.mxu0 %v23699_v41  ;;  %9224 = vmatmul.mubr.f32.gmra.mrb[78].mxu1 %v10481_v7  ;;  %v2834_v22 = vsel %vm2800_vm5, %v23702_v11, %v23700_v38  ;;  %v23708_v7 = vld [vmem:[#allocation196_spill] sm:$0xff]  ;;  %v10215_v2 = vld [vmem:[%s22628_s1 + $0xb60] sm:$0xff] }
 0x41d   : > { %v2839_v27 = vsel %vm2800_vm5, %v23704_v44, %v23703_v49  ;;  %11335 = vmatprep.subr.bf16.mxu0 %v20769_v8  ;;  %11581 = vmatpush1.bf16.msra.mxu1 %v23592_v21  ;;  %v10205_v21 = vld [vmem:[%s22628_s1 + $0xb10] sm:$0xff]  ;;  %v23715_v49 = vld [vmem:[#allocation79_spill] sm:$0xff] }
 0x41e   : > { %8051 = vmatprep.mubr.f32.mxu0 %v10196_v19  ;;  %11583 = vmatprep.subr.bf16.mxu1 %v23707_v45  ;;  %v20799_v36 = vpack.c.bf16 %v2839_v27, %v2834_v22  ;;  %v23711_v19 = vunpack.i.l.bf16 %v23710_v17  ;;  %v5522_v11 = vpop.f32.mrb[44].mxu0  ;;  %v23714_v22 = vld [vmem:[#allocation80_spill] sm:$0xff]  ;;  %v23719_v45 = vunpack.i.l.bf16 %v19625_v3 }
 0x41f   : > { %8052 = vmatmul.mubr.f32.gmra.mrb[52].mxu0 %v10195_v4  ;;  %9292 = vmatprep.mubr.f32.mxu1 %v10334_v59  ;;  %v23712_v4 = vunpack.i.h.bf16 %v19640_v63  ;;  %v23713_v59 = vunpack.i.h.bf16 %v23710_v17  ;;  %v23716_v44 = vpack.c.bf16 %v23714_v22, %v23715_v49  ;;  %v20830_v63 = vadd.f32 %v5522_v11, %v20087_v60  ;;  %v5524_v27 = vpop.f32.mrb[45].mxu0  ;;  %v10354_v60 = vld [vmem:[%s22628_s1 + $0xfb8] sm:$0xff]  ;;  %v23728_v22 = vld [vmem:[#allocation204_spill] sm:$0xff]  ;;  %v10225_v49 = vld [vmem:[%s22628_s1 + $0xbb0] sm:$0xff] }
 0x420   : > { %11337 = vmatpush1.bf16.msra.mxu0 %v23708_v7  ;;  %9293 = vmatmul.mubr.f32.vlgmr.msra.gmra.mrb[80].mxu1 %v10333_v18  ;;  %v2844_v41 = vsel %vm2800_vm5, %v23711_v19, %v23709_v42  ;;  %v10353_v19 = vld [vmem:[%s22628_s1 + $0xfb0] sm:$0xff]  ;;  %v23730_v27 = vld [vmem:[#allocation207_spill] sm:$0xff] }
 0x421   : > { %v2849_v38 = vsel %vm2800_vm5, %v23713_v59, %v23712_v4  ;;  %11339 = vmatprep.subr.bf16.mxu0 %v20799_v36  ;;  %11585 = vmatpush1.bf16.msra.mxu1 %v23597_v28  ;;  %23717 = vst [vmem:[#allocation58_spill] sm:$0xff] %v20830_v63  ;;  %v10216_v28 = vld [vmem:[%s22628_s1 + $0xb68] sm:$0xff]  ;;  %v23725_v59 = vld [vmem:[#allocation115_spill] sm:$0xff]  ;;  %v23907_v63 = vld [vmem:[#allocation50_spill] sm:$0xff] }
 0x422   : > { %8057 = vmatprep.mubr.f32.mxu0 %v10206_v33  ;;  %11587 = vmatprep.subr.bf16.mxu1 %v23716_v44  ;;  %v20832_v18 = vpack.c.bf16 %v2849_v38, %v2844_v41  ;;  %v23720_v33 = vld [vmem:[#allocation205_spill] sm:$0xff]  ;;  %v5527_v41 = vpop.f32.mrb[46].mxu0  ;;  %v23724_v4 = vld [vmem:[#allocation116_spill] sm:$0xff]  ;;  %v23729_v44 = vunpack.i.l.bf16 %v19674_v51 }
 0x423   : > { %8058 = vmatmul.mubr.f32.gmra.mrb[54].mxu0 %v10205_v21  ;;  %9297 = vmatprep.mubr.f32.mxu1 %v10344_v0  ;;  %v23721_v7 = vunpack.i.l.bf16 %v23720_v33  ;;  %v23722_v0 = vunpack.i.h.bf16 %v19625_v3  ;;  %v23723_v42 = vunpack.i.h.bf16 %v23720_v33  ;;  %v23726_v38 = vpack.c.bf16 %v23724_v4, %v23725_v59  ;;  %v10363_v33 = vld [vmem:[%s22628_s1 + $0x1000] sm:$0xff]  ;;  %v23737_v59 = vld [vmem:[#allocation206_spill] sm:$0xff] }
 0x424   : > { %11341 = vmatpush1.bf16.msra.mxu0 %v23718_v40  ;;  %9298 = vmatmul.mubr.f32.gmra.mrb[82].mxu1 %v10343_v10  ;;  %v20863_v3 = vadd.f32 %v5527_v41, %v20121_v52  ;;  %v5529_v10 = vpop.f32.mrb[47].mxu0  ;;  %v10364_v52 = vld [vmem:[%s22628_s1 + $0x1008] sm:$0xff] }
 0x425   : > { %v2854_v21 = vsel %vm2800_vm5, %v23721_v7, %v23719_v45  ;;  %v2859_v17 = vsel %vm2800_vm5, %v23723_v42, %v23722_v0  ;;  %11343 = vmatprep.subr.bf16.mxu0 %v20832_v18  ;;  %11589 = vmatpush1.bf16.msra.mxu1 %v23602_v57  ;;  %v10226_v57 = vld [vmem:[%s22628_s1 + $0xbb8] sm:$0xff]  ;;  %v23735_v0 = vld [vmem:[#allocation119_spill] sm:$0xff] }
 0x426   : > { %8063 = vmatprep.mubr.f32.mxu0 %v10216_v28  ;;  %11591 = vmatprep.subr.bf16.mxu1 %v23726_v38  ;;  %23727 = vst [vmem:[#allocation57_spill] sm:$0xff] %v20863_v3  ;;  %v20865_v11 = vpack.c.bf16 %v2859_v17, %v2854_v21  ;;  %v23731_v28 = vunpack.i.l.bf16 %v23730_v27  ;;  %v5532_v7 = vpop.f32.mrb[4].mxu0  ;;  %v23734_v21 = vld [vmem:[#allocation120_spill] sm:$0xff]  ;;  %v10235_v38 = vld [vmem:[%s22628_s1 + $0xc00] sm:$0xff]  ;;  %v10374_v10 = vld [vmem:[%s22628_s1 + $0x1058] sm:$0xff] }
 0x427   : > { %8064 = vmatmul.mubr.f32.gmra.mrb[56].mxu0 %v10215_v2  ;;  %9302 = vmatprep.mubr.f32.mxu1 %v10354_v60  ;;  %v23732_v2 = vunpack.i.h.bf16 %v19674_v51  ;;  %v23733_v60 = vunpack.i.h.bf16 %v23730_v27  ;;  %v23736_v42 = vpack.c.bf16 %v23734_v21, %v23735_v0  ;;  %v5534_v51 = vpop.f32.mrb[5].mxu0 }
 0x428   : > { %11345 = vmatpush1.bf16.msra.mxu0 %v23728_v22  ;;  %9303 = vmatmul.mubr.f32.gmra.mrb[52].mxu1 %v10353_v19  ;;  %v2864_v40 = vsel %vm2800_vm5, %v23731_v28, %v23729_v44  ;;  %v6784_v17 = vpop.f32.mrb[40].mxu1  ;;  %v23739_v22 = vld [vmem:[#allocation210_spill] sm:$0xff]  ;;  %v10373_v28 = vld [vmem:[%s22628_s1 + $0x1050] sm:$0xff] }
 0x429   : > { %v2869_v45 = vsel %vm2800_vm5, %v23733_v60, %v23732_v2  ;;  %11347 = vmatprep.subr.bf16.mxu0 %v20865_v11  ;;  %11593 = vmatpush1.bf16.msra.mxu1 %v23607_v48  ;;  %v10236_v48 = vld [vmem:[%s22628_s1 + $0xc08] sm:$0xff]  ;;  %v20901_v41 = vadd.f32 %v6784_v17, %v19179_v13  ;;  %v6786_v4 = vpop.f32.mrb[41].mxu1  ;;  %v23741_v13 = vunpack.i.h.bf16 %v19659_v15  ;;  %v23742_v44 = vunpack.i.h.bf16 %v23739_v22  ;;  %v23744_v60 = vld [vmem:[#allocation123_spill] sm:$0xff] }
 0x42a   : > { %8069 = vmatprep.mubr.f32.mxu0 %v10226_v57  ;;  %11595 = vmatprep.subr.bf16.mxu1 %v23736_v42  ;;  %v20895_v19 = vpack.c.bf16 %v2869_v45, %v2864_v40  ;;  %v23738_v57 = vunpack.i.l.bf16 %v19659_v15  ;;  %v5538_v40 = vpop.f32.mrb[6].mxu0  ;;  %v23743_v2 = vld [vmem:[#allocation124_spill] sm:$0xff] }
 0x42b   : > { %8070 = vmatmul.mubr.f32.gmra.mrb[58].mxu0 %v10225_v49  ;;  %9308 = vmatprep.mubr.f32.mxu1 %v10364_v52  ;;  %v23740_v49 = vunpack.i.l.bf16 %v23739_v22  ;;  %v2879_v27 = vsel %vm2800_vm5, %v23742_v44, %v23741_v13  ;;  %v23745_v45 = vpack.c.bf16 %v23743_v2, %v23744_v60  ;;  %v5540_v15 = vpop.f32.mrb[7].mxu0  ;;  %v23746_v17 = vld [vmem:[#allocation208_spill] sm:$0xff]  ;;  %v23753_v44 = vld [vmem:[#allocation127_spill] sm:$0xff] }
 0x42c   : > { %11349 = vmatpush1.bf16.msra.mxu0 %v23737_v59  ;;  %9309 = vmatmul.mubr.f32.gmra.mrb[54].mxu1 %v10363_v33  ;;  %v6789_v33 = vpop.f32.mrb[42].mxu1  ;;  %v10384_v4 = vld [vmem:[%s22628_s1 + $0x10a8] sm:$0xff]  ;;  %v23747_v59 = vunpack.i.l.bf16 %v19708_v24 }
 0x42d   : > { %v2874_v52 = vsel %vm2800_vm5, %v23740_v49, %v23738_v57  ;;  %11351 = vmatprep.subr.bf16.mxu0 %v20895_v19  ;;  %11597 = vmatpush1.bf16.msra.mxu1 %v23612_v37  ;;  %v10246_v37 = vld [vmem:[%s22628_s1 + $0xc58] sm:$0xff]  ;;  %v20934_v0 = vadd.f32 %v6789_v33, %v19236_v30  ;;  %v6791_v42 = vpop.f32.mrb[43].mxu1  ;;  %v23748_v30 = vld [vmem:[#allocation213_spill] sm:$0xff]  ;;  %v23750_v57 = vunpack.i.h.bf16 %v19708_v24  ;;  %v23752_v13 = vld [vmem:[#allocation128_spill] sm:$0xff] }
 0x42e   : > { %8075 = vmatprep.mubr.f32.mxu0 %v10236_v48  ;;  %11599 = vmatprep.subr.bf16.mxu1 %v23745_v45  ;;  %v20928_v21 = vpack.c.bf16 %v2879_v27, %v2874_v52  ;;  %v10245_v48 = vld [vmem:[%s22628_s1 + $0xc50] sm:$0xff]  ;;  %v23751_v22 = vunpack.i.h.bf16 %v23748_v30  ;;  %v20955_v52 = vpop.f32.mrb[8].mxu0  ;;  %v23754_v27 = vpack.c.bf16 %v23752_v13, %v23753_v44  ;;  %v23755_v24 = vld [vmem:[#allocation211_spill] sm:$0xff]  ;;  %v10256_v60 = vld [vmem:[%s22628_s1 + $0xca8] sm:$0xff]  ;;  %v23048_v44 = vunpack.i.h.bf16 %v19725_v6 }
 0x42f   : > { %8076 = vmatmul.mubr.f32.gmra.mrb[60].mxu0 %v10235_v38  ;;  %9314 = vmatprep.mubr.f32.mxu1 %v10374_v10  ;;  %v23749_v38 = vunpack.i.l.bf16 %v23748_v30  ;;  %v10255_v45 = vld [vmem:[%s22628_s1 + $0xca0] sm:$0xff]  ;;  %v10394_v33 = vld [vmem:[%s22628_s1 + $0x10f8] sm:$0xff]  ;;  %v23757_v42 = vld [vmem:[#allocation216_spill] sm:$0xff] }
 0x430   : > { %11353 = vmatpush1.bf16.msra.mxu0 %v23746_v17  ;;  %9315 = vmatmul.mubr.f32.gmra.mrb[56].mxu1 %v10373_v28  ;;  %v3242_v49 = vsel %vm3233_vm6, %v23751_v22, %v23750_v57  ;;  %v20963_v28 = vpop.f32.mrb[9].mxu0  ;;  %v23758_v17 = vunpack.i.l.bf16 %v23757_v42 }
 0x431   : > { %11355 = vmatprep.subr.bf16.mxu0 %v20928_v21  ;;  %11601 = vmatpush1.bf16.msra.mxu1 %v23617_v62  ;;  %v3237_v10 = vsel %vm3233_vm6, %v23749_v38, %v23747_v59  ;;  %v10383_v62 = vld [vmem:[%s22628_s1 + $0x10a0] sm:$0xff]  ;;  %v23761_v38 = vld [vmem:[#allocation132_spill] sm:$0xff] }
 0x432   : > { %8081 = vmatprep.mubr.f32.mxu0 %v10246_v37  ;;  %11603 = vmatprep.subr.bf16.mxu1 %v23754_v27  ;;  %v20967_v2 = vpack.c.bf16 %v3242_v49, %v3237_v10  ;;  %v23756_v37 = vunpack.i.l.bf16 %v19693_v5  ;;  %v23762_v10 = vld [vmem:[#allocation131_spill] sm:$0xff]  ;;  %v10266_v49 = vld [vmem:[%s22628_s1 + $0xcf8] sm:$0xff]  ;;  %v23049_v27 = vunpack.i.l.bf16 %v19725_v6 }
 0x433   : > { %8082 = vmatmul.mubr.f32.gmra.mrb[62].mxu0 %v10245_v48  ;;  %9320 = vmatprep.mubr.f32.mxu1 %v10384_v4  ;;  %v23759_v48 = vunpack.i.h.bf16 %v19693_v5  ;;  %v23760_v4 = vunpack.i.h.bf16 %v23757_v42  ;;  %v23763_v57 = vpack.c.bf16 %v23761_v38, %v23762_v10  ;;  %v23764_v5 = vld [vmem:[#allocation214_spill] sm:$0xff]  ;;  %v10276_v38 = vld [vmem:[%s22628_s1 + $0xd48] sm:$0xff] }
 0x434   : > { %5619 = vrot.lane.b32.xlu0 %v5532_v7, %s14770_s10  ;;  %11357 = vmatpush1.bf16.msra.mxu0 %v23755_v24  ;;  %v20979_v7 = vpop.f32.mrb[10].mxu0  ;;  %v23765_v24 = vunpack.i.l.bf16 %v19740_v58 }
 0x435   : > { %9321 = vmatmul.mubr.f32.gmra.mrb[58].mxu1 %v10383_v62  ;;  %5621 = vrot.lane.b32.xlu1 %v5534_v51, %s14770_s10  ;;  %v3247_v51 = vsel %vm3233_vm6, %v23758_v17, %v23756_v37  ;;  %v3252_v59 = vsel %vm3233_vm6, %v23760_v4, %v23759_v48  ;;  %v20993_v30 = vpop.f32.mrb[11].mxu0  ;;  %v10404_v62 = vld [vmem:[%s22628_s1 + $0x1148] sm:$0xff]  ;;  %v23768_v37 = vunpack.i.h.bf16 %v19740_v58  ;;  %v23771_v4 = vld [vmem:[#allocation135_spill] sm:$0xff] }
 0x436   : > { %11359 = vmatprep.subr.bf16.mxu0 %v20967_v2  ;;  %11605 = vmatpush1.bf16.msra.mxu1 %v23622_v56  ;;  %v10393_v56 = vld [vmem:[%s22628_s1 + $0x10f0] sm:$0xff]  ;;  %v21003_v22 = vpack.c.bf16 %v3252_v59, %v3247_v51  ;;  %v5556_v13 = vpop.f32.mrb[12].mxu0  ;;  %v10403_v51 = vld [vmem:[%s22628_s1 + $0x1140] sm:$0xff]  ;;  %v23770_v48 = vld [vmem:[#allocation136_spill] sm:$0xff] }
 0x437   : > { %8087 = vmatprep.mubr.f32.mxu0 %v10256_v60  ;;  %11607 = vmatprep.subr.bf16.mxu1 %v23763_v57  ;;  %v23766_v60 = vld [vmem:[#allocation220_spill] sm:$0xff]  ;;  %v5558_v17 = vpop.f32.mrb[13].mxu0  ;;  %v23772_v59 = vpack.c.bf16 %v23770_v48, %v23771_v4  ;;  %v23773_v57 = vld [vmem:[#allocation218_spill] sm:$0xff] }
 0x438   : > { %8088 = vmatmul.mubr.f32.gmra.mrb[64].mxu0 %v10255_v45  ;;  %9326 = vmatprep.mubr.f32.mxu1 %v10394_v33  ;;  %v23767_v45 = vunpack.i.l.bf16 %v23766_v60  ;;  %v23769_v42 = vunpack.i.h.bf16 %v23766_v60  ;;  %v10286_v4 = vld [vmem:[%s22628_s1 + $0xd98] sm:$0xff] }
 0x439   : > { %5623 = vrot.lane.b32.xlu0 %v5538_v40, %s14770_s10  ;;  %11361 = vmatpush1.bf16.msra.mxu0 %v23764_v5  ;;  %v10265_v40 = vld [vmem:[%s22628_s1 + $0xcf0] sm:$0xff] }
 0x43a   : > { %9327 = vmatmul.mubr.f32.gmra.mrb[60].mxu1 %v10393_v56  ;;  %5625 = vrot.lane.b32.xlu1 %v5540_v15, %s14770_s10  ;;  %v3257_v33 = vsel %vm3233_vm6, %v23767_v45, %v23765_v24  ;;  %v3262_v15 = vsel %vm3233_vm6, %v23769_v42, %v23768_v37  ;;  %v5562_v10 = vpop.f32.mrb[14].mxu0  ;;  %v10414_v56 = vld [vmem:[%s22628_s1 + $0x1198] sm:$0xff]  ;;  %v23774_v5 = vld [vmem:[#allocation173_spill] sm:$0xff]  ;;  %v23046_v45 = vunpack.i.h.bf16 %v19764_v16  ;;  %v23777_v42 = vld [vmem:[#allocation140_spill] sm:$0xff] }
 0x43b   : > { %11363 = vmatprep.subr.bf16.mxu0 %v21003_v22  ;;  %11609 = vmatpush1.bf16.msra.mxu1 %v23627_v23  ;;  %v21035_v58 = vpack.c.bf16 %v3262_v15, %v3257_v33  ;;  %v10275_v23 = vld [vmem:[%s22628_s1 + $0xd40] sm:$0xff]  ;;  %v5564_v60 = vpop.f32.mrb[15].mxu0  ;;  %v23047_v33 = vunpack.i.l.bf16 %v19764_v16  ;;  %v10413_v37 = vld [vmem:[%s22628_s1 + $0x1190] sm:$0xff] }
 0x43c   : > { %8093 = vmatprep.mubr.f32.mxu0 %v10266_v49  ;;  %11611 = vmatprep.subr.bf16.mxu1 %v23772_v59  ;;  %v23775_v49 = vunpack.i.l.bf16 %v23774_v5  ;;  %v23778_v15 = vld [vmem:[#allocation139_spill] sm:$0xff] }
 0x43d   : > { %8094 = vmatmul.mubr.f32.gmra.mrb[66].mxu0 %v10265_v40  ;;  %9332 = vmatprep.mubr.f32.mxu1 %v10404_v62  ;;  %v23776_v62 = vunpack.i.h.bf16 %v23774_v5 }
 0x43e   : > { %11365 = vmatpush1.bf16.msra.mxu0 %v23773_v57  ;;  %9333 = vmatmul.mubr.f32.gmra.mrb[62].mxu1 %v10403_v51  ;;  %v3267_v40 = vsel %vm3233_vm6, %v23775_v49, %v23049_v27  ;;  %v23779_v51 = vpack.c.bf16 %v23777_v42, %v23778_v15  ;;  %v10424_v57 = vld [vmem:[%s22628_s1 + $0x11e8] sm:$0xff]  ;;  %v21101_v15 = vpop.permute.xlu1 %14167 }
 0x43f   : > { %v3272_v24 = vsel %vm3233_vm6, %v23776_v62, %v23048_v44  ;;  %11367 = vmatprep.subr.bf16.mxu0 %v21035_v58  ;;  %11613 = vmatpush1.bf16.msra.mxu1 %v23632_v43  ;;  %v21072_v59 = vpop.f32.mrb[16].mxu0  ;;  %v23781_v43 = vld [vmem:[#allocation221_spill] sm:$0xff]  ;;  %v23815_v44 = vld [vmem:[#allocation176_spill] sm:$0xff] }
 0x440   : > { %8099 = vmatprep.mubr.f32.mxu0 %v10276_v38  ;;  %11615 = vmatprep.subr.bf16.mxu1 %v23779_v51  ;;  %v21067_v48 = vpack.c.bf16 %v3272_v24, %v3267_v40  ;;  %23780 = vst [vmem:[#allocation62_spill] sm:$0xff] %v21072_v59  ;;  %v10285_v38 = vld [vmem:[%s22628_s1 + $0xd90] sm:$0xff]  ;;  %v23786_v24 = vld [vmem:[#allocation144_spill] sm:$0xff] }
 0x441   : > { %8100 = vmatmul.mubr.f32.gmra.mrb[68].mxu0 %v10275_v23  ;;  %9338 = vmatprep.mubr.f32.mxu1 %v10414_v56  ;;  %v21081_v23 = vpop.f32.mrb[17].mxu0  ;;  %v23783_v56 = vld [vmem:[#allocation224_spill] sm:$0xff] }
 0x442   : > { %11369 = vmatpush1.bf16.msra.mxu0 %v23781_v43  ;;  %9339 = vmatmul.mubr.f32.gmra.mrb[64].mxu1 %v10413_v37  ;;  %23782 = vst [vmem:[#allocation60_spill] sm:$0xff] %v21081_v23  ;;  %v23784_v5 = vunpack.i.l.bf16 %v23783_v56  ;;  %v23785_v40 = vunpack.i.h.bf16 %v23783_v56  ;;  %v23787_v37 = vld [vmem:[#allocation143_spill] sm:$0xff] }
 0x443   : > { %11371 = vmatprep.subr.bf16.mxu0 %v21067_v48  ;;  %11617 = vmatpush1.bf16.msra.mxu1 %v23637_v12  ;;  %v23788_v42 = vpack.c.bf16 %v23786_v24, %v23787_v37  ;;  %v10423_v12 = vld [vmem:[%s22628_s1 + $0x11e0] sm:$0xff]  ;;  %v21103_v51 = vpop.f32.mrb[18].mxu0  ;;  %v21133_v37 = vpop.permute.xlu1 %14177 }
 0x444   : > { %v3277_v49 = vsel %vm3233_vm6, %v23784_v5, %v23047_v33  ;;  %v3282_v62 = vsel %vm3233_vm6, %v23785_v40, %v23046_v45  ;;  %8105 = vmatprep.mubr.f32.mxu0 %v10286_v4  ;;  %9344 = vmatprep.mubr.f32.mxu1 %v10424_v57  ;;  %23789 = vst [vmem:[#allocation66_spill] sm:$0xff] %v21103_v51  ;;  %v23790_v43 = vld [vmem:[#allocation223_spill] sm:$0xff]  ;;  %v10296_v4 = vld [vmem:[%s22628_s1 + $0xde8] sm:$0xff]  ;;  %v21112_v5 = vpop.f32.mrb[19].mxu0  ;;  %v23811_v45 = vld [vmem:[#allocation177_spill] sm:$0xff] }
 0x445   : > { %11619 = vmatprep.subr.bf16.mxu1 %v23788_v42  ;;  %8106 = vmatmul.mubr.f32.gmra.mrb[70].mxu0 %v10285_v38  ;;  %v21107_v56 = vpack.c.bf16 %v3282_v62, %v3277_v49  ;;  %23791 = vst [vmem:[#allocation65_spill] sm:$0xff] %v21112_v5  ;;  %v10295_v38 = vld [vmem:[%s22628_s1 + $0xde0] sm:$0xff]  ;;  %v23792_v57 = vld [vmem:[#allocation148_spill] sm:$0xff]  ;;  %v10306_v42 = vld [vmem:[%s22628_s1 + $0xe38] sm:$0xff] }
 0x446   : > { %5638 = vrot.lane.b32.xlu0 %v5556_v13, %s14770_s10  ;;  %11373 = vmatpush1.bf16.msra.mxu0 %v23790_v43  ;;  %v10434_v13 = vld [vmem:[%s22628_s1 + $0x1238] sm:$0xff]  ;;  %v23793_v49 = vld [vmem:[#allocation147_spill] sm:$0xff]  ;;  %v10444_v43 = vld [vmem:[%s22628_s1 + $0x1288] sm:$0xff] }
 0x447   : > { %9345 = vmatmul.mubr.f32.gmra.mrb[66].mxu1 %v10423_v12  ;;  %5640 = vrot.lane.b32.xlu1 %v5558_v17, %s14770_s10  ;;  %v23794_v40 = vpack.c.bf16 %v23792_v57, %v23793_v49  ;;  %v10433_v17 = vld [vmem:[%s22628_s1 + $0x1230] sm:$0xff]  ;;  %v21129_v62 = vpop.f32.mrb[20].mxu0  ;;  %v10316_v49 = vld [vmem:[%s22628_s1 + $0xe88] sm:$0xff]  ;;  %v10198_v51 = vld [vmem:[%s22628_s1 + $0xad8] sm:$0xff] }
 0x448   : > { %11375 = vmatprep.subr.bf16.mxu0 %v21107_v56  ;;  %11621 = vmatpush1.bf16.msra.mxu1 %v23642_v14  ;;  %v21131_v24 = vpop.f32.mrb[21].mxu0  ;;  %v23795_v14 = vld [vmem:[#allocation175_spill] sm:$0xff]  ;;  %v10305_v12 = vld [vmem:[%s22628_s1 + $0xe30] sm:$0xff]  ;;  %v10188_v33 = vld [vmem:[%s22628_s1 + $0xa88] sm:$0xff] }
 0x449   : > { %8111 = vmatprep.mubr.f32.mxu0 %v10296_v4  ;;  %11623 = vmatprep.subr.bf16.mxu1 %v23794_v40  ;;  %v10315_v40 = vld [vmem:[%s22628_s1 + $0xe80] sm:$0xff]  ;;  %v23820_v5 = vld [vmem:[#allocation180_spill] sm:$0xff] }
 0x44a   : > { %8112 = vmatmul.mubr.f32.gmra.mrb[72].mxu0 %v10295_v38  ;;  %9350 = vmatprep.mubr.f32.mxu1 %v10434_v13  ;;  %v23797_v38 = vld [vmem:[#allocation151_spill] sm:$0xff] }
 0x44b   : > { %5642 = vrot.lane.b32.xlu0 %v5562_v10, %s14770_s10  ;;  %11377 = vmatpush1.bf16.msra.mxu0 %v23795_v14  ;;  %v10443_v10 = vld [vmem:[%s22628_s1 + $0x1280] sm:$0xff]  ;;  %v21152_v4 = vpop.f32.mrb[22].mxu0  ;;  %v21169_v14 = vpop.permute.xlu1 %14187 }
 0x44c   : > { %9351 = vmatmul.mubr.f32.gmra.mrb[68].mxu1 %v10433_v17  ;;  %5644 = vrot.lane.b32.xlu1 %v5564_v60, %s14770_s10  ;;  %v23796_v60 = vld [vmem:[#allocation152_spill] sm:$0xff]  ;;  %v21157_v57 = vpop.f32.mrb[23].mxu0  ;;  %v10454_v17 = vld [vmem:[%s22628_s1 + $0x12d8] sm:$0xff] }
 0x44d   : > { %11379 = vmatprep.subr.bf16.mxu0 %v19794_v20  ;;  %11625 = vmatpush1.bf16.msra.mxu1 %v23647_v35  ;;  %v23798_v13 = vpack.c.bf16 %v23796_v60, %v23797_v38  ;;  %v23799_v35 = vld [vmem:[#allocation174_spill] sm:$0xff] }
 0x44e   : > { %8117 = vmatprep.mubr.f32.mxu0 %v10306_v42  ;;  %9356 = vmatprep.mubr.f32.mxu1 %v10444_v43  ;;  %v10453_v42 = vld [vmem:[%s22628_s1 + $0x12d0] sm:$0xff]  ;;  %v23801_v43 = vld [vmem:[#allocation156_spill] sm:$0xff] }
 0x44f   : > { %11627 = vmatprep.subr.bf16.mxu1 %v23798_v13  ;;  %8118 = vmatmul.mubr.f32.gmra.mrb[74].mxu0 %v10305_v12  ;;  %v21176_v12 = vpop.f32.mrb[24].mxu0  ;;  %v10326_v13 = vld [vmem:[%s22628_s1 + $0xed8] sm:$0xff] }
 0x450   : > { %11381 = vmatpush1.bf16.msra.mxu0 %v23799_v35  ;;  %9357 = vmatmul.mubr.f32.gmra.mrb[70].mxu1 %v10443_v10  ;;  %23800 = vst [vmem:[#allocation70_spill] sm:$0xff] %v21176_v12  ;;  %v23802_v10 = vld [vmem:[#allocation155_spill] sm:$0xff]  ;;  %v21181_v38 = vpop.f32.mrb[25].mxu0  ;;  %v10325_v35 = vld [vmem:[%s22628_s1 + $0xed0] sm:$0xff]  ;;  %v23921_v12 = vld [vmem:[#allocation54_spill] sm:$0xff] }
 0x451   : > { %11383 = vmatprep.subr.bf16.mxu0 %v19847_v53  ;;  %11629 = vmatpush1.bf16.msra.mxu1 %v23652_v54  ;;  %v23803_v60 = vpack.c.bf16 %v23801_v43, %v23802_v10  ;;  %23804 = vst [vmem:[#allocation68_spill] sm:$0xff] %v21181_v38  ;;  %v23805_v54 = vld [vmem:[#allocation171_spill] sm:$0xff] }
 0x452   : > { %8123 = vmatprep.mubr.f32.mxu0 %v10316_v49  ;;  %9362 = vmatprep.mubr.f32.mxu1 %v10454_v17  ;;  %v10464_v49 = vld [vmem:[%s22628_s1 + $0x1328] sm:$0xff]  ;;  %v23808_v43 = vld [vmem:[#allocation159_spill] sm:$0xff] }
 0x453   : > { %11631 = vmatprep.subr.bf16.mxu1 %v23803_v60  ;;  %8124 = vmatmul.mubr.f32.gmra.mrb[76].mxu0 %v10315_v40  ;;  %v10463_v40 = vld [vmem:[%s22628_s1 + $0x1320] sm:$0xff]  ;;  %v21198_v17 = vpop.f32.mrb[26].mxu0 }
 0x454   : > { %11385 = vmatpush1.bf16.msra.mxu0 %v23805_v54  ;;  %9363 = vmatmul.mubr.f32.gmra.mrb[84].mxu1 %v10453_v42  ;;  %23806 = vst [vmem:[#allocation74_spill] sm:$0xff] %v21198_v17  ;;  %v23807_v42 = vld [vmem:[#allocation160_spill] sm:$0xff]  ;;  %v21203_v60 = vpop.f32.mrb[27].mxu0  ;;  %v21205_v54 = vpop.permute.xlu1 %14197  ;;  %v10298_v17 = vld [vmem:[%s22628_s1 + $0xdf8] sm:$0xff] }
 0x455   : > { %11387 = vmatprep.subr.bf16.mxu0 %v19840_v1  ;;  %11633 = vmatpush1.bf16.msra.mxu1 %v23657_v39  ;;  %v23809_v10 = vpack.c.bf16 %v23807_v42, %v23808_v43  ;;  %23810 = vst [vmem:[#allocation73_spill] sm:$0xff] %v21203_v60  ;;  %v10178_v39 = vld [vmem:[%s22628_s1 + $0xa38] sm:$0xff] }
 0x456   : > { %8129 = vmatprep.mubr.f32.mxu0 %v10326_v13  ;;  %9366 = vmatprep.mubr.f32.mxu1 %v10464_v49  ;;  %v10177_v13 = vld [vmem:[%s22628_s1 + $0xa30] sm:$0xff]  ;;  %v10474_v42 = vld [vmem:[%s22628_s1 + $0x1378] sm:$0xff] }
 0x457   : > { %11635 = vmatprep.subr.bf16.mxu1 %v23809_v10  ;;  %8130 = vmatmul.mubr.f32.gmra.mrb[78].mxu0 %v10325_v35  ;;  %v10473_v35 = vld [vmem:[%s22628_s1 + $0x1370] sm:$0xff]  ;;  %v5604_v49 = vpop.f32.mrb[28].mxu0 }
 0x458   : > { %11389 = vmatpush1.bf16.msra.mxu0 %v23811_v45  ;;  %9367 = vmatmul.mubr.f32.gmra.mrb[86].mxu1 %v10463_v40  ;;  %v23812_v45 = vld [vmem:[#allocation164_spill] sm:$0xff]  ;;  %v23813_v40 = vld [vmem:[#allocation163_spill] sm:$0xff]  ;;  %v5606_v10 = vpop.f32.mrb[29].mxu0 }
 0x459   : > { %11391 = vmatprep.subr.bf16.mxu0 %v19893_v32  ;;  %11637 = vmatpush1.bf16.msra.mxu1 %v23662_v46  ;;  %v23814_v43 = vpack.c.bf16 %v23812_v45, %v23813_v40  ;;  %v10187_v46 = vld [vmem:[%s22628_s1 + $0xa80] sm:$0xff]  ;;  %v21235_v45 = vpop.permute.xlu1 %14207  ;;  %v23816_v40 = vld [vmem:[#allocation25_spill] sm:$0xff] }
 0x45a   : > { %8200 = vmatprep.mubr.f32.mxu0 %v10178_v39  ;;  %9370 = vmatprep.mubr.f32.mxu1 %v10474_v42  ;;  %v10484_v39 = vld [vmem:[%s22628_s1 + $0x13c8] sm:$0xff] }
 0x45b   : > { %11639 = vmatprep.subr.bf16.mxu1 %v23814_v43  ;;  %8201 = vmatmul.mubr.f32.vlgmr.msra.gmra.mrb[88].mxu0 %v10177_v13  ;;  %v10483_v13 = vld [vmem:[%s22628_s1 + $0x13c0] sm:$0xff]  ;;  %v23817_v42 = vld [vmem:[#allocation168_spill] sm:$0xff] }
 0x45c   : > { %11393 = vmatpush1.bf16.msra.mxu0 %v23815_v44  ;;  %9371 = vmatmul.mubr.f32.gmra.mrb[88].mxu1 %v10473_v35  ;;  %v5610_v44 = vpop.f32.mrb[30].mxu0  ;;  %v23818_v35 = vld [vmem:[#allocation167_spill] sm:$0xff] }
 0x45d   : > { %11395 = vmatprep.subr.bf16.mxu0 %v23816_v40  ;;  %11641 = vmatpush1.bf16.msra.mxu1 %v23667_v26  ;;  %v23819_v43 = vpack.c.bf16 %v23817_v42, %v23818_v35  ;;  %v5612_v27 = vpop.f32.mrb[31].mxu0  ;;  %v10197_v26 = vld [vmem:[%s22628_s1 + $0xad0] sm:$0xff]  ;;  %v21265_v42 = vpop.permute.xlu1 %14217  ;;  %v23822_v35 = vld [vmem:[#allocation3_spill] sm:$0xff] }
 0x45e   : > { %8205 = vmatprep.mubr.f32.mxu0 %v10188_v33  ;;  %9374 = vmatprep.mubr.f32.mxu1 %v10484_v39  ;;  %v10336_v33 = vld [vmem:[%s22628_s1 + $0xf28] sm:$0xff] }
 0x45f   : > { %11643 = vmatprep.subr.bf16.mxu1 %v23819_v43  ;;  %8206 = vmatmul.mubr.f32.gmra.mrb[90].mxu0 %v10187_v46  ;;  %v10335_v46 = vld [vmem:[%s22628_s1 + $0xf20] sm:$0xff]  ;;  %v23050_v43 = vunpack.i.h.bf16 %v21101_v15 }
 0x460   : > { %11397 = vmatpush1.bf16.msra.mxu0 %v23820_v5  ;;  %9375 = vmatmul.mubr.f32.gmra.mrb[90].mxu1 %v10483_v13  ;;  %v21260_v39 = vpop.f32.mrb[48].mxu0  ;;  %v23821_v5 = vpack.c.bf16 %v19981_v29, %v19976_v25  ;;  %v10346_v25 = vld [vmem:[%s22628_s1 + $0xf78] sm:$0xff] }
 0x461   : > { %11399 = vmatprep.subr.bf16.mxu0 %v19942_v55  ;;  %11645 = vmatpush1.bf16.msra.mxu1 %v23672_v61  ;;  %v7727_v13 = vpop.f32.mrb[49].mxu0  ;;  %v10208_v61 = vld [vmem:[%s22628_s1 + $0xb28] sm:$0xff] }
 0x462   : > { %8210 = vmatprep.mubr.f32.mxu0 %v10198_v51  ;;  %11647 = vmatprep.subr.bf16.mxu1 %v23821_v5  ;;  %v10207_v51 = vld [vmem:[%s22628_s1 + $0xb20] sm:$0xff]  ;;  %v10218_v13 = vld [vmem:[%s22628_s1 + $0xb78] sm:$0xff] }
 0x463   : > { %8211 = vmatmul.mubr.f32.gmra.mrb[52].mxu0 %v10197_v26  ;;  %9443 = vmatprep.mubr.f32.mxu1 %v10336_v33  ;;  %v23051_v26 = vunpack.i.l.bf16 %v21101_v15  ;;  %v23823_v33 = vpack.c.bf16 %v20014_v31, %v20009_v47  ;;  %v10217_v47 = vld [vmem:[%s22628_s1 + $0xb70] sm:$0xff]  ;;  %v10356_v31 = vld [vmem:[%s22628_s1 + $0xfc8] sm:$0xff] }
 0x464   : > { %11401 = vmatpush1.bf16.msra.mxu0 %v23822_v35  ;;  %9444 = vmatmul.mubr.f32.vlgmr.msra.gmra.mrb[92].mxu1 %v10335_v46  ;;  %v10345_v46 = vld [vmem:[%s22628_s1 + $0xf70] sm:$0xff] }
 0x465   : > { %11403 = vmatprep.subr.bf16.mxu0 %v19944_v9  ;;  %11649 = vmatpush1.bf16.msra.mxu1 %v20705_v50  ;;  %v21279_v29 = vpop.f32.mrb[50].mxu0  ;;  %v23824_v50 = vld [vmem:[#allocation182_spill] sm:$0xff]  ;;  %v23830_v35 = vld [vmem:[#allocation29_spill] sm:$0xff] }
 0x466   : > { %8216 = vmatprep.mubr.f32.mxu0 %v10208_v61  ;;  %11651 = vmatprep.subr.bf16.mxu1 %v23823_v33  ;;  %v7732_v5 = vpop.f32.mrb[51].mxu0  ;;  %v21294_v61 = vpop.permute.xlu1 %14227 }
 0x467   : > { %8217 = vmatmul.mubr.f32.gmra.mrb[54].mxu0 %v10207_v51  ;;  %9448 = vmatprep.mubr.f32.mxu1 %v10346_v25  ;;  %v23825_v51 = vld [vmem:[#allocation30_spill] sm:$0xff]  ;;  %v23826_v25 = vld [vmem:[#allocation172_spill] sm:$0xff] }
 0x468   : > { %5682 = vrot.lane.b32.xlu0 %v5604_v49, %s14770_s10  ;;  %11405 = vmatpush1.bf16.msra.mxu0 %v23824_v50  ;;  %v23829_v49 = vld [vmem:[#allocation212_spill] sm:$0xff] }
 0x469   : > { %9449 = vmatmul.mubr.f32.gmra.mrb[94].mxu1 %v10345_v46  ;;  %5684 = vrot.lane.b32.xlu1 %v5606_v10, %s14770_s10  ;;  %v23827_v10 = vunpack.i.l.bf16 %v23826_v25  ;;  %v23828_v46 = vunpack.i.h.bf16 %v23826_v25  ;;  %v6943_v50 = vpop.f32.mrb[44].mxu1  ;;  %v23831_v59 = vpack.c.bf16 %v23829_v49, %v23830_v35  ;;  %v23833_v25 = vld [vmem:[#allocation185_spill] sm:$0xff]  ;;  %v23052_v49 = vunpack.i.l.bf16 %v21169_v14 }
 0x46a   : > { %11407 = vmatprep.subr.bf16.mxu0 %v23825_v51  ;;  %11653 = vmatpush1.bf16.msra.mxu1 %v20737_v34  ;;  %v10355_v34 = vld [vmem:[%s22628_s1 + $0xfc0] sm:$0xff]  ;;  %v21324_v23 = vadd.f32 %v6943_v50, %v20901_v41 }
 0x46b   : > { %v3720_v33 = vsel %vm3666_vm7, %v23827_v10, %v23051_v26  ;;  %v3725_v5 = vsel %vm3666_vm7, %v23828_v46, %v23050_v43  ;;  %8222 = vmatprep.mubr.f32.mxu0 %v10218_v13  ;;  %11655 = vmatprep.subr.bf16.mxu1 %v23831_v59  ;;  %v6945_v10 = vpop.f32.mrb[45].mxu1  ;;  %v10228_v59 = vld [vmem:[%s22628_s1 + $0xbc8] sm:$0xff]  ;;  %v10227_v41 = vld [vmem:[%s22628_s1 + $0xbc0] sm:$0xff]  ;;  %v23854_v13 = vld [vmem:[#allocation189_spill] sm:$0xff] }
 0x46c   : > { %23832 = vst [vmem:[#allocation78_spill] sm:$0xff] %v21324_v23  ;;  %8223 = vmatmul.mubr.f32.gmra.mrb[56].mxu0 %v10217_v47  ;;  %9453 = vmatprep.mubr.f32.mxu1 %v10356_v31  ;;  %v21328_v46 = vpack.c.bf16 %v3725_v5, %v3720_v33  ;;  %v23834_v47 = vunpack.i.l.bf16 %v21133_v37  ;;  %v23835_v31 = vld [vmem:[#allocation178_spill] sm:$0xff]  ;;  %v23837_v5 = vunpack.i.h.bf16 %v21133_v37  ;;  %v21352_v10 = vpop.permute.xlu1 %14237  ;;  %v23876_v23 = vld [vmem:[#allocation199_spill] sm:$0xff] }
 0x46d   : > { %5686 = vrot.lane.b32.xlu0 %v5610_v44, %s14770_s10  ;;  %11409 = vmatpush1.bf16.msra.mxu0 %v23833_v25  ;;  %v10366_v44 = vld [vmem:[%s22628_s1 + $0x1018] sm:$0xff]  ;;  %v23836_v35 = vunpack.i.l.bf16 %v23835_v31  ;;  %v23838_v50 = vunpack.i.h.bf16 %v23835_v31  ;;  %v10365_v25 = vld [vmem:[%s22628_s1 + $0x1010] sm:$0xff] }
 0x46e   : > { %9454 = vmatmul.mubr.f32.gmra.mrb[52].mxu1 %v10355_v34  ;;  %5688 = vrot.lane.b32.xlu1 %v5612_v27, %s14770_s10  ;;  %v6948_v34 = vpop.f32.mrb[46].mxu1  ;;  %v23841_v31 = vld [vmem:[#allocation34_spill] sm:$0xff] }
 0x46f   : > { %v3730_v33 = vsel %vm3666_vm7, %v23836_v35, %v23834_v47  ;;  %v3735_v27 = vsel %vm3666_vm7, %v23838_v50, %v23837_v5  ;;  %11411 = vmatprep.subr.bf16.mxu0 %v21328_v46  ;;  %11657 = vmatpush1.bf16.msra.mxu1 %v20769_v8  ;;  %v21360_v43 = vadd.f32 %v6948_v34, %v20934_v0  ;;  %v6950_v47 = vpop.f32.mrb[47].mxu1  ;;  %v23840_v35 = vld [vmem:[#allocation217_spill] sm:$0xff]  ;;  %v10238_v8 = vld [vmem:[%s22628_s1 + $0xc18] sm:$0xff] }
 0x470   : > { %8228 = vmatprep.mubr.f32.mxu0 %v10228_v59  ;;  %v23842_v26 = vpack.c.bf16 %v23840_v35, %v23841_v31  ;;  %9459 = vmatprep.mubr.f32.mxu1 %v10366_v44  ;;  %v21365_v5 = vpack.c.bf16 %v3735_v27, %v3730_v33  ;;  %v23843_v0 = vld [vmem:[#allocation6_spill] sm:$0xff]  ;;  %v10237_v59 = vld [vmem:[%s22628_s1 + $0xc10] sm:$0xff]  ;;  %v23846_v27 = vunpack.i.h.bf16 %v21169_v14  ;;  %v10375_v35 = vld [vmem:[%s22628_s1 + $0x1060] sm:$0xff] }
 0x471   : > { %23839 = vst [vmem:[#allocation77_spill] sm:$0xff] %v21360_v43  ;;  %8229 = vmatmul.mubr.f32.gmra.mrb[58].mxu0 %v10227_v41  ;;  %v23844_v41 = vld [vmem:[#allocation179_spill] sm:$0xff]  ;;  %v21389_v47 = vpop.f32.mrb[4].mxu1 }
 0x472   : > { %11659 = vmatprep.subr.bf16.mxu1 %v23842_v26  ;;  %11413 = vmatpush1.bf16.msra.mxu0 %v23843_v0  ;;  %v10376_v26 = vld [vmem:[%s22628_s1 + $0x1068] sm:$0xff]  ;;  %v23845_v44 = vunpack.i.l.bf16 %v23844_v41  ;;  %v23847_v34 = vunpack.i.h.bf16 %v23844_v41  ;;  %23848 = vst [vmem:[#allocation84_spill] sm:$0xff] %v21389_v47  ;;  %v21396_v31 = vpop.f32.mrb[5].mxu1  ;;  %v23850_v0 = vld [vmem:[#allocation215_spill] sm:$0xff]  ;;  %v21401_v41 = vpop.permute.xlu1 %14247 }
 0x473   : > { %9460 = vmatmul.mubr.f32.gmra.mrb[54].mxu1 %v10365_v25  ;;  %11415 = vmatprep.subr.bf16.mxu0 %v21365_v5  ;;  %23849 = vst [vmem:[#allocation83_spill] sm:$0xff] %v21396_v31  ;;  %23853 = vst [vmem:[#allocation88_spill] sm:$0xff] %v21401_v41 }
 0x474   : > { %v3740_v33 = vsel %vm3666_vm7, %v23845_v44, %v23052_v49  ;;  %v3745_v25 = vsel %vm3666_vm7, %v23847_v34, %v23846_v27  ;;  %11661 = vmatpush1.bf16.msra.mxu1 %v20799_v36  ;;  %8234 = vmatprep.mubr.f32.mxu0 %v10238_v8  ;;  %v23851_v44 = vld [vmem:[#allocation33_spill] sm:$0xff]  ;;  %v10248_v36 = vld [vmem:[%s22628_s1 + $0xc68] sm:$0xff]  ;;  %v10386_v8 = vld [vmem:[%s22628_s1 + $0x10b8] sm:$0xff] }
 0x475   : > { %v23852_v49 = vpack.c.bf16 %v23850_v0, %v23851_v44  ;;  %8235 = vmatmul.mubr.f32.gmra.mrb[60].mxu0 %v10237_v59  ;;  %9465 = vmatprep.mubr.f32.mxu1 %v10376_v26  ;;  %v21403_v27 = vpack.c.bf16 %v3745_v25, %v3740_v33  ;;  %v23855_v59 = vunpack.i.l.bf16 %v21205_v54  ;;  %v23856_v26 = vld [vmem:[#allocation183_spill] sm:$0xff]  ;;  %v23858_v0 = vunpack.i.h.bf16 %v21205_v54  ;;  %v10385_v34 = vld [vmem:[%s22628_s1 + $0x10b0] sm:$0xff] }
 0x476   : > { %11417 = vmatpush1.bf16.msra.mxu0 %v23854_v13  ;;  %v23857_v33 = vunpack.i.l.bf16 %v23856_v26  ;;  %v23859_v44 = vunpack.i.h.bf16 %v23856_v26  ;;  %8240 = vmatprep.mubr.f32.mxu0 %v10248_v36  ;;  %v10257_v36 = vld [vmem:[%s22628_s1 + $0xcb0] sm:$0xff] }
 0x477   : > { %11663 = vmatprep.subr.bf16.mxu1 %v23852_v49  ;;  %9466 = vmatmul.mubr.f32.gmra.mrb[56].mxu1 %v10375_v35  ;;  %v10247_v49 = vld [vmem:[%s22628_s1 + $0xc60] sm:$0xff]  ;;  %v21427_v35 = vpop.f32.mrb[6].mxu1 }
 0x478   : > { %v4103_v25 = vsel %vm4099_vm8, %v23857_v33, %v23855_v59  ;;  %v4108_v13 = vsel %vm4099_vm8, %v23859_v44, %v23858_v0  ;;  %23860 = vst [vmem:[#allocation12_spill] sm:$0xff] %v21427_v35  ;;  %11419 = vmatprep.subr.bf16.mxu0 %v21403_v27  ;;  %11665 = vmatpush1.bf16.msra.mxu1 %v20832_v18  ;;  %v21434_v50 = vpop.f32.mrb[7].mxu1  ;;  %v23862_v59 = vld [vmem:[#allocation37_spill] sm:$0xff]  ;;  %v23863_v33 = vld [vmem:[#allocation38_spill] sm:$0xff]  ;;  %v21465_v18 = vpop.permute.xlu1 %14257  ;;  %v10395_v44 = vld [vmem:[%s22628_s1 + $0x1100] sm:$0xff] }
 0x479   : > { %23861 = vst [vmem:[#allocation11_spill] sm:$0xff] %v21434_v50  ;;  %v23864_v43 = vpack.c.bf16 %v23862_v59, %v23863_v33  ;;  %8241 = vmatmul.mubr.f32.gmra.mrb[62].mxu0 %v10247_v49  ;;  %9471 = vmatprep.mubr.f32.mxu1 %v10386_v8  ;;  %v21439_v26 = vpack.c.bf16 %v4108_v13, %v4103_v25  ;;  %v10258_v0 = vld [vmem:[%s22628_s1 + $0xcb8] sm:$0xff]  ;;  %v23865_v35 = vld [vmem:[#allocation9_spill] sm:$0xff]  ;;  %v23866_v49 = vunpack.i.l.bf16 %v21235_v45  ;;  %v23869_v59 = vunpack.i.h.bf16 %v21235_v45 }
 0x47a   : > { %11421 = vmatpush1.bf16.msra.mxu0 %v23865_v35  ;;  %v23867_v8 = vld [vmem:[#allocation181_spill] sm:$0xff]  ;;  %v21463_v35 = vpop.f32.mrb[8].mxu1  ;;  %8246 = vmatprep.mubr.f32.mxu0 %v10258_v0  ;;  %v10267_v0 = vld [vmem:[%s22628_s1 + $0xd00] sm:$0xff] }
 0x47b   : > { %11667 = vmatprep.subr.bf16.mxu1 %v23864_v43  ;;  %9472 = vmatmul.mubr.f32.gmra.mrb[58].mxu1 %v10385_v34  ;;  %v10396_v43 = vld [vmem:[%s22628_s1 + $0x1108] sm:$0xff]  ;;  %v23868_v25 = vunpack.i.l.bf16 %v23867_v8  ;;  %v23870_v33 = vunpack.i.h.bf16 %v23867_v8  ;;  %23871 = vst [vmem:[#allocation87_spill] sm:$0xff] %v21463_v35  ;;  %v21472_v50 = vpop.f32.mrb[9].mxu1  ;;  %v10405_v35 = vld [vmem:[%s22628_s1 + $0x1150] sm:$0xff] }
 0x47c   : > { %11423 = vmatprep.subr.bf16.mxu0 %v21439_v26  ;;  %11669 = vmatpush1.bf16.msra.mxu1 %v20865_v11  ;;  %23872 = vst [vmem:[#allocation92_spill] sm:$0xff] %v21472_v50  ;;  %v21503_v11 = vpop.permute.xlu0 %14262 }
 0x47d   : > { %v4113_v13 = vsel %vm4099_vm8, %v23868_v25, %v23866_v49  ;;  %v4118_v34 = vsel %vm4099_vm8, %v23870_v33, %v23869_v59  ;;  %v23873_v49 = vld [vmem:[#allocation42_spill] sm:$0xff]  ;;  %v23874_v25 = vld [vmem:[#allocation219_spill] sm:$0xff]  ;;  %8247 = vmatmul.mubr.f32.gmra.mrb[64].mxu0 %v10257_v36  ;;  %9477 = vmatprep.mubr.f32.mxu1 %v10396_v43  ;;  %v10268_v33 = vld [vmem:[%s22628_s1 + $0xd08] sm:$0xff]  ;;  %v23877_v43 = vunpack.i.l.bf16 %v21265_v42  ;;  %v14264_v3 = vunpack.i.l.bf16 %v21503_v11 }
 0x47e   : > { %v23875_v8 = vpack.c.bf16 %v23873_v49, %v23874_v25  ;;  %v21477_v59 = vpack.c.bf16 %v4118_v34, %v4113_v13  ;;  %11425 = vmatpush1.bf16.msra.mxu0 %v23876_v23  ;;  %v10406_v36 = vld [vmem:[%s22628_s1 + $0x1158] sm:$0xff]  ;;  %v23878_v13 = vld [vmem:[#allocation184_spill] sm:$0xff]  ;;  %v23880_v25 = vunpack.i.h.bf16 %v21265_v42  ;;  %8252 = vmatprep.mubr.f32.mxu0 %v10268_v33  ;;  %v10277_v33 = vld [vmem:[%s22628_s1 + $0xd50] sm:$0xff] }
 0x47f   : > { %9478 = vmatmul.mubr.f32.gmra.mrb[60].mxu1 %v10395_v44  ;;  %v23879_v34 = vunpack.i.l.bf16 %v23878_v13  ;;  %v21501_v44 = vpop.f32.mrb[10].mxu1 }
 0x480   : > { %11671 = vmatprep.subr.bf16.mxu1 %v23875_v8  ;;  %v23881_v8 = vunpack.i.h.bf16 %v23878_v13  ;;  %23882 = vst [vmem:[#allocation16_spill] sm:$0xff] %v21501_v44  ;;  %11427 = vmatprep.subr.bf16.mxu0 %v21477_v59  ;;  %v21510_v50 = vpop.f32.mrb[11].mxu1  ;;  %v10415_v44 = vld [vmem:[%s22628_s1 + $0x11a0] sm:$0xff] }
 0x481   : > { %v4123_v49 = vsel %vm4099_vm8, %v23879_v34, %v23877_v43  ;;  %11673 = vmatpush1.bf16.msra.mxu1 %v20895_v19  ;;  %23883 = vst [vmem:[#allocation15_spill] sm:$0xff] %v21510_v50  ;;  %v23884_v43 = vld [vmem:[#allocation222_spill] sm:$0xff]  ;;  %v23885_v34 = vld [vmem:[#allocation41_spill] sm:$0xff]  ;;  %8253 = vmatmul.mubr.f32.gmra.mrb[66].mxu0 %v10267_v0  ;;  %v23887_v50 = vld [vmem:[#allocation200_spill] sm:$0xff] }
 0x482   : > { %v4128_v23 = vsel %vm4099_vm8, %v23881_v8, %v23880_v25  ;;  %v23886_v13 = vpack.c.bf16 %v23884_v43, %v23885_v34  ;;  %v21515_v25 = vpop.permute.xlu1 %14267  ;;  %9483 = vmatprep.mubr.f32.mxu1 %v10406_v36  ;;  %v10278_v19 = vld [vmem:[%s22628_s1 + $0xd58] sm:$0xff]  ;;  %11429 = vmatpush1.bf16.msra.mxu0 %v23887_v50  ;;  %v10416_v0 = vld [vmem:[%s22628_s1 + $0x11a8] sm:$0xff]  ;;  %v23888_v36 = vunpack.i.l.bf16 %v21294_v61  ;;  %v23891_v34 = vunpack.i.h.bf16 %v21294_v61 }
 0x483   : > { %v21517_v8 = vpack.c.bf16 %v4128_v23, %v4123_v49  ;;  %9484 = vmatmul.mubr.f32.gmra.mrb[62].mxu1 %v10405_v35  ;;  %v23889_v49 = vld [vmem:[#allocation4_spill] sm:$0xff]  ;;  %v21541_v35 = vpop.f32.mrb[12].mxu1  ;;  %8258 = vmatprep.mubr.f32.mxu0 %v10278_v19  ;;  %v14265_v19 = vunpack.i.h.bf16 %v21503_v11 }
 0x484   : > { %11675 = vmatprep.subr.bf16.mxu1 %v23886_v13  ;;  %v23890_v23 = vunpack.i.l.bf16 %v23889_v49  ;;  %v23892_v13 = vunpack.i.h.bf16 %v23889_v49  ;;  %23893 = vst [vmem:[#allocation91_spill] sm:$0xff] %v21541_v35  ;;  %v21548_v47 = vpop.f32.mrb[13].mxu1  ;;  %v21553_v49 = vpop.permute.xlu0 %14272  ;;  %9489 = vmatprep.mubr.f32.mxu1 %v10416_v0  ;;  %v23899_v0 = vunpack.i.l.bf16 %v21352_v10 }
 0x485   : > { %11431 = vmatprep.subr.bf16.mxu0 %v21517_v8  ;;  %11677 = vmatpush1.bf16.msra.mxu1 %v20928_v21  ;;  %23894 = vst [vmem:[#allocation96_spill] sm:$0xff] %v21548_v47  ;;  %v10288_v21 = vld [vmem:[%s22628_s1 + $0xda8] sm:$0xff]  ;;  %v23898_v47 = vld [vmem:[#allocation10_spill] sm:$0xff]  ;;  %v14274_v60 = vunpack.i.l.bf16 %v21553_v49 }
 0x486   : > { %v4133_v43 = vsel %vm4099_vm8, %v23890_v23, %v23888_v36  ;;  %v4138_v50 = vsel %vm4099_vm8, %v23892_v13, %v23891_v34  ;;  %v23895_v36 = vld [vmem:[#allocation45_spill] sm:$0xff]  ;;  %v23896_v23 = vld [vmem:[#allocation46_spill] sm:$0xff]  ;;  %v21555_v34 = vpop.permute.xlu1 %14277  ;;  %8259 = vmatmul.mubr.f32.gmra.mrb[68].mxu0 %v10277_v33 }
 0x487   : > { %v23897_v31 = vpack.c.bf16 %v23895_v36, %v23896_v23  ;;  %v21557_v13 = vpack.c.bf16 %v4138_v50, %v4133_v43  ;;  %11433 = vmatpush1.bf16.msra.mxu0 %v23898_v47  ;;  %9490 = vmatmul.mubr.f32.gmra.mrb[64].mxu1 %v10415_v44  ;;  %v10426_v33 = vld [vmem:[%s22628_s1 + $0x11f8] sm:$0xff]  ;;  %v23902_v23 = vunpack.i.h.bf16 %v21352_v10  ;;  %v21581_v44 = vpop.f32.mrb[14].mxu1 }
 0x488   : > { %v23900_v43 = vld [vmem:[#allocation186_spill] sm:$0xff]  ;;  %23904 = vst [vmem:[#allocation20_spill] sm:$0xff] %v21581_v44  ;;  %8264 = vmatprep.mubr.f32.mxu0 %v10288_v21  ;;  %v21596_v44 = vpop.permute.xlu0 %14282  ;;  %9495 = vmatprep.mubr.f32.mxu1 %v10426_v33  ;;  %v23911_v33 = vunpack.i.l.bf16 %v21401_v41 }
 0x489   : > { %11679 = vmatprep.subr.bf16.mxu1 %v23897_v31  ;;  %v10287_v31 = vld [vmem:[%s22628_s1 + $0xda0] sm:$0xff]  ;;  %v23901_v50 = vunpack.i.l.bf16 %v23900_v43  ;;  %v23903_v35 = vunpack.i.h.bf16 %v23900_v43  ;;  %11435 = vmatprep.subr.bf16.mxu0 %v21557_v13  ;;  %v23906_v43 = vld [vmem:[#allocation48_spill] sm:$0xff] }
 0x48a   : > { %11681 = vmatpush1.bf16.msra.mxu1 %v20967_v2  ;;  %v21598_v11 = vpop.permute.xlu1 %14287  ;;  %8265 = vmatmul.mubr.f32.gmra.mrb[70].mxu0 %v10287_v31  ;;  %v10436_v31 = vld [vmem:[%s22628_s1 + $0x1248] sm:$0xff] }
 0x48b   : > { %v4143_v36 = vsel %vm4099_vm8, %v23901_v50, %v23899_v0  ;;  %v4148_v47 = vsel %vm4099_vm8, %v23903_v35, %v23902_v23  ;;  %v10425_v0 = vld [vmem:[%s22628_s1 + $0x11f0] sm:$0xff]  ;;  %v21590_v50 = vpop.f32.mrb[15].mxu1  ;;  %v23908_v35 = vpack.c.bf16 %v23906_v43, %v23907_v63  ;;  %v14275_v23 = vunpack.i.h.bf16 %v21553_v49  ;;  %8270 = vmatprep.mubr.f32.mxu0 %v10298_v17  ;;  %v23920_v49 = vld [vmem:[#allocation52_spill] sm:$0xff] }
 0x48c   : > { %23905 = vst [vmem:[#allocation19_spill] sm:$0xff] %v21590_v50  ;;  %v21600_v2 = vpack.c.bf16 %v4148_v47, %v4143_v36  ;;  %v23910_v50 = vld [vmem:[#allocation197_spill] sm:$0xff]  ;;  %9496 = vmatmul.mubr.f32.gmra.mrb[66].mxu1 %v10425_v0  ;;  %v23922_v38 = vpack.c.bf16 %v23920_v49, %v23921_v12 }
 0x48d   : > { %11683 = vmatprep.subr.bf16.mxu1 %v23908_v35  ;;  %11437 = vmatpush1.bf16.msra.mxu0 %v23910_v50  ;;  %v10297_v63 = vld [vmem:[%s22628_s1 + $0xdf0] sm:$0xff]  ;;  %v23914_v35 = vunpack.i.h.bf16 %v21401_v41  ;;  %v21623_v50 = vpop.f32.mrb[16].mxu1 }
 0x48e   : > { %23909 = vst [vmem:[#allocation95_spill] sm:$0xff] %v21600_v2  ;;  %v23912_v36 = vld [vmem:[#allocation5_spill] sm:$0xff]  ;;  %23916 = vst [vmem:[#allocation100_spill] sm:$0xff] %v21623_v50  ;;  %11439 = vmatprep.subr.bf16.mxu0 %v21600_v2  ;;  %11685 = vmatpush1.bf16.msra.mxu1 %v21003_v22  ;;  %v21638_v50 = vpop.f32.mrb[17].mxu1  ;;  %v21643_v22 = vpop.permute.xlu0 %14292 }
 0x48f   : > { %v23913_v47 = vunpack.i.l.bf16 %v23912_v36  ;;  %v23915_v21 = vunpack.i.h.bf16 %v23912_v36  ;;  %23919 = vst [vmem:[#allocation24_spill] sm:$0xff] %v21638_v50  ;;  %11687 = vmatprep.subr.bf16.mxu1 %v23922_v38  ;;  %v21645_v2 = vpop.permute.xlu1 %14297  ;;  %8271 = vmatmul.mubr.f32.gmra.mrb[72].mxu0 %v10297_v63 }
 0x490   : > { %9501 = vmatprep.mubr.f32.mxu1 %v10436_v31  ;;  %v10307_v31 = vld [vmem:[%s22628_s1 + $0xe40] sm:$0xff] }
 0x491   : > { %v4153_v43 = vsel %vm4099_vm8, %v23913_v47, %v23911_v33  ;;  %v4158_v0 = vsel %vm4099_vm8, %v23915_v21, %v23914_v35  ;;  %v10435_v33 = vld [vmem:[%s22628_s1 + $0x1240] sm:$0xff]  ;;  %v23917_v47 = vunpack.i.l.bf16 %v19725_v6  ;;  %v23918_v21 = vunpack.i.h.bf16 %v19725_v6  ;;  %v10308_v6 = vld [vmem:[%s22628_s1 + $0xe48] sm:$0xff] }
 0x492   : > { %v21647_v41 = vpack.c.bf16 %v4158_v0, %v4153_v43  ;;  %9502 = vmatmul.mubr.f32.gmra.mrb[68].mxu1 %v10435_v33  ;;  %v10446_v43 = vld [vmem:[%s22628_s1 + $0x1298] sm:$0xff]  ;;  %v23927_v0 = vunpack.i.h.bf16 %v21465_v18  ;;  %v14279_v33 = vunpack.i.l.bf16 %v21555_v34  ;;  %8276 = vmatprep.mubr.f32.mxu0 %v10308_v6  ;;  %v10456_v6 = vld [vmem:[%s22628_s1 + $0x12e8] sm:$0xff] }
 0x493   : > { %v3268_v36 = vsel %vm3233_vm6, %v23917_v47, %v14264_v3  ;;  %v3273_v35 = vsel %vm3233_vm6, %v23918_v21, %v14265_v19  ;;  %v23923_v3 = vunpack.i.l.bf16 %v21465_v18  ;;  %v23924_v19 = vld [vmem:[#allocation7_spill] sm:$0xff]  ;;  %v23926_v21 = vld [vmem:[#allocation14_spill] sm:$0xff]  ;;  %11689 = vmatpush1.bf16.msra.mxu1 %v21035_v58  ;;  %v21690_v38 = vpop.permute.xlu1 %14307  ;;  %8277 = vmatmul.mubr.f32.gmra.mrb[74].mxu0 %v10307_v31 }
 0x494   : > { %v23925_v17 = vunpack.i.l.bf16 %v23924_v19  ;;  %11441 = vmatpush1.bf16.msra.mxu0 %v23926_v21  ;;  %v11690_v63 = vpack.c.bf16 %v3273_v35, %v3268_v36  ;;  %v23928_v49 = vunpack.i.h.bf16 %v23924_v19  ;;  %v14280_v21 = vunpack.i.h.bf16 %v21555_v34  ;;  %v10445_v36 = vld [vmem:[%s22628_s1 + $0x1290] sm:$0xff]  ;;  %v21688_v34 = vpop.permute.xlu0 %14302  ;;  %9507 = vmatprep.mubr.f32.mxu1 %v10446_v43 }
 0x495   : > { %11443 = vmatprep.subr.bf16.mxu0 %v21647_v41  ;;  %v23930_v35 = vunpack.i.l.bf16 %v19764_v16 }
 0x496   : > { %v4163_v47 = vsel %vm4099_vm8, %v23925_v17, %v23923_v3  ;;  %v4168_v3 = vsel %vm4099_vm8, %v23928_v49, %v23927_v0  ;;  %v21671_v17 = vpop.f32.mrb[18].mxu1  ;;  %v23931_v0 = vunpack.i.h.bf16 %v19764_v16  ;;  %11691 = vmatprep.subr.bf16.mxu1 %v11690_v63  ;;  %9508 = vmatmul.mubr.f32.gmra.mrb[70].mxu1 %v10445_v36  ;;  %v23934_v63 = vunpack.i.l.bf16 %v21515_v25 }
 0x497   : > { %23929 = vst [vmem:[#allocation23_spill] sm:$0xff] %v21671_v17  ;;  %v3278_v19 = vsel %vm3233_vm6, %v23930_v35, %v14274_v60  ;;  %v21686_v12 = vpop.f32.mrb[19].mxu1  ;;  %v21692_v58 = vpack.c.bf16 %v4168_v3, %v4163_v47  ;;  %v10318_v60 = vld [vmem:[%s22628_s1 + $0xe98] sm:$0xff]  ;;  %v23933_v35 = vld [vmem:[#allocation188_spill] sm:$0xff]  ;;  %v23935_v47 = vld [vmem:[#allocation187_spill] sm:$0xff]  ;;  %v23937_v3 = vunpack.i.h.bf16 %v21515_v25  ;;  %11693 = vmatpush1.bf16.msra.mxu1 %v21067_v48  ;;  %v21733_v50 = vpop.permute.xlu1 %14317  ;;  %9513 = vmatprep.mubr.f32.mxu1 %v10456_v6  ;;  %v14290_v6 = vunpack.i.h.bf16 %v21598_v11 }
 0x498   : > { %v3283_v49 = vsel %vm3233_vm6, %v23931_v0, %v14275_v23  ;;  %23932 = vst [vmem:[#allocation99_spill] sm:$0xff] %v21686_v12  ;;  %11445 = vmatpush1.bf16.msra.mxu0 %v23933_v35  ;;  %v10317_v23 = vld [vmem:[%s22628_s1 + $0xe90] sm:$0xff]  ;;  %v23936_v31 = vunpack.i.l.bf16 %v23935_v47  ;;  %v23938_v0 = vunpack.i.h.bf16 %v23935_v47  ;;  %v14284_v35 = vunpack.i.l.bf16 %v21596_v44  ;;  %8282 = vmatprep.mubr.f32.mxu0 %v10318_v60  ;;  %v10327_v60 = vld [vmem:[%s22628_s1 + $0xee0] sm:$0xff] }
 0x499   : > { %v11694_v16 = vpack.c.bf16 %v3283_v49, %v3278_v19  ;;  %v21714_v19 = vpop.f32.mrb[20].mxu1  ;;  %v14285_v49 = vunpack.i.h.bf16 %v21596_v44  ;;  %11447 = vmatprep.subr.bf16.mxu0 %v21692_v58  ;;  %v21731_v44 = vpop.permute.xlu0 %14312  ;;  %8283 = vmatmul.mubr.f32.gmra.mrb[76].mxu0 %v10317_v23 }
 0x49a   : > { %v4173_v43 = vsel %vm4099_vm8, %v23936_v31, %v23934_v63  ;;  %v4178_v36 = vsel %vm4099_vm8, %v23938_v0, %v23937_v3  ;;  %23939 = vst [vmem:[#allocation104_spill] sm:$0xff] %v21714_v19  ;;  %v10455_v63 = vld [vmem:[%s22628_s1 + $0x12e0] sm:$0xff]  ;;  %v23940_v31 = vld [vmem:[#allocation13_spill] sm:$0xff]  ;;  %v21729_v12 = vpop.f32.mrb[21].mxu1 }
 0x49b   : > { %v23941_v17 = vunpack.i.l.bf16 %v23940_v31  ;;  %v23942_v3 = vunpack.i.h.bf16 %v23940_v31  ;;  %23943 = vst [vmem:[#allocation28_spill] sm:$0xff] %v21729_v12  ;;  %11695 = vmatprep.subr.bf16.mxu1 %v11694_v16  ;;  %v21735_v48 = vpack.c.bf16 %v4178_v36, %v4173_v43  ;;  %9514 = vmatmul.mubr.f32.gmra.mrb[96].mxu1 %v10455_v63  ;;  %v10466_v16 = vld [vmem:[%s22628_s1 + $0x1338] sm:$0xff]  ;;  %v21747_v23 = vpop.f32.mrb[22].mxu1  ;;  %v14289_v43 = vunpack.i.l.bf16 %v21598_v11  ;;  %v10465_v36 = vld [vmem:[%s22628_s1 + $0x1330] sm:$0xff] }
 0x49c   : > { %23945 = vst [vmem:[#allocation27_spill] sm:$0xff] %v21747_v23  ;;  %11697 = vmatpush1.bf16.msra.mxu1 %v21107_v56  ;;  %v23946_v63 = vld [vmem:[#allocation18_spill] sm:$0xff]  ;;  %v10180_v56 = vld [vmem:[%s22628_s1 + $0xa48] sm:$0xff]  ;;  %v21769_v23 = vpop.permute.xlu1 %14327  ;;  %9517 = vmatprep.mubr.f32.mxu1 %v10466_v16 }
 0x49d   : > { %v3288_v47 = vsel %vm3233_vm6, %v23941_v17, %v14279_v33  ;;  %v3293_v0 = vsel %vm3233_vm6, %v23942_v3, %v14280_v21  ;;  %v10328_v17 = vld [vmem:[%s22628_s1 + $0xee8] sm:$0xff]  ;;  %v23947_v31 = vunpack.i.l.bf16 %v23946_v63  ;;  %v23948_v3 = vunpack.i.h.bf16 %v23946_v63  ;;  %v21767_v11 = vpop.permute.xlu0 %14322  ;;  %v10190_v16 = vld [vmem:[%s22628_s1 + $0xa98] sm:$0xff] }
 0x49e   : > { %v23944_v33 = vld [vmem:[#allocation192_spill] sm:$0xff]  ;;  %v11698_v21 = vpack.c.bf16 %v3293_v0, %v3288_v47  ;;  %8288 = vmatprep.mubr.f32.mxu0 %v10328_v17  ;;  %v10179_v17 = vld [vmem:[%s22628_s1 + $0xa40] sm:$0xff] }
 0x49f   : > { %11449 = vmatpush1.bf16.msra.mxu0 %v23944_v33  ;;  %v3298_v47 = vsel %vm3233_vm6, %v23947_v31, %v14284_v35  ;;  %v3303_v0 = vsel %vm3233_vm6, %v23948_v3, %v14285_v49  ;;  %v21762_v33 = vpop.f32.mrb[23].mxu1  ;;  %v10476_v35 = vld [vmem:[%s22628_s1 + $0x1388] sm:$0xff]  ;;  %9518 = vmatmul.mubr.f32.gmra.mrb[98].mxu1 %v10465_v36  ;;  %v14295_v31 = vunpack.i.h.bf16 %v21643_v22  ;;  %v14294_v3 = vunpack.i.l.bf16 %v21643_v22  ;;  %v23952_v36 = vld [vmem:[#allocation202_spill] sm:$0xff] }
 0x4a0   : > { %11451 = vmatprep.subr.bf16.mxu0 %v21735_v48  ;;  %23949 = vst [vmem:[#allocation103_spill] sm:$0xff] %v21762_v33  ;;  %11699 = vmatprep.subr.bf16.mxu1 %v11698_v21  ;;  %v23950_v63 = vld [vmem:[#allocation8_spill] sm:$0xff]  ;;  %v11702_v49 = vpack.c.bf16 %v3303_v0, %v3298_v47  ;;  %v21778_v21 = vpop.f32.mrb[24].mxu1  ;;  %v23953_v47 = vunpack.i.l.bf16 %v23952_v36  ;;  %v21802_v12 = vpop.permute.xlu1 %14337 }
 0x4a1   : > { %8289 = vmatmul.mubr.f32.gmra.mrb[78].mxu0 %v10327_v60  ;;  %23951 = vst [vmem:[#allocation108_spill] sm:$0xff] %v21778_v21  ;;  %11701 = vmatpush1.bf16.msra.mxu1 %v19794_v20  ;;  %v10475_v60 = vld [vmem:[%s22628_s1 + $0x1380] sm:$0xff]  ;;  %v21795_v22 = vpop.f32.mrb[25].mxu1  ;;  %v10486_v20 = vld [vmem:[%s22628_s1 + $0x13d8] sm:$0xff]  ;;  %v10348_v21 = vld [vmem:[%s22628_s1 + $0xf88] sm:$0xff] }
 0x4a2   : > { %8359 = vmatprep.mubr.f32.mxu0 %v10180_v56  ;;  %v3308_v0 = vsel %vm3233_vm6, %v23953_v47, %v14289_v43  ;;  %11703 = vmatprep.subr.bf16.mxu1 %v11702_v49  ;;  %v21800_v56 = vpop.permute.xlu0 %14332  ;;  %v14299_v49 = vunpack.i.l.bf16 %v21645_v2 }
 0x4a3   : > { %11453 = vmatpush1.bf16.msra.mxu0 %v23950_v63  ;;  %v23954_v63 = vunpack.i.h.bf16 %v23952_v36  ;;  %9521 = vmatprep.mubr.f32.mxu1 %v10476_v35  ;;  %v21807_v36 = vpop.f32.mrb[26].mxu1  ;;  %v14300_v35 = vunpack.i.h.bf16 %v21645_v2 }
 0x4a4   : > { %9522 = vmatmul.mubr.f32.gmra.mrb[100].mxu1 %v10475_v60  ;;  %23955 = vst [vmem:[#allocation32_spill] sm:$0xff] %v21807_v36  ;;  %v23956_v60 = vld [vmem:[#allocation22_spill] sm:$0xff]  ;;  %v21824_v2 = vpop.f32.mrb[27].mxu1  ;;  %v21831_v19 = vpop.permute.xlu1 %14347  ;;  %v14304_v36 = vunpack.i.l.bf16 %v21688_v34 }
 0x4a5   : > { %v3313_v33 = vsel %vm3233_vm6, %v23954_v63, %v14290_v6  ;;  %v10189_v6 = vld [vmem:[%s22628_s1 + $0xa90] sm:$0xff]  ;;  %11705 = vmatpush1.bf16.msra.mxu1 %v19847_v53  ;;  %9525 = vmatprep.mubr.f32.mxu1 %v10486_v20  ;;  %23959 = vst [vmem:[#allocation31_spill] sm:$0xff] %v21824_v2  ;;  %v10338_v53 = vld [vmem:[%s22628_s1 + $0xf38] sm:$0xff] }
 0x4a6   : > { %8360 = vmatmul.mubr.f32.vlgmr.msra.gmra.mrb[92].mxu0 %v10179_v17  ;;  %v11706_v43 = vpack.c.bf16 %v3313_v33, %v3308_v0  ;;  %v10485_v17 = vld [vmem:[%s22628_s1 + $0x13d0] sm:$0xff]  ;;  %v10200_v33 = vld [vmem:[%s22628_s1 + $0xae8] sm:$0xff]  ;;  %v23958_v0 = vunpack.i.h.bf16 %v23956_v60  ;;  %v21829_v20 = vpop.permute.xlu0 %14342 }
 0x4a7   : > { %8364 = vmatprep.mubr.f32.mxu0 %v10190_v16  ;;  %v23957_v16 = vunpack.i.l.bf16 %v23956_v60  ;;  %v7884_v60 = vpop.f32.mrb[80].mxu0 }
 0x4a8   : > { %v3676_v63 = vsel %vm3666_vm7, %v23958_v0, %v14295_v31  ;;  %11707 = vmatprep.subr.bf16.mxu1 %v11706_v43  ;;  %9526 = vmatmul.mubr.f32.gmra.mrb[102].mxu1 %v10485_v17  ;;  %v10199_v31 = vld [vmem:[%s22628_s1 + $0xae0] sm:$0xff]  ;;  %v7025_v43 = vpop.f32.mrb[28].mxu1  ;;  %v10210_v17 = vld [vmem:[%s22628_s1 + $0xb38] sm:$0xff] }
 0x4a9   : > { %v3671_v47 = vsel %vm3666_vm7, %v23957_v16, %v14294_v3  ;;  %v14305_v16 = vunpack.i.h.bf16 %v21688_v34  ;;  %11709 = vmatpush1.bf16.msra.mxu1 %v19840_v1  ;;  %9594 = vmatprep.mubr.f32.mxu1 %v10338_v53  ;;  %v21852_v34 = vadd.f32 %v7884_v60, %v21260_v39  ;;  %v7886_v1 = vpop.f32.mrb[81].mxu0  ;;  %v7027_v53 = vpop.f32.mrb[29].mxu1  ;;  %v10209_v39 = vld [vmem:[%s22628_s1 + $0xb30] sm:$0xff]  ;;  %v23963_v60 = vld [vmem:[#allocation26_spill] sm:$0xff] }
 0x4aa   : > { %8365 = vmatmul.mubr.f32.gmra.mrb[94].mxu0 %v10189_v6  ;;  %v11710_v3 = vpack.c.bf16 %v3676_v63, %v3671_v47  ;;  %v10337_v6 = vld [vmem:[%s22628_s1 + $0xf30] sm:$0xff]  ;;  %7102 = vrot.lane.b32.xlu0 %v7025_v43, %s14770_s10  ;;  %v21869_v43 = vpop.permute.xlu1 %14357 }
 0x4ab   : > { %8369 = vmatprep.mubr.f32.mxu0 %v10200_v33  ;;  %v23960_v33 = vld [vmem:[#allocation17_spill] sm:$0xff]  ;;  %7104 = vrot.lane.b32.xlu1 %v7027_v53, %s14770_s10 }
 0x4ac   : > { %v23961_v47 = vunpack.i.l.bf16 %v23960_v33  ;;  %v23962_v63 = vunpack.i.h.bf16 %v23960_v33  ;;  %11711 = vmatprep.subr.bf16.mxu1 %v11710_v3  ;;  %9595 = vmatmul.mubr.f32.vlgmr.msra.gmra.mrb[104].mxu1 %v10337_v6  ;;  %v23964_v3 = vunpack.i.l.bf16 %v23963_v60  ;;  %v10220_v6 = vld [vmem:[%s22628_s1 + $0xb88] sm:$0xff] }
 0x4ad   : > { %11713 = vmatpush1.bf16.msra.mxu1 %v19893_v32  ;;  %9599 = vmatprep.mubr.f32.mxu1 %v10348_v21  ;;  %v10358_v32 = vld [vmem:[%s22628_s1 + $0xfd8] sm:$0xff] }
 0x4ae   : > { %v3681_v0 = vsel %vm3666_vm7, %v23961_v47, %v14299_v49  ;;  %v3686_v2 = vsel %vm3666_vm7, %v23962_v63, %v14300_v35  ;;  %8370 = vmatmul.mubr.f32.gmra.mrb[52].mxu0 %v10199_v31  ;;  %v21859_v49 = vpop.permute.xlu0 %14352  ;;  %v3691_v33 = vsel %vm3666_vm7, %v23964_v3, %v14304_v36  ;;  %v7889_v47 = vpop.f32.mrb[82].mxu0  ;;  %v14310_v63 = vunpack.i.h.bf16 %v21690_v38 }
 0x4af   : > { %8375 = vmatprep.mubr.f32.mxu0 %v10210_v17  ;;  %v11714_v35 = vpack.c.bf16 %v3686_v2, %v3681_v0  ;;  %v14309_v31 = vunpack.i.l.bf16 %v21690_v38  ;;  %v10347_v2 = vld [vmem:[%s22628_s1 + $0xf80] sm:$0xff]  ;;  %v23965_v36 = vunpack.i.h.bf16 %v23963_v60  ;;  %v21882_v0 = vadd.f32 %v7889_v47, %v21279_v29  ;;  %v7031_v38 = vpop.f32.mrb[30].mxu1  ;;  %v7891_v21 = vpop.f32.mrb[83].mxu0  ;;  %v23966_v47 = vld [vmem:[#allocation21_spill] sm:$0xff] }
 0x4b0   : > { %v7033_v1 = vpop.f32.mrb[31].mxu1  ;;  %7106 = vrot.lane.b32.xlu0 %v7031_v38, %s14770_s10  ;;  %9600 = vmatmul.mubr.f32.gmra.mrb[106].mxu1 %v10347_v2  ;;  %v10219_v29 = vld [vmem:[%s22628_s1 + $0xb80] sm:$0xff]  ;;  %v14314_v60 = vunpack.i.l.bf16 %v21731_v44  ;;  %v21896_v3 = vpop.permute.xlu1 %14367  ;;  %v23967_v2 = vunpack.i.l.bf16 %v23966_v47  ;;  %v14320_v21 = vunpack.i.h.bf16 %v21733_v50 }
 0x4b1   : > { %v3696_v17 = vsel %vm3666_vm7, %v23965_v36, %v14305_v16  ;;  %11715 = vmatprep.subr.bf16.mxu1 %v11714_v35  ;;  %7108 = vrot.lane.b32.xlu1 %v7033_v1, %s14770_s10  ;;  %v14315_v35 = vunpack.i.h.bf16 %v21731_v44  ;;  %v23968_v36 = vunpack.i.h.bf16 %v23966_v47 }
 0x4b2   : > { %8376 = vmatmul.mubr.f32.gmra.mrb[54].mxu0 %v10209_v39  ;;  %v21889_v53 = vpop.permute.xlu0 %14362  ;;  %v11718_v16 = vpack.c.bf16 %v3696_v17, %v3691_v33  ;;  %11717 = vmatpush1.bf16.msra.mxu1 %v23816_v40  ;;  %v10357_v39 = vld [vmem:[%s22628_s1 + $0xfd0] sm:$0xff]  ;;  %v10230_v33 = vld [vmem:[%s22628_s1 + $0xbd8] sm:$0xff]  ;;  %v10368_v40 = vld [vmem:[%s22628_s1 + $0x1028] sm:$0xff]  ;;  %v21916_v17 = vpop.f32.mrb[48].mxu1 }
 0x4b3   : > { %8381 = vmatprep.mubr.f32.mxu0 %v10220_v6  ;;  %9604 = vmatprep.mubr.f32.mxu1 %v10358_v32  ;;  %v3701_v6 = vsel %vm3666_vm7, %v23967_v2, %v14309_v31  ;;  %v3706_v44 = vsel %vm3666_vm7, %v23968_v36, %v14310_v63  ;;  %v9145_v38 = vpop.f32.mrb[49].mxu1  ;;  %v10229_v32 = vld [vmem:[%s22628_s1 + $0xbd0] sm:$0xff]  ;;  %v14324_v36 = vunpack.i.l.bf16 %v21767_v11 }
 0x4b4   : > { %11719 = vmatprep.subr.bf16.mxu1 %v11718_v16  ;;  %5660 = vrot.lane.b32.xlu0 %v21129_v62, %s14770_s10  ;;  %v11722_v63 = vpack.c.bf16 %v3706_v44, %v3701_v6  ;;  %v14319_v62 = vunpack.i.l.bf16 %v21733_v50  ;;  %v21927_v1 = vpop.permute.xlu1 %5621  ;;  %v10240_v16 = vld [vmem:[%s22628_s1 + $0xc28] sm:$0xff]  ;;  %v21947_v2 = vpop.f32.mrb[50].mxu1  ;;  %v10239_v44 = vld [vmem:[%s22628_s1 + $0xc20] sm:$0xff]  ;;  %v23973_v38 = vunpack.i.h.bf16 %v21101_v15 }
 0x4b5   : > { %5662 = vrot.lane.b32.xlu1 %v21131_v24, %s14770_s10  ;;  %9605 = vmatmul.mubr.f32.gmra.mrb[52].mxu1 %v10357_v39  ;;  %v10367_v24 = vld [vmem:[%s22628_s1 + $0x1020] sm:$0xff]  ;;  %v9150_v6 = vpop.f32.mrb[51].mxu1 }
 0x4b6   : > { %8382 = vmatmul.mubr.f32.gmra.mrb[56].mxu0 %v10219_v29  ;;  %v21920_v31 = vpop.permute.xlu0 %5619  ;;  %11721 = vmatpush1.bf16.msra.mxu1 %v19942_v55  ;;  %v23969_v29 = vld [vmem:[#allocation209_spill] sm:$0xff]  ;;  %v10378_v55 = vld [vmem:[%s22628_s1 + $0x1078] sm:$0xff] }
 0x4b7   : > { %8387 = vmatprep.mubr.f32.mxu0 %v10230_v33  ;;  %9610 = vmatprep.mubr.f32.mxu1 %v10368_v40  ;;  %v23970_v39 = vunpack.i.l.bf16 %v23969_v29  ;;  %v23971_v47 = vunpack.i.h.bf16 %v23969_v29  ;;  %v23975_v29 = vunpack.i.h.bf16 %v21133_v37 }
 0x4b8   : > { %11723 = vmatprep.subr.bf16.mxu1 %v11722_v63  ;;  %5664 = vrot.lane.b32.xlu0 %v21152_v4, %s14770_s10  ;;  %v10377_v4 = vld [vmem:[%s22628_s1 + $0x1070] sm:$0xff]  ;;  %v3726_v63 = vsel %vm3666_vm7, %v23973_v38, %v14320_v21  ;;  %v23977_v38 = vunpack.i.h.bf16 %v21169_v14 }
 0x4b9   : > { %v3711_v33 = vsel %vm3666_vm7, %v23970_v39, %v14314_v60  ;;  %v3716_v50 = vsel %vm3666_vm7, %v23971_v47, %v14315_v35  ;;  %5666 = vrot.lane.b32.xlu1 %v21157_v57, %s14770_s10  ;;  %v14325_v60 = vunpack.i.h.bf16 %v21767_v11  ;;  %9611 = vmatmul.mubr.f32.gmra.mrb[54].mxu1 %v10367_v24  ;;  %v10250_v57 = vld [vmem:[%s22628_s1 + $0xc78] sm:$0xff]  ;;  %v23972_v11 = vunpack.i.l.bf16 %v21101_v15  ;;  %v21974_v24 = vpop.permute.xlu1 %5625 }
 0x4ba   : > { %8388 = vmatmul.mubr.f32.gmra.mrb[58].mxu0 %v10229_v32  ;;  %v11726_v35 = vpack.c.bf16 %v3716_v50, %v3711_v33  ;;  %11725 = vmatpush1.bf16.msra.mxu1 %v19944_v9  ;;  %v21969_v32 = vpop.permute.xlu0 %5623  ;;  %v10388_v9 = vld [vmem:[%s22628_s1 + $0x10c8] sm:$0xff]  ;;  %v23974_v15 = vunpack.i.l.bf16 %v21133_v37  ;;  %v14330_v33 = vunpack.i.h.bf16 %v21769_v23  ;;  %v14329_v47 = vunpack.i.l.bf16 %v21769_v23  ;;  %v10387_v50 = vld [vmem:[%s22628_s1 + $0x10c0] sm:$0xff]  ;;  %v10398_v37 = vld [vmem:[%s22628_s1 + $0x1118] sm:$0xff] }
 0x4bb   : > { %8393 = vmatprep.mubr.f32.mxu0 %v10240_v16  ;;  %9616 = vmatprep.mubr.f32.mxu1 %v10378_v55  ;;  %v3721_v40 = vsel %vm3666_vm7, %v23972_v11, %v14319_v62  ;;  %v10249_v62 = vld [vmem:[%s22628_s1 + $0xc70] sm:$0xff]  ;;  %v3736_v39 = vsel %vm3666_vm7, %v23975_v29, %v14325_v60  ;;  %v10260_v55 = vld [vmem:[%s22628_s1 + $0xcc8] sm:$0xff] }
 0x4bc   : > { %11727 = vmatprep.subr.bf16.mxu1 %v11726_v35  ;;  %v11730_v16 = vpack.c.bf16 %v3726_v63, %v3721_v40  ;;  %v3731_v21 = vsel %vm3666_vm7, %v23974_v15, %v14324_v36  ;;  %v14334_v36 = vunpack.i.l.bf16 %v21800_v56  ;;  %v10397_v11 = vld [vmem:[%s22628_s1 + $0x1110] sm:$0xff]  ;;  %v23976_v40 = vunpack.i.l.bf16 %v21169_v14 }
 0x4bd   : > { %9617 = vmatmul.mubr.f32.gmra.mrb[56].mxu1 %v10377_v4  ;;  %v11734_v23 = vpack.c.bf16 %v3736_v39, %v3731_v21  ;;  %v5641_v60 = vpop.permute.xlu1 %5640  ;;  %v10259_v4 = vld [vmem:[%s22628_s1 + $0xcc0] sm:$0xff]  ;;  %v3746_v63 = vsel %vm3666_vm7, %v23977_v38, %v14330_v33  ;;  %v10269_v14 = vld [vmem:[%s22628_s1 + $0xd10] sm:$0xff]  ;;  %v23979_v21 = vunpack.i.h.bf16 %v21205_v54  ;;  %v14340_v39 = vunpack.i.h.bf16 %v21802_v12 }
 0x4be   : > { %8394 = vmatmul.mubr.f32.gmra.mrb[60].mxu0 %v10239_v44  ;;  %11729 = vmatpush1.bf16.msra.mxu1 %v23825_v51  ;;  %v5639_v6 = vpop.permute.xlu0 %5638  ;;  %v14335_v51 = vunpack.i.h.bf16 %v21800_v56  ;;  %v5653_v44 = vadd.f32 %v5641_v60, %v20963_v28  ;;  %v10270_v56 = vld [vmem:[%s22628_s1 + $0xd18] sm:$0xff]  ;;  %v3741_v28 = vsel %vm3666_vm7, %v23976_v40, %v14329_v47  ;;  %v14339_v33 = vunpack.i.l.bf16 %v21802_v12 }
 0x4bf   : > { %8399 = vmatprep.mubr.f32.mxu0 %v10250_v57  ;;  %9622 = vmatprep.mubr.f32.mxu1 %v10388_v9  ;;  %v5646_v35 = vsel %vm5627_vm9, %v5639_v6, %v5641_v60  ;;  %v11738_v9 = vpack.c.bf16 %v3746_v63, %v3741_v28  ;;  %v10418_v12 = vld [vmem:[%s22628_s1 + $0x11b8] sm:$0xff]  ;;  %v10279_v6 = vld [vmem:[%s22628_s1 + $0xd60] sm:$0xff]  ;;  %v10417_v60 = vld [vmem:[%s22628_s1 + $0x11b0] sm:$0xff]  ;;  %v23982_v40 = vunpack.i.l.bf16 %v21265_v42  ;;  %v23983_v38 = vunpack.i.h.bf16 %v21265_v42 }
 0x4c0   : > { %11731 = vmatprep.subr.bf16.mxu1 %v11730_v16  ;;  %v5652_v57 = vadd.f32 %v5646_v35, %v20955_v52  ;;  %v10408_v52 = vld [vmem:[%s22628_s1 + $0x1168] sm:$0xff]  ;;  %5706 = vrot.lane.b32.xlu1 %v5653_v44, %s14771_s8  ;;  %v4109_v29 = vsel %vm4099_vm8, %v23979_v21, %v14335_v51  ;;  %v23980_v51 = vunpack.i.l.bf16 %v21235_v45  ;;  %v23981_v35 = vunpack.i.h.bf16 %v21235_v45  ;;  %v10437_v42 = vld [vmem:[%s22628_s1 + $0x1250] sm:$0xff] }
 0x4c1   : > { %9623 = vmatmul.mubr.f32.gmra.mrb[58].mxu1 %v10387_v50  ;;  %v5645_v16 = vpop.permute.xlu1 %5644  ;;  %v14349_v45 = vunpack.i.l.bf16 %v21831_v19 }
 0x4c2   : > { %8400 = vmatmul.mubr.f32.gmra.mrb[62].mxu0 %v10249_v62  ;;  %11733 = vmatpush1.bf16.msra.mxu1 %v21328_v46  ;;  %v5643_v46 = vpop.permute.xlu0 %5642  ;;  %v23978_v62 = vunpack.i.l.bf16 %v21205_v54  ;;  %v5655_v50 = vadd.f32 %v5645_v16, %v20993_v30  ;;  %v10280_v54 = vld [vmem:[%s22628_s1 + $0xd68] sm:$0xff]  ;;  %v4119_v44 = vsel %vm4099_vm8, %v23981_v35, %v14340_v39  ;;  %v14360_v39 = vunpack.i.h.bf16 %v21869_v43  ;;  %v10329_v35 = vld [vmem:[%s22628_s1 + $0xef0] sm:$0xff] }
 0x4c3   : > { %8405 = vmatprep.mubr.f32.mxu0 %v10260_v55  ;;  %9628 = vmatprep.mubr.f32.mxu1 %v10398_v37  ;;  %v5647_v47 = vsel %vm5627_vm9, %v5643_v46, %v5645_v16  ;;  %v10407_v55 = vld [vmem:[%s22628_s1 + $0x1160] sm:$0xff]  ;;  %v14345_v37 = vunpack.i.h.bf16 %v21829_v20  ;;  %v14355_v46 = vunpack.i.h.bf16 %v21859_v49  ;;  %v10310_v16 = vld [vmem:[%s22628_s1 + $0xe58] sm:$0xff] }
 0x4c4   : > { %11735 = vmatprep.subr.bf16.mxu1 %v11734_v23  ;;  %5704 = vrot.lane.b32.xlu0 %v5652_v57, %s14771_s8  ;;  %v4104_v15 = vsel %vm4099_vm8, %v23978_v62, %v14334_v36  ;;  %v14344_v23 = vunpack.i.l.bf16 %v21829_v20  ;;  %v4114_v36 = vsel %vm4099_vm8, %v23980_v51, %v14339_v33  ;;  %v14350_v57 = vunpack.i.h.bf16 %v21831_v19 }
 0x4c5   : > { %9629 = vmatmul.mubr.f32.gmra.mrb[60].mxu1 %v10397_v11  ;;  %5710 = vrot.lane.b32.xlu1 %v5655_v50, %s14771_s8  ;;  %v11742_v30 = vpack.c.bf16 %v4109_v29, %v4104_v15  ;;  %v11746_v20 = vpack.c.bf16 %v4119_v44, %v4114_v36  ;;  %v10427_v11 = vld [vmem:[%s22628_s1 + $0x1200] sm:$0xff]  ;;  %v4129_v63 = vsel %vm4099_vm8, %v23983_v38, %v14345_v37  ;;  %v23985_v15 = vunpack.i.h.bf16 %v21294_v61  ;;  %v10309_v29 = vld [vmem:[%s22628_s1 + $0xe50] sm:$0xff]  ;;  %v10330_v37 = vld [vmem:[%s22628_s1 + $0xef8] sm:$0xff] }
 0x4c6   : > { %8406 = vmatmul.mubr.f32.gmra.mrb[64].mxu0 %v10259_v4  ;;  %11737 = vmatpush1.bf16.msra.mxu1 %v21365_v5  ;;  %v5654_v5 = vadd.f32 %v5647_v47, %v20979_v7  ;;  %v10290_v7 = vld [vmem:[%s22628_s1 + $0xdb8] sm:$0xff]  ;;  %v10289_v4 = vld [vmem:[%s22628_s1 + $0xdb0] sm:$0xff]  ;;  %v4124_v28 = vsel %vm4099_vm8, %v23982_v40, %v14344_v23  ;;  %v14359_v33 = vunpack.i.l.bf16 %v21869_v43  ;;  %v10320_v47 = vld [vmem:[%s22628_s1 + $0xea8] sm:$0xff]  ;;  %v23986_v50 = vunpack.i.l.bf16 %v21352_v10 }
 0x4c7   : > { %8411 = vmatprep.mubr.f32.mxu0 %v10270_v56  ;;  %9634 = vmatprep.mubr.f32.mxu1 %v10408_v52  ;;  %v10300_v56 = vld [vmem:[%s22628_s1 + $0xe08] sm:$0xff]  ;;  %v11750_v19 = vpack.c.bf16 %v4129_v63, %v4124_v28  ;;  %v10299_v52 = vld [vmem:[%s22628_s1 + $0xe00] sm:$0xff]  ;;  %v4139_v21 = vsel %vm4099_vm8, %v23985_v15, %v14350_v57  ;;  %v14370_v44 = vunpack.i.h.bf16 %v21896_v3  ;;  %v23992_v57 = vunpack.i.l.bf16 %v21465_v18  ;;  %v10477_v63 = vld [vmem:[%s22628_s1 + $0x1390] sm:$0xff] }
 0x4c8   : > { %11739 = vmatprep.subr.bf16.mxu1 %v11738_v9  ;;  %5708 = vrot.lane.b32.xlu0 %v5654_v5, %s14771_s8  ;;  %v14354_v9 = vunpack.i.l.bf16 %v21859_v49  ;;  %v10319_v5 = vld [vmem:[%s22628_s1 + $0xea0] sm:$0xff]  ;;  %v23988_v23 = vld [vmem:[#allocation88_spill] sm:$0xff] }
 0x4c9   : > { %9635 = vmatmul.mubr.f32.gmra.mrb[62].mxu1 %v10407_v55  ;;  %v23990_v51 = vunpack.i.h.bf16 %v23988_v23  ;;  %v10487_v15 = vld [vmem:[%s22628_s1 + $0x13e0] sm:$0xff] }
 0x4ca   : > { %8412 = vmatmul.mubr.f32.gmra.mrb[66].mxu0 %v10269_v14  ;;  %11741 = vmatpush1.bf16.msra.mxu1 %v21403_v27  ;;  %v10428_v27 = vld [vmem:[%s22628_s1 + $0x1208] sm:$0xff]  ;;  %v23984_v14 = vunpack.i.l.bf16 %v21294_v61  ;;  %v10447_v61 = vld [vmem:[%s22628_s1 + $0x12a0] sm:$0xff]  ;;  %v4144_v55 = vsel %vm4099_vm8, %v23986_v50, %v14354_v9 }
 0x4cb   : > { %8417 = vmatprep.mubr.f32.mxu0 %v10280_v54  ;;  %9640 = vmatprep.mubr.f32.mxu1 %v10418_v12  ;;  %v23987_v54 = vunpack.i.h.bf16 %v21352_v10  ;;  %v10457_v10 = vld [vmem:[%s22628_s1 + $0x12f0] sm:$0xff]  ;;  %v4159_v36 = vsel %vm4099_vm8, %v23990_v51, %v14360_v39  ;;  %v23996_v9 = vld [vmem:[#allocation68_spill] sm:$0xff] }
 0x4cc   : > { %11743 = vmatprep.subr.bf16.mxu1 %v11742_v30  ;;  %v4134_v62 = vsel %vm4099_vm8, %v23984_v14, %v14349_v45  ;;  %v14365_v30 = vunpack.i.h.bf16 %v21889_v53  ;;  %v10488_v14 = vld [vmem:[%s22628_s1 + $0x13e8] sm:$0xff] }
 0x4cd   : > { %9641 = vmatmul.mubr.f32.gmra.mrb[64].mxu1 %v10417_v60  ;;  %v11754_v49 = vpack.c.bf16 %v4139_v21, %v4134_v62  ;;  %v4149_v12 = vsel %vm4099_vm8, %v23987_v54, %v14355_v46  ;;  %v23989_v60 = vunpack.i.l.bf16 %v23988_v23  ;;  %v10340_v39 = vld [vmem:[%s22628_s1 + $0xf48] sm:$0xff] }
 0x4ce   : > { %8418 = vmatmul.mubr.f32.gmra.mrb[68].mxu0 %v10279_v6  ;;  %11745 = vmatpush1.bf16.msra.mxu1 %v21439_v26  ;;  %v10438_v26 = vld [vmem:[%s22628_s1 + $0x1258] sm:$0xff]  ;;  %v11758_v43 = vpack.c.bf16 %v4149_v12, %v4144_v55  ;;  %v14364_v6 = vunpack.i.l.bf16 %v21889_v53 }
 0x4cf   : > { %8423 = vmatprep.mubr.f32.mxu0 %v10290_v7  ;;  %9646 = vmatprep.mubr.f32.mxu1 %v10428_v27  ;;  %v4154_v7 = vsel %vm4099_vm8, %v23989_v60, %v14359_v33  ;;  %v14369_v27 = vunpack.i.l.bf16 %v21896_v3  ;;  %v10478_v3 = vld [vmem:[%s22628_s1 + $0x1398] sm:$0xff] }
 0x4d0   : > { %11747 = vmatprep.subr.bf16.mxu1 %v11746_v20  ;;  %v11762_v53 = vpack.c.bf16 %v4159_v36, %v4154_v7  ;;  %v23991_v20 = vld [vmem:[#allocation95_spill] sm:$0xff]  ;;  %v4164_v45 = vsel %vm4099_vm8, %v23992_v57, %v14364_v6  ;;  %v23999_v33 = vld [vmem:[#allocation74_spill] sm:$0xff] }
 0x4d1   : > { %9647 = vmatmul.mubr.f32.gmra.mrb[66].mxu1 %v10427_v11  ;;  %v23993_v11 = vunpack.i.h.bf16 %v21465_v18  ;;  %v23994_v18 = vunpack.i.l.bf16 %v21515_v25  ;;  %v10350_v55 = vld [vmem:[%s22628_s1 + $0xf98] sm:$0xff]  ;;  %v10359_v6 = vld [vmem:[%s22628_s1 + $0xfe0] sm:$0xff] }
 0x4d2   : > { %8424 = vmatmul.mubr.f32.gmra.mrb[70].mxu0 %v10289_v4  ;;  %11749 = vmatpush1.bf16.msra.mxu1 %v21477_v59  ;;  %v10448_v59 = vld [vmem:[%s22628_s1 + $0x12a8] sm:$0xff]  ;;  %v10467_v4 = vld [vmem:[%s22628_s1 + $0x1340] sm:$0xff] }
 0x4d3   : > { %8429 = vmatprep.mubr.f32.mxu0 %v10300_v56  ;;  %9652 = vmatprep.mubr.f32.mxu1 %v10438_v26  ;;  %v4169_v56 = vsel %vm4099_vm8, %v23993_v11, %v14365_v30  ;;  %v4174_v26 = vsel %vm4099_vm8, %v23994_v18, %v14369_v27  ;;  %v10440_v18 = vld [vmem:[%s22628_s1 + $0x1268] sm:$0xff] }
 0x4d4   : > { %11751 = vmatprep.subr.bf16.mxu1 %v11750_v19  ;;  %v11766_v28 = vpack.c.bf16 %v4169_v56, %v4164_v45  ;;  %v23995_v19 = vunpack.i.h.bf16 %v21515_v25  ;;  %v10399_v56 = vld [vmem:[%s22628_s1 + $0x1120] sm:$0xff] }
 0x4d5   : > { %9653 = vmatmul.mubr.f32.gmra.mrb[68].mxu1 %v10437_v42 }
 0x4d6   : > { %8430 = vmatmul.mubr.f32.gmra.mrb[72].mxu0 %v10299_v52  ;;  %11753 = vmatpush1.bf16.msra.mxu1 %v21517_v8  ;;  %v10458_v8 = vld [vmem:[%s22628_s1 + $0x12f8] sm:$0xff]  ;;  %v4179_v52 = vsel %vm4099_vm8, %v23995_v19, %v14370_v44 }
 0x4d7   : > { %8435 = vmatprep.mubr.f32.mxu0 %v10310_v16  ;;  %9658 = vmatprep.mubr.f32.mxu1 %v10448_v59  ;;  %v11770_v62 = vpack.c.bf16 %v4179_v52, %v4174_v26  ;;  %v10439_v26 = vld [vmem:[%s22628_s1 + $0x1260] sm:$0xff]  ;;  %v10450_v19 = vld [vmem:[%s22628_s1 + $0x12b8] sm:$0xff]  ;;  %v10449_v52 = vld [vmem:[%s22628_s1 + $0x12b0] sm:$0xff] }
 0x4d8   : > { %11755 = vmatprep.subr.bf16.mxu1 %v11754_v49  ;;  %v23998_v49 = vld [vmem:[#allocation73_spill] sm:$0xff] }
 0x4d9   : > { %9659 = vmatmul.mubr.f32.gmra.mrb[70].mxu1 %v10447_v61 }
 0x4da   : > { %8436 = vmatmul.mubr.f32.gmra.mrb[74].mxu0 %v10309_v29  ;;  %11757 = vmatpush1.bf16.msra.mxu1 %v21557_v13  ;;  %v10468_v13 = vld [vmem:[%s22628_s1 + $0x1348] sm:$0xff]  ;;  %v5683_v40 = vpop.permute.xlu0 %5682 }
 0x4db   : > { %8441 = vmatprep.mubr.f32.mxu0 %v10320_v47  ;;  %9664 = vmatprep.mubr.f32.mxu1 %v10458_v8  ;;  %v5685_v38 = vpop.permute.xlu1 %5684  ;;  %v10339_v47 = vld [vmem:[%s22628_s1 + $0xf40] sm:$0xff]  ;;  %v10360_v8 = vld [vmem:[%s22628_s1 + $0xfe8] sm:$0xff] }
 0x4dc   : > { %11759 = vmatprep.subr.bf16.mxu1 %v11758_v43  ;;  %v5690_v46 = vsel %vm5627_vm9, %v5683_v40, %v5685_v38  ;;  %v5697_v42 = vadd.f32 %v5685_v38, %v23996_v9  ;;  %v10420_v40 = vld [vmem:[%s22628_s1 + $0x11c8] sm:$0xff]  ;;  %v10430_v38 = vld [vmem:[%s22628_s1 + $0x1218] sm:$0xff] }
 0x4dd   : > { %9665 = vmatmul.mubr.f32.gmra.mrb[108].mxu1 %v10457_v10 }
 0x4de   : > { %8442 = vmatmul.mubr.f32.gmra.mrb[76].mxu0 %v10319_v5  ;;  %11761 = vmatpush1.bf16.msra.mxu1 %v23991_v20 }
 0x4df   : > { %8447 = vmatprep.mubr.f32.mxu0 %v10330_v37  ;;  %9668 = vmatprep.mubr.f32.mxu1 %v10468_v13  ;;  %v5687_v25 = vpop.permute.xlu0 %5686  ;;  %v10370_v37 = vld [vmem:[%s22628_s1 + $0x1038] sm:$0xff]  ;;  %v10380_v13 = vld [vmem:[%s22628_s1 + $0x1088] sm:$0xff] }
 0x4e0   : > { %11763 = vmatprep.subr.bf16.mxu1 %v11762_v53  ;;  %5725 = vrot.lane.b32.xlu1 %v5697_v42, %s14771_s8  ;;  %v5689_v21 = vpop.permute.xlu1 %5688 }
 0x4e1   : > { %9669 = vmatmul.mubr.f32.gmra.mrb[110].mxu1 %v10467_v4  ;;  %v5691_v59 = vsel %vm5627_vm9, %v5687_v25, %v5689_v21  ;;  %v5699_v29 = vadd.f32 %v5689_v21, %v23998_v49  ;;  %v10389_v4 = vld [vmem:[%s22628_s1 + $0x10d0] sm:$0xff]  ;;  %v24001_v21 = vld [vmem:[#allocation31_spill] sm:$0xff]  ;;  %v24002_v49 = vld [vmem:[#allocation32_spill] sm:$0xff] }
 0x4e2   : > { %8448 = vmatmul.mubr.f32.gmra.mrb[78].mxu0 %v10329_v35  ;;  %11765 = vmatpush1.bf16.msra.mxu1 %v21647_v41  ;;  %v23997_v41 = vld [vmem:[#allocation70_spill] sm:$0xff]  ;;  %v9213_v61 = vpop.f32.mrb[72].mxu1  ;;  %v10379_v35 = vld [vmem:[%s22628_s1 + $0x1080] sm:$0xff] }
 0x4e3   : > { %9672 = vmatprep.mubr.f32.mxu1 %v10478_v3  ;;  %11767 = vmatprep.subr.bf16.mxu1 %v11766_v28  ;;  %v5696_v16 = vadd.f32 %v5690_v46, %v23997_v41  ;;  %v9214_v50 = vpop.f32.mrb[73].mxu1  ;;  %v10410_v3 = vld [vmem:[%s22628_s1 + $0x1178] sm:$0xff]  ;;  %v10419_v28 = vld [vmem:[%s22628_s1 + $0x11c0] sm:$0xff] }
 0x4e4   : > { %5729 = vrot.lane.b32.xlu1 %v5699_v29, %s14771_s8 }
 0x4e5   : > { %9673 = vmatmul.mubr.f32.gmra.mrb[112].mxu1 %v10477_v63  ;;  %5723 = vrot.lane.b32.xlu0 %v5696_v16, %s14771_s8  ;;  %v10429_v63 = vld [vmem:[%s22628_s1 + $0x1210] sm:$0xff]  ;;  %v24000_v16 = vld [vmem:[#allocation108_spill] sm:$0xff] }
 0x4e6   : > { %11769 = vmatpush1.bf16.msra.mxu1 %v21692_v58  ;;  %9676 = vmatprep.mubr.f32.mxu1 %v10488_v14  ;;  %v5698_v58 = vadd.f32 %v5691_v59, %v23999_v33  ;;  %v9217_v54 = vpop.f32.mrb[74].mxu1 }
 0x4e7   : > { %11771 = vmatprep.subr.bf16.mxu1 %v11770_v62  ;;  %v9218_v12 = vpop.f32.mrb[75].mxu1 }
 0x4e9   : > { %9677 = vmatmul.mubr.f32.gmra.mrb[114].mxu1 %v10487_v15  ;;  %5727 = vrot.lane.b32.xlu0 %v5698_v58, %s14771_s8  ;;  %v8043_v43 = vpop.f32.mrb[84].mxu0 }
 0x4ea   : > { %11773 = vmatpush1.bf16.msra.mxu1 %v21735_v48  ;;  %9745 = vmatprep.mubr.f32.mxu1 %v10340_v39  ;;  %v10349_v48 = vld [vmem:[%s22628_s1 + $0xf90] sm:$0xff]  ;;  %v22216_v5 = vadd.f32 %v8043_v43, %v21852_v34  ;;  %v8045_v30 = vpop.f32.mrb[85].mxu0 }
 0x4eb   : > { %v9221_v10 = vpop.f32.mrb[76].mxu1  ;;  %v10369_v34 = vld [vmem:[%s22628_s1 + $0x1030] sm:$0xff] }
 0x4ec   : > { %v9222_v23 = vpop.f32.mrb[77].mxu1 }
 0x4ed   : > { %9746 = vmatmul.mubr.f32.vlgmr.msra.gmra.mrb[116].mxu1 %v10339_v47 }
 0x4ee   : > { %9750 = vmatprep.mubr.f32.mxu1 %v10350_v55  ;;  %v8048_v60 = vpop.f32.mrb[86].mxu0  ;;  %v5628_v55 = vsel %vm5627_vm9, %v21920_v31, %v21927_v1  ;;  %v5629_v31 = vsel %vm5627_vm9, %v21969_v32, %v21974_v24 }
 0x4ef   : > { %v22228_v7 = vadd.f32 %v8048_v60, %v21882_v0  ;;  %v8050_v51 = vpop.f32.mrb[87].mxu0  ;;  %v9225_v36 = vpop.f32.mrb[78].mxu1  ;;  %v10390_v0 = vld [vmem:[%s22628_s1 + $0x10d8] sm:$0xff] }
 0x4f0   : > { %v9226_v53 = vpop.f32.mrb[79].mxu1 }
 0x4f1   : > { %9751 = vmatmul.mubr.f32.gmra.mrb[118].mxu1 %v10349_v48 }
 0x4f2   : > { %9755 = vmatprep.mubr.f32.mxu1 %v10360_v8  ;;  %v24003_v8 = vld [vmem:[#allocation58_spill] sm:$0xff] }
 0x4f3   : > { %v9294_v44 = vpop.f32.mrb[80].mxu1  ;;  %v5632_v43 = vadd.f32 %v5628_v55, %v24003_v8 }
 0x4f4   : > { %v22237_v27 = vadd.f32 %v9294_v44, %v21916_v17  ;;  %v9296_v20 = vpop.f32.mrb[81].mxu1  ;;  %v10400_v17 = vld [vmem:[%s22628_s1 + $0x1128] sm:$0xff] }
 0x4f5   : > { %9756 = vmatmul.mubr.f32.gmra.mrb[52].mxu1 %v10359_v6 }
 0x4f6   : > { %9761 = vmatprep.mubr.f32.mxu1 %v10370_v37 }
 0x4f7   : > { %v9299_v57 = vpop.f32.mrb[82].mxu1 }
 0x4f8   : > { %v22246_v45 = vadd.f32 %v9299_v57, %v21947_v2  ;;  %v9301_v11 = vpop.f32.mrb[83].mxu1  ;;  %v10409_v2 = vld [vmem:[%s22628_s1 + $0x1170] sm:$0xff] }
 0x4f9   : > { %9762 = vmatmul.mubr.f32.gmra.mrb[54].mxu1 %v10369_v34 }
 0x4fa   : > { %9767 = vmatprep.mubr.f32.mxu1 %v10380_v13 }
 0x4fd   : > { %9768 = vmatmul.mubr.f32.gmra.mrb[56].mxu1 %v10379_v35 }
 0x4fe   : > { %9773 = vmatprep.mubr.f32.mxu1 %v10390_v0 }
 0x501   : > { %9774 = vmatmul.mubr.f32.gmra.mrb[58].mxu1 %v10389_v4 }
 0x502   : > { %9779 = vmatprep.mubr.f32.mxu1 %v10400_v17 }
 0x505   : > { %9780 = vmatmul.mubr.f32.gmra.mrb[60].mxu1 %v10399_v56 }
 0x506   : > { %9785 = vmatprep.mubr.f32.mxu1 %v10410_v3  ;;  %v24005_v3 = vld [vmem:[#allocation60_spill] sm:$0xff] }
 0x509   : > { %9786 = vmatmul.mubr.f32.gmra.mrb[62].mxu1 %v10409_v2 }
 0x50a   : > { %9791 = vmatprep.mubr.f32.mxu1 %v10420_v40 }
 0x50d   : > { %9792 = vmatmul.mubr.f32.gmra.mrb[64].mxu1 %v10419_v28  ;;  %v24006_v28 = vld [vmem:[#allocation62_spill] sm:$0xff] }
 0x50e   : > { %9797 = vmatprep.mubr.f32.mxu1 %v10430_v38 }
 0x511   : > { %9798 = vmatmul.mubr.f32.gmra.mrb[66].mxu1 %v10429_v63 }
 0x512   : > { %9803 = vmatprep.mubr.f32.mxu1 %v10440_v18 }
 0x515   : > { %9804 = vmatmul.mubr.f32.gmra.mrb[68].mxu1 %v10439_v26 }
 0x516   : > { %9809 = vmatprep.mubr.f32.mxu1 %v10450_v19 }
 0x519   : > { %9810 = vmatmul.mubr.f32.gmra.mrb[70].mxu1 %v10449_v52  ;;  %v24007_v52 = vld [vmem:[#allocation65_spill] sm:$0xff] }
 0x51c   : > { %v7103_v46 = vpop.permute.xlu0 %7102 }
 0x51d   : > { %v7105_v9 = vpop.permute.xlu1 %7104 }
 0x51e   : > { %v7110_v42 = vsel %vm5627_vm9, %v7103_v46, %v7105_v9  ;;  %v22286_v41 = vadd.f32 %v7105_v9, %v21795_v22  ;;  %v24008_v9 = vld [vmem:[#allocation66_spill] sm:$0xff] }
 0x51f   : > { %v22289_v14 = vadd.f32 %v7110_v42, %v24000_v16 }
 0x522   : > { %v7107_v62 = vpop.permute.xlu0 %7106 }
 0x523   : > { %v7109_v25 = vpop.permute.xlu1 %7108 }
 0x524   : > { %v7111_v15 = vsel %vm5627_vm9, %v7107_v62, %v7109_v25  ;;  %v22293_v59 = vadd.f32 %v7109_v25, %v24001_v21  ;;  %v24009_v21 = vld [vmem:[#allocation83_spill] sm:$0xff] }
 0x525   : > { %v22296_v29 = vadd.f32 %v7111_v15, %v24002_v49  ;;  %v24010_v49 = vld [vmem:[#allocation84_spill] sm:$0xff] }
 0x526   : > { %v5661_v33 = vpop.permute.xlu0 %5660 }
 0x527   : > { %v5663_v39 = vpop.permute.xlu1 %5662  ;;  %v9364_v58 = vpop.f32.mrb[84].mxu1 }
 0x528   : > { %v9365_v47 = vpop.f32.mrb[85].mxu1  ;;  %v5675_v2 = vadd.f32 %v5663_v39, %v24005_v3  ;;  %v24013_v58 = vld [vmem:[#allocation19_spill] sm:$0xff] }
 0x52a   : > { %v5665_v22 = vpop.permute.xlu0 %5664 }
 0x52b   : > { %v5667_v61 = vpop.permute.xlu1 %5666  ;;  %v9368_v50 = vpop.f32.mrb[86].mxu1 }
 0x52c   : > { %v9369_v54 = vpop.f32.mrb[87].mxu1 }
 0x52e   : > { %v8202_v48 = vpop.f32.mrb[88].mxu0 }
 0x52f   : > { %v8203_v30 = vadd.f32 %v8202_v48, %v22216_v5  ;;  %v8204_v6 = vpop.f32.mrb[89].mxu0  ;;  %v9372_v37 = vpop.f32.mrb[88].mxu1  ;;  %v24004_v5 = vld [vmem:[#allocation57_spill] sm:$0xff] }
 0x530   : > { %v9373_v34 = vpop.f32.mrb[89].mxu1  ;;  %v5633_v44 = vadd.f32 %v5629_v31, %v24004_v5 }
 0x532   : > { %v5707_v12 = vpop.permute.xlu1 %5706  ;;  %v8207_v51 = vpop.f32.mrb[90].mxu0 }
 0x533   : > { %v8208_v1 = vadd.f32 %v8207_v51, %v22228_v7  ;;  %v8209_v36 = vpop.f32.mrb[91].mxu0  ;;  %v9376_v13 = vpop.f32.mrb[90].mxu1  ;;  %v5668_v7 = vsel %vm5627_vm9, %v5661_v33, %v5663_v39  ;;  %v24011_v39 = vld [vmem:[#allocation96_spill] sm:$0xff]  ;;  %v24012_v33 = vld [vmem:[#allocation91_spill] sm:$0xff] }
 0x534   : > { %v9377_v53 = vpop.f32.mrb[91].mxu1  ;;  %v5674_v38 = vadd.f32 %v5668_v7, %v24006_v28 }
 0x536   : > { %v5705_v10 = vpop.permute.xlu0 %5704 }
 0x537   : > { %v5713_v23 = vsel %vm5712_vm10, %v5705_v10, %v5707_v12  ;;  %v5711_v35 = vpop.permute.xlu1 %5710  ;;  %v9445_v20 = vpop.f32.mrb[92].mxu1 }
 0x538   : > { %v22304_v60 = vadd.f32 %v5713_v23, %v5632_v43  ;;  %v9446_v57 = vadd.f32 %v9445_v20, %v22237_v27  ;;  %v9447_v11 = vpop.f32.mrb[93].mxu1  ;;  %v5669_v27 = vsel %vm5627_vm9, %v5665_v22, %v5667_v61 }
 0x539   : > { %v5676_v42 = vadd.f32 %v5669_v27, %v24008_v9 }
 0x53a   : > { %v5709_v0 = vpop.permute.xlu0 %5708 }
 0x53b   : > { %v5714_v4 = vsel %vm5712_vm10, %v5709_v0, %v5711_v35 }
 0x53c   : > { %v22313_v17 = vadd.f32 %v5714_v4, %v5633_v44  ;;  %v9450_v56 = vpop.f32.mrb[94].mxu1 }
 0x53d   : > { %v9451_v32 = vadd.f32 %v9450_v56, %v22246_v45  ;;  %v9452_v24 = vpop.f32.mrb[95].mxu1  ;;  %v5677_v45 = vadd.f32 %v5667_v61, %v24007_v52  ;;  %v24014_v61 = vld [vmem:[#allocation20_spill] sm:$0xff] }
 0x552   : > { %v5726_v40 = vpop.permute.xlu1 %5725 }
 0x553   : > { %v5738_v63 = vadd.f32 %v5726_v40, %v5675_v2 }
 0x555   : > { %5747 = vrot.lane.b32.xlu1 %v5738_v63, %s14772_s7 }
 0x556   : > { %v5730_v46 = vpop.permute.xlu1 %5729 }
 0x557   : > { %v5724_v18 = vpop.permute.xlu0 %5723  ;;  %v5740_v16 = vadd.f32 %v5730_v46, %v5677_v45 }
 0x558   : > { %v5731_v26 = vsel %vm5712_vm10, %v5724_v18, %v5726_v40 }
 0x559   : > { %v5737_v19 = vadd.f32 %v5731_v26, %v5674_v38  ;;  %5751 = vrot.lane.b32.xlu1 %v5740_v16, %s14772_s7 }
 0x55b   : > { %5745 = vrot.lane.b32.xlu0 %v5737_v19, %s14772_s7  ;;  %v5728_v62 = vpop.permute.xlu0 %5727 }
 0x55c   : > { %v5732_v25 = vsel %vm5712_vm10, %v5728_v62, %v5730_v46 }
 0x55d   : > { %v5739_v15 = vadd.f32 %v5732_v25, %v5676_v42  ;;  %7042 = vrot.lane.b32.xlu1 %v24009_v21, %s14770_s10  ;;  %v24015_v21 = vld [vmem:[#allocation104_spill] sm:$0xff] }
 0x55f   : > { %5749 = vrot.lane.b32.xlu0 %v5739_v15, %s14772_s7 }
 0x561   : > { %7060 = vrot.lane.b32.xlu1 %v24011_v39, %s14770_s10  ;;  %v24016_v39 = vld [vmem:[#allocation28_spill] sm:$0xff] }
 0x563   : > { %7040 = vrot.lane.b32.xlu0 %v24010_v49, %s14770_s10 }
 0x565   : > { %7064 = vrot.lane.b32.xlu1 %v24013_v58, %s14770_s10  ;;  %v24017_v58 = vld [vmem:[#allocation27_spill] sm:$0xff] }
 0x567   : > { %7058 = vrot.lane.b32.xlu0 %v24012_v33, %s14770_s10 }
 0x56b   : > { %7062 = vrot.lane.b32.xlu0 %v24014_v61, %s14770_s10 }
 0x56e   : > { %v9515_v47 = vpop.f32.mrb[96].mxu1 }
 0x56f   : > { %v9516_v22 = vpop.f32.mrb[97].mxu1  ;;  %v24018_v47 = vld [vmem:[#allocation103_spill] sm:$0xff] }
 0x572   : > { %v9519_v50 = vpop.f32.mrb[98].mxu1 }
 0x573   : > { %v9520_v55 = vpop.f32.mrb[99].mxu1 }
 0x577   : > { %v9523_v8 = vpop.f32.mrb[100].mxu1 }
 0x578   : > { %v9524_v43 = vpop.f32.mrb[101].mxu1  ;;  %v10459_v8 = vld [vmem:[%s22628_s1 + $0x1300] sm:$0xff] }
 0x579   : > { %v8361_v54 = vpop.f32.mrb[92].mxu0 }
 0x57a   : > { %v22340_v48 = vadd.f32 %v8361_v54, %v8203_v30  ;;  %v8363_v12 = vpop.f32.mrb[93].mxu0 }
 0x57b   : > { %v9527_v23 = vpop.f32.mrb[102].mxu1  ;;  %v10460_v12 = vld [vmem:[%s22628_s1 + $0x1308] sm:$0xff] }
 0x57c   : > { %v9528_v34 = vpop.f32.mrb[103].mxu1  ;;  %9815 = vmatprep.mubr.f32.mxu1 %v10460_v12  ;;  %v10470_v23 = vld [vmem:[%s22628_s1 + $0x1358] sm:$0xff] }
 0x57d   : > { %v8366_v6 = vpop.f32.mrb[94].mxu0  ;;  %9816 = vmatmul.mubr.f32.gmra.mrb[120].mxu1 %v10459_v8  ;;  %v10469_v34 = vld [vmem:[%s22628_s1 + $0x1350] sm:$0xff] }
 0x57e   : > { %v22342_v10 = vadd.f32 %v8366_v6, %v8208_v1  ;;  %v8368_v37 = vpop.f32.mrb[95].mxu0  ;;  %9819 = vmatprep.mubr.f32.mxu1 %v10470_v23 }
 0x57f   : > { %v9596_v36 = vpop.f32.mrb[104].mxu1 }
 0x580   : > { %v9597_v13 = vadd.f32 %v9596_v36, %v9446_v57  ;;  %v9598_v53 = vpop.f32.mrb[105].mxu1 }
 0x581   : > { %v22344_v51 = vpop.f32.mrb[52].mxu0  ;;  %9820 = vmatmul.mubr.f32.gmra.mrb[122].mxu1 %v10469_v34  ;;  %v10480_v53 = vld [vmem:[%s22628_s1 + $0x13a8] sm:$0xff] }
 0x582   : > { %v22346_v31 = vpop.f32.mrb[53].mxu0  ;;  %9823 = vmatprep.mubr.f32.mxu1 %v10480_v53 }
 0x583   : > { %v9601_v5 = vpop.f32.mrb[106].mxu1 }
 0x584   : > { %v9602_v44 = vadd.f32 %v9601_v5, %v9451_v32  ;;  %v9603_v0 = vpop.f32.mrb[107].mxu1  ;;  %v10479_v5 = vld [vmem:[%s22628_s1 + $0x13a0] sm:$0xff] }
 0x585   : > { %v22348_v35 = vpop.f32.mrb[54].mxu0  ;;  %9824 = vmatmul.mubr.f32.gmra.mrb[124].mxu1 %v10479_v5 }
 0x586   : > { %v22350_v30 = vpop.f32.mrb[55].mxu0 }
 0x589   : > { %v22352_v20 = vpop.f32.mrb[56].mxu0 }
 0x58a   : > { %v22354_v1 = vpop.f32.mrb[57].mxu0 }
 0x58d   : > { %v22356_v4 = vpop.f32.mrb[58].mxu0 }
 0x58e   : > { %v22358_v11 = vpop.f32.mrb[59].mxu0 }
 0x591   : > { %v8395_v56 = vpop.f32.mrb[60].mxu0 }
 0x592   : > { %v8397_v24 = vpop.f32.mrb[61].mxu0 }
 0x595   : > { %v8401_v7 = vpop.f32.mrb[62].mxu0 }
 0x596   : > { %v8403_v57 = vpop.f32.mrb[63].mxu0 }
 0x599   : > { %v22360_v3 = vpop.f32.mrb[64].mxu0 }
 0x59a   : > { %v22362_v2 = vpop.f32.mrb[65].mxu0 }
 0x59d   : > { %v22364_v40 = vpop.f32.mrb[66].mxu0 }
 0x59e   : > { %v22366_v32 = vpop.f32.mrb[67].mxu0 }
 0x5a1   : > { %v8419_v28 = vpop.f32.mrb[68].mxu0 }
 0x5a2   : > { %v8421_v38 = vpop.f32.mrb[69].mxu0 }
 0x5a5   : > { %v8425_v63 = vpop.f32.mrb[70].mxu0 }
 0x5a6   : > { %v8427_v18 = vpop.f32.mrb[71].mxu0 }
 0x5a9   : > { %v22368_v26 = vpop.f32.mrb[72].mxu0 }
 0x5aa   : > { %v22370_v27 = vpop.f32.mrb[73].mxu0 }
 0x5ad   : > { %v22372_v19 = vpop.f32.mrb[74].mxu0 }
 0x5ae   : > { %v22374_v52 = vpop.f32.mrb[75].mxu0 }
 0x5b0   : > { %v9666_v9 = vpop.f32.mrb[108].mxu1 }
 0x5b1   : > { %v8443_v45 = vpop.f32.mrb[76].mxu0  ;;  %v9667_v42 = vpop.f32.mrb[109].mxu1 }
 0x5b2   : > { %8520 = vrot.lane.b32.xlu0 %v8443_v45, %s14770_s10  ;;  %v8445_v46 = vpop.f32.mrb[77].mxu0 }
 0x5b3   : > { %8522 = vrot.lane.b32.xlu1 %v8445_v46, %s14770_s10 }
 0x5b4   : > { %v9670_v25 = vpop.f32.mrb[110].mxu1 }
 0x5b5   : > { %v8449_v16 = vpop.f32.mrb[78].mxu0  ;;  %v9671_v15 = vpop.f32.mrb[111].mxu1 }
 0x5b6   : > { %8524 = vrot.lane.b32.xlu0 %v8449_v16, %s14770_s10  ;;  %v8451_v62 = vpop.f32.mrb[79].mxu0 }
 0x5b7   : > { %8526 = vrot.lane.b32.xlu1 %v8451_v62, %s14770_s10 }
 0x5b8   : > { %v9674_v49 = vpop.f32.mrb[112].mxu1 }
 0x5b9   : > { %v9675_v33 = vpop.f32.mrb[113].mxu1  ;;  %v24019_v49 = vld [vmem:[#allocation78_spill] sm:$0xff] }
 0x5ba   : > { %7080 = vrot.lane.b32.xlu0 %v24015_v21, %s14770_s10 }
 0x5bb   : > { %7082 = vrot.lane.b32.xlu1 %v24016_v39, %s14770_s10 }
 0x5bc   : > { %v9678_v61 = vpop.f32.mrb[114].mxu1 }
 0x5bd   : > { %v9679_v22 = vpop.f32.mrb[115].mxu1 }
 0x5be   : > { %7084 = vrot.lane.b32.xlu0 %v24017_v58, %s14770_s10 }
 0x5bf   : > { %7086 = vrot.lane.b32.xlu1 %v24018_v47, %s14770_s10 }
 0x5c0   : > { %v9747_v50 = vpop.f32.mrb[116].mxu1 }
 0x5c1   : > { %v22389_v55 = vadd.f32 %v9747_v50, %v9597_v13  ;;  %v9749_v54 = vpop.f32.mrb[117].mxu1 }
 0x5c2   : > { %8476 = vrot.lane.b32.xlu0 %v8395_v56, %s14770_s10 }
 0x5c3   : > { %8478 = vrot.lane.b32.xlu1 %v8397_v24, %s14770_s10  ;;  %v10490_v24 = vld [vmem:[%s22628_s1 + $0x13f8] sm:$0xff] }
 0x5c4   : > { %v9752_v43 = vpop.f32.mrb[118].mxu1  ;;  %9827 = vmatprep.mubr.f32.mxu1 %v10490_v24 }
 0x5c5   : > { %v22399_v6 = vadd.f32 %v9752_v43, %v9602_v44  ;;  %v9754_v37 = vpop.f32.mrb[119].mxu1 }
 0x5c6   : > { %8480 = vrot.lane.b32.xlu0 %v8401_v7, %s14770_s10 }
 0x5c7   : > { %8482 = vrot.lane.b32.xlu1 %v8403_v57, %s14770_s10  ;;  %v5748_v0 = vpop.permute.xlu1 %5747  ;;  %v10489_v57 = vld [vmem:[%s22628_s1 + $0x13f0] sm:$0xff] }
 0x5c8   : > { %v22408_v36 = vpop.f32.mrb[52].mxu1  ;;  %9828 = vmatmul.mubr.f32.gmra.mrb[126].mxu1 %v10489_v57 }
 0x5c9   : > { %v22411_v13 = vpop.f32.mrb[53].mxu1 }
 0x5ca   : > { %8498 = vrot.lane.b32.xlu0 %v8419_v28, %s14770_s10 }
 0x5cb   : > { %8500 = vrot.lane.b32.xlu1 %v8421_v38, %s14770_s10 }
 0x5cc   : > { %v22420_v44 = vpop.f32.mrb[54].mxu1 }
 0x5cd   : > { %v22423_v56 = vpop.f32.mrb[55].mxu1  ;;  %v5746_v7 = vpop.permute.xlu0 %5745 }
 0x5ce   : > { %8502 = vrot.lane.b32.xlu0 %v8425_v63, %s14770_s10  ;;  %v5754_v28 = vsel %vm5753_vm11, %v5746_v7, %v5748_v0 }
 0x5cf   : > { %8504 = vrot.lane.b32.xlu1 %v8427_v18, %s14770_s10  ;;  %v22434_v38 = vadd.f32 %v5754_v28, %v22304_v60  ;;  %v5752_v18 = vpop.permute.xlu1 %5751 }
 0x5d0   : > { %v22436_v63 = vpop.f32.mrb[56].mxu1 }
 0x5d1   : > { %v22438_v45 = vpop.f32.mrb[57].mxu1  ;;  %v5750_v46 = vpop.permute.xlu0 %5749 }
 0x5d2   : > { %v5755_v9 = vsel %vm5753_vm11, %v5750_v46, %v5752_v18 }
 0x5d3   : > { %v22444_v16 = vadd.f32 %v5755_v9, %v22313_v17  ;;  %v7043_v25 = vpop.permute.xlu1 %7042 }
 0x5d4   : > { %v22441_v42 = vpop.f32.mrb[58].mxu1 }
 0x5d5   : > { %v22446_v62 = vpop.f32.mrb[59].mxu1  ;;  %v7041_v15 = vpop.permute.xlu0 %7040 }
 0x5d6   : > { %v7048_v60 = vsel %vm5627_vm9, %v7041_v15, %v7043_v25 }
 0x5d7   : > { %v22450_v39 = vadd.f32 %v7048_v60, %v24019_v49 }
 0x5d8   : > { %v9781_v21 = vpop.f32.mrb[60].mxu1 }
 0x5d9   : > { %v9783_v33 = vpop.f32.mrb[61].mxu1  ;;  %9854 = vrot.lane.b32.xlu0 %v9781_v21, %s14770_s10  ;;  %v7059_v43 = vpop.permute.xlu0 %7058 }
 0x5da   : > { %9856 = vrot.lane.b32.xlu1 %v9783_v33, %s14770_s10  ;;  %v24023_v33 = vld [vmem:[#allocation87_spill] sm:$0xff] }
 0x5dc   : > { %v9787_v58 = vpop.f32.mrb[62].mxu1 }
 0x5dd   : > { %v9789_v61 = vpop.f32.mrb[63].mxu1  ;;  %9858 = vrot.lane.b32.xlu0 %v9787_v58, %s14770_s10  ;;  %v7063_v37 = vpop.permute.xlu0 %7062 }
 0x5de   : > { %9860 = vrot.lane.b32.xlu1 %v9789_v61, %s14770_s10 }
 0x5e0   : > { %v22456_v17 = vpop.f32.mrb[64].mxu1 }
 0x5e1   : > { %v22458_v47 = vpop.f32.mrb[65].mxu1  ;;  %7142 = vrot.lane.b32.xlu0 %v22289_v14, %s14771_s8 }
 0x5e2   : > { %7144 = vrot.lane.b32.xlu1 %v22286_v41, %s14771_s8  ;;  %v24020_v41 = vld [vmem:[#allocation12_spill] sm:$0xff] }
 0x5e4   : > { %v22464_v22 = vpop.f32.mrb[66].mxu1 }
 0x5e5   : > { %v22466_v50 = vpop.f32.mrb[67].mxu1  ;;  %7146 = vrot.lane.b32.xlu0 %v22296_v29, %s14771_s8  ;;  %v24021_v29 = vld [vmem:[#allocation11_spill] sm:$0xff] }
 0x5e6   : > { %7148 = vrot.lane.b32.xlu1 %v22293_v59, %s14771_s8  ;;  %v7061_v59 = vpop.permute.xlu1 %7060 }
 0x5e8   : > { %v9805_v54 = vpop.f32.mrb[68].mxu1 }
 0x5e9   : > { %v9807_v12 = vpop.f32.mrb[69].mxu1  ;;  %9876 = vrot.lane.b32.xlu0 %v9805_v54, %s14770_s10 }
 0x5ea   : > { %9878 = vrot.lane.b32.xlu1 %v9807_v12, %s14770_s10  ;;  %v7065_v23 = vpop.permute.xlu1 %7064 }
 0x5eb   : > { %v7067_v61 = vsel %vm5627_vm9, %v7063_v37, %v7065_v23 }
 0x5ec   : > { %v9811_v14 = vpop.f32.mrb[70].mxu1 }
 0x5ed   : > { %v9813_v8 = vpop.f32.mrb[71].mxu1  ;;  %9880 = vrot.lane.b32.xlu0 %v9811_v14, %s14770_s10 }
 0x5ee   : > { %9882 = vrot.lane.b32.xlu1 %v9813_v8, %s14770_s10  ;;  %v24025_v8 = vld [vmem:[#allocation16_spill] sm:$0xff] }
 0x5f1   : > { %7044 = vrot.lane.b32.xlu0 %v24020_v41, %s14770_s10  ;;  %v7074_v41 = vadd.f32 %v7067_v61, %v24025_v8 }
 0x5f2   : > { %7046 = vrot.lane.b32.xlu1 %v24021_v29, %s14770_s10 }
 0x624   : > { %v8521_v34 = vpop.permute.xlu0 %8520 }
 0x625   : > { %v8523_v53 = vpop.permute.xlu1 %8522 }
 0x626   : > { %v8528_v5 = vsel %vm5627_vm9, %v8521_v34, %v8523_v53  ;;  %v8535_v0 = vadd.f32 %v8523_v53, %v22370_v27 }
 0x627   : > { %v8534_v24 = vadd.f32 %v8528_v5, %v22368_v26 }
 0x628   : > { %v8525_v7 = vpop.permute.xlu0 %8524  ;;  %8562 = vrot.lane.b32.xlu1 %v8535_v0, %s14771_s8 }
 0x629   : > { %8560 = vrot.lane.b32.xlu0 %v8534_v24, %s14771_s8  ;;  %v8527_v57 = vpop.permute.xlu1 %8526 }
 0x62a   : > { %v8529_v28 = vsel %vm5627_vm9, %v8525_v7, %v8527_v57  ;;  %v8537_v18 = vadd.f32 %v8527_v57, %v22374_v52  ;;  %v24026_v57 = vld [vmem:[#allocation24_spill] sm:$0xff] }
 0x62b   : > { %v8536_v46 = vadd.f32 %v8529_v28, %v22372_v19 }
 0x62c   : > { %v7081_v9 = vpop.permute.xlu0 %7080  ;;  %8566 = vrot.lane.b32.xlu1 %v8537_v18, %s14771_s8 }
 0x62d   : > { %8564 = vrot.lane.b32.xlu0 %v8536_v46, %s14771_s8  ;;  %v7083_v27 = vpop.permute.xlu1 %7082 }
 0x62e   : > { %v7095_v28 = vadd.f32 %v7083_v27, %v24026_v57 }
 0x630   : > { %v22490_v25 = vpop.permute.xlu0 %7084  ;;  %8460 = vrot.lane.b32.xlu1 %v22346_v31, %s14770_s10 }
 0x631   : > { %8458 = vrot.lane.b32.xlu0 %v22344_v51, %s14770_s10  ;;  %v22496_v26 = vpop.permute.xlu1 %7086  ;;  %v7066_v51 = vsel %vm5627_vm9, %v7059_v43, %v7061_v59 }
 0x634   : > { %v8477_v15 = vpop.permute.xlu0 %8476  ;;  %8464 = vrot.lane.b32.xlu1 %v22350_v30, %s14770_s10 }
 0x635   : > { %8462 = vrot.lane.b32.xlu0 %v22348_v35, %s14770_s10  ;;  %v8479_v19 = vpop.permute.xlu1 %8478  ;;  %v24022_v35 = vld [vmem:[#allocation92_spill] sm:$0xff] }
 0x636   : > { %v7073_v21 = vadd.f32 %v7061_v59, %v24022_v35  ;;  %v8484_v29 = vsel %vm5627_vm9, %v8477_v15, %v8479_v19  ;;  %v8491_v43 = vadd.f32 %v8479_v19, %v22354_v1 }
 0x637   : > { %v8490_v59 = vadd.f32 %v8484_v29, %v22352_v20 }
 0x638   : > { %v8481_v52 = vpop.permute.xlu0 %8480  ;;  %9838 = vrot.lane.b32.xlu1 %v22411_v13, %s14770_s10 }
 0x639   : > { %9836 = vrot.lane.b32.xlu0 %v22408_v36, %s14770_s10  ;;  %v8483_v31 = vpop.permute.xlu1 %8482  ;;  %v7072_v36 = vadd.f32 %v7066_v51, %v24023_v33 }
 0x63a   : > { %v8485_v37 = vsel %vm5627_vm9, %v8481_v52, %v8483_v31  ;;  %v24028_v52 = vld [vmem:[#allocation99_spill] sm:$0xff] }
 0x63c   : > { %v8499_v60 = vpop.permute.xlu0 %8498  ;;  %9842 = vrot.lane.b32.xlu1 %v22423_v56, %s14770_s10  ;;  %v24024_v56 = vld [vmem:[#allocation15_spill] sm:$0xff] }
 0x63d   : > { %9840 = vrot.lane.b32.xlu0 %v22420_v44, %s14770_s10  ;;  %v8501_v30 = vpop.permute.xlu1 %8500  ;;  %v7075_v12 = vadd.f32 %v7065_v23, %v24024_v56 }
 0x63e   : > { %v8506_v49 = vsel %vm5627_vm9, %v8499_v60, %v8501_v30  ;;  %v22514_v13 = vadd.f32 %v8501_v30, %v22362_v2 }
 0x63f   : > { %v22518_v58 = vadd.f32 %v8506_v49, %v22360_v3 }
 0x640   : > { %v8503_v54 = vpop.permute.xlu0 %8502  ;;  %7126 = vrot.lane.b32.xlu1 %v7073_v21, %s14771_s8 }
 0x641   : > { %7124 = vrot.lane.b32.xlu0 %v7072_v36, %s14771_s8  ;;  %v8505_v44 = vpop.permute.xlu1 %8504 }
 0x642   : > { %v8507_v14 = vsel %vm5627_vm9, %v8503_v54, %v8505_v44  ;;  %v22526_v2 = vadd.f32 %v8505_v44, %v22366_v32  ;;  %v8493_v32 = vadd.f32 %v8483_v31, %v22358_v11  ;;  %v24029_v31 = vld [vmem:[#allocation23_spill] sm:$0xff] }
 0x643   : > { %v22530_v3 = vadd.f32 %v8507_v14, %v22364_v40  ;;  %v8492_v40 = vadd.f32 %v8485_v37, %v22356_v4  ;;  %v7088_v4 = vsel %vm5627_vm9, %v7081_v9, %v7083_v27  ;;  %v7089_v9 = vsel %vm5627_vm9, %v22490_v25, %v22496_v26  ;;  %v24030_v14 = vld [vmem:[#allocation77_spill] sm:$0xff] }
 0x644   : > { %7130 = vrot.lane.b32.xlu1 %v7075_v12, %s14771_s8  ;;  %v7096_v51 = vadd.f32 %v7089_v9, %v24029_v31 }
 0x645   : > { %7128 = vrot.lane.b32.xlu0 %v7074_v41, %s14771_s8 }
 0x648   : > { %8544 = vrot.lane.b32.xlu1 %v8491_v43, %s14771_s8 }
 0x649   : > { %8542 = vrot.lane.b32.xlu0 %v8490_v59, %s14771_s8 }
 0x64b   : > { %v9855_v23 = vpop.permute.xlu0 %9854 }
 0x64c   : > { %8548 = vrot.lane.b32.xlu1 %v8493_v32, %s14771_s8  ;;  %v9857_v34 = vpop.permute.xlu1 %9856 }
 0x64d   : > { %8546 = vrot.lane.b32.xlu0 %v8492_v40, %s14771_s8  ;;  %v9862_v1 = vsel %vm5627_vm9, %v9855_v23, %v9857_v34  ;;  %v9869_v20 = vadd.f32 %v9857_v34, %v22438_v45 }
 0x64e   : > { %v9868_v53 = vadd.f32 %v9862_v1, %v22436_v63  ;;  %v24027_v63 = vld [vmem:[#allocation100_spill] sm:$0xff] }
 0x64f   : > { %v9859_v5 = vpop.permute.xlu0 %9858  ;;  %v7094_v45 = vadd.f32 %v7088_v4, %v24027_v63 }
 0x650   : > { %9900 = vrot.lane.b32.xlu1 %v9869_v20, %s14771_s8  ;;  %v9861_v11 = vpop.permute.xlu1 %9860  ;;  %v9817_v41 = vpop.f32.mrb[120].mxu1 }
 0x651   : > { %9898 = vrot.lane.b32.xlu0 %v9868_v53, %s14771_s8  ;;  %v9863_v0 = vsel %vm5627_vm9, %v9859_v5, %v9861_v11  ;;  %v9871_v24 = vadd.f32 %v9861_v11, %v22446_v62  ;;  %v9818_v29 = vpop.f32.mrb[121].mxu1 }
 0x652   : > { %v9870_v7 = vadd.f32 %v9863_v0, %v22441_v42  ;;  %v7097_v42 = vadd.f32 %v22496_v26, %v24028_v52 }
 0x653   : > { %v7143_v18 = vpop.permute.xlu0 %7142 }
 0x654   : > { %9904 = vrot.lane.b32.xlu1 %v9871_v24, %s14771_s8  ;;  %v7145_v46 = vpop.permute.xlu1 %7144  ;;  %v9821_v37 = vpop.f32.mrb[122].mxu1 }
 0x655   : > { %9902 = vrot.lane.b32.xlu0 %v9870_v7, %s14771_s8  ;;  %v7150_v15 = vsel %vm5712_vm10, %v7143_v18, %v7145_v46  ;;  %v7157_v19 = vadd.f32 %v7145_v46, %v7095_v28  ;;  %v9822_v40 = vpop.f32.mrb[123].mxu1 }
 0x656   : > { %v7156_v62 = vadd.f32 %v7150_v15, %v7094_v45 }
 0x657   : > { %v7147_v27 = vpop.permute.xlu0 %7146 }
 0x658   : > { %7166 = vrot.lane.b32.xlu1 %v7157_v19, %s14772_s7  ;;  %v7149_v60 = vpop.permute.xlu1 %7148  ;;  %v9825_v53 = vpop.f32.mrb[124].mxu1 }
 0x659   : > { %7164 = vrot.lane.b32.xlu0 %v7156_v62, %s14772_s7  ;;  %v7151_v30 = vsel %vm5712_vm10, %v7147_v27, %v7149_v60  ;;  %v7159_v35 = vadd.f32 %v7149_v60, %v7097_v42  ;;  %v9826_v5 = vpop.f32.mrb[125].mxu1 }
 0x65a   : > { %v7158_v21 = vadd.f32 %v7151_v30, %v7096_v51 }
 0x65b   : > { %v9877_v25 = vpop.permute.xlu0 %9876 }
 0x65c   : > { %7170 = vrot.lane.b32.xlu1 %v7159_v35, %s14772_s7  ;;  %v9879_v49 = vpop.permute.xlu1 %9878 }
 0x65d   : > { %7168 = vrot.lane.b32.xlu0 %v7158_v21, %s14772_s7  ;;  %v9884_v26 = vsel %vm5627_vm9, %v9877_v25, %v9879_v49  ;;  %v9891_v33 = vadd.f32 %v9879_v49, %v22458_v47 }
 0x65e   : > { %v9890_v36 = vadd.f32 %v9884_v26, %v22456_v17 }
 0x65f   : > { %v9881_v61 = vpop.permute.xlu0 %9880 }
 0x660   : > { %9918 = vrot.lane.b32.xlu1 %v9891_v33, %s14772_s7  ;;  %v9883_v54 = vpop.permute.xlu1 %9882 }
 0x661   : > { %9916 = vrot.lane.b32.xlu0 %v9890_v36, %s14772_s7  ;;  %v9885_v11 = vsel %vm5627_vm9, %v9881_v61, %v9883_v54  ;;  %v9893_v4 = vadd.f32 %v9883_v54, %v22466_v50 }
 0x662   : > { %v9892_v24 = vadd.f32 %v9885_v11, %v22464_v22  ;;  %v9936_v11 = vld [vmem:[%s22629_s2] sm:$0xff] }
 0x663   : > { %v7045_v44 = vpop.permute.xlu0 %7044 }
 0x664   : > { %v7047_v56 = vpop.permute.xlu1 %7046 }
 0x665   : > { %v7049_v12 = vsel %vm5627_vm9, %v7045_v44, %v7047_v56 }
 0x666   : > { %v7053_v8 = vadd.f32 %v7049_v12, %v24030_v14 }
 0x69a   : > { %v8563_v43 = vpop.permute.xlu1 %8562 }
 0x69b   : > { %v8575_v59 = vadd.f32 %v8563_v43, %v22514_v13  ;;  %v8561_v47 = vpop.permute.xlu0 %8560 }
 0x69c   : > { %v8568_v17 = vsel %vm5712_vm10, %v8561_v47, %v8563_v43 }
 0x69d   : > { %v8574_v32 = vadd.f32 %v8568_v17, %v22518_v58  ;;  %8584 = vrot.lane.b32.xlu1 %v8575_v59, %s14772_s7 }
 0x69e   : > { %v8567_v23 = vpop.permute.xlu1 %8566 }
 0x69f   : > { %v8577_v34 = vadd.f32 %v8567_v23, %v22526_v2  ;;  %v8565_v1 = vpop.permute.xlu0 %8564  ;;  %8582 = vrot.lane.b32.xlu0 %v8574_v32, %s14772_s7  ;;  %v9829_v2 = vpop.f32.mrb[126].mxu1 }
 0x6a0   : > { %v8569_v20 = vsel %vm5712_vm10, %v8565_v1, %v8567_v23  ;;  %v9830_v7 = vpop.f32.mrb[127].mxu1 }
 0x6a1   : > { %v8576_v13 = vadd.f32 %v8569_v20, %v22530_v3  ;;  %8588 = vrot.lane.b32.xlu1 %v8577_v34, %s14772_s7 }
 0x6a2   : > { %v8461_v58 = vpop.permute.xlu1 %8460 }
 0x6a3   : > { %v8459_v0 = vpop.permute.xlu0 %8458  ;;  %8586 = vrot.lane.b32.xlu0 %v8576_v13, %s14772_s7 }
 0x6a4   : > { %v8466_v41 = vsel %vm5627_vm9, %v8459_v0, %v8461_v58 }
 0x6a5   : > { %9922 = vrot.lane.b32.xlu1 %v9893_v4, %s14772_s7 }
 0x6a6   : > { %v8465_v57 = vpop.permute.xlu1 %8464 }
 0x6a7   : > { %v8463_v28 = vpop.permute.xlu0 %8462  ;;  %9920 = vrot.lane.b32.xlu0 %v9892_v24, %s14772_s7 }
 0x6a8   : > { %v8467_v20 = vsel %vm5627_vm9, %v8463_v28, %v8465_v57 }
 0x6a9   : > { %v8471_v58 = vadd.f32 %v8467_v20, %v22342_v10 }
 0x6aa   : > { %v9839_v3 = vpop.permute.xlu1 %9838 }
 0x6ab   : > { %v9837_v18 = vpop.permute.xlu0 %9836 }
 0x6ae   : > { %v9843_v63 = vpop.permute.xlu1 %9842 }
 0x6af   : > { %v9841_v45 = vpop.permute.xlu0 %9840 }
 0x6b0   : > { %v9845_v53 = vsel %vm5627_vm9, %v9841_v45, %v9843_v63 }
 0x6b1   : > { %v9849_v4 = vadd.f32 %v9845_v53, %v22399_v6 }
 0x6b2   : > { %v7127_v46 = vpop.permute.xlu1 %7126 }
 0x6b3   : > { %v7125_v9 = vpop.permute.xlu0 %7124 }
 0x6b4   : > { %v7132_v60 = vsel %vm5712_vm10, %v7125_v9, %v7127_v46  ;;  %v9937_v9 = vld [vmem:[%s22629_s2 + $0x8] sm:$0xff] }
 0x6b5   : > { %v7136_v35 = vadd.f32 %v7132_v60, %v22450_v39  ;;  %v9844_v39 = vsel %vm5627_vm9, %v9837_v18, %v9839_v3 }
 0x6b6   : > { %v7131_v50 = vpop.permute.xlu1 %7130 }
 0x6b7   : > { %v7129_v15 = vpop.permute.xlu0 %7128 }
 0x6b8   : > { %v7133_v25 = vsel %vm5712_vm10, %v7129_v15, %v7131_v50 }
 0x6b9   : > { %v7137_v36 = vadd.f32 %v7133_v25, %v7053_v8  ;;  %v8470_v8 = vadd.f32 %v8466_v41, %v22340_v48 }
 0x6ba   : > { %v8545_v19 = vpop.permute.xlu1 %8544 }
 0x6bb   : > { %v8543_v62 = vpop.permute.xlu0 %8542 }
 0x6bc   : > { %v8550_v43 = vsel %vm5712_vm10, %v8543_v62, %v8545_v19 }
 0x6bd   : > { %v8554_v37 = vadd.f32 %v8550_v43, %v8470_v8 }
 0x6be   : > { %v8549_v52 = vpop.permute.xlu1 %8548 }
 0x6bf   : > { %v8547_v42 = vpop.permute.xlu0 %8546 }
 0x6c2   : > { %v9901_v22 = vpop.permute.xlu1 %9900 }
 0x6c3   : > { %v9899_v27 = vpop.permute.xlu0 %9898 }
 0x6c4   : > { %v9906_v59 = vsel %vm5712_vm10, %v9899_v27, %v9901_v22 }
 0x6c6   : > { %v9905_v31 = vpop.permute.xlu1 %9904 }
 0x6c7   : > { %v9903_v51 = vpop.permute.xlu0 %9902 }
 0x6c8   : > { %v9907_v5 = vsel %vm5712_vm10, %v9903_v51, %v9905_v31 }
 0x6c9   : > { %v9911_v7 = vadd.f32 %v9907_v5, %v9849_v4 }
 0x6ca   : > { %v7167_v30 = vpop.permute.xlu1 %7166 }
 0x6cb   : > { %v7165_v21 = vpop.permute.xlu0 %7164 }
 0x6cc   : > { %v7172_v49 = vsel %vm5753_vm11, %v7165_v21, %v7167_v30 }
 0x6cd   : > { %v7176_v26 = vadd.f32 %v7172_v49, %v7136_v35 }
 0x6ce   : > { %v7171_v33 = vpop.permute.xlu1 %7170 }
 0x6cf   : > { %v9930_v61 = vadd.f32 %v7176_v26, %v22434_v38  ;;  %v7169_v54 = vpop.permute.xlu0 %7168  ;;  %v9848_v38 = vadd.f32 %v9844_v39, %v22389_v55  ;;  %v8551_v55 = vsel %vm5712_vm10, %v8547_v42, %v8549_v52 }
 0x6d0   : > { %v7173_v44 = vsel %vm5753_vm11, %v7169_v54, %v7171_v33  ;;  %v8555_v24 = vadd.f32 %v8551_v55, %v8471_v58 }
 0x6d1   : > { %v7177_v56 = vadd.f32 %v7173_v44, %v7137_v36  ;;  %v9910_v32 = vadd.f32 %v9906_v59, %v9848_v38 }
 0x6d2   : > { %v9919_v14 = vpop.permute.xlu1 %9918 }
 0x6d3   : > { %v9931_v12 = vadd.f32 %v7177_v56, %v22444_v16  ;;  %v9917_v29 = vpop.permute.xlu0 %9916 }
 0x6d4   : > { %v9924_v17 = vsel %vm5753_vm11, %v9917_v29, %v9919_v14 }
 0x6d5   : > { %v9928_v23 = vadd.f32 %v9924_v17, %v9910_v32 }
 0x70f   : > { %v8585_v47 = vpop.permute.xlu1 %8584 }
 0x711   : > { %v8583_v16 = vpop.permute.xlu0 %8582 }
 0x712   : > { %v8590_v40 = vsel %vm5753_vm11, %v8583_v16, %v8585_v47 }
 0x713   : > { %v8594_v34 = vadd.f32 %v8590_v40, %v8554_v37  ;;  %v8589_v1 = vpop.permute.xlu1 %8588 }
 0x715   : > { %v9932_v13 = vadd.f32 %v9928_v23, %v8594_v34  ;;  %v8587_v48 = vpop.permute.xlu0 %8586 }
 0x716   : > { %v8591_v2 = vsel %vm5753_vm11, %v8587_v48, %v8589_v1 }
 0x717   : > { %v9934_v0 = vadd.f32 %v9932_v13, %v9930_v61  ;;  %v9923_v28 = vpop.permute.xlu1 %9922  ;;  %v8595_v10 = vadd.f32 %v8591_v2, %v8555_v24 }
 0x719   : > { %v9938_v57 = vadd.f32 %v9936_v11, %v9934_v0  ;;  %v9921_v3 = vpop.permute.xlu0 %9920 }
 0x71a   : > { %v9925_v18 = vsel %vm5753_vm11, %v9921_v3, %v9923_v28 }
 0x71b   : > { %vm9940_vm12 = vcmp.gt.f32.partialorder %v9938_v57, 0.0  ;;  %v9942_v63 = vmul.f32 0.9503408, %v9938_v57  ;;  %v9929_v45 = vadd.f32 %v9925_v18, %v9911_v7 }
 0x71d   : > { %v9944_v6 = vsel %vm9940_vm12, %v9938_v57, %v9942_v63  ;;  %v9933_v46 = vadd.f32 %v9929_v45, %v8595_v10 }
 0x71e   : > { %9946 = vst [vmem:[%s170_s5] sm:$0xff] %v9944_v6 }
 0x71f   : > { %v9935_v50 = vadd.f32 %v9933_v46, %v9931_v12 }
 0x721   : > { %v9939_v15 = vadd.f32 %v9937_v9, %v9935_v50 }
 0x723   : > { %vm9941_vm13 = vcmp.gt.f32.partialorder %v9939_v15, 0.0  ;;  %v9943_v19 = vmul.f32 0.9503408, %v9939_v15 }
 0x725   : > { %v9945_v62 = vsel %vm9941_vm13, %v9939_v15, %v9943_v19 }
 0x726   : > { %9947 = vst [vmem:[%s170_s5 + $0x8] sm:$0xff] %v9945_v62 }
 0x727 PF: > { %s13_s12 = sadd.s32 1, %s14759_s12  }
 0x728   : > { %p10_p4 = scmp.ge.s32.totalorder %s13_s12, 4  }
 0x72a   :  { %12 = sbr.rel (!%p10_p4) target bundleno = 1 (0x1), region = 65 }

</bundles_post_ra>
